<compile_context>
chip_gen: v6e
topology: v6e:2x2x1
jax: 0.10.0
libtpu: 0.0.40
codegen_flags: <defaults>
</compile_context>

<pallas_src>
import jax
import jax.numpy as jnp
from jax.experimental import pallas as pl
from jax.experimental.pallas import tpu as pltpu

NUM_CLASSES = 10
NC_PAD = 128            # lane-dense padded class dimension
NEG_PAD_BIAS = -1e30    # padded-class bias -> exp underflows to exactly 0


def _round_up(x, m):
    return (x + m - 1) // m * m


def mlp_kernel(x_ref, w1_ref, b1_ref, w2_ref, b2_ref, w3_ref, b3_ref, o_ref):
    # Matmuls in bf16 on the MXU with f32 accumulation; elementwise math in f32.
    x = x_ref[...].astype(jnp.bfloat16)

    h1 = jnp.dot(x, w1_ref[...], preferred_element_type=jnp.float32)
    h1 = jnp.maximum(h1 + b1_ref[...], 0.0)

    h2 = jnp.dot(h1.astype(jnp.bfloat16), w2_ref[...],
                 preferred_element_type=jnp.float32)
    h2 = jnp.maximum(h2 + b2_ref[...], 0.0)

    logits = jnp.dot(h2.astype(jnp.bfloat16), w3_ref[...],
                     preferred_element_type=jnp.float32)
    logits = logits + b3_ref[...]        # padded classes carry -1e30 bias

    # Numerically stable softmax over the (padded, lane-dense) class dim.
    m = jnp.max(logits, axis=-1, keepdims=True)
    e = jnp.exp(logits - m)              # padded classes -> exactly 0
    denom = jnp.sum(e, axis=-1, keepdims=True)
    o_ref[...] = (e * pl.reciprocal(denom, approx=True)).astype(o_ref.dtype)


def mlp_forward(x, prepared, *, block_m=256):
    """x: [B, 784] float32. prepared: output of prepare_params()."""
    w1, b1, w2, b2, w3, b3 = (prepared["w1"], prepared["b1"], prepared["w2"],
                              prepared["b2"], prepared["w3"], prepared["b3"])
    B, F = x.shape
    assert F == w1.shape[0]

    # Batch tile: large (256 default) for MXU utilisation; shrink / pad so any
    # batch size works (block's second-last dim stays a multiple of 8).
    bm = min(block_m, _round_up(B, 8))
    B_pad = _round_up(B, bm)
    if B_pad != B:
        x = jnp.pad(x, ((0, B_pad - B), (0, 0)))

    grid = (B_pad // bm,)
    # Constant-index specs: weights/biases stay resident in VMEM.
    resident = lambda arr: pl.BlockSpec(arr.shape, lambda i: (0, 0))

    out = pl.pallas_call(
        mlp_kernel,
        out_shape=jax.ShapeDtypeStruct((B_pad, NC_PAD), jnp.float32),
        grid_spec=pltpu.PrefetchScalarGridSpec(
            num_scalar_prefetch=0,
            grid=grid,
            in_specs=[
                pl.BlockSpec((bm, F), lambda i: (i, 0)),   # x tile (streamed)
                resident(w1),   # (784, 512) bf16
                resident(b1),   # (1, 512)   f32
                resident(w2),   # (512, 512) bf16
                resident(b2),   # (1, 512)   f32
                resident(w3),   # (512, 128) bf16 (padded)
                resident(b3),   # (1, 128)   f32  (padded with -1e30)
            ],
            out_specs=pl.BlockSpec((bm, NC_PAD), lambda i: (i, 0)),
        ),
        compiler_params=pltpu.CompilerParams(
            dimension_semantics=("parallel",)),
    )(x, w1, b1, w2, b2, w3, b3)

    return out[:B, :NUM_CLASSES]


def init_params(key):
    """PyTorch nn.Linear-style init (U[-1/sqrt(fan_in), +1/sqrt(fan_in)]).
    Weights returned already transposed to [in, out]; biases as [1, out]."""
    ks = jax.random.split(key, 6)

    def linear(kw, kb, fan_in, fan_out):
        bound = 1.0 / jnp.sqrt(fan_in)
        w = jax.random.uniform(kw, (fan_in, fan_out), jnp.float32, -bound, bound)
        b = jax.random.uniform(kb, (1, fan_out), jnp.float32, -bound, bound)
        return w, b

    w1, b1 = linear(ks[0], ks[1], 784, 512)
    w2, b2 = linear(ks[2], ks[3], 512, 512)
    w3, b3 = linear(ks[4], ks[5], 512, 10)
    return dict(w1=w1, b1=b1, w2=w2, b2=b2, w3=w3, b3=b3)


def prepare_params(params):
    """Cast weights to bf16 (MXU-native) and pad the last layer to a lane-dense
    128-wide class dim. Padded weight columns are 0 and padded biases -1e30, so
    softmax over 128 lanes equals softmax over the real 10 classes."""
    w3 = jnp.zeros((params["w3"].shape[0], NC_PAD), jnp.bfloat16)
    w3 = w3.at[:, :NUM_CLASSES].set(params["w3"].astype(jnp.bfloat16))
    b3 = jnp.full((1, NC_PAD), NEG_PAD_BIAS, jnp.float32)
    b3 = b3.at[:, :NUM_CLASSES].set(params["b3"])
    return dict(
        w1=params["w1"].astype(jnp.bfloat16), b1=params["b1"],
        w2=params["w2"].astype(jnp.bfloat16), b2=params["b2"],
        w3=w3, b3=b3,
    )


def mlp_reference_f32(x, p):
    h1 = jnp.maximum(x @ p["w1"] + p["b1"], 0.0)
    h2 = jnp.maximum(h1 @ p["w2"] + p["b2"], 0.0)
    logits = h2 @ p["w3"] + p["b3"]
    return jax.nn.softmax(logits, axis=-1)


def mlp_reference_matched(x, prepared):
    """Mirrors the kernel's dtype strategy (bf16 matmul inputs, f32 accumulate,
    padded class dim) for a tight-tolerance check."""
    bf = jnp.bfloat16
    h1 = jnp.maximum(
        jnp.dot(x.astype(bf), prepared["w1"], preferred_element_type=jnp.float32)
        + prepared["b1"], 0.0)
    h2 = jnp.maximum(
        jnp.dot(h1.astype(bf), prepared["w2"], preferred_element_type=jnp.float32)
        + prepared["b2"], 0.0)
    logits = jnp.dot(h2.astype(bf), prepared["w3"],
                     preferred_element_type=jnp.float32) + prepared["b3"]
    return jax.nn.softmax(logits, axis=-1)[:, :NUM_CLASSES]


if __name__ == "__main__":
    key = jax.random.PRNGKey(0)
    k_param, k_x = jax.random.split(key)
    params = init_params(k_param)
    prepared = prepare_params(params)

    # 512 rows -> two 256-row grid steps (lets v7x shard across both TCs).
    batch = 512
    x = jax.random.normal(k_x, (batch, 784), dtype=jnp.float32)

    out = mlp_forward(x, prepared, block_m=256)
    out = jax.block_until_ready(out)
    assert out.shape == (batch, NUM_CLASSES)

    # Tight check vs a reference using the identical bf16/f32 dtype strategy.
    ref_matched = mlp_reference_matched(x, prepared)
    assert jnp.allclose(out, ref_matched, atol=2e-3), "mismatch vs bf16-matched reference"

    # Loose check vs the pure-f32 PyTorch-equivalent forward.
    ref_f32 = mlp_reference_f32(x, params)
    assert jnp.allclose(out, ref_f32, atol=5e-2), "mismatch vs f32 reference"

    # Softmax rows sum to 1 (up to the approximate-reciprocal error).
    assert jnp.allclose(jnp.sum(out, axis=-1), 1.0, atol=2e-3), "softmax rows must sum to 1"

    # Ragged-batch path (batch not a multiple of the tile) also works.
    out_small = mlp_forward(x[:40], prepared, block_m=256)
    out_small = jax.block_until_ready(out_small)
    assert out_small.shape == (40, NUM_CLASSES)
    assert jnp.allclose(out_small, ref_matched[:40], atol=2e-3), "ragged-batch mismatch"

    print("KERNEL_OK")
</pallas_src>

<mosaic_0001>
module attributes {stable_mosaic.version = 11 : i64} {
  func.func @mlp_kernel(%arg0: i32, %arg1: memref<256x784xf32, #tpu.memory_space<vmem>>, %arg2: memref<784x512xbf16, #tpu.memory_space<vmem>>, %arg3: memref<1x512xf32, #tpu.memory_space<vmem>>, %arg4: memref<512x512xbf16, #tpu.memory_space<vmem>>, %arg5: memref<1x512xf32, #tpu.memory_space<vmem>>, %arg6: memref<512x128xbf16, #tpu.memory_space<vmem>>, %arg7: memref<1x128xf32, #tpu.memory_space<vmem>>, %arg8: memref<256x128xf32, #tpu.memory_space<vmem>>) attributes {dimension_semantics = [#tpu.dimension_semantics<parallel>], iteration_bounds = array<i64: 2>, scalar_prefetch = 0 : i64, scratch_operands = 0 : i64, tpu.core_type = #tpu.core_type<tc>, window_params = [{transform_indices = @transform_0, window_bounds = array<i64: 256, 784>}, {pipeline_mode = #tpu.pipeline_mode<synchronous>, transform_indices = @transform_1, window_bounds = array<i64: 784, 512>}, {pipeline_mode = #tpu.pipeline_mode<synchronous>, transform_indices = @transform_2, window_bounds = array<i64: 1, 512>}, {pipeline_mode = #tpu.pipeline_mode<synchronous>, transform_indices = @transform_3, window_bounds = array<i64: 512, 512>}, {pipeline_mode = #tpu.pipeline_mode<synchronous>, transform_indices = @transform_4, window_bounds = array<i64: 1, 512>}, {pipeline_mode = #tpu.pipeline_mode<synchronous>, transform_indices = @transform_5, window_bounds = array<i64: 512, 128>}, {pipeline_mode = #tpu.pipeline_mode<synchronous>, transform_indices = @transform_6, window_bounds = array<i64: 1, 128>}, {transform_indices = @transform_7, window_bounds = array<i64: 256, 128>}]} {
    %c0 = arith.constant 0 : index
    %c0_0 = arith.constant 0 : index
    %0 = vector.load %arg1[%c0, %c0_0] : memref<256x784xf32, #tpu.memory_space<vmem>>, vector<256x784xf32>
    %1 = arith.truncf %0 : vector<256x784xf32> to vector<256x784xbf16>
    %c0_1 = arith.constant 0 : index
    %c0_2 = arith.constant 0 : index
    %2 = vector.load %arg2[%c0_1, %c0_2] : memref<784x512xbf16, #tpu.memory_space<vmem>>, vector<784x512xbf16>
    %cst = arith.constant dense<0.000000e+00> : vector<256x512xf32>
    %3 = tpu.matmul %1, %2, %cst {dimension_numbers = #tpu.dot_dimension_numbers<[1], [0], [0], [1], [0, 0, 1, 1], [], []>} : vector<256x784xbf16>, vector<784x512xbf16>, vector<256x512xf32> -> vector<256x512xf32>
    %c0_3 = arith.constant 0 : index
    %c0_4 = arith.constant 0 : index
    %4 = vector.load %arg3[%c0_3, %c0_4] : memref<1x512xf32, #tpu.memory_space<vmem>>, vector<1x512xf32>
    %5 = vector.broadcast %4 : vector<1x512xf32> to vector<256x512xf32>
    %6 = arith.addf %3, %5 : vector<256x512xf32>
    %cst_5 = arith.constant 0.000000e+00 : f32
    %7 = vector.broadcast %cst_5 : f32 to vector<256x512xf32>
    %8 = arith.maximumf %6, %7 : vector<256x512xf32>
    %9 = arith.truncf %8 : vector<256x512xf32> to vector<256x512xbf16>
    %c0_6 = arith.constant 0 : index
    %c0_7 = arith.constant 0 : index
    %10 = vector.load %arg4[%c0_6, %c0_7] : memref<512x512xbf16, #tpu.memory_space<vmem>>, vector<512x512xbf16>
    %cst_8 = arith.constant dense<0.000000e+00> : vector<256x512xf32>
    %11 = tpu.matmul %9, %10, %cst_8 {dimension_numbers = #tpu.dot_dimension_numbers<[1], [0], [0], [1], [0, 0, 1, 1], [], []>} : vector<256x512xbf16>, vector<512x512xbf16>, vector<256x512xf32> -> vector<256x512xf32>
    %c0_9 = arith.constant 0 : index
    %c0_10 = arith.constant 0 : index
    %12 = vector.load %arg5[%c0_9, %c0_10] : memref<1x512xf32, #tpu.memory_space<vmem>>, vector<1x512xf32>
    %13 = vector.broadcast %12 : vector<1x512xf32> to vector<256x512xf32>
    %14 = arith.addf %11, %13 : vector<256x512xf32>
    %cst_11 = arith.constant 0.000000e+00 : f32
    %15 = vector.broadcast %cst_11 : f32 to vector<256x512xf32>
    %16 = arith.maximumf %14, %15 : vector<256x512xf32>
    %17 = arith.truncf %16 : vector<256x512xf32> to vector<256x512xbf16>
    %c0_12 = arith.constant 0 : index
    %c0_13 = arith.constant 0 : index
    %18 = vector.load %arg6[%c0_12, %c0_13] : memref<512x128xbf16, #tpu.memory_space<vmem>>, vector<512x128xbf16>
    %cst_14 = arith.constant dense<0.000000e+00> : vector<256x128xf32>
    %19 = tpu.matmul %17, %18, %cst_14 {dimension_numbers = #tpu.dot_dimension_numbers<[1], [0], [0], [1], [0, 0, 1, 1], [], []>} : vector<256x512xbf16>, vector<512x128xbf16>, vector<256x128xf32> -> vector<256x128xf32>
    %c0_15 = arith.constant 0 : index
    %c0_16 = arith.constant 0 : index
    %20 = vector.load %arg7[%c0_15, %c0_16] : memref<1x128xf32, #tpu.memory_space<vmem>>, vector<1x128xf32>
    %21 = vector.broadcast %20 : vector<1x128xf32> to vector<256x128xf32>
    %22 = arith.addf %19, %21 : vector<256x128xf32>
    %cst_17 = arith.constant dense<0xFF800000> : vector<256xf32>
    %23 = vector.multi_reduction <maximumf>, %22, %cst_17 [1] : vector<256x128xf32> to vector<256xf32>
    %24 = vector.shape_cast %23 : vector<256xf32> to vector<256x1xf32>
    %25 = vector.broadcast %24 : vector<256x1xf32> to vector<256x128xf32>
    %26 = arith.subf %22, %25 : vector<256x128xf32>
    %27 = math.exp %26 : vector<256x128xf32>
    %cst_18 = arith.constant dense<0.000000e+00> : vector<256xf32>
    %28 = vector.multi_reduction <add>, %27, %cst_18 [1] : vector<256x128xf32> to vector<256xf32>
    %29 = vector.shape_cast %28 : vector<256xf32> to vector<256x1xf32>
    %30 = tpu.reciprocal %29 {approx = true} : vector<256x1xf32> -> vector<256x1xf32>
    %31 = vector.broadcast %30 : vector<256x1xf32> to vector<256x128xf32>
    %32 = arith.mulf %27, %31 : vector<256x128xf32>
    %c0_19 = arith.constant 0 : index
    %c0_20 = arith.constant 0 : index
    %33 = vector.load %arg8[%c0_19, %c0_20] : memref<256x128xf32, #tpu.memory_space<vmem>>, vector<256x128xf32>
    tpu.vector_store %arg8[%c0_19, %c0_20], %32 {strides = array<i32>} : memref<256x128xf32, #tpu.memory_space<vmem>>, vector<256x128xf32>,
    return
  }
  func.func @transform_0(%arg0: i32) -> (i32, i32) {
    %c0_i32 = arith.constant 0 : i32
    %c0_i32_0 = arith.constant 0 : i32
    return %arg0, %c0_i32 : i32, i32
  }
  func.func @transform_1(%arg0: i32) -> (i32, i32) {
    %c0_i32 = arith.constant 0 : i32
    %c0_i32_0 = arith.constant 0 : i32
    %c0_i32_1 = arith.constant 0 : i32
    return %c0_i32, %c0_i32_0 : i32, i32
  }
  func.func @transform_2(%arg0: i32) -> (i32, i32) {
    %c0_i32 = arith.constant 0 : i32
    %c0_i32_0 = arith.constant 0 : i32
    %c0_i32_1 = arith.constant 0 : i32
    return %c0_i32, %c0_i32_0 : i32, i32
  }
  func.func @transform_3(%arg0: i32) -> (i32, i32) {
    %c0_i32 = arith.constant 0 : i32
    %c0_i32_0 = arith.constant 0 : i32
    %c0_i32_1 = arith.constant 0 : i32
    return %c0_i32, %c0_i32_0 : i32, i32
  }
  func.func @transform_4(%arg0: i32) -> (i32, i32) {
    %c0_i32 = arith.constant 0 : i32
    %c0_i32_0 = arith.constant 0 : i32
    %c0_i32_1 = arith.constant 0 : i32
    return %c0_i32, %c0_i32_0 : i32, i32
  }
  func.func @transform_5(%arg0: i32) -> (i32, i32) {
    %c0_i32 = arith.constant 0 : i32
    %c0_i32_0 = arith.constant 0 : i32
    %c0_i32_1 = arith.constant 0 : i32
    return %c0_i32, %c0_i32_0 : i32, i32
  }
  func.func @transform_6(%arg0: i32) -> (i32, i32) {
    %c0_i32 = arith.constant 0 : i32
    %c0_i32_0 = arith.constant 0 : i32
    %c0_i32_1 = arith.constant 0 : i32
    return %c0_i32, %c0_i32_0 : i32, i32
  }
  func.func @transform_7(%arg0: i32) -> (i32, i32) {
    %c0_i32 = arith.constant 0 : i32
    %c0_i32_0 = arith.constant 0 : i32
    return %arg0, %c0_i32 : i32, i32
  }
}

</mosaic_0001>

<bundles_post_ra>
// kernel: tpu_custom_call.1
= control target key start
LH: loop header
LB: loop body
LE: loop exit
PB: predicated region body
PF: predicated region fallthrough
CT: control target
= control target key end

     0   :  { %12 = vsyncpa [#allocation3], 0  ;;  %s11515_s0 = inlined_call_operand.vmem [shape: f32[512,784], index: 0, kind: input, shape index: {}]   ;;  %s11516_s1 = inlined_call_operand.vmem [shape: bf16[784,512], index: 1, kind: input, shape index: {}]   ;;  %s11517_s2 = inlined_call_operand.vmem [shape: f32[1,512], index: 2, kind: input, shape index: {}]   ;;  %s11518_s3 = inlined_call_operand.vmem [shape: bf16[512,512], index: 3, kind: input, shape index: {}]   ;;  %s11519_s4 = inlined_call_operand.vmem [shape: f32[1,512], index: 4, kind: input, shape index: {}]   ;;  %s11520_s5 = inlined_call_operand.vmem [shape: bf16[512,128], index: 5, kind: input, shape index: {}]   ;;  %s11521_s6 = inlined_call_operand.vmem [shape: f32[1,128], index: 6, kind: input, shape index: {}]   ;;  %s11522_s7 = inlined_call_operand.hbm [shape: f32[512,128], index: 7, kind: output, shape index: {}]  }
   0x1   :  { %14 = vsyncpa [#allocation3 + $0x1], 0  ;;  %s7760_s24 = smov 0   ;;  %s7762_s25 = smov 0  }
   0x2   :  { %s7764_s26 = smov 0   ;;  %s7766_s27 = smov 0  }
   0x3 LB: > { %s7781_s28 = sadd.s32 4294967295, %s7714_s27   ;;  %s6338_s29 = sadd.s32 4294967294, %s7714_s27   ;;  %s7714_s27 = sphi %s7766_s27, %s12011_s27   ;;  %s7710_s26 = sphi %s7764_s26, %s12010_s26   ;;  %s7706_s25 = sphi %s7762_s25, %s12009_s25   ;;  %s7702_s24 = sphi %s7760_s24, %s12008_s24  }
   0x4   : > { %s7785_s30 = sadd.s32 1, %s7714_s27   ;;  %s179_s8 = sadd.s32 1, %s7710_s26 }
   0x5   : > { %s176_s9 = ssub.s32 %s7714_s27, %s7785_s30  ;;  %p189_p0 = scmp.ne.s32.totalorder %s7710_s26, %s7706_s25 }
   0x6   : > { %p177_p1 = scmp.eq.s32.totalorder %s176_s9, 0  ;;  %p190_p2 = scmp.eq.s32.totalorder %s7781_s28, 1 }
   0x7   : > { %p195_p3 = scmp.ne.s32.totalorder %s7706_s25, %s7702_s24  ;;  %p196_p4 = scmp.eq.s32.totalorder %s6338_s29, 1 }
   0x8   : > { %s7796_s10 = scalar_select %p177_p1, %s7710_s26, %s179_s8  }
   0x9   : > { %p7798_p5 = por %p190_p2, %p189_p0  ;;  %p7802_p6 = por %p196_p4, %p195_p3 }
   0xa   : > { %p6341_p7 = scmp.ge.s32.totalorder %s7714_s27, 1  ;;  %p242_p8 = scmp.lt.s32.totalorder %s7714_s27, 3 }
   0xc   : > { %p243_p9 = pnand %p6341_p7, %p242_p8 }
   0xe   : > { %246 = sbr.rel (%p243_p9) target bundleno = 1657 (0x679), region = 48 }
  0x13   : > { %v7007_v0 = vld [vmem:[%s11516_s1 + $0xe4] ss:$16 sps:$4 sm:$0xff]   ;;  %v7011_v2 = vld [vmem:[%s11516_s1 + $0xe0] ss:$16 sps:$4 sm:$0xff]   ;;  %s6343_s15 = sshll.u32 %s7781_s28, 5  ;;  %vm1818_vm0 = vcmask 130048  }
  0x14   : > { %v7009_v1 = vld [vmem:[%s11516_s1 + $0x2e4] ss:$16 sps:$4 sm:$0xff]   ;;  %1867 = vmatprep.subr.bf16.mxu0 %v7007_v0  ;;  %v7012_v3 = vld [vmem:[%s11516_s1 + $0x2e0] ss:$16 sps:$4 sm:$0xff]   ;;  %p276_p10 = scmp.lt.s32.totalorder %s6343_s15, 63  ;;  %s272_s16 = sand.u32 1, %s7706_s25  }
  0x15   : > { %2060 = vmatprep.subr.bf16.mxu1 %v7009_v1  ;;  %v7013_v4 = vld [vmem:[%s11516_s1 + $0xc4] ss:$16 sps:$4 sm:$0xff]   ;;  %1868 = vmatpush1.bf16.msra.mxu0 %v7011_v2  ;;  %v7017_v6 = vld [vmem:[%s11516_s1 + $0xc0] ss:$16 sps:$4 sm:$0xff]   ;;  %s6342_s17 = sshll.u32 %s272_s16, 8  ;;  %s6739_s18 = sshll.u32 %s7781_s28, 12 }
  0x16   : > { %2061 = vmatpush1.bf16.msra.mxu1 %v7012_v3  ;;  %v7015_v5 = vld [vmem:[%s11516_s1 + $0x2c4] ss:$16 sps:$4 sm:$0xff]   ;;  %1869 = vmatprep.subr.bf16.mxu0 %v7013_v4  ;;  %v7018_v7 = vld [vmem:[%s11516_s1 + $0x2c0] ss:$16 sps:$4 sm:$0xff]   ;;  %s12013_s15 = smov (!%p276_p10, %s6343_s15), 63  ;;  %s11467_s21 = scalar_lea.hbm %s11522_s7, %s6739_s18 }
  0x17   : > { %2062 = vmatprep.subr.bf16.mxu1 %v7015_v5  ;;  %v7019_v8 = vld [vmem:[%s11516_s1 + $0xa4] ss:$16 sps:$4 sm:$0xff]   ;;  %v7023_v10 = vld [vmem:[%s11516_s1 + $0xa0] ss:$16 sps:$4 sm:$0xff]   ;;  %s6964_s23 = smul.u32 56, %s12013_s15  ;;  %s11475_s29 = scalar_lea.sflag [#allocation3], %s272_s16 }
  0x18   : > { %v7021_v9 = vld [vmem:[%s11516_s1 + $0x2a4] ss:$16 sps:$4 sm:$0xff]   ;;  %v7024_v11 = vld [vmem:[%s11516_s1 + $0x2a0] ss:$16 sps:$4 sm:$0xff]   ;;  %s7717_s8 = smov [#allocation2]  }
  0x19   : > { %1870 = vmatpush1.bf16.msra.mxu0 %v7017_v6  ;;  %v7025_v12 = vld [vmem:[%s11516_s1 + $0x84] ss:$16 sps:$4 sm:$0xff]   ;;  %v7029_v14 = vld [vmem:[%s11516_s1 + $0x80] ss:$16 sps:$4 sm:$0xff]   ;;  %s7944_s22 = scalar_lea.vmem %s11515_s0, %s6964_s23  ;;  %s7658_s9 = sshll.u32 %s7717_s8, 4  ;;  %s7659_s9 = int_to_ptr.vmem [resolvable:$false] %s7658_s9 }
  0x1a   : > { %2063 = vmatpush1.bf16.msra.mxu1 %v7018_v7  ;;  %1871 = vmatprep.subr.bf16.mxu0 %v7019_v8  ;;  %v7027_v13 = vld [vmem:[%s11516_s1 + $0x284] ss:$16 sps:$4 sm:$0xff]   ;;  %v7030_v15 = vld [vmem:[%s11516_s1 + $0x280] ss:$16 sps:$4 sm:$0xff]   ;;  %v285_v46 = vld [vmem:[%s7944_s22 + $0x8] sm:$0xff]  ;;  %s7660_s13 = scalar_lea.vmem %s7659_s9, 8192 }
  0x1b   : > { %2064 = vmatprep.subr.bf16.mxu1 %v7021_v9  ;;  %v7031_v16 = vld [vmem:[%s11516_s1 + $0x64] ss:$16 sps:$4 sm:$0xff]   ;;  %v7035_v18 = vld [vmem:[%s11516_s1 + $0x60] ss:$16 sps:$4 sm:$0xff]   ;;  %v287_v48 = vld [vmem:[%s7944_s22 + $0x18] sm:$0xff] }
  0x1c   : > { %v7033_v17 = vld [vmem:[%s11516_s1 + $0x264] ss:$16 sps:$4 sm:$0xff]   ;;  %v7036_v19 = vld [vmem:[%s11516_s1 + $0x260] ss:$16 sps:$4 sm:$0xff]   ;;  %v291_v7 = vld [vmem:[%s7944_s22 + $0x38] sm:$0xff] }
  0x1d   : > { %1872 = vmatpush1.bf16.msra.mxu0 %v7023_v10  ;;  %v7037_v20 = vld [vmem:[%s11516_s1 + $0x44] ss:$16 sps:$4 sm:$0xff]   ;;  %v7041_v22 = vld [vmem:[%s11516_s1 + $0x40] ss:$16 sps:$4 sm:$0xff]   ;;  %v293_v9 = vld [vmem:[%s7944_s22 + $0x48] sm:$0xff] }
  0x1e   : > { %2065 = vmatpush1.bf16.msra.mxu1 %v7024_v11  ;;  %1873 = vmatprep.subr.bf16.mxu0 %v7025_v12  ;;  %v7039_v21 = vld [vmem:[%s11516_s1 + $0x244] ss:$16 sps:$4 sm:$0xff]   ;;  %v7042_v23 = vld [vmem:[%s11516_s1 + $0x240] ss:$16 sps:$4 sm:$0xff]   ;;  %v299_v12 = vld [vmem:[%s7944_s22 + $0x78] sm:$0xff] }
  0x1f   : > { %2066 = vmatprep.subr.bf16.mxu1 %v7027_v13  ;;  %v7043_v24 = vld [vmem:[%s11516_s1 + $0x24] ss:$16 sps:$4 sm:$0xff]   ;;  %v7047_v26 = vld [vmem:[%s11516_s1 + $0x20] ss:$16 sps:$4 sm:$0xff]  }
  0x20   : > { %v7045_v25 = vld [vmem:[%s11516_s1 + $0x224] ss:$16 sps:$4 sm:$0xff]   ;;  %v7048_v27 = vld [vmem:[%s11516_s1 + $0x220] ss:$16 sps:$4 sm:$0xff]  }
  0x21   : > { %1874 = vmatpush1.bf16.msra.mxu0 %v7029_v14  ;;  %v7049_v28 = vld [vmem:[%s11516_s1 + $0x4] ss:$16 sps:$4 sm:$0xff]   ;;  %v7053_v30 = vld [vmem:[%s11516_s1] ss:$16 sps:$4 sm:$0xff]   ;;  %v301_v14 = vld [vmem:[%s7944_s22 + $0x88] sm:$0xff] }
  0x22   : > { %2067 = vmatpush1.bf16.msra.mxu1 %v7030_v15  ;;  %1875 = vmatprep.subr.bf16.mxu0 %v7031_v16  ;;  %v7051_v29 = vld [vmem:[%s11516_s1 + $0x204] ss:$16 sps:$4 sm:$0xff]   ;;  %v7054_v31 = vld [vmem:[%s11516_s1 + $0x200] ss:$16 sps:$4 sm:$0xff]  }
  0x23   : > { %2068 = vmatprep.subr.bf16.mxu1 %v7033_v17  ;;  %v7055_v32 = vld [vmem:[%s11516_s1 + $0x1e4] ss:$16 sps:$4 sm:$0xff]   ;;  %v7059_v34 = vld [vmem:[%s11516_s1 + $0x1e0] ss:$16 sps:$4 sm:$0xff]  }
  0x24   : > { %v7057_v33 = vld [vmem:[%s11516_s1 + $0x3e4] ss:$16 sps:$4 sm:$0xff]   ;;  %v7060_v35 = vld [vmem:[%s11516_s1 + $0x3e0] ss:$16 sps:$4 sm:$0xff]  }
  0x25   : > { %1876 = vmatpush1.bf16.msra.mxu0 %v7035_v18  ;;  %v7061_v36 = vld [vmem:[%s11516_s1 + $0x1c4] ss:$16 sps:$4 sm:$0xff]   ;;  %v7065_v38 = vld [vmem:[%s11516_s1 + $0x1c0] ss:$16 sps:$4 sm:$0xff]  }
  0x26   : > { %2069 = vmatpush1.bf16.msra.mxu1 %v7036_v19  ;;  %1877 = vmatprep.subr.bf16.mxu0 %v7037_v20  ;;  %v7063_v37 = vld [vmem:[%s11516_s1 + $0x3c4] ss:$16 sps:$4 sm:$0xff]   ;;  %v7066_v39 = vld [vmem:[%s11516_s1 + $0x3c0] ss:$16 sps:$4 sm:$0xff]  }
  0x27   : > { %2070 = vmatprep.subr.bf16.mxu1 %v7039_v21  ;;  %v7067_v40 = vld [vmem:[%s11516_s1 + $0x1a4] ss:$16 sps:$4 sm:$0xff]   ;;  %v7071_v42 = vld [vmem:[%s11516_s1 + $0x1a0] ss:$16 sps:$4 sm:$0xff]  }
  0x28   : > { %v7069_v41 = vld [vmem:[%s11516_s1 + $0x3a4] ss:$16 sps:$4 sm:$0xff]   ;;  %v7072_v43 = vld [vmem:[%s11516_s1 + $0x3a0] ss:$16 sps:$4 sm:$0xff]  }
  0x29   : > { %1878 = vmatpush1.bf16.msra.mxu0 %v7041_v22  ;;  %v7073_v44 = vld [vmem:[%s11516_s1 + $0x184] ss:$16 sps:$4 sm:$0xff]   ;;  %v7077_v50 = vld [vmem:[%s11516_s1 + $0x180] ss:$16 sps:$4 sm:$0xff]  }
  0x2a   : > { %2071 = vmatpush1.bf16.msra.mxu1 %v7042_v23  ;;  %1879 = vmatprep.subr.bf16.mxu0 %v7043_v24  ;;  %v7075_v45 = vld [vmem:[%s11516_s1 + $0x384] ss:$16 sps:$4 sm:$0xff]   ;;  %v7078_v51 = vld [vmem:[%s11516_s1 + $0x380] ss:$16 sps:$4 sm:$0xff]   ;;  %v305_v23 = vld [vmem:[%s7944_s22 + $0xa8] sm:$0xff] }
  0x2b   : > { %2072 = vmatprep.subr.bf16.mxu1 %v7045_v25  ;;  %v292_v47 = vld [vmem:[%s7944_s22 + $0x40] sm:$0xff]  ;;  %v294_v49 = vld [vmem:[%s7944_s22 + $0x50] sm:$0xff] }
  0x2c   : > { %v7079_v52 = vld [vmem:[%s11516_s1 + $0x164] ss:$16 sps:$4 sm:$0xff]   ;;  %v7965_v53 = vpack.c.bf16 %v292_v47, %v285_v46  ;;  %v7967_v54 = vpack.c.bf16 %v294_v49, %v287_v48  ;;  %v7083_v56 = vld [vmem:[%s11516_s1 + $0x160] ss:$16 sps:$4 sm:$0xff]  }
  0x2d   : > { %1880 = vmatpush1.bf16.msra.mxu0 %v7047_v26  ;;  %v7081_v55 = vld [vmem:[%s11516_s1 + $0x364] ss:$16 sps:$4 sm:$0xff]   ;;  %v7084_v57 = vld [vmem:[%s11516_s1 + $0x360] ss:$16 sps:$4 sm:$0xff]   ;;  %v307_v26 = vld [vmem:[%s7944_s22 + $0xb8] sm:$0xff] }
  0x2e   : > { %2073 = vmatpush1.bf16.msra.mxu1 %v7048_v27  ;;  %1881 = vmatprep.subr.bf16.mxu0 %v7049_v28  ;;  %v7085_v58 = vld [vmem:[%s11516_s1 + $0x144] ss:$16 sps:$4 sm:$0xff]   ;;  %v7089_v60 = vld [vmem:[%s11516_s1 + $0x140] ss:$16 sps:$4 sm:$0xff]   ;;  %v313_v28 = vld [vmem:[%s7944_s22 + $0xe8] sm:$0xff] }
  0x2f   : > { %2074 = vmatprep.subr.bf16.mxu1 %v7051_v29  ;;  %1899 = vmatprep.mubr.bf16.mxu0 %v7965_v53  ;;  %v7087_v59 = vld [vmem:[%s11516_s1 + $0x344] ss:$16 sps:$4 sm:$0xff]   ;;  %v7090_v61 = vld [vmem:[%s11516_s1 + $0x340] ss:$16 sps:$4 sm:$0xff]  }
  0x30   : > { %2092 = vmatprep.mubr.bf16.mxu1 %v7967_v54  ;;  %v7091_v62 = vld [vmem:[%s11516_s1 + $0x124] ss:$16 sps:$4 sm:$0xff]   ;;  %v7095_v0 = vld [vmem:[%s11516_s1 + $0x120] ss:$16 sps:$4 sm:$0xff]  }
  0x31   : > { %1882 = vmatpush1.bf16.msra.mxu0 %v7053_v30  ;;  %v7093_v63 = vld [vmem:[%s11516_s1 + $0x324] ss:$16 sps:$4 sm:$0xff]   ;;  %v7096_v1 = vld [vmem:[%s11516_s1 + $0x320] ss:$16 sps:$4 sm:$0xff]   ;;  %v315_v30 = vld [vmem:[%s7944_s22 + $0xf8] sm:$0xff] }
  0x32   : > { %2075 = vmatpush1.bf16.msra.mxu1 %v7054_v31  ;;  %1883 = vmatprep.subr.bf16.mxu0 %v7055_v32  ;;  %v7097_v2 = vld [vmem:[%s11516_s1 + $0x104] ss:$16 sps:$4 sm:$0xff]   ;;  %v7101_v4 = vld [vmem:[%s11516_s1 + $0x100] ss:$16 sps:$4 sm:$0xff]  }
  0x33   : > { %2076 = vmatprep.subr.bf16.mxu1 %v7057_v33  ;;  %v7099_v3 = vld [vmem:[%s11516_s1 + $0x304] ss:$16 sps:$4 sm:$0xff]   ;;  %v7102_v5 = vld [vmem:[%s11516_s1 + $0x300] ss:$16 sps:$4 sm:$0xff]  }
  0x34   : > { %v284_v6 = vld [vmem:[%s7944_s22] sm:$0xff]  ;;  %v286_v8 = vld [vmem:[%s7944_s22 + $0x10] sm:$0xff] }
  0x35   : > { %1884 = vmatpush2.bf16.msra.mxu0 %v7059_v34  ;;  %v7105_v10 = vld [vmem:[%s11516_s1 + $0x4e4] ss:$16 sps:$4 sm:$0xff]   ;;  %v8030_v16 = vpack.c.bf16 %v291_v7, %v284_v6  ;;  %v8032_v17 = vpack.c.bf16 %v293_v9, %v286_v8  ;;  %v7103_v18 = vld [vmem:[%s11516_s1 + $0x4e0] ss:$16 sps:$4 sm:$0xff]  }
  0x36   : > { %2077 = vmatpush2.bf16.msra.mxu1 %v7060_v35  ;;  %1885 = vmatprep.subr.bf16.mxu0 %v7061_v36  ;;  %v7108_v11 = vld [vmem:[%s11516_s1 + $0x604] ss:$16 sps:$4 sm:$0xff]   ;;  %v7106_v19 = vld [vmem:[%s11516_s1 + $0x600] ss:$16 sps:$4 sm:$0xff]  }
  0x37   : > { %2078 = vmatprep.subr.bf16.mxu1 %v7063_v37  ;;  %v306_v13 = vld [vmem:[%s7944_s22 + $0xb0] sm:$0xff]  ;;  %v308_v15 = vld [vmem:[%s7944_s22 + $0xc0] sm:$0xff] }
  0x38   : > { %v8040_v20 = vpack.c.bf16 %v306_v13, %v299_v12  ;;  %v8042_v21 = vpack.c.bf16 %v308_v15, %v301_v14  ;;  %v298_v22 = vld [vmem:[%s7944_s22 + $0x70] sm:$0xff]  ;;  %v300_v25 = vld [vmem:[%s7944_s22 + $0x80] sm:$0xff]  ;;  %v349_v12 = vld [vmem:[%s7944_s22 + $0x208] sm:$0xff] }
  0x39   : > { %1886 = vmatpush2.bf16.msra.mxu0 %v7065_v38  ;;  %v7111_v24 = vld [vmem:[%s11516_s1 + $0x4c4] ss:$16 sps:$4 sm:$0xff]   ;;  %v7109_v27 = vld [vmem:[%s11516_s1 + $0x4c0] ss:$16 sps:$4 sm:$0xff]   ;;  %v8065_v33 = vpack.c.bf16 %v305_v23, %v298_v22  ;;  %v8067_v34 = vpack.c.bf16 %v307_v26, %v300_v25  ;;  %v355_v13 = vld [vmem:[%s7944_s22 + $0x238] sm:$0xff] }
  0x3a   : > { %2079 = vmatpush2.bf16.msra.mxu1 %v7066_v39  ;;  %1887 = vmatprep.subr.bf16.mxu0 %v7067_v40  ;;  %v320_v29 = vld [vmem:[%s7944_s22 + $0x120] sm:$0xff]  ;;  %v322_v31 = vld [vmem:[%s7944_s22 + $0x130] sm:$0xff]  ;;  %v319_v40 = vld [vmem:[%s7944_s22 + $0x118] sm:$0xff] }
  0x3b   : > { %2080 = vmatprep.subr.bf16.mxu1 %v7069_v41  ;;  %v7114_v32 = vld [vmem:[%s11516_s1 + $0x4a4] ss:$16 sps:$4 sm:$0xff]   ;;  %v8069_v35 = vpack.c.bf16 %v320_v29, %v313_v28  ;;  %v8071_v36 = vpack.c.bf16 %v322_v31, %v315_v30  ;;  %v7112_v37 = vld [vmem:[%s11516_s1 + $0x4a0] ss:$16 sps:$4 sm:$0xff]   ;;  %v357_v15 = vld [vmem:[%s7944_s22 + $0x248] sm:$0xff] }
  0x3c   : > { %v312_v38 = vld [vmem:[%s7944_s22 + $0xe0] sm:$0xff]  ;;  %v314_v41 = vld [vmem:[%s7944_s22 + $0xf0] sm:$0xff]  ;;  %v361_v30 = vld [vmem:[%s7944_s22 + $0x268] sm:$0xff] }
  0x3d   : > { %1888 = vmatpush2.bf16.msra.mxu0 %v7071_v42  ;;  %v7117_v39 = vld [vmem:[%s11516_s1 + $0x484] ss:$16 sps:$4 sm:$0xff]   ;;  %v321_v42 = vld [vmem:[%s7944_s22 + $0x128] sm:$0xff]  ;;  %v7115_v47 = vld [vmem:[%s11516_s1 + $0x480] ss:$16 sps:$4 sm:$0xff]   ;;  %v8097_v49 = vpack.c.bf16 %v319_v40, %v312_v38 }
  0x3e   : > { %2081 = vmatpush2.bf16.msra.mxu1 %v7072_v43  ;;  %1889 = vmatprep.subr.bf16.mxu0 %v7073_v44  ;;  %v327_v43 = vld [vmem:[%s7944_s22 + $0x158] sm:$0xff]  ;;  %v334_v44 = vld [vmem:[%s7944_s22 + $0x190] sm:$0xff]  ;;  %v336_v46 = vld [vmem:[%s7944_s22 + $0x1a0] sm:$0xff] }
  0x3f   : > { %2082 = vmatprep.subr.bf16.mxu1 %v7075_v45  ;;  %v329_v45 = vld [vmem:[%s7944_s22 + $0x168] sm:$0xff]  ;;  %v7120_v48 = vld [vmem:[%s11516_s1 + $0x464] ss:$16 sps:$4 sm:$0xff]   ;;  %v7124_v7 = vld [vmem:[%s11516_s1 + $0x420] ss:$16 sps:$4 sm:$0xff]  }
  0x40   : > { %v340_v8 = vld [vmem:[%s7944_s22 + $0x1c0] sm:$0xff]  ;;  %v362_v14 = vld [vmem:[%s7944_s22 + $0x270] sm:$0xff] }
  0x41   : > { %1890 = vmatpush2.bf16.msra.mxu0 %v7077_v50  ;;  %v8099_v50 = vpack.c.bf16 %v321_v42, %v314_v41  ;;  %v7129_v9 = vld [vmem:[%s11516_s1 + $0x404] ss:$16 sps:$4 sm:$0xff]   ;;  %v8165_v25 = vpack.c.bf16 %v362_v14, %v355_v13  ;;  %v7133_v41 = vld [vmem:[%s11516_s1 + $0x5c0] ss:$16 sps:$4 sm:$0xff]  }
  0x42   : > { %2083 = vmatpush2.bf16.msra.mxu1 %v7078_v51  ;;  %1891 = vmatprep.subr.bf16.mxu0 %v7079_v52  ;;  %v8101_v51 = vpack.c.bf16 %v334_v44, %v327_v43  ;;  %v8103_v52 = vpack.c.bf16 %v336_v46, %v329_v45  ;;  %v7132_v22 = vld [vmem:[%s11516_s1 + $0x5e4] ss:$16 sps:$4 sm:$0xff]  }
  0x43   : > { %2084 = vmatprep.subr.bf16.mxu1 %v7081_v55  ;;  %v7118_v55 = vld [vmem:[%s11516_s1 + $0x460] ss:$16 sps:$4 sm:$0xff]   ;;  %v7135_v29 = vld [vmem:[%s11516_s1 + $0x5c4] ss:$16 sps:$4 sm:$0xff]  }
  0x44   : > { %v354_v28 = vld [vmem:[%s7944_s22 + $0x230] sm:$0xff]  ;;  %v356_v31 = vld [vmem:[%s7944_s22 + $0x240] sm:$0xff] }
  0x45   : > { %1892 = vmatpush2.bf16.msra.mxu0 %v7083_v56  ;;  %v326_v56 = vld [vmem:[%s7944_s22 + $0x150] sm:$0xff]  ;;  %v376_v38 = vld [vmem:[%s7944_s22 + $0x2e0] sm:$0xff]  ;;  %v8193_v43 = vpack.c.bf16 %v361_v30, %v354_v28 }
  0x46   : > { %2085 = vmatpush2.bf16.msra.mxu1 %v7084_v57  ;;  %1893 = vmatprep.subr.bf16.mxu0 %v7085_v58  ;;  %v7123_v57 = vld [vmem:[%s11516_s1 + $0x444] ss:$16 sps:$4 sm:$0xff]   ;;  %v333_v58 = vld [vmem:[%s7944_s22 + $0x188] sm:$0xff]  ;;  %v7145_v28 = vld [vmem:[%s11516_s1 + $0x540] ss:$16 sps:$4 sm:$0xff]  }
  0x47   : > { %2086 = vmatprep.subr.bf16.mxu1 %v7087_v59  ;;  %v328_v59 = vld [vmem:[%s7944_s22 + $0x160] sm:$0xff]  ;;  %v378_v40 = vld [vmem:[%s7944_s22 + $0x2f0] sm:$0xff] }
  0x48   : > { %v7138_v42 = vld [vmem:[%s11516_s1 + $0x5a4] ss:$16 sps:$4 sm:$0xff]  }
  0x49   : > { %1894 = vmatpush2.bf16.msra.mxu0 %v7089_v60  ;;  %v335_v60 = vld [vmem:[%s7944_s22 + $0x198] sm:$0xff]  ;;  %v384_v13 = vld [vmem:[%s7944_s22 + $0x320] sm:$0xff] }
  0x4a   : > { %2087 = vmatpush2.bf16.msra.mxu1 %v7090_v61  ;;  %1895 = vmatprep.subr.bf16.mxu0 %v7091_v62  ;;  %v341_v61 = vld [vmem:[%s7944_s22 + $0x1c8] sm:$0xff]  ;;  %v348_v62 = vld [vmem:[%s7944_s22 + $0x200] sm:$0xff] }
  0x4b   : > { %2088 = vmatprep.subr.bf16.mxu1 %v7093_v63  ;;  %v343_v63 = vld [vmem:[%s7944_s22 + $0x1d8] sm:$0xff]  ;;  %v7147_v14 = vld [vmem:[%s11516_s1 + $0x544] ss:$16 sps:$4 sm:$0xff]  }
  0x4d   : > { %1896 = vmatpush2.bf16.msra.mxu0 %v7095_v0  ;;  %v350_v0 = vld [vmem:[%s7944_s22 + $0x210] sm:$0xff] }
  0x4e   : > { %2089 = vmatpush2.bf16.msra.mxu1 %v7096_v1  ;;  %1897 = vmatprep.subr.bf16.mxu0 %v7097_v2  ;;  %v7121_v1 = vld [vmem:[%s11516_s1 + $0x440] ss:$16 sps:$4 sm:$0xff]   ;;  %v7126_v2 = vld [vmem:[%s11516_s1 + $0x424] ss:$16 sps:$4 sm:$0xff]   ;;  %v8135_v6 = vpack.c.bf16 %v350_v0, %v343_v63 }
  0x4f   : > { %2090 = vmatprep.subr.bf16.mxu1 %v7099_v3  ;;  %v8129_v3 = vpack.c.bf16 %v333_v58, %v326_v56  ;;  %v375_v56 = vld [vmem:[%s7944_s22 + $0x2d8] sm:$0xff]  ;;  %v377_v58 = vld [vmem:[%s7944_s22 + $0x2e8] sm:$0xff]  ;;  %v7139_v63 = vld [vmem:[%s11516_s1 + $0x580] ss:$16 sps:$4 sm:$0xff]  }
  0x50   : > { %v7144_v0 = vld [vmem:[%s11516_s1 + $0x564] ss:$16 sps:$4 sm:$0xff]  }
  0x51   : > { %1898 = vmatpush2.bf16.msra.mxu0 %v7101_v4  ;;  %v8131_v4 = vpack.c.bf16 %v335_v60, %v328_v59  ;;  %v383_v59 = vld [vmem:[%s7944_s22 + $0x318] sm:$0xff]  ;;  %v390_v60 = vld [vmem:[%s7944_s22 + $0x350] sm:$0xff] }
  0x52   : > { %2091 = vmatpush2.bf16.msra.mxu1 %v7102_v5  ;;  %2253 = vmatprep.subr.bf16.mxu0 %v7105_v10  ;;  %v8133_v5 = vpack.c.bf16 %v348_v62, %v341_v61  ;;  %v347_v10 = vld [vmem:[%s7944_s22 + $0x1f8] sm:$0xff]  ;;  %v385_v61 = vld [vmem:[%s7944_s22 + $0x328] sm:$0xff]  ;;  %v392_v62 = vld [vmem:[%s7944_s22 + $0x360] sm:$0xff] }
  0x53   : > { %2460 = vmatprep.subr.bf16.mxu1 %v7108_v11  ;;  %v342_v11 = vld [vmem:[%s7944_s22 + $0x1d0] sm:$0xff]  ;;  %v8161_v23 = vpack.c.bf16 %v347_v10, %v340_v8  ;;  %v8231_v8 = vpack.c.bf16 %v392_v62, %v385_v61 }
  0x54   : > { %1900 = vmatmul.mubr.bf16.vlgmr.msra.gmra.mxu0 %v8030_v16  ;;  %v7142_v10 = vld [vmem:[%s11516_s1 + $0x560] ss:$16 sps:$4 sm:$0xff]  }
  0x55   : > { %2093 = vmatmul.mubr.bf16.vlgmr.msra.gmra.mxu1 %v8032_v17  ;;  %2254 = vmatpush1.bf16.msra.mxu0 %v7103_v18  ;;  %v364_v18 = vld [vmem:[%s7944_s22 + $0x280] sm:$0xff] }
  0x56   : > { %2461 = vmatpush1.bf16.msra.mxu1 %v7106_v19  ;;  %1909 = vmatprep.mubr.bf16.mxu0 %v8040_v20  ;;  %v7127_v19 = vld [vmem:[%s11516_s1 + $0x400] ss:$16 sps:$4 sm:$0xff]   ;;  %v8167_v26 = vpack.c.bf16 %v364_v18, %v357_v15  ;;  %v391_v15 = vld [vmem:[%s7944_s22 + $0x358] sm:$0xff]  ;;  %v397_v18 = vld [vmem:[%s7944_s22 + $0x388] sm:$0xff] }
  0x57   : > { %2102 = vmatprep.mubr.bf16.mxu1 %v8042_v21  ;;  %2255 = vmatprep.subr.bf16.mxu0 %v7111_v24  ;;  %v8163_v24 = vpack.c.bf16 %v349_v12, %v342_v11  ;;  %v382_v11 = vld [vmem:[%s7944_s22 + $0x310] sm:$0xff]  ;;  %v389_v12 = vld [vmem:[%s7944_s22 + $0x348] sm:$0xff] }
  0x58   : > { %v8260_v30 = vpack.c.bf16 %v389_v12, %v382_v11  ;;  %v419_v11 = vld [vmem:[%s7944_s22 + $0x438] sm:$0xff]  ;;  %v425_v12 = vld [vmem:[%s7944_s22 + $0x468] sm:$0xff] }
  0x59   : > { %2256 = vmatpush1.bf16.msra.mxu0 %v7109_v27  ;;  %v7130_v27 = vld [vmem:[%s11516_s1 + $0x5e0] ss:$16 sps:$4 sm:$0xff]  }
  0x5a   : > { %2257 = vmatprep.subr.bf16.mxu0 %v7114_v32  ;;  %v363_v32 = vld [vmem:[%s7944_s22 + $0x278] sm:$0xff] }
  0x5b   : > { %v8195_v44 = vpack.c.bf16 %v363_v32, %v356_v31  ;;  %v8262_v31 = vpack.c.bf16 %v391_v15, %v384_v13  ;;  %v432_v13 = vld [vmem:[%s7944_s22 + $0x4a0] sm:$0xff]  ;;  %v434_v15 = vld [vmem:[%s7944_s22 + $0x4b0] sm:$0xff] }
  0x5c   : > { %1910 = vmatmul.mubr.bf16.gmra.mxu0 %v8065_v33 }
  0x5d   : > { %2103 = vmatmul.mubr.bf16.gmra.mxu1 %v8067_v34  ;;  %1919 = vmatprep.mubr.bf16.mxu0 %v8069_v35 }
  0x5e   : > { %2112 = vmatprep.mubr.bf16.mxu1 %v8071_v36  ;;  %2258 = vmatpush1.bf16.msra.mxu0 %v7112_v37  ;;  %v369_v37 = vld [vmem:[%s7944_s22 + $0x2a8] sm:$0xff] }
  0x5f   : > { %2259 = vmatprep.subr.bf16.mxu0 %v7117_v39  ;;  %v371_v39 = vld [vmem:[%s7944_s22 + $0x2b8] sm:$0xff]  ;;  %v8197_v45 = vpack.c.bf16 %v376_v38, %v369_v37  ;;  %v7148_v38 = vld [vmem:[%s11516_s1 + $0x520] ss:$16 sps:$4 sm:$0xff]  }
  0x60   : > { %v8199_v46 = vpack.c.bf16 %v378_v40, %v371_v39  ;;  %v396_v39 = vld [vmem:[%s7944_s22 + $0x380] sm:$0xff]  ;;  %v403_v40 = vld [vmem:[%s7944_s22 + $0x3b8] sm:$0xff] }
  0x62   : > { %2260 = vmatpush1.bf16.msra.mxu0 %v7115_v47  ;;  %v7136_v47 = vld [vmem:[%s11516_s1 + $0x5a0] ss:$16 sps:$4 sm:$0xff]  }
  0x63   : > { %2261 = vmatprep.subr.bf16.mxu0 %v7120_v48  ;;  %v368_v48 = vld [vmem:[%s7944_s22 + $0x2a0] sm:$0xff] }
  0x64   : > { %1920 = vmatmul.mubr.bf16.gmra.mxu0 %v8097_v49 }
  0x65   : > { %2113 = vmatmul.mubr.bf16.gmra.mxu1 %v8099_v50  ;;  %1929 = vmatprep.mubr.bf16.mxu0 %v8101_v51 }
  0x66   : > { %2122 = vmatprep.mubr.bf16.mxu1 %v8103_v52  ;;  %2262 = vmatpush1.bf16.msra.mxu0 %v7118_v55  ;;  %v7141_v55 = vld [vmem:[%s11516_s1 + $0x584] ss:$16 sps:$4 sm:$0xff]  }
  0x67   : > { %2263 = vmatprep.subr.bf16.mxu0 %v7123_v57  ;;  %v370_v57 = vld [vmem:[%s7944_s22 + $0x2b0] sm:$0xff] }
  0x6a   : > { %2264 = vmatpush1.bf16.msra.mxu0 %v7121_v1  ;;  %v8225_v1 = vpack.c.bf16 %v375_v56, %v368_v48  ;;  %v411_v48 = vld [vmem:[%s7944_s22 + $0x3f8] sm:$0xff]  ;;  %v413_v56 = vld [vmem:[%s7944_s22 + $0x408] sm:$0xff] }
  0x6b   : > { %2265 = vmatprep.subr.bf16.mxu0 %v7126_v2  ;;  %v8227_v2 = vpack.c.bf16 %v377_v58, %v370_v57  ;;  %v420_v57 = vld [vmem:[%s7944_s22 + $0x440] sm:$0xff] }
  0x6c   : > { %1930 = vmatmul.mubr.bf16.gmra.mxu0 %v8129_v3  ;;  %v7151_v58 = vld [vmem:[%s11516_s1 + $0x500] ss:$16 sps:$4 sm:$0xff]  }
  0x6d   : > { %2123 = vmatmul.mubr.bf16.gmra.mxu1 %v8131_v4  ;;  %1939 = vmatprep.mubr.bf16.mxu0 %v8133_v5 }
  0x6e   : > { %2132 = vmatprep.mubr.bf16.mxu1 %v8135_v6  ;;  %2266 = vmatpush1.bf16.msra.mxu0 %v7124_v7  ;;  %v8229_v7 = vpack.c.bf16 %v390_v60, %v383_v59  ;;  %v7156_v59 = vld [vmem:[%s11516_s1 + $0xec] ss:$16 sps:$4 sm:$0xff]   ;;  %v8292_v60 = vpack.c.bf16 %v403_v40, %v396_v39 }
  0x6f   : > { %2267 = vmatprep.subr.bf16.mxu0 %v7129_v9  ;;  %v7159_v9 = vld [vmem:[%s11516_s1 + $0x2ec] ss:$16 sps:$4 sm:$0xff]  }
  0x70   : > { %2832 = vmatprep.subr.bf16.mxu1 %v7159_v9  ;;  %v417_v9 = vld [vmem:[%s7944_s22 + $0x428] sm:$0xff]  ;;  %v439_v40 = vld [vmem:[%s7944_s22 + $0x4d8] sm:$0xff] }
  0x71   : > { %v433_v39 = vld [vmem:[%s7944_s22 + $0x4a8] sm:$0xff] }
  0x72   : > { %2268 = vmatpush1.bf16.msra.mxu0 %v7127_v19  ;;  %v404_v19 = vld [vmem:[%s7944_s22 + $0x3c0] sm:$0xff] }
  0x73   : > { %2269 = vmatprep.subr.bf16.mxu0 %v7132_v22  ;;  %v399_v22 = vld [vmem:[%s7944_s22 + $0x398] sm:$0xff]  ;;  %v8264_v32 = vpack.c.bf16 %v404_v19, %v397_v18 }
  0x74   : > { %1940 = vmatmul.mubr.bf16.gmra.mxu0 %v8161_v23 }
  0x75   : > { %2133 = vmatmul.mubr.bf16.gmra.mxu1 %v8163_v24  ;;  %1949 = vmatprep.mubr.bf16.mxu0 %v8165_v25 }
  0x76   : > { %2142 = vmatprep.mubr.bf16.mxu1 %v8167_v26  ;;  %2270 = vmatpush2.bf16.msra.mxu0 %v7130_v27  ;;  %v406_v27 = vld [vmem:[%s7944_s22 + $0x3d0] sm:$0xff] }
  0x77   : > { %2271 = vmatprep.subr.bf16.mxu0 %v7135_v29  ;;  %v7150_v29 = vld [vmem:[%s11516_s1 + $0x524] ss:$16 sps:$4 sm:$0xff]   ;;  %v8266_v37 = vpack.c.bf16 %v406_v27, %v399_v22  ;;  %v8316_v22 = vpack.c.bf16 %v432_v13, %v425_v12  ;;  %v455_v12 = vld [vmem:[%s7944_s22 + $0x558] sm:$0xff] }
  0x78   : > { %v462_v13 = vld [vmem:[%s7944_s22 + $0x590] sm:$0xff] }
  0x79   : > { %11639 = vst [vmem:[#allocation7_spill] sm:$0xff] %v8316_v22 }
  0x7a   : > { %2272 = vmatpush2.bf16.msra.mxu0 %v7133_v41  ;;  %v398_v41 = vld [vmem:[%s7944_s22 + $0x390] sm:$0xff] }
  0x7b   : > { %2273 = vmatprep.subr.bf16.mxu0 %v7138_v42  ;;  %v405_v42 = vld [vmem:[%s7944_s22 + $0x3c8] sm:$0xff] }
  0x7c   : > { %1950 = vmatmul.mubr.bf16.gmra.mxu0 %v8193_v43  ;;  %v8294_v61 = vpack.c.bf16 %v405_v42, %v398_v41  ;;  %v446_v41 = vld [vmem:[%s7944_s22 + $0x510] sm:$0xff]  ;;  %v441_v42 = vld [vmem:[%s7944_s22 + $0x4e8] sm:$0xff] }
  0x7d   : > { %2143 = vmatmul.mubr.bf16.gmra.mxu1 %v8195_v44  ;;  %1959 = vmatprep.mubr.bf16.mxu0 %v8197_v45 }
  0x7e   : > { %2152 = vmatprep.mubr.bf16.mxu1 %v8199_v46  ;;  %2274 = vmatpush2.bf16.msra.mxu0 %v7136_v47  ;;  %v7153_v47 = vld [vmem:[%s11516_s1 + $0x504] ss:$16 sps:$4 sm:$0xff]  }
  0x7f   : > { %2275 = vmatprep.subr.bf16.mxu0 %v7141_v55  ;;  %v418_v55 = vld [vmem:[%s7944_s22 + $0x430] sm:$0xff] }
  0x80   : > { %v8296_v62 = vpack.c.bf16 %v418_v55, %v411_v48 }
  0x82   : > { %2276 = vmatpush2.bf16.msra.mxu0 %v7139_v63  ;;  %v8298_v63 = vpack.c.bf16 %v420_v57, %v413_v56  ;;  %v8336_v56 = vpack.c.bf16 %v446_v41, %v439_v40  ;;  %v454_v40 = vld [vmem:[%s7944_s22 + $0x550] sm:$0xff]  ;;  %v461_v41 = vld [vmem:[%s7944_s22 + $0x588] sm:$0xff] }
  0x83   : > { %2277 = vmatprep.subr.bf16.mxu0 %v7144_v0  ;;  %v410_v0 = vld [vmem:[%s7944_s22 + $0x3f0] sm:$0xff] }
  0x84   : > { %1960 = vmatmul.mubr.bf16.gmra.mxu0 %v8225_v1  ;;  %v8312_v18 = vpack.c.bf16 %v417_v9, %v410_v0  ;;  %11643 = vst [vmem:[#allocation11_spill] sm:$0xff] %v8336_v56  ;;  %v440_v0 = vld [vmem:[%s7944_s22 + $0x4e0] sm:$0xff]  ;;  %v447_v9 = vld [vmem:[%s7944_s22 + $0x518] sm:$0xff] }
  0x85   : > { %2153 = vmatmul.mubr.bf16.gmra.mxu1 %v8227_v2  ;;  %1969 = vmatprep.mubr.bf16.mxu0 %v8229_v7 }
  0x86   : > { %2162 = vmatprep.mubr.bf16.mxu1 %v8231_v8  ;;  %2278 = vmatpush2.bf16.msra.mxu0 %v7142_v10  ;;  %v412_v10 = vld [vmem:[%s7944_s22 + $0x400] sm:$0xff]  ;;  %11637 = vst [vmem:[#allocation5_spill] sm:$0xff] %v8312_v18 }
  0x87   : > { %2279 = vmatprep.subr.bf16.mxu0 %v7147_v14  ;;  %v427_v14 = vld [vmem:[%s7944_s22 + $0x478] sm:$0xff]  ;;  %v8314_v19 = vpack.c.bf16 %v419_v11, %v412_v10  ;;  %v453_v10 = vld [vmem:[%s7944_s22 + $0x548] sm:$0xff]  ;;  %v460_v11 = vld [vmem:[%s7944_s22 + $0x580] sm:$0xff] }
  0x88   : > { %v8318_v27 = vpack.c.bf16 %v434_v15, %v427_v14  ;;  %v8354_v15 = vpack.c.bf16 %v447_v9, %v440_v0  ;;  %v8374_v9 = vpack.c.bf16 %v461_v41, %v454_v40  ;;  %v481_v40 = vld [vmem:[%s7944_s22 + $0x628] sm:$0xff]  ;;  %v488_v41 = vld [vmem:[%s7944_s22 + $0x660] sm:$0xff] }
  0x89   : > { %11638 = vst [vmem:[#allocation6_spill] sm:$0xff] %v8314_v19 }
  0x8a   : > { %2280 = vmatpush2.bf16.msra.mxu0 %v7145_v28  ;;  %11640 = vst [vmem:[#allocation8_spill] sm:$0xff] %v8318_v27  ;;  %v424_v28 = vld [vmem:[%s7944_s22 + $0x460] sm:$0xff]  ;;  %11646 = vst [vmem:[#allocation14_spill] sm:$0xff] %v8354_v15 }
  0x8b   : > { %2281 = vmatprep.subr.bf16.mxu0 %v7150_v29  ;;  %v431_v29 = vld [vmem:[%s7944_s22 + $0x498] sm:$0xff]  ;;  %11650 = vst [vmem:[#allocation18_spill] sm:$0xff] %v8374_v9 }
  0x8c   : > { %1970 = vmatmul.mubr.bf16.gmra.mxu0 %v8260_v30  ;;  %v8332_v48 = vpack.c.bf16 %v431_v29, %v424_v28  ;;  %v8356_v28 = vpack.c.bf16 %v460_v11, %v453_v10  ;;  %v8358_v29 = vpack.c.bf16 %v462_v13, %v455_v12  ;;  %v466_v12 = vld [vmem:[%s7944_s22 + $0x5b0] sm:$0xff]  ;;  %v473_v13 = vld [vmem:[%s7944_s22 + $0x5e8] sm:$0xff] }
  0x8d   : > { %2163 = vmatmul.mubr.bf16.gmra.mxu1 %v8262_v31  ;;  %1979 = vmatprep.mubr.bf16.mxu0 %v8264_v32 }
  0x8e   : > { %2172 = vmatprep.mubr.bf16.mxu1 %v8266_v37  ;;  %2282 = vmatpush2.bf16.msra.mxu0 %v7148_v38  ;;  %v426_v38 = vld [vmem:[%s7944_s22 + $0x470] sm:$0xff]  ;;  %11641 = vst [vmem:[#allocation9_spill] sm:$0xff] %v8332_v48  ;;  %11647 = vst [vmem:[#allocation15_spill] sm:$0xff] %v8356_v28 }
  0x8f   : > { %2283 = vmatprep.subr.bf16.mxu0 %v7153_v47  ;;  %v448_v47 = vld [vmem:[%s7944_s22 + $0x520] sm:$0xff]  ;;  %v8334_v55 = vpack.c.bf16 %v433_v39, %v426_v38  ;;  %11648 = vst [vmem:[#allocation16_spill] sm:$0xff] %v8358_v29  ;;  %v459_v39 = vld [vmem:[%s7944_s22 + $0x578] sm:$0xff] }
  0x90   : > { %v8338_v57 = vpack.c.bf16 %v448_v47, %v441_v42  ;;  %v452_v38 = vld [vmem:[%s7944_s22 + $0x540] sm:$0xff]  ;;  %v467_v42 = vld [vmem:[%s7944_s22 + $0x5b8] sm:$0xff]  ;;  %v474_v47 = vld [vmem:[%s7944_s22 + $0x5f0] sm:$0xff] }
  0x91   : > { %11642 = vst [vmem:[#allocation10_spill] sm:$0xff] %v8334_v55  ;;  %v8372_v0 = vpack.c.bf16 %v459_v39, %v452_v38  ;;  %v8376_v10 = vpack.c.bf16 %v474_v47, %v467_v42  ;;  %v468_v38 = vld [vmem:[%s7944_s22 + $0x5c0] sm:$0xff]  ;;  %v475_v39 = vld [vmem:[%s7944_s22 + $0x5f8] sm:$0xff]  ;;  %v490_v47 = vld [vmem:[%s7944_s22 + $0x670] sm:$0xff] }
  0x92   : > { %2284 = vmatpush2.bf16.msra.mxu0 %v7151_v58  ;;  %11644 = vst [vmem:[#allocation12_spill] sm:$0xff] %v8338_v57  ;;  %v438_v58 = vld [vmem:[%s7944_s22 + $0x4d0] sm:$0xff]  ;;  %v483_v42 = vld [vmem:[%s7944_s22 + $0x638] sm:$0xff] }
  0x93   : > { %2639 = vmatprep.subr.bf16.mxu0 %v7156_v59  ;;  %v445_v59 = vld [vmem:[%s7944_s22 + $0x508] sm:$0xff]  ;;  %11649 = vst [vmem:[#allocation17_spill] sm:$0xff] %v8372_v0  ;;  %11651 = vst [vmem:[#allocation19_spill] sm:$0xff] %v8376_v10 }
  0x94   : > { %1980 = vmatmul.mubr.bf16.gmra.mxu0 %v8292_v60  ;;  %v8352_v14 = vpack.c.bf16 %v445_v59, %v438_v58  ;;  %v469_v58 = vld [vmem:[%s7944_s22 + $0x5c8] sm:$0xff]  ;;  %v476_v59 = vld [vmem:[%s7944_s22 + $0x600] sm:$0xff] }
  0x95   : > { %2173 = vmatmul.mubr.bf16.gmra.mxu1 %v8294_v61  ;;  %1989 = vmatprep.mubr.bf16.mxu0 %v8296_v62  ;;  %v8378_v11 = vpack.c.bf16 %v476_v59, %v469_v58  ;;  %v8392_v58 = vpack.c.bf16 %v473_v13, %v466_v12  ;;  %v8394_v59 = vpack.c.bf16 %v475_v39, %v468_v38  ;;  %v495_v12 = vld [vmem:[%s7944_s22 + $0x698] sm:$0xff]  ;;  %v502_v13 = vld [vmem:[%s7944_s22 + $0x6d0] sm:$0xff]  ;;  %v497_v38 = vld [vmem:[%s7944_s22 + $0x6a8] sm:$0xff] }
  0x96   : > { %2182 = vmatprep.mubr.bf16.mxu1 %v8298_v63  ;;  %11645 = vst [vmem:[#allocation13_spill] sm:$0xff] %v8352_v14  ;;  %v504_v39 = vld [vmem:[%s7944_s22 + $0x6e0] sm:$0xff] }
  0x97   : > { %11652 = vst [vmem:[#allocation20_spill] sm:$0xff] %v8378_v11  ;;  %11653 = vst [vmem:[#allocation21_spill] sm:$0xff] %v8392_v58 }
  0x98   : > { %11654 = vst [vmem:[#allocation22_spill] sm:$0xff] %v8394_v59 }
  0x9c   : > { %1990 = vmatmul.mubr.bf16.gmra.mxu0 %v8312_v18 }
  0x9d   : > { %2183 = vmatmul.mubr.bf16.gmra.mxu1 %v8314_v19  ;;  %1999 = vmatprep.mubr.bf16.mxu0 %v8316_v22 }
  0x9e   : > { %2192 = vmatprep.mubr.bf16.mxu1 %v8318_v27 }
  0xa4   : > { %2000 = vmatmul.mubr.bf16.gmra.mxu0 %v8332_v48  ;;  %v421_v48 = vld [vmem:[%s7944_s22 + $0x448] sm:$0xff] }
  0xa5   : > { %2193 = vmatmul.mubr.bf16.gmra.mxu1 %v8334_v55  ;;  %2009 = vmatprep.mubr.bf16.mxu0 %v8336_v56  ;;  %v7220_v56 = vld [vmem:[%s11516_s1 + $0x188] ss:$16 sps:$4 sm:$0xff]   ;;  %v408_v55 = vld [vmem:[%s7944_s22 + $0x3e0] sm:$0xff] }
  0xa6   : > { %2202 = vmatprep.mubr.bf16.mxu1 %v8338_v57  ;;  %v7184_v57 = vld [vmem:[%s11516_s1 + $0x48] ss:$16 sps:$4 sm:$0xff]  }
  0xac   : > { %2010 = vmatmul.mubr.bf16.gmra.mxu0 %v8352_v14  ;;  %v503_v14 = vld [vmem:[%s7944_s22 + $0x6d8] sm:$0xff] }
  0xad   : > { %2203 = vmatmul.mubr.bf16.gmra.mxu1 %v8354_v15  ;;  %2019 = vmatprep.mubr.bf16.mxu0 %v8356_v28  ;;  %v489_v28 = vld [vmem:[%s7944_s22 + $0x668] sm:$0xff]  ;;  %v496_v15 = vld [vmem:[%s7944_s22 + $0x6a0] sm:$0xff] }
  0xae   : > { %2212 = vmatprep.mubr.bf16.mxu1 %v8358_v29  ;;  %v482_v29 = vld [vmem:[%s7944_s22 + $0x630] sm:$0xff] }
  0xb4   : > { %2020 = vmatmul.mubr.bf16.gmra.mxu0 %v8372_v0  ;;  %v8398_v0 = vpack.c.bf16 %v490_v47, %v483_v42  ;;  %v8416_v42 = vpack.c.bf16 %v502_v13, %v495_v12  ;;  %v8418_v47 = vpack.c.bf16 %v504_v39, %v497_v38  ;;  %v288_v13 = vld [vmem:[%s7944_s22 + $0x20] sm:$0xff]  ;;  %v295_v38 = vld [vmem:[%s7944_s22 + $0x58] sm:$0xff]  ;;  %v290_v39 = vld [vmem:[%s7944_s22 + $0x30] sm:$0xff] }
  0xb5   : > { %2213 = vmatmul.mubr.bf16.gmra.mxu1 %v8374_v9  ;;  %2029 = vmatprep.mubr.bf16.mxu0 %v8376_v10  ;;  %v8396_v9 = vpack.c.bf16 %v488_v41, %v481_v40  ;;  %v480_v10 = vld [vmem:[%s7944_s22 + $0x620] sm:$0xff]  ;;  %v8414_v41 = vpack.c.bf16 %v489_v28, %v482_v29  ;;  %v8432_v29 = vpack.c.bf16 %v503_v14, %v496_v15  ;;  %v7154_v14 = vld [vmem:[%s11516_s1 + $0xe8] ss:$16 sps:$4 sm:$0xff]  }
  0xb6   : > { %2222 = vmatprep.mubr.bf16.mxu1 %v8378_v11  ;;  %11656 = vst [vmem:[#allocation24_spill] sm:$0xff] %v8398_v0  ;;  %v487_v11 = vld [vmem:[%s7944_s22 + $0x658] sm:$0xff]  ;;  %11659 = vst [vmem:[#allocation27_spill] sm:$0xff] %v8416_v42 }
  0xb7   : > { %11655 = vst [vmem:[#allocation23_spill] sm:$0xff] %v8396_v9  ;;  %v8412_v40 = vpack.c.bf16 %v487_v11, %v480_v10  ;;  %11658 = vst [vmem:[#allocation26_spill] sm:$0xff] %v8414_v41  ;;  %v289_v10 = vld [vmem:[%s7944_s22 + $0x28] sm:$0xff]  ;;  %v296_v11 = vld [vmem:[%s7944_s22 + $0x60] sm:$0xff] }
  0xb8   : > { %11660 = vst [vmem:[#allocation28_spill] sm:$0xff] %v8418_v47  ;;  %11662 = vst [vmem:[#allocation30_spill] sm:$0xff] %v8432_v29  ;;  %v8434_v12 = vpack.c.bf16 %v296_v11, %v289_v10  ;;  %v7157_v15 = vld [vmem:[%s11516_s1 + $0x2e8] ss:$16 sps:$4 sm:$0xff]   ;;  %v310_v10 = vld [vmem:[%s7944_s22 + $0xd0] sm:$0xff]  ;;  %v8452_v11 = vpack.c.bf16 %v295_v38, %v288_v13 }
  0xb9   : > { %11657 = vst [vmem:[#allocation25_spill] sm:$0xff] %v8412_v40  ;;  %v7163_v13 = vld [vmem:[%s11516_s1 + $0x2c8] ss:$16 sps:$4 sm:$0xff]  }
  0xba   : > { %11663 = vst [vmem:[#allocation31_spill] sm:$0xff] %v8434_v12  ;;  %11664 = vst [vmem:[#allocation32_spill] sm:$0xff] %v8452_v11  ;;  %v317_v38 = vld [vmem:[%s7944_s22 + $0x108] sm:$0xff] }
  0xbc   : > { %2030 = vmatmul.mubr.bf16.gmra.mxu0 %v8392_v58  ;;  %v501_v58 = vld [vmem:[%s7944_s22 + $0x6c8] sm:$0xff] }
  0xbd   : > { %2223 = vmatmul.mubr.bf16.gmra.mxu1 %v8394_v59  ;;  %2039 = vmatprep.mubr.bf16.mxu0 %v8396_v9  ;;  %v494_v59 = vld [vmem:[%s7944_s22 + $0x690] sm:$0xff]  ;;  %v11667_v9 = vmov 0  }
  0xbe   : > { %2232 = vmatprep.mubr.bf16.mxu1 %v8398_v0  ;;  %v8430_v28 = vpack.c.bf16 %v501_v58, %v494_v59  ;;  %v11535_v58 = vmov 0   ;;  %v303_v59 = vld [vmem:[%s7944_s22 + $0x98] sm:$0xff] }
  0xbf   : > { %v311_v0 = vld [vmem:[%s7944_s22 + $0xd8] sm:$0xff] }
  0xc0   : > { %11661 = vst [vmem:[#allocation29_spill] sm:$0xff] %v8430_v28 }
  0xc4   : > { %2040 = vmatmul.mubr.bf16.gmra.mxu0 %v8412_v40  ;;  %v297_v40 = vld [vmem:[%s7944_s22 + $0x68] sm:$0xff] }
  0xc5   : > { %2233 = vmatmul.mubr.bf16.gmra.mxu1 %v8414_v41  ;;  %2049 = vmatprep.mubr.bf16.mxu0 %v8416_v42  ;;  %v309_v42 = vld [vmem:[%s7944_s22 + $0xc8] sm:$0xff]  ;;  %v304_v41 = vld [vmem:[%s7944_s22 + $0xa0] sm:$0xff] }
  0xc6   : > { %2242 = vmatprep.mubr.bf16.mxu1 %v8418_v47  ;;  %v302_v47 = vld [vmem:[%s7944_s22 + $0x90] sm:$0xff] }
  0xcc   : > { %2050 = vmatmul.mubr.bf16.gmra.mxu0 %v8430_v28  ;;  %v8462_v28 = vpack.c.bf16 %v310_v10, %v303_v59  ;;  %v7168_v59 = vld [vmem:[%s11516_s1 + $0xac] ss:$16 sps:$4 sm:$0xff]  }
  0xcd   : > { %2243 = vmatmul.mubr.bf16.gmra.mxu1 %v8432_v29  ;;  %2285 = vmatprep.mubr.bf16.mxu0 %v8434_v12  ;;  %v8454_v29 = vpack.c.bf16 %v297_v40, %v290_v39  ;;  %v7165_v12 = vld [vmem:[%s11516_s1 + $0x2cc] ss:$16 sps:$4 sm:$0xff]   ;;  %v7160_v40 = vld [vmem:[%s11516_s1 + $0xc8] ss:$16 sps:$4 sm:$0xff]   ;;  %v324_v39 = vld [vmem:[%s7944_s22 + $0x140] sm:$0xff] }
  0xce   : > { %2478 = vmatprep.mubr.bf16.mxu1 %v11535_v58  ;;  %v7162_v58 = vld [vmem:[%s11516_s1 + $0xcc] ss:$16 sps:$4 sm:$0xff]   ;;  %11666 = vst [vmem:[#allocation34_spill] sm:$0xff] %v8462_v28 }
  0xcf   : > { %11665 = vst [vmem:[#allocation33_spill] sm:$0xff] %v8454_v29  ;;  %v7171_v10 = vld [vmem:[%s11516_s1 + $0x2ac] ss:$16 sps:$4 sm:$0xff]  }
  0xd4   : > { %2286 = vmatmul.mubr.bf16.vlgmr.msra.gmra.mxu0 %v8452_v11  ;;  %v8489_v11 = vpack.c.bf16 %v311_v0, %v304_v41  ;;  %v7177_v0 = vld [vmem:[%s11516_s1 + $0x28c] ss:$16 sps:$4 sm:$0xff]   ;;  %v316_v41 = vld [vmem:[%s7944_s22 + $0x100] sm:$0xff] }
  0xd5   : > { %6541 = vmatmul.mubr.msk.bf16.vlgmr.msra.gmra.mxu1 %vm1818_vm0, %v8454_v29  ;;  %2640 = vmatpush1.bf16.msra.mxu0 %v7154_v14  ;;  %v8487_v29 = vpack.c.bf16 %v309_v42, %v302_v47  ;;  %v7166_v14 = vld [vmem:[%s11516_s1 + $0xa8] ss:$16 sps:$4 sm:$0xff]   ;;  %v7174_v42 = vld [vmem:[%s11516_s1 + $0x8c] ss:$16 sps:$4 sm:$0xff]  }
  0xd6   : > { %2833 = vmatpush1.bf16.msra.mxu1 %v7157_v15  ;;  %2295 = vmatprep.mubr.bf16.mxu0 %v8462_v28  ;;  %11669 = vst [vmem:[#allocation36_spill] sm:$0xff] %v8489_v11  ;;  %v7169_v15 = vld [vmem:[%s11516_s1 + $0x2a8] ss:$16 sps:$4 sm:$0xff]   ;;  %v8497_v28 = vpack.c.bf16 %v324_v39, %v317_v38 }
  0xd7   : > { %2488 = vmatprep.mubr.bf16.mxu1 %v11667_v9  ;;  %2641 = vmatprep.subr.bf16.mxu0 %v7162_v58  ;;  %11668 = vst [vmem:[#allocation35_spill] sm:$0xff] %v8487_v29  ;;  %v323_v47 = vld [vmem:[%s7944_s22 + $0x138] sm:$0xff]  ;;  %v325_v58 = vld [vmem:[%s7944_s22 + $0x148] sm:$0xff] }
  0xd8   : > { %2834 = vmatprep.subr.bf16.mxu1 %v7165_v12  ;;  %11670 = vst [vmem:[#allocation37_spill] sm:$0xff] %v8497_v28  ;;  %v318_v12 = vld [vmem:[%s7944_s22 + $0x110] sm:$0xff]  ;;  %v7172_v38 = vld [vmem:[%s11516_s1 + $0x88] ss:$16 sps:$4 sm:$0xff]  }
  0xd9   : > { %2642 = vmatpush1.bf16.msra.mxu0 %v7160_v40  ;;  %v331_v40 = vld [vmem:[%s7944_s22 + $0x178] sm:$0xff] }
  0xda   : > { %2835 = vmatpush1.bf16.msra.mxu1 %v7163_v13  ;;  %2643 = vmatprep.subr.bf16.mxu0 %v7168_v59  ;;  %v338_v13 = vld [vmem:[%s7944_s22 + $0x1b0] sm:$0xff]  ;;  %v7175_v39 = vld [vmem:[%s11516_s1 + $0x288] ss:$16 sps:$4 sm:$0xff]   ;;  %v7180_v59 = vld [vmem:[%s11516_s1 + $0x6c] ss:$16 sps:$4 sm:$0xff]  }
  0xdb   : > { %2836 = vmatprep.subr.bf16.mxu1 %v7171_v10  ;;  %v7183_v10 = vld [vmem:[%s11516_s1 + $0x26c] ss:$16 sps:$4 sm:$0xff]  }
  0xdc   : > { %2296 = vmatmul.mubr.bf16.gmra.mxu0 %v8487_v29  ;;  %v339_v29 = vld [vmem:[%s7944_s22 + $0x1b8] sm:$0xff] }
  0xdd   : > { %6542 = vmatmul.mubr.msk.bf16.gmra.mxu1 %vm1818_vm0, %v8489_v11  ;;  %2305 = vmatprep.mubr.bf16.mxu0 %v8497_v28  ;;  %v8528_v11 = vpack.c.bf16 %v323_v47, %v316_v41  ;;  %v8530_v28 = vpack.c.bf16 %v325_v58, %v318_v12  ;;  %v7189_v41 = vld [vmem:[%s11516_s1 + $0x24c] ss:$16 sps:$4 sm:$0xff]   ;;  %v330_v47 = vld [vmem:[%s7944_s22 + $0x170] sm:$0xff]  ;;  %v332_v58 = vld [vmem:[%s7944_s22 + $0x180] sm:$0xff] }
  0xde   : > { %2498 = vmatprep.mubr.bf16.mxu1 %v11667_v9  ;;  %2644 = vmatpush1.bf16.msra.mxu0 %v7166_v14  ;;  %v7178_v14 = vld [vmem:[%s11516_s1 + $0x68] ss:$16 sps:$4 sm:$0xff]  }
  0xdf   : > { %2837 = vmatpush1.bf16.msra.mxu1 %v7169_v15  ;;  %2645 = vmatprep.subr.bf16.mxu0 %v7174_v42  ;;  %11671 = vst [vmem:[#allocation38_spill] sm:$0xff] %v8528_v11  ;;  %11672 = vst [vmem:[#allocation39_spill] sm:$0xff] %v8530_v28  ;;  %v7181_v15 = vld [vmem:[%s11516_s1 + $0x268] ss:$16 sps:$4 sm:$0xff]   ;;  %v8538_v42 = vpack.c.bf16 %v338_v13, %v331_v40  ;;  %v352_v13 = vld [vmem:[%s7944_s22 + $0x220] sm:$0xff] }
  0xe0   : > { %2838 = vmatprep.subr.bf16.mxu1 %v7177_v0  ;;  %v7186_v0 = vld [vmem:[%s11516_s1 + $0x4c] ss:$16 sps:$4 sm:$0xff]  }
  0xe1   : > { %11673 = vst [vmem:[#allocation40_spill] sm:$0xff] %v8538_v42  ;;  %v337_v12 = vld [vmem:[%s7944_s22 + $0x1a8] sm:$0xff] }
  0xe2   : > { %2646 = vmatpush1.bf16.msra.mxu0 %v7172_v38  ;;  %v345_v40 = vld [vmem:[%s7944_s22 + $0x1e8] sm:$0xff] }
  0xe3   : > { %2839 = vmatpush1.bf16.msra.mxu1 %v7175_v39  ;;  %2647 = vmatprep.subr.bf16.mxu0 %v7180_v59  ;;  %v7187_v38 = vld [vmem:[%s11516_s1 + $0x248] ss:$16 sps:$4 sm:$0xff]   ;;  %v7192_v39 = vld [vmem:[%s11516_s1 + $0x2c] ss:$16 sps:$4 sm:$0xff]  }
  0xe4   : > { %2840 = vmatprep.subr.bf16.mxu1 %v7183_v10  ;;  %2306 = vmatmul.mubr.bf16.gmra.mxu0 %v8528_v11  ;;  %v7195_v59 = vld [vmem:[%s11516_s1 + $0x22c] ss:$16 sps:$4 sm:$0xff]   ;;  %v8569_v10 = vpack.c.bf16 %v337_v12, %v330_v47  ;;  %v344_v47 = vld [vmem:[%s7944_s22 + $0x1e0] sm:$0xff]  ;;  %v7196_v11 = vld [vmem:[%s11516_s1 + $0x8] ss:$16 sps:$4 sm:$0xff]  }
  0xe5   : > { %6543 = vmatmul.mubr.msk.bf16.gmra.mxu1 %vm1818_vm0, %v8530_v28  ;;  %2315 = vmatprep.mubr.bf16.mxu0 %v8538_v42  ;;  %v8571_v42 = vpack.c.bf16 %v339_v29, %v332_v58  ;;  %v7201_v29 = vld [vmem:[%s11516_s1 + $0x20c] ss:$16 sps:$4 sm:$0xff]   ;;  %v346_v58 = vld [vmem:[%s7944_s22 + $0x1f0] sm:$0xff] }
  0xe6   : > { %2508 = vmatprep.mubr.bf16.mxu1 %v11667_v9  ;;  %2648 = vmatpush1.bf16.msra.mxu0 %v7178_v14  ;;  %11674 = vst [vmem:[#allocation41_spill] sm:$0xff] %v8569_v10  ;;  %v7190_v14 = vld [vmem:[%s11516_s1 + $0x28] ss:$16 sps:$4 sm:$0xff]  }
  0xe7   : > { %2841 = vmatpush1.bf16.msra.mxu1 %v7181_v15  ;;  %2649 = vmatprep.subr.bf16.mxu0 %v7186_v0  ;;  %11675 = vst [vmem:[#allocation42_spill] sm:$0xff] %v8571_v42  ;;  %v7193_v15 = vld [vmem:[%s11516_s1 + $0x228] ss:$16 sps:$4 sm:$0xff]   ;;  %v8579_v0 = vpack.c.bf16 %v352_v13, %v345_v40  ;;  %v366_v13 = vld [vmem:[%s7944_s22 + $0x290] sm:$0xff] }
  0xe8   : > { %2842 = vmatprep.subr.bf16.mxu1 %v7189_v41  ;;  %v7198_v41 = vld [vmem:[%s11516_s1 + $0xc] ss:$16 sps:$4 sm:$0xff]  }
  0xe9   : > { %11676 = vst [vmem:[#allocation43_spill] sm:$0xff] %v8579_v0  ;;  %v351_v12 = vld [vmem:[%s7944_s22 + $0x218] sm:$0xff]  ;;  %v353_v28 = vld [vmem:[%s7944_s22 + $0x228] sm:$0xff] }
  0xea   : > { %2650 = vmatpush1.bf16.msra.mxu0 %v7184_v57  ;;  %v359_v40 = vld [vmem:[%s7944_s22 + $0x258] sm:$0xff] }
  0xeb   : > { %2843 = vmatpush1.bf16.msra.mxu1 %v7187_v38  ;;  %2651 = vmatprep.subr.bf16.mxu0 %v7192_v39  ;;  %v7199_v57 = vld [vmem:[%s11516_s1 + $0x208] ss:$16 sps:$4 sm:$0xff]   ;;  %v7204_v38 = vld [vmem:[%s11516_s1 + $0x1ec] ss:$16 sps:$4 sm:$0xff]  }
  0xec   : > { %2844 = vmatprep.subr.bf16.mxu1 %v7195_v59  ;;  %2316 = vmatmul.mubr.bf16.gmra.mxu0 %v8569_v10  ;;  %v7207_v39 = vld [vmem:[%s11516_s1 + $0x3ec] ss:$16 sps:$4 sm:$0xff]   ;;  %v8610_v59 = vpack.c.bf16 %v351_v12, %v344_v47  ;;  %v358_v47 = vld [vmem:[%s7944_s22 + $0x250] sm:$0xff]  ;;  %v7208_v10 = vld [vmem:[%s11516_s1 + $0x1c8] ss:$16 sps:$4 sm:$0xff]  }
  0xed   : > { %6544 = vmatmul.mubr.msk.bf16.gmra.mxu1 %vm1818_vm0, %v8571_v42  ;;  %2325 = vmatprep.mubr.bf16.mxu0 %v8579_v0  ;;  %v8612_v0 = vpack.c.bf16 %v353_v28, %v346_v58  ;;  %v7213_v28 = vld [vmem:[%s11516_s1 + $0x3cc] ss:$16 sps:$4 sm:$0xff]   ;;  %v360_v58 = vld [vmem:[%s7944_s22 + $0x260] sm:$0xff] }
  0xee   : > { %2518 = vmatprep.mubr.bf16.mxu1 %v11667_v9  ;;  %2652 = vmatpush1.bf16.msra.mxu0 %v7190_v14  ;;  %11677 = vst [vmem:[#allocation44_spill] sm:$0xff] %v8610_v59  ;;  %v7202_v14 = vld [vmem:[%s11516_s1 + $0x1e8] ss:$16 sps:$4 sm:$0xff]  }
  0xef   : > { %2845 = vmatpush1.bf16.msra.mxu1 %v7193_v15  ;;  %2653 = vmatprep.subr.bf16.mxu0 %v7198_v41  ;;  %11678 = vst [vmem:[#allocation45_spill] sm:$0xff] %v8612_v0  ;;  %v7205_v15 = vld [vmem:[%s11516_s1 + $0x3e8] ss:$16 sps:$4 sm:$0xff]   ;;  %v8620_v41 = vpack.c.bf16 %v366_v13, %v359_v40  ;;  %v380_v13 = vld [vmem:[%s7944_s22 + $0x300] sm:$0xff] }
  0xf0   : > { %2846 = vmatprep.subr.bf16.mxu1 %v7201_v29  ;;  %v7210_v29 = vld [vmem:[%s11516_s1 + $0x1cc] ss:$16 sps:$4 sm:$0xff]  }
  0xf1   : > { %11679 = vst [vmem:[#allocation46_spill] sm:$0xff] %v8620_v41  ;;  %v365_v12 = vld [vmem:[%s7944_s22 + $0x288] sm:$0xff]  ;;  %v367_v42 = vld [vmem:[%s7944_s22 + $0x298] sm:$0xff] }
  0xf2   : > { %2654 = vmatpush1.bf16.msra.mxu0 %v7196_v11  ;;  %v373_v40 = vld [vmem:[%s7944_s22 + $0x2c8] sm:$0xff] }
  0xf3   : > { %2847 = vmatpush1.bf16.msra.mxu1 %v7199_v57  ;;  %2655 = vmatprep.subr.bf16.mxu0 %v7204_v38  ;;  %v7211_v11 = vld [vmem:[%s11516_s1 + $0x3c8] ss:$16 sps:$4 sm:$0xff]   ;;  %v7216_v57 = vld [vmem:[%s11516_s1 + $0x1ac] ss:$16 sps:$4 sm:$0xff]  }
  0xf4   : > { %2848 = vmatprep.subr.bf16.mxu1 %v7207_v39  ;;  %2326 = vmatmul.mubr.bf16.gmra.mxu0 %v8610_v59  ;;  %v7219_v38 = vld [vmem:[%s11516_s1 + $0x3ac] ss:$16 sps:$4 sm:$0xff]   ;;  %v8651_v39 = vpack.c.bf16 %v365_v12, %v358_v47  ;;  %v818_v47 = vlaneseq  ;;  %v372_v12 = vld [vmem:[%s7944_s22 + $0x2c0] sm:$0xff] }
  0xf5   : > { %6545 = vmatmul.mubr.msk.bf16.gmra.mxu1 %vm1818_vm0, %v8612_v0  ;;  %2335 = vmatprep.mubr.bf16.mxu0 %v8620_v41  ;;  %v8653_v41 = vpack.c.bf16 %v367_v42, %v360_v58  ;;  %v7225_v42 = vld [vmem:[%s11516_s1 + $0x38c] ss:$16 sps:$4 sm:$0xff]   ;;  %v374_v0 = vld [vmem:[%s7944_s22 + $0x2d0] sm:$0xff] }
  0xf6   : > { %2528 = vmatprep.mubr.bf16.mxu1 %v11667_v9  ;;  %2656 = vmatpush2.bf16.msra.mxu0 %v7202_v14  ;;  %11680 = vst [vmem:[#allocation47_spill] sm:$0xff] %v8651_v39  ;;  %v7214_v14 = vld [vmem:[%s11516_s1 + $0x1a8] ss:$16 sps:$4 sm:$0xff]  }
  0xf7   : > { %2849 = vmatpush2.bf16.msra.mxu1 %v7205_v15  ;;  %2657 = vmatprep.subr.bf16.mxu0 %v7210_v29  ;;  %11681 = vst [vmem:[#allocation48_spill] sm:$0xff] %v8653_v41  ;;  %v7217_v15 = vld [vmem:[%s11516_s1 + $0x3a8] ss:$16 sps:$4 sm:$0xff]   ;;  %v8661_v29 = vpack.c.bf16 %v380_v13, %v373_v40  ;;  %v394_v13 = vld [vmem:[%s7944_s22 + $0x370] sm:$0xff] }
  0xf8   : > { %2850 = vmatprep.subr.bf16.mxu1 %v7213_v28  ;;  %v7222_v28 = vld [vmem:[%s11516_s1 + $0x18c] ss:$16 sps:$4 sm:$0xff]  }
  0xf9   : > { %11682 = vst [vmem:[#allocation49_spill] sm:$0xff] %v8661_v29  ;;  %v379_v58 = vld [vmem:[%s7944_s22 + $0x2f8] sm:$0xff]  ;;  %v381_v59 = vld [vmem:[%s7944_s22 + $0x308] sm:$0xff] }
  0xfa   : > { %2658 = vmatpush2.bf16.msra.mxu0 %v7208_v10  ;;  %v387_v40 = vld [vmem:[%s7944_s22 + $0x338] sm:$0xff] }
  0xfb   : > { %2851 = vmatpush2.bf16.msra.mxu1 %v7211_v11  ;;  %2659 = vmatprep.subr.bf16.mxu0 %v7216_v57  ;;  %v7223_v10 = vld [vmem:[%s11516_s1 + $0x388] ss:$16 sps:$4 sm:$0xff]   ;;  %v8686_v11 = vshrl.u32 %v818_v47, 7  ;;  %v7228_v57 = vld [vmem:[%s11516_s1 + $0x16c] ss:$16 sps:$4 sm:$0xff]   ;;  %v8696_v47 = vpack.c.bf16 %v381_v59, %v374_v0 }
  0xfc   : > { %2852 = vmatprep.subr.bf16.mxu1 %v7219_v38  ;;  %2336 = vmatmul.mubr.bf16.gmra.mxu0 %v8651_v39  ;;  %v7231_v38 = vld [vmem:[%s11516_s1 + $0x36c] ss:$16 sps:$4 sm:$0xff]   ;;  %v388_v39 = vld [vmem:[%s7944_s22 + $0x340] sm:$0xff]  ;;  %v7232_v59 = vld [vmem:[%s11516_s1 + $0x148] ss:$16 sps:$4 sm:$0xff]  }
  0xfd   : > { %6546 = vmatmul.mubr.msk.bf16.gmra.mxu1 %vm1818_vm0, %v8653_v41  ;;  %2345 = vmatprep.mubr.bf16.mxu0 %v8661_v29  ;;  %11683 = vst [vmem:[#allocation50_spill] sm:$0xff] %v8686_v11  ;;  %v8694_v29 = vpack.c.bf16 %v379_v58, %v372_v12  ;;  %11685 = vst [vmem:[#allocation52_spill] sm:$0xff] %v8696_v47  ;;  %v7237_v0 = vld [vmem:[%s11516_s1 + $0x34c] ss:$16 sps:$4 sm:$0xff]   ;;  %v386_v58 = vld [vmem:[%s7944_s22 + $0x330] sm:$0xff] }
  0xfe   : > { %2538 = vmatprep.mubr.bf16.mxu1 %v11667_v9  ;;  %2660 = vmatpush2.bf16.msra.mxu0 %v7214_v14  ;;  %v7226_v14 = vld [vmem:[%s11516_s1 + $0x168] ss:$16 sps:$4 sm:$0xff]  }
  0xff   : > { %2853 = vmatpush2.bf16.msra.mxu1 %v7217_v15  ;;  %2661 = vmatprep.subr.bf16.mxu0 %v7222_v28  ;;  %11684 = vst [vmem:[#allocation51_spill] sm:$0xff] %v8694_v29  ;;  %v7229_v15 = vld [vmem:[%s11516_s1 + $0x368] ss:$16 sps:$4 sm:$0xff]   ;;  %v8704_v28 = vpack.c.bf16 %v394_v13, %v387_v40 }
 0x100   : > { %2854 = vmatprep.subr.bf16.mxu1 %v7225_v42  ;;  %v7234_v42 = vld [vmem:[%s11516_s1 + $0x14c] ss:$16 sps:$4 sm:$0xff]  }
 0x101   : > { %11686 = vst [vmem:[#allocation53_spill] sm:$0xff] %v8704_v28  ;;  %v393_v41 = vld [vmem:[%s7944_s22 + $0x368] sm:$0xff]  ;;  %v395_v40 = vld [vmem:[%s7944_s22 + $0x378] sm:$0xff] }
 0x102   : > { %2662 = vmatpush2.bf16.msra.mxu0 %v7220_v56  ;;  %v401_v13 = vld [vmem:[%s7944_s22 + $0x3a8] sm:$0xff]  ;;  %v8739_v12 = vpack.c.bf16 %v395_v40, %v388_v39  ;;  %v400_v39 = vld [vmem:[%s7944_s22 + $0x3a0] sm:$0xff]  ;;  %v402_v40 = vld [vmem:[%s7944_s22 + $0x3b0] sm:$0xff] }
 0x103   : > { %2855 = vmatpush2.bf16.msra.mxu1 %v7223_v10  ;;  %2663 = vmatprep.subr.bf16.mxu0 %v7228_v57  ;;  %v7235_v56 = vld [vmem:[%s11516_s1 + $0x348] ss:$16 sps:$4 sm:$0xff]   ;;  %v7240_v10 = vld [vmem:[%s11516_s1 + $0x12c] ss:$16 sps:$4 sm:$0xff]  }
 0x104   : > { %2856 = vmatprep.subr.bf16.mxu1 %v7231_v38  ;;  %2346 = vmatmul.mubr.bf16.gmra.mxu0 %v8694_v29  ;;  %v7243_v57 = vld [vmem:[%s11516_s1 + $0x32c] ss:$16 sps:$4 sm:$0xff]   ;;  %v8737_v38 = vpack.c.bf16 %v393_v41, %v386_v58  ;;  %11688 = vst [vmem:[#allocation55_spill] sm:$0xff] %v8739_v12  ;;  %v414_v29 = vld [vmem:[%s7944_s22 + $0x410] sm:$0xff] }
 0x105   : > { %6547 = vmatmul.mubr.msk.bf16.gmra.mxu1 %vm1818_vm0, %v8696_v47  ;;  %2355 = vmatprep.mubr.bf16.mxu0 %v8704_v28  ;;  %v7249_v41 = vld [vmem:[%s11516_s1 + $0x30c] ss:$16 sps:$4 sm:$0xff]   ;;  %v422_v47 = vld [vmem:[%s7944_s22 + $0x450] sm:$0xff] }
 0x106   : > { %2548 = vmatprep.mubr.bf16.mxu1 %v11667_v9  ;;  %2664 = vmatpush2.bf16.msra.mxu0 %v7226_v14  ;;  %11687 = vst [vmem:[#allocation54_spill] sm:$0xff] %v8737_v38  ;;  %v7238_v14 = vld [vmem:[%s11516_s1 + $0x128] ss:$16 sps:$4 sm:$0xff]  }
 0x107   : > { %2857 = vmatpush2.bf16.msra.mxu1 %v7229_v15  ;;  %2665 = vmatprep.subr.bf16.mxu0 %v7234_v42  ;;  %v7241_v15 = vld [vmem:[%s11516_s1 + $0x328] ss:$16 sps:$4 sm:$0xff]   ;;  %v8747_v42 = vpack.c.bf16 %v408_v55, %v401_v13  ;;  %v816_v55 = vld [vmem:[%s11517_s2] sm:$0xf] }
 0x108   : > { %2858 = vmatprep.subr.bf16.mxu1 %v7237_v0  ;;  %v7246_v0 = vld [vmem:[%s11516_s1 + $0x10c] ss:$16 sps:$4 sm:$0xff]  }
 0x109   : > { %11689 = vst [vmem:[#allocation56_spill] sm:$0xff] %v8747_v42  ;;  %v407_v58 = vld [vmem:[%s7944_s22 + $0x3d8] sm:$0xff]  ;;  %v409_v28 = vld [vmem:[%s7944_s22 + $0x3e8] sm:$0xff] }
 0x10a   : > { %2666 = vmatpush2.bf16.msra.mxu0 %v7232_v59  ;;  %v415_v13 = vld [vmem:[%s7944_s22 + $0x418] sm:$0xff] }
 0x10b   : > { %2859 = vmatpush2.bf16.msra.mxu1 %v7235_v56  ;;  %2667 = vmatprep.subr.bf16.mxu0 %v7240_v10  ;;  %v7244_v59 = vld [vmem:[%s11516_s1 + $0x108] ss:$16 sps:$4 sm:$0xff]   ;;  %v7252_v10 = vld [vmem:[%s11516_s1 + $0x4ec] ss:$16 sps:$4 sm:$0xff]  }
 0x10c   : > { %2860 = vmatprep.subr.bf16.mxu1 %v7243_v57  ;;  %2356 = vmatmul.mubr.bf16.gmra.mxu0 %v8737_v38  ;;  %v7247_v56 = vld [vmem:[%s11516_s1 + $0x308] ss:$16 sps:$4 sm:$0xff]   ;;  %v7255_v57 = vld [vmem:[%s11516_s1 + $0x60c] ss:$16 sps:$4 sm:$0xff]   ;;  %v11692_v38 = vsub.s32 0, %v8686_v11 }
 0x10d   : > { %6548 = vmatmul.mubr.msk.bf16.gmra.mxu1 %vm1818_vm0, %v8739_v12  ;;  %2365 = vmatprep.mubr.bf16.mxu0 %v8747_v42  ;;  %v8781_v12 = vpack.c.bf16 %v407_v58, %v400_v39  ;;  %v8783_v42 = vpack.c.bf16 %v409_v28, %v402_v40  ;;  %v416_v39 = vld [vmem:[%s7944_s22 + $0x420] sm:$0xff]  ;;  %v423_v58 = vld [vmem:[%s7944_s22 + $0x458] sm:$0xff] }
 0x10e   : > { %2558 = vmatprep.mubr.bf16.mxu1 %v11667_v9  ;;  %2668 = vmatpush2.bf16.msra.mxu0 %v7238_v14  ;;  %v8787_v14 = vrot.slane %v816_v55, %v11692_v38  ;;  %v436_v38 = vld [vmem:[%s7944_s22 + $0x4c0] sm:$0xff] }
 0x10f   : > { %2861 = vmatpush2.bf16.msra.mxu1 %v7241_v15  ;;  %2669 = vmatprep.subr.bf16.mxu0 %v7246_v0  ;;  %11690 = vst [vmem:[#allocation57_spill] sm:$0xff] %v8781_v12  ;;  %11691 = vst [vmem:[#allocation58_spill] sm:$0xff] %v8783_v42  ;;  %v8789_v15 = vpack.c.bf16 %v422_v47, %v415_v13  ;;  %v11694_v0 = vsub.s32 1, %v8686_v11  ;;  %v429_v47 = vld [vmem:[%s7944_s22 + $0x488] sm:$0xff] }
 0x110   : > { %2862 = vmatprep.subr.bf16.mxu1 %v7249_v41 }
 0x111   : > { %11693 = vst [vmem:[#allocation59_spill] sm:$0xff] %v8789_v15  ;;  %v8793_v41 = vrot.slane %v816_v55, %v11694_v0 }
 0x112   : > { %2670 = vmatpush2.bf16.msra.mxu0 %v7244_v59 }
 0x113   : > { %2863 = vmatpush2.bf16.msra.mxu1 %v7247_v56  ;;  %3025 = vmatprep.subr.bf16.mxu0 %v7252_v10 }
 0x114   : > { %3232 = vmatprep.subr.bf16.mxu1 %v7255_v57  ;;  %v1901_v28 = vpop.f32.mrf.mxu0  ;;  %2366 = vmatmul.mubr.bf16.gmra.mxu0 %v8781_v12  ;;  %v8810_v12 = vpack.c.bf16 %v421_v48, %v414_v29 }
 0x115   : > { %v2094_v40 = vpop.f32.mrf.mxu1  ;;  %6549 = vmatmul.mubr.msk.bf16.gmra.mxu1 %vm1818_vm0, %v8783_v42  ;;  %v1902_v13 = vadd.f32 %v1901_v28, %v8787_v14  ;;  %2375 = vmatprep.mubr.bf16.mxu0 %v8789_v15  ;;  %v8812_v42 = vpack.c.bf16 %v423_v58, %v416_v39  ;;  %v8817_v15 = vpack.c.bf16 %v436_v38, %v429_v47  ;;  %v428_v39 = vld [vmem:[%s7944_s22 + $0x480] sm:$0xff]  ;;  %v435_v38 = vld [vmem:[%s7944_s22 + $0x4b8] sm:$0xff] }
 0x116   : > { %2568 = vmatprep.mubr.bf16.mxu1 %v11667_v9  ;;  %v1903_v55 = vpop.f32.mrf.mxu0  ;;  %11695 = vst [vmem:[#allocation60_spill] sm:$0xff] %v8810_v12  ;;  %v8839_v22 = vpack.c.bf16 %v435_v38, %v428_v39 }
 0x117   : > { %v2096_v59 = vpop.f32.mrf.mxu1  ;;  %v8807_v56 = vadd.f32 %v2094_v40, %v1902_v13  ;;  %v1904_v10 = vadd.f32 %v1903_v55, %v8793_v41  ;;  %11696 = vst [vmem:[#allocation61_spill] sm:$0xff] %v8812_v42  ;;  %11697 = vst [vmem:[#allocation62_spill] sm:$0xff] %v8817_v15 }
 0x118   : > { %v1905_v57 = vpop.f32.mrf.mxu0  ;;  %11700 = vst [vmem:[#allocation65_spill] sm:$0xff] %v8839_v22 }
 0x119   : > { %v2098_v0 = vpop.f32.mrf.mxu1  ;;  %v8814_v11 = vadd.f32 %v2096_v59, %v1904_v10  ;;  %v1906_v28 = vadd.f32 %v1905_v57, %v8787_v14  ;;  %v430_v59 = vld [vmem:[%s7944_s22 + $0x490] sm:$0xff]  ;;  %v437_v10 = vld [vmem:[%s7944_s22 + $0x4c8] sm:$0xff] }
 0x11a   : > { %v1907_v40 = vpop.f32.mrf.mxu0 }
 0x11b   : > { %v2100_v13 = vpop.f32.mrf.mxu1  ;;  %v8819_v27 = vadd.f32 %v2098_v0, %v1906_v28  ;;  %v1908_v55 = vadd.f32 %v1907_v40, %v8793_v41  ;;  %v443_v28 = vld [vmem:[%s7944_s22 + $0x4f8] sm:$0xff]  ;;  %v450_v40 = vld [vmem:[%s7944_s22 + $0x530] sm:$0xff] }
 0x11c   : > { %v1911_v48 = vpop.f32.mrf.mxu0  ;;  %2376 = vmatmul.mubr.bf16.gmra.mxu0 %v8810_v12  ;;  %v8846_v18 = vpack.c.bf16 %v450_v40, %v443_v28  ;;  %v451_v28 = vld [vmem:[%s7944_s22 + $0x538] sm:$0xff] }
 0x11d   : > { %v2104_v29 = vpop.f32.mrf.mxu1  ;;  %6550 = vmatmul.mubr.msk.bf16.gmra.mxu1 %vm1818_vm0, %v8812_v42  ;;  %v8826_v58 = vadd.f32 %v2100_v13, %v1908_v55  ;;  %v1912_v47 = vadd.f32 %v1911_v48, %v8787_v14  ;;  %2385 = vmatprep.mubr.bf16.mxu0 %v8817_v15  ;;  %v8841_v48 = vpack.c.bf16 %v437_v10, %v430_v59 }
 0x11e   : > { %2578 = vmatprep.mubr.bf16.mxu1 %v11667_v9  ;;  %v1913_v57 = vpop.f32.mrf.mxu0  ;;  %11703 = vst [vmem:[#allocation68_spill] sm:$0xff] %v8846_v18 }
 0x11f   : > { %11698 = vst [vmem:[#allocation63_spill] sm:$0xff] %v8826_v58  ;;  %v2106_v0 = vpop.f32.mrf.mxu1  ;;  %v8836_v12 = vadd.f32 %v2104_v29, %v1912_v47  ;;  %v1914_v42 = vadd.f32 %v1913_v57, %v8793_v41  ;;  %11701 = vst [vmem:[#allocation66_spill] sm:$0xff] %v8841_v48 }
 0x120   : > { %v1915_v13 = vpop.f32.mrf.mxu0 }
 0x121   : > { %11699 = vst [vmem:[#allocation64_spill] sm:$0xff] %v8836_v12  ;;  %v2108_v55 = vpop.f32.mrf.mxu1  ;;  %v8843_v15 = vadd.f32 %v2106_v0, %v1914_v42  ;;  %v1916_v19 = vadd.f32 %v1915_v13, %v8787_v14  ;;  %v442_v42 = vld [vmem:[%s7944_s22 + $0x4f0] sm:$0xff]  ;;  %v444_v0 = vld [vmem:[%s7944_s22 + $0x500] sm:$0xff] }
 0x122   : > { %v1917_v29 = vpop.f32.mrf.mxu0 }
 0x123   : > { %11702 = vst [vmem:[#allocation67_spill] sm:$0xff] %v8843_v15  ;;  %v2110_v47 = vpop.f32.mrf.mxu1  ;;  %v8848_v12 = vadd.f32 %v2108_v55, %v1916_v19  ;;  %v1918_v57 = vadd.f32 %v1917_v29, %v8793_v41  ;;  %v449_v19 = vld [vmem:[%s7944_s22 + $0x528] sm:$0xff]  ;;  %v464_v29 = vld [vmem:[%s7944_s22 + $0x5a0] sm:$0xff] }
 0x124   : > { %v1921_v39 = vpop.f32.mrf.mxu0  ;;  %2386 = vmatmul.mubr.bf16.gmra.mxu0 %v8839_v22  ;;  %v457_v55 = vld [vmem:[%s7944_s22 + $0x568] sm:$0xff] }
 0x125   : > { %11704 = vst [vmem:[#allocation69_spill] sm:$0xff] %v8848_v12  ;;  %v2114_v38 = vpop.f32.mrf.mxu1  ;;  %6551 = vmatmul.mubr.msk.bf16.gmra.mxu1 %vm1818_vm0, %v8841_v48  ;;  %v8855_v59 = vadd.f32 %v2110_v47, %v1918_v57  ;;  %v1922_v10 = vadd.f32 %v1921_v39, %v8787_v14  ;;  %2395 = vmatprep.mubr.bf16.mxu0 %v8846_v18 }
 0x126   : > { %2588 = vmatprep.mubr.bf16.mxu1 %v11667_v9  ;;  %v1923_v40 = vpop.f32.mrf.mxu0  ;;  %v8870_v39 = vpack.c.bf16 %v451_v28, %v444_v0  ;;  %v8875_v15 = vpack.c.bf16 %v464_v29, %v457_v55  ;;  %v465_v55 = vld [vmem:[%s7944_s22 + $0x5a8] sm:$0xff] }
 0x127   : > { %11705 = vst [vmem:[#allocation70_spill] sm:$0xff] %v8855_v59  ;;  %v2116_v13 = vpop.f32.mrf.mxu1  ;;  %v8865_v22 = vadd.f32 %v2114_v38, %v1922_v10  ;;  %v1924_v48 = vadd.f32 %v1923_v40, %v8793_v41  ;;  %v8868_v59 = vpack.c.bf16 %v449_v19, %v442_v42 }
 0x128   : > { %v1925_v47 = vpop.f32.mrf.mxu0  ;;  %11708 = vst [vmem:[#allocation73_spill] sm:$0xff] %v8870_v39  ;;  %11710 = vst [vmem:[#allocation75_spill] sm:$0xff] %v8875_v15 }
 0x129   : > { %11706 = vst [vmem:[#allocation71_spill] sm:$0xff] %v8865_v22  ;;  %v2118_v57 = vpop.f32.mrf.mxu1  ;;  %11707 = vst [vmem:[#allocation72_spill] sm:$0xff] %v8868_v59  ;;  %v8872_v18 = vadd.f32 %v2116_v13, %v1924_v48  ;;  %v1926_v12 = vadd.f32 %v1925_v47, %v8787_v14  ;;  %v456_v48 = vld [vmem:[%s7944_s22 + $0x560] sm:$0xff]  ;;  %v458_v13 = vld [vmem:[%s7944_s22 + $0x570] sm:$0xff] }
 0x12a   : > { %v1927_v38 = vpop.f32.mrf.mxu0 }
 0x12b   : > { %11709 = vst [vmem:[#allocation74_spill] sm:$0xff] %v8872_v18  ;;  %v2120_v10 = vpop.f32.mrf.mxu1  ;;  %v8877_v22 = vadd.f32 %v2118_v57, %v1926_v12  ;;  %v1928_v40 = vadd.f32 %v1927_v38, %v8793_v41  ;;  %v463_v12 = vld [vmem:[%s7944_s22 + $0x598] sm:$0xff]  ;;  %v478_v38 = vld [vmem:[%s7944_s22 + $0x610] sm:$0xff] }
 0x12c   : > { %v1931_v42 = vpop.f32.mrf.mxu0  ;;  %2396 = vmatmul.mubr.bf16.gmra.mxu0 %v8868_v59  ;;  %v471_v57 = vld [vmem:[%s7944_s22 + $0x5d8] sm:$0xff] }
 0x12d   : > { %11711 = vst [vmem:[#allocation76_spill] sm:$0xff] %v8877_v22  ;;  %v2124_v19 = vpop.f32.mrf.mxu1  ;;  %6552 = vmatmul.mubr.msk.bf16.gmra.mxu1 %vm1818_vm0, %v8870_v39  ;;  %v8884_v0 = vadd.f32 %v2120_v10, %v1928_v40  ;;  %v1932_v28 = vadd.f32 %v1931_v42, %v8787_v14  ;;  %2405 = vmatprep.mubr.bf16.mxu0 %v8875_v15 }
 0x12e   : > { %2598 = vmatprep.mubr.bf16.mxu1 %v11667_v9  ;;  %v1933_v29 = vpop.f32.mrf.mxu0  ;;  %v8899_v42 = vpack.c.bf16 %v465_v55, %v458_v13  ;;  %v8904_v18 = vpack.c.bf16 %v478_v38, %v471_v57  ;;  %v479_v57 = vld [vmem:[%s7944_s22 + $0x618] sm:$0xff] }
 0x12f   : > { %11712 = vst [vmem:[#allocation77_spill] sm:$0xff] %v8884_v0  ;;  %v2126_v47 = vpop.f32.mrf.mxu1  ;;  %v8894_v59 = vadd.f32 %v2124_v19, %v1932_v28  ;;  %v1934_v39 = vadd.f32 %v1933_v29, %v8793_v41  ;;  %v8897_v0 = vpack.c.bf16 %v463_v12, %v456_v48 }
 0x130   : > { %v1935_v10 = vpop.f32.mrf.mxu0  ;;  %11715 = vst [vmem:[#allocation80_spill] sm:$0xff] %v8899_v42  ;;  %11717 = vst [vmem:[#allocation82_spill] sm:$0xff] %v8904_v18 }
 0x131   : > { %11713 = vst [vmem:[#allocation78_spill] sm:$0xff] %v8894_v59  ;;  %v2128_v40 = vpop.f32.mrf.mxu1  ;;  %11714 = vst [vmem:[#allocation79_spill] sm:$0xff] %v8897_v0  ;;  %v8901_v15 = vadd.f32 %v2126_v47, %v1934_v39  ;;  %v1936_v22 = vadd.f32 %v1935_v10, %v8787_v14  ;;  %v470_v39 = vld [vmem:[%s7944_s22 + $0x5d0] sm:$0xff]  ;;  %v472_v47 = vld [vmem:[%s7944_s22 + $0x5e0] sm:$0xff] }
 0x132   : > { %v1937_v19 = vpop.f32.mrf.mxu0 }
 0x133   : > { %11716 = vst [vmem:[#allocation81_spill] sm:$0xff] %v8901_v15  ;;  %v2130_v28 = vpop.f32.mrf.mxu1  ;;  %v8906_v59 = vadd.f32 %v2128_v40, %v1936_v22  ;;  %v1938_v29 = vadd.f32 %v1937_v19, %v8793_v41  ;;  %v477_v22 = vld [vmem:[%s7944_s22 + $0x608] sm:$0xff]  ;;  %v492_v19 = vld [vmem:[%s7944_s22 + $0x680] sm:$0xff] }
 0x134   : > { %v1941_v48 = vpop.f32.mrf.mxu0  ;;  %2406 = vmatmul.mubr.bf16.gmra.mxu0 %v8897_v0  ;;  %v485_v40 = vld [vmem:[%s7944_s22 + $0x648] sm:$0xff] }
 0x135   : > { %11718 = vst [vmem:[#allocation83_spill] sm:$0xff] %v8906_v59  ;;  %v2134_v12 = vpop.f32.mrf.mxu1  ;;  %6553 = vmatmul.mubr.msk.bf16.gmra.mxu1 %vm1818_vm0, %v8899_v42  ;;  %v8913_v13 = vadd.f32 %v2130_v28, %v1938_v29  ;;  %v1942_v55 = vadd.f32 %v1941_v48, %v8787_v14  ;;  %2415 = vmatprep.mubr.bf16.mxu0 %v8904_v18 }
 0x136   : > { %2608 = vmatprep.mubr.bf16.mxu1 %v11667_v9  ;;  %v1943_v38 = vpop.f32.mrf.mxu0  ;;  %v8928_v48 = vpack.c.bf16 %v479_v57, %v472_v47  ;;  %v8933_v15 = vpack.c.bf16 %v492_v19, %v485_v40  ;;  %v493_v40 = vld [vmem:[%s7944_s22 + $0x688] sm:$0xff] }
 0x137   : > { %11719 = vst [vmem:[#allocation84_spill] sm:$0xff] %v8913_v13  ;;  %v2136_v10 = vpop.f32.mrf.mxu1  ;;  %v8923_v0 = vadd.f32 %v2134_v12, %v1942_v55  ;;  %v1944_v42 = vadd.f32 %v1943_v38, %v8793_v41  ;;  %v8926_v13 = vpack.c.bf16 %v477_v22, %v470_v39 }
 0x138   : > { %v1945_v28 = vpop.f32.mrf.mxu0  ;;  %11722 = vst [vmem:[#allocation87_spill] sm:$0xff] %v8928_v48  ;;  %11724 = vst [vmem:[#allocation89_spill] sm:$0xff] %v8933_v15 }
 0x139   : > { %11720 = vst [vmem:[#allocation85_spill] sm:$0xff] %v8923_v0  ;;  %v2138_v29 = vpop.f32.mrf.mxu1  ;;  %11721 = vst [vmem:[#allocation86_spill] sm:$0xff] %v8926_v13  ;;  %v8930_v18 = vadd.f32 %v2136_v10, %v1944_v42  ;;  %v1946_v59 = vadd.f32 %v1945_v28, %v8787_v14  ;;  %v484_v42 = vld [vmem:[%s7944_s22 + $0x640] sm:$0xff]  ;;  %v486_v10 = vld [vmem:[%s7944_s22 + $0x650] sm:$0xff] }
 0x13a   : > { %v1947_v12 = vpop.f32.mrf.mxu0 }
 0x13b   : > { %11723 = vst [vmem:[#allocation88_spill] sm:$0xff] %v8930_v18  ;;  %v2140_v55 = vpop.f32.mrf.mxu1  ;;  %v8935_v0 = vadd.f32 %v2138_v29, %v1946_v59  ;;  %v1948_v38 = vadd.f32 %v1947_v12, %v8793_v41  ;;  %v491_v59 = vld [vmem:[%s7944_s22 + $0x678] sm:$0xff]  ;;  %v506_v12 = vld [vmem:[%s7944_s22 + $0x6f0] sm:$0xff] }
 0x13c   : > { %v1951_v39 = vpop.f32.mrf.mxu0  ;;  %2416 = vmatmul.mubr.bf16.gmra.mxu0 %v8926_v13  ;;  %v499_v29 = vld [vmem:[%s7944_s22 + $0x6b8] sm:$0xff] }
 0x13d   : > { %11725 = vst [vmem:[#allocation90_spill] sm:$0xff] %v8935_v0  ;;  %v2144_v22 = vpop.f32.mrf.mxu1  ;;  %6554 = vmatmul.mubr.msk.bf16.gmra.mxu1 %vm1818_vm0, %v8928_v48  ;;  %v8942_v47 = vadd.f32 %v2140_v55, %v1948_v38  ;;  %v1952_v57 = vadd.f32 %v1951_v39, %v8787_v14  ;;  %2425 = vmatprep.mubr.bf16.mxu0 %v8933_v15 }
 0x13e   : > { %2618 = vmatprep.mubr.bf16.mxu1 %v11667_v9  ;;  %v1953_v19 = vpop.f32.mrf.mxu0  ;;  %v8957_v39 = vpack.c.bf16 %v493_v40, %v486_v10  ;;  %v8962_v18 = vpack.c.bf16 %v506_v12, %v499_v29  ;;  %v500_v40 = vld [vmem:[%s7944_s22 + $0x6c0] sm:$0xff] }
 0x13f   : > { %11726 = vst [vmem:[#allocation91_spill] sm:$0xff] %v8942_v47  ;;  %v2146_v28 = vpop.f32.mrf.mxu1  ;;  %v8952_v13 = vadd.f32 %v2144_v22, %v1952_v57  ;;  %v1954_v48 = vadd.f32 %v1953_v19, %v8793_v41  ;;  %v8955_v47 = vpack.c.bf16 %v491_v59, %v484_v42 }
 0x140   : > { %v1955_v55 = vpop.f32.mrf.mxu0  ;;  %11729 = vst [vmem:[#allocation94_spill] sm:$0xff] %v8957_v39  ;;  %11730 = vst [vmem:[#allocation95_spill] sm:$0xff] %v8962_v18 }
 0x141   : > { %11727 = vst [vmem:[#allocation92_spill] sm:$0xff] %v8952_v13  ;;  %v2148_v38 = vpop.f32.mrf.mxu1  ;;  %11728 = vst [vmem:[#allocation93_spill] sm:$0xff] %v8955_v47  ;;  %v8959_v15 = vadd.f32 %v2146_v28, %v1954_v48  ;;  %v1956_v0 = vadd.f32 %v1955_v55, %v8787_v14  ;;  %v498_v48 = vld [vmem:[%s7944_s22 + $0x6b0] sm:$0xff]  ;;  %v507_v28 = vld [vmem:[%s7944_s22 + $0x6f8] sm:$0xff] }
 0x142   : > { %v1957_v22 = vpop.f32.mrf.mxu0 }
 0x143   : > { %v2150_v57 = vpop.f32.mrf.mxu1  ;;  %v8964_v13 = vadd.f32 %v2148_v38, %v1956_v0  ;;  %v1958_v19 = vadd.f32 %v1957_v22, %v8793_v41  ;;  %v505_v0 = vld [vmem:[%s7944_s22 + $0x6e8] sm:$0xff]  ;;  %s11399_s22 = scalar_lea.vmem [#allocation2], %s6342_s17 }
 0x144   : > { %v1961_v58 = vpop.f32.mrf.mxu0  ;;  %2426 = vmatmul.mubr.bf16.gmra.mxu0 %v8955_v47  ;;  %v8982_v47 = vpack.c.bf16 %v505_v0, %v498_v48  ;;  %s6276_s15 = sshll.u32 %s11399_s22, 4  ;;  %s11469_s15 = int_to_ptr.vmem [resolvable:$true] %s6276_s15 }
 0x145   : > { %11731 = vst [vmem:[#allocation96_spill] sm:$0xff] %v8964_v13  ;;  %v2154_v42 = vpop.f32.mrf.mxu1  ;;  %6555 = vmatmul.mubr.msk.bf16.gmra.mxu1 %vm1818_vm0, %v8957_v39  ;;  %v8971_v59 = vadd.f32 %v2150_v57, %v1958_v19  ;;  %v1962_v10 = vadd.f32 %v1961_v58, %v8787_v14  ;;  %2435 = vmatprep.mubr.bf16.mxu0 %v8962_v18  ;;  %s7654_s28 = scalar_lea.vmem %s11469_s15, 4096  ;;  %p7661_p0 = scmp.lt.s32.totalorder %s11469_s15, %s7659_s9 }
 0x146   : > { %2628 = vmatprep.mubr.bf16.mxu1 %v11667_v9  ;;  %v1963_v29 = vpop.f32.mrf.mxu0  ;;  %11733 = vst [vmem:[#allocation98_spill] sm:$0xff] %v8982_v47  ;;  %v8984_v57 = vpack.c.bf16 %v507_v28, %v500_v40  ;;  %p7655_p11 = scmp.ne.s32.totalorder %s11469_s15, %s7654_s28  ;;  %p7662_p1 = scmp.lt.s32.totalorder %s7660_s13, %s7654_s28 }
 0x147   : > { %11732 = vst [vmem:[#allocation97_spill] sm:$0xff] %v8971_v59  ;;  %v2156_v12 = vpop.f32.mrf.mxu1  ;;  %v8979_v55 = vadd.f32 %v2154_v42, %v1962_v10  ;;  %v1964_v38 = vadd.f32 %v1963_v29, %v8793_v41 }
 0x148   : > { %v1965_v22 = vpop.f32.mrf.mxu0  ;;  %11734 = vst [vmem:[#allocation99_spill] sm:$0xff] %v8984_v57  ;;  %p7656_p12 = pnand %p7655_p11, %p7798_p5  ;;  %p7663_p2 = por %p7662_p1, %p7661_p0 }
 0x149   : > { %v2158_v39 = vpop.f32.mrf.mxu1  ;;  %v8986_v58 = vadd.f32 %v2156_v12, %v1964_v38  ;;  %v1966_v19 = vadd.f32 %v1965_v22, %v8787_v14 }
 0x14a   : > { %v1967_v18 = vpop.f32.mrf.mxu0  ;;  %p7657_p13 = pneg %p7656_p12 }
 0x14b   : > { %v2160_v9 = vpop.f32.mrf.mxu1  ;;  %v8989_v59 = vadd.f32 %v2158_v39, %v1966_v19  ;;  %v1968_v13 = vadd.f32 %v1967_v18, %v8793_v41 }
 0x14c   : > { %v1971_v42 = vpop.f32.mrf.mxu0  ;;  %2436 = vmatmul.mubr.bf16.gmra.mxu0 %v8982_v47  ;;  %v11742_v47 = vld [vmem:[#allocation7_spill] sm:$0xff]  ;;  %p7664_p3 = pnand %p7663_p2, %p7657_p13 }
 0x14d   : > { %v2164_v10 = vpop.f32.mrf.mxu1  ;;  %6556 = vmatmul.mubr.msk.bf16.gmra.mxu1 %vm1818_vm0, %v8984_v57  ;;  %v8995_v48 = vadd.f32 %v2160_v9, %v1968_v13  ;;  %v1972_v0 = vadd.f32 %v1971_v42, %v8787_v14  ;;  %2671 = vmatprep.mubr.bf16.mxu0 %v7965_v53  ;;  %v7250_v9 = vld [vmem:[%s11516_s1 + $0x4e8] ss:$16 sps:$4 sm:$0xff]  }
 0x14e   : > { %2864 = vmatprep.mubr.bf16.mxu1 %v7967_v54  ;;  %v1973_v40 = vpop.f32.mrf.mxu0  ;;  %v7253_v53 = vld [vmem:[%s11516_s1 + $0x608] ss:$16 sps:$4 sm:$0xff]  }
 0x14f   : > { %v2166_v39 = vpop.f32.mrf.mxu1  ;;  %v9000_v28 = vadd.f32 %v2164_v10, %v1972_v0  ;;  %v1974_v18 = vadd.f32 %v1973_v40, %v8793_v41  ;;  %v7258_v10 = vld [vmem:[%s11516_s1 + $0x4cc] ss:$16 sps:$4 sm:$0xff]  }
 0x150   : > { %v1975_v29 = vpop.f32.mrf.mxu0 }
 0x151   : > { %v2168_v12 = vpop.f32.mrf.mxu1  ;;  %v9003_v38 = vadd.f32 %v2166_v39, %v1974_v18  ;;  %v1976_v22 = vadd.f32 %v1975_v29, %v8787_v14  ;;  %v7256_v29 = vld [vmem:[%s11516_s1 + $0x4c8] ss:$16 sps:$4 sm:$0xff]  }
 0x152   : > { %v1977_v54 = vpop.f32.mrf.mxu0 }
 0x153   : > { %v2170_v13 = vpop.f32.mrf.mxu1  ;;  %v9012_v19 = vadd.f32 %v2168_v12, %v1976_v22  ;;  %v1978_v42 = vadd.f32 %v1977_v54, %v8793_v41 }
 0x154   : > { %v1981_v0 = vpop.f32.mrf.mxu0  ;;  %2672 = vmatmul.mubr.bf16.vlgmr.msra.gmra.mxu0 %v8030_v16  ;;  %v7261_v16 = vld [vmem:[%s11516_s1 + $0x4ac] ss:$16 sps:$4 sm:$0xff]  }
 0x155   : > { %v2174_v40 = vpop.f32.mrf.mxu1  ;;  %2865 = vmatmul.mubr.bf16.vlgmr.msra.gmra.mxu1 %v8032_v17  ;;  %v9020_v39 = vadd.f32 %v2170_v13, %v1978_v42  ;;  %v1982_v18 = vadd.f32 %v1981_v0, %v8787_v14  ;;  %3026 = vmatpush1.bf16.msra.mxu0 %v7250_v9 }
 0x156   : > { %3233 = vmatpush1.bf16.msra.mxu1 %v7253_v53  ;;  %v1983_v12 = vpop.f32.mrf.mxu0  ;;  %2681 = vmatprep.mubr.bf16.mxu0 %v8040_v20 }
 0x157   : > { %v2176_v22 = vpop.f32.mrf.mxu1  ;;  %2874 = vmatprep.mubr.bf16.mxu1 %v8042_v21  ;;  %v9031_v17 = vadd.f32 %v2174_v40, %v1982_v18  ;;  %v1984_v54 = vadd.f32 %v1983_v12, %v8793_v41  ;;  %3027 = vmatprep.subr.bf16.mxu0 %v7258_v10  ;;  %v7259_v21 = vld [vmem:[%s11516_s1 + $0x4a8] ss:$16 sps:$4 sm:$0xff]   ;;  %v7264_v10 = vld [vmem:[%s11516_s1 + $0x48c] ss:$16 sps:$4 sm:$0xff]  }
 0x158   : > { %v1985_v9 = vpop.f32.mrf.mxu0 }
 0x159   : > { %v2178_v53 = vpop.f32.mrf.mxu1  ;;  %v9034_v13 = vadd.f32 %v2176_v22, %v1984_v54  ;;  %v1986_v42 = vadd.f32 %v1985_v9, %v8787_v14  ;;  %3028 = vmatpush1.bf16.msra.mxu0 %v7256_v29  ;;  %v7262_v9 = vld [vmem:[%s11516_s1 + $0x488] ss:$16 sps:$4 sm:$0xff]  }
 0x15a   : > { %v1987_v0 = vpop.f32.mrf.mxu0  ;;  %3029 = vmatprep.subr.bf16.mxu0 %v7261_v16 }
 0x15b   : > { %v2180_v20 = vpop.f32.mrf.mxu1  ;;  %v9040_v57 = vadd.f32 %v2178_v53, %v1986_v42  ;;  %v1988_v40 = vadd.f32 %v1987_v0, %v8793_v41 }
 0x15c   : > { %v1991_v18 = vpop.f32.mrf.mxu0  ;;  %2682 = vmatmul.mubr.bf16.gmra.mxu0 %v8065_v33 }
 0x15d   : > { %v2184_v12 = vpop.f32.mrf.mxu1  ;;  %2875 = vmatmul.mubr.bf16.gmra.mxu1 %v8067_v34  ;;  %v9048_v29 = vadd.f32 %v2180_v20, %v1988_v40  ;;  %v1992_v22 = vadd.f32 %v1991_v18, %v8787_v14  ;;  %2691 = vmatprep.mubr.bf16.mxu0 %v8069_v35  ;;  %v7267_v34 = vld [vmem:[%s11516_s1 + $0x46c] ss:$16 sps:$4 sm:$0xff]   ;;  %v7265_v40 = vld [vmem:[%s11516_s1 + $0x468] ss:$16 sps:$4 sm:$0xff]  }
 0x15e   : > { %2884 = vmatprep.mubr.bf16.mxu1 %v8071_v36  ;;  %v1993_v16 = vpop.f32.mrf.mxu0  ;;  %3030 = vmatpush1.bf16.msra.mxu0 %v7259_v21 }
 0x15f   : > { %v2186_v54 = vpop.f32.mrf.mxu1  ;;  %v9056_v53 = vadd.f32 %v2184_v12, %v1992_v22  ;;  %v1994_v33 = vadd.f32 %v1993_v16, %v8793_v41  ;;  %3031 = vmatprep.subr.bf16.mxu0 %v7264_v10  ;;  %v7270_v12 = vld [vmem:[%s11516_s1 + $0x44c] ss:$16 sps:$4 sm:$0xff]  }
 0x160   : > { %v1995_v42 = vpop.f32.mrf.mxu0 }
 0x161   : > { %v2188_v35 = vpop.f32.mrf.mxu1  ;;  %v9062_v0 = vadd.f32 %v2186_v54, %v1994_v33  ;;  %v1996_v36 = vadd.f32 %v1995_v42, %v8787_v14  ;;  %v7268_v42 = vld [vmem:[%s11516_s1 + $0x448] ss:$16 sps:$4 sm:$0xff]  }
 0x162   : > { %v1997_v20 = vpop.f32.mrf.mxu0  ;;  %3032 = vmatpush1.bf16.msra.mxu0 %v7262_v9 }
 0x163   : > { %v2190_v21 = vpop.f32.mrf.mxu1  ;;  %v9068_v18 = vadd.f32 %v2188_v35, %v1996_v36  ;;  %v1998_v10 = vadd.f32 %v1997_v20, %v8793_v41  ;;  %3033 = vmatprep.subr.bf16.mxu0 %v7267_v34 }
 0x164   : > { %v2001_v22 = vpop.f32.mrf.mxu0  ;;  %2692 = vmatmul.mubr.bf16.gmra.mxu0 %v8097_v49 }
 0x165   : > { %v2194_v16 = vpop.f32.mrf.mxu1  ;;  %2885 = vmatmul.mubr.bf16.gmra.mxu1 %v8099_v50  ;;  %v9076_v54 = vadd.f32 %v2190_v21, %v1998_v10  ;;  %v2002_v9 = vadd.f32 %v2001_v22, %v8787_v14  ;;  %2701 = vmatprep.mubr.bf16.mxu0 %v8101_v51  ;;  %v7273_v50 = vld [vmem:[%s11516_s1 + $0x42c] ss:$16 sps:$4 sm:$0xff]   ;;  %v7271_v10 = vld [vmem:[%s11516_s1 + $0x428] ss:$16 sps:$4 sm:$0xff]  }
 0x166   : > { %2894 = vmatprep.mubr.bf16.mxu1 %v8103_v52  ;;  %v2003_v33 = vpop.f32.mrf.mxu0  ;;  %3034 = vmatpush1.bf16.msra.mxu0 %v7265_v40 }
 0x167   : > { %v2196_v34 = vpop.f32.mrf.mxu1  ;;  %v9084_v35 = vadd.f32 %v2194_v16, %v2002_v9  ;;  %v2004_v49 = vadd.f32 %v2003_v33, %v8793_v41  ;;  %3035 = vmatprep.subr.bf16.mxu0 %v7270_v12  ;;  %v7276_v16 = vld [vmem:[%s11516_s1 + $0x40c] ss:$16 sps:$4 sm:$0xff]  }
 0x168   : > { %v2005_v36 = vpop.f32.mrf.mxu0 }
 0x169   : > { %v2198_v51 = vpop.f32.mrf.mxu1  ;;  %v9090_v20 = vadd.f32 %v2196_v34, %v2004_v49  ;;  %v2006_v52 = vadd.f32 %v2005_v36, %v8787_v14  ;;  %v7274_v36 = vld [vmem:[%s11516_s1 + $0x408] ss:$16 sps:$4 sm:$0xff]  }
 0x16a   : > { %v2007_v21 = vpop.f32.mrf.mxu0  ;;  %3036 = vmatpush1.bf16.msra.mxu0 %v7268_v42 }
 0x16b   : > { %v2200_v40 = vpop.f32.mrf.mxu1  ;;  %v9096_v22 = vadd.f32 %v2198_v51, %v2006_v52  ;;  %v2008_v12 = vadd.f32 %v2007_v21, %v8793_v41  ;;  %3037 = vmatprep.subr.bf16.mxu0 %v7273_v50 }
 0x16c   : > { %v2011_v9 = vpop.f32.mrf.mxu0  ;;  %2702 = vmatmul.mubr.bf16.gmra.mxu0 %v8129_v3 }
 0x16d   : > { %v2204_v33 = vpop.f32.mrf.mxu1  ;;  %2895 = vmatmul.mubr.bf16.gmra.mxu1 %v8131_v4  ;;  %v9104_v34 = vadd.f32 %v2200_v40, %v2008_v12  ;;  %v2012_v42 = vadd.f32 %v2011_v9, %v8787_v14  ;;  %2711 = vmatprep.mubr.bf16.mxu0 %v8133_v5  ;;  %v7279_v4 = vld [vmem:[%s11516_s1 + $0x5ec] ss:$16 sps:$4 sm:$0xff]   ;;  %v7277_v12 = vld [vmem:[%s11516_s1 + $0x5e8] ss:$16 sps:$4 sm:$0xff]  }
 0x16e   : > { %2904 = vmatprep.mubr.bf16.mxu1 %v8135_v6  ;;  %v2013_v49 = vpop.f32.mrf.mxu0  ;;  %3038 = vmatpush1.bf16.msra.mxu0 %v7271_v10 }
 0x16f   : > { %v2206_v50 = vpop.f32.mrf.mxu1  ;;  %v9112_v51 = vadd.f32 %v2204_v33, %v2012_v42  ;;  %v2014_v3 = vadd.f32 %v2013_v49, %v8793_v41  ;;  %3039 = vmatprep.subr.bf16.mxu0 %v7276_v16  ;;  %v7282_v33 = vld [vmem:[%s11516_s1 + $0x5cc] ss:$16 sps:$4 sm:$0xff]  }
 0x170   : > { %v2015_v52 = vpop.f32.mrf.mxu0 }
 0x171   : > { %v2208_v5 = vpop.f32.mrf.mxu1  ;;  %v9118_v21 = vadd.f32 %v2206_v50, %v2014_v3  ;;  %v2016_v6 = vadd.f32 %v2015_v52, %v8787_v14  ;;  %v7280_v52 = vld [vmem:[%s11516_s1 + $0x5c8] ss:$16 sps:$4 sm:$0xff]  }
 0x172   : > { %v2017_v40 = vpop.f32.mrf.mxu0  ;;  %3040 = vmatpush1.bf16.msra.mxu0 %v7274_v36 }
 0x173   : > { %v2210_v10 = vpop.f32.mrf.mxu1  ;;  %v9124_v9 = vadd.f32 %v2208_v5, %v2016_v6  ;;  %v2018_v16 = vadd.f32 %v2017_v40, %v8793_v41  ;;  %3041 = vmatprep.subr.bf16.mxu0 %v7279_v4 }
 0x174   : > { %v2021_v42 = vpop.f32.mrf.mxu0  ;;  %2712 = vmatmul.mubr.bf16.gmra.mxu0 %v8161_v23 }
 0x175   : > { %v2214_v49 = vpop.f32.mrf.mxu1  ;;  %2905 = vmatmul.mubr.bf16.gmra.mxu1 %v8163_v24  ;;  %v9132_v50 = vadd.f32 %v2210_v10, %v2018_v16  ;;  %v2022_v36 = vadd.f32 %v2021_v42, %v8787_v14  ;;  %2721 = vmatprep.mubr.bf16.mxu0 %v8165_v25  ;;  %v7285_v24 = vld [vmem:[%s11516_s1 + $0x5ac] ss:$16 sps:$4 sm:$0xff]   ;;  %v7283_v16 = vld [vmem:[%s11516_s1 + $0x5a8] ss:$16 sps:$4 sm:$0xff]  }
 0x176   : > { %2914 = vmatprep.mubr.bf16.mxu1 %v8167_v26  ;;  %v2023_v3 = vpop.f32.mrf.mxu0  ;;  %3042 = vmatpush2.bf16.msra.mxu0 %v7277_v12 }
 0x177   : > { %v2216_v4 = vpop.f32.mrf.mxu1  ;;  %v9140_v5 = vadd.f32 %v2214_v49, %v2022_v36  ;;  %v2024_v23 = vadd.f32 %v2023_v3, %v8793_v41  ;;  %3043 = vmatprep.subr.bf16.mxu0 %v7282_v33  ;;  %v7288_v49 = vld [vmem:[%s11516_s1 + $0x58c] ss:$16 sps:$4 sm:$0xff]  }
 0x178   : > { %v2025_v6 = vpop.f32.mrf.mxu0 }
 0x179   : > { %v2218_v25 = vpop.f32.mrf.mxu1  ;;  %v9146_v40 = vadd.f32 %v2216_v4, %v2024_v23  ;;  %v2026_v26 = vadd.f32 %v2025_v6, %v8787_v14  ;;  %v7286_v6 = vld [vmem:[%s11516_s1 + $0x588] ss:$16 sps:$4 sm:$0xff]  }
 0x17a   : > { %v2027_v10 = vpop.f32.mrf.mxu0  ;;  %3044 = vmatpush2.bf16.msra.mxu0 %v7280_v52 }
 0x17b   : > { %v2220_v12 = vpop.f32.mrf.mxu1  ;;  %v9152_v42 = vadd.f32 %v2218_v25, %v2026_v26  ;;  %v2028_v33 = vadd.f32 %v2027_v10, %v8793_v41  ;;  %3045 = vmatprep.subr.bf16.mxu0 %v7285_v24 }
 0x17c   : > { %v2031_v36 = vpop.f32.mrf.mxu0  ;;  %2722 = vmatmul.mubr.bf16.gmra.mxu0 %v8193_v43 }
 0x17d   : > { %v2224_v3 = vpop.f32.mrf.mxu1  ;;  %2915 = vmatmul.mubr.bf16.gmra.mxu1 %v8195_v44  ;;  %v9160_v4 = vadd.f32 %v2220_v12, %v2028_v33  ;;  %v2032_v52 = vadd.f32 %v2031_v36, %v8787_v14  ;;  %2731 = vmatprep.mubr.bf16.mxu0 %v8197_v45  ;;  %v7291_v44 = vld [vmem:[%s11516_s1 + $0x56c] ss:$16 sps:$4 sm:$0xff]   ;;  %v7289_v33 = vld [vmem:[%s11516_s1 + $0x568] ss:$16 sps:$4 sm:$0xff]  }
 0x17e   : > { %2924 = vmatprep.mubr.bf16.mxu1 %v8199_v46  ;;  %v2033_v23 = vpop.f32.mrf.mxu0  ;;  %3046 = vmatpush2.bf16.msra.mxu0 %v7283_v16 }
 0x17f   : > { %v2226_v24 = vpop.f32.mrf.mxu1  ;;  %v9168_v25 = vadd.f32 %v2224_v3, %v2032_v52  ;;  %v2034_v43 = vadd.f32 %v2033_v23, %v8793_v41  ;;  %3047 = vmatprep.subr.bf16.mxu0 %v7288_v49  ;;  %v7294_v3 = vld [vmem:[%s11516_s1 + $0x54c] ss:$16 sps:$4 sm:$0xff]  }
 0x180   : > { %v2035_v26 = vpop.f32.mrf.mxu0 }
 0x181   : > { %v2228_v45 = vpop.f32.mrf.mxu1  ;;  %v9174_v10 = vadd.f32 %v2226_v24, %v2034_v43  ;;  %v2036_v46 = vadd.f32 %v2035_v26, %v8787_v14  ;;  %v7292_v26 = vld [vmem:[%s11516_s1 + $0x548] ss:$16 sps:$4 sm:$0xff]  }
 0x182   : > { %v2037_v12 = vpop.f32.mrf.mxu0  ;;  %3048 = vmatpush2.bf16.msra.mxu0 %v7286_v6 }
 0x183   : > { %v2230_v16 = vpop.f32.mrf.mxu1  ;;  %v9180_v36 = vadd.f32 %v2228_v45, %v2036_v46  ;;  %v2038_v49 = vadd.f32 %v2037_v12, %v8793_v41  ;;  %3049 = vmatprep.subr.bf16.mxu0 %v7291_v44 }
 0x184   : > { %v2041_v52 = vpop.f32.mrf.mxu0  ;;  %2732 = vmatmul.mubr.bf16.gmra.mxu0 %v8225_v1 }
 0x185   : > { %v2234_v23 = vpop.f32.mrf.mxu1  ;;  %2925 = vmatmul.mubr.bf16.gmra.mxu1 %v8227_v2  ;;  %v9188_v24 = vadd.f32 %v2230_v16, %v2038_v49  ;;  %v2042_v6 = vadd.f32 %v2041_v52, %v8787_v14  ;;  %2741 = vmatprep.mubr.bf16.mxu0 %v8229_v7  ;;  %v7297_v2 = vld [vmem:[%s11516_s1 + $0x52c] ss:$16 sps:$4 sm:$0xff]   ;;  %v7295_v49 = vld [vmem:[%s11516_s1 + $0x528] ss:$16 sps:$4 sm:$0xff]  }
 0x186   : > { %2934 = vmatprep.mubr.bf16.mxu1 %v8231_v8  ;;  %v2043_v43 = vpop.f32.mrf.mxu0  ;;  %3050 = vmatpush2.bf16.msra.mxu0 %v7289_v33 }
 0x187   : > { %v2236_v44 = vpop.f32.mrf.mxu1  ;;  %v9196_v45 = vadd.f32 %v2234_v23, %v2042_v6  ;;  %v2044_v1 = vadd.f32 %v2043_v43, %v8793_v41  ;;  %3051 = vmatprep.subr.bf16.mxu0 %v7294_v3  ;;  %v7300_v23 = vld [vmem:[%s11516_s1 + $0x50c] ss:$16 sps:$4 sm:$0xff]  }
 0x188   : > { %v2045_v46 = vpop.f32.mrf.mxu0 }
 0x189   : > { %v2238_v7 = vpop.f32.mrf.mxu1  ;;  %v9202_v12 = vadd.f32 %v2236_v44, %v2044_v1  ;;  %v2046_v8 = vadd.f32 %v2045_v46, %v8787_v14  ;;  %v7298_v46 = vld [vmem:[%s11516_s1 + $0x508] ss:$16 sps:$4 sm:$0xff]  }
 0x18a   : > { %v2047_v16 = vpop.f32.mrf.mxu0  ;;  %3052 = vmatpush2.bf16.msra.mxu0 %v7292_v26 }
 0x18b   : > { %v2240_v33 = vpop.f32.mrf.mxu1  ;;  %v9208_v52 = vadd.f32 %v2238_v7, %v2046_v8  ;;  %v2048_v3 = vadd.f32 %v2047_v16, %v8793_v41  ;;  %3053 = vmatprep.subr.bf16.mxu0 %v7297_v2 }
 0x18c   : > { %v2051_v6 = vpop.f32.mrf.mxu0  ;;  %2742 = vmatmul.mubr.bf16.gmra.mxu0 %v8260_v30 }
 0x18d   : > { %v2244_v43 = vpop.f32.mrf.mxu1  ;;  %2935 = vmatmul.mubr.bf16.gmra.mxu1 %v8262_v31  ;;  %v9216_v44 = vadd.f32 %v2240_v33, %v2048_v3  ;;  %v2052_v26 = vadd.f32 %v2051_v6, %v8787_v14  ;;  %2751 = vmatprep.mubr.bf16.mxu0 %v8264_v32 }
 0x18e   : > { %2944 = vmatprep.mubr.bf16.mxu1 %v8266_v37  ;;  %v2053_v1 = vpop.f32.mrf.mxu0  ;;  %3054 = vmatpush2.bf16.msra.mxu0 %v7295_v49  ;;  %v7303_v49 = vld [vmem:[%s11518_s3 + $0xe4] ss:$16 sps:$4 sm:$0xff]  }
 0x18f   : > { %v2246_v2 = vpop.f32.mrf.mxu1  ;;  %v9224_v7 = vadd.f32 %v2244_v43, %v2052_v26  ;;  %v2054_v30 = vadd.f32 %v2053_v1, %v8793_v41  ;;  %3055 = vmatprep.subr.bf16.mxu0 %v7300_v23 }
 0x190   : > { %v2055_v31 = vpop.f32.mrf.mxu0 }
 0x191   : > { %v2248_v8 = vpop.f32.mrf.mxu1  ;;  %v9227_v16 = vadd.f32 %v2246_v2, %v2054_v30  ;;  %v2056_v32 = vadd.f32 %v2055_v31, %v8787_v14 }
 0x192   : > { %v2057_v33 = vpop.f32.mrf.mxu0  ;;  %3056 = vmatpush2.bf16.msra.mxu0 %v7298_v46 }
 0x193   : > { %11735 = vst [vmem:[#allocation100_spill] sm:$0xff] %v9227_v16  ;;  %v2250_v37 = vpop.f32.mrf.mxu1  ;;  %v9233_v3 = vadd.f32 %v2248_v8, %v2056_v32  ;;  %v2058_v6 = vadd.f32 %v2057_v33, %v8793_v41  ;;  %4393 = vmatprep.subr.bf16.mxu0 %v7303_v49 }
 0x194   : > { %v2287_v43 = vpop.f32.mrf.mxu0  ;;  %2752 = vmatmul.mubr.bf16.gmra.mxu0 %v8292_v60 }
 0x195   : > { %11736 = vst [vmem:[#allocation101_spill] sm:$0xff] %v9233_v3  ;;  %v2480_v26 = vpop.f32.mrf.mxu1  ;;  %2945 = vmatmul.mubr.bf16.gmra.mxu1 %v8294_v61  ;;  %v9238_v23 = vadd.f32 %v2250_v37, %v2058_v6  ;;  %v2288_v14 = vadd.f32 %v2287_v43, %v8807_v56  ;;  %2761 = vmatprep.mubr.bf16.mxu0 %v8296_v62  ;;  %v11738_v37 = vld [vmem:[#allocation63_spill] sm:$0xff]  ;;  %v11739_v43 = vld [vmem:[#allocation5_spill] sm:$0xff] }
 0x196   : > { %2954 = vmatprep.mubr.bf16.mxu1 %v8298_v63  ;;  %v2289_v1 = vpop.f32.mrf.mxu0  ;;  %v11740_v63 = vld [vmem:[#allocation6_spill] sm:$0xff] }
 0x197   : > { %11737 = vst [vmem:[#allocation102_spill] sm:$0xff] %v9238_v23  ;;  %v2482_v2 = vpop.f32.mrf.mxu1  ;;  %v2481_v46 = vadd.f32 %v2480_v26, %v2288_v14  ;;  %v2290_v41 = vadd.f32 %v2289_v1, %v8814_v11  ;;  %v11741_v11 = vld [vmem:[#allocation64_spill] sm:$0xff] }
 0x198   : > { %v2291_v30 = vpop.f32.mrf.mxu0 }
 0x199   : > { %v2484_v31 = vpop.f32.mrf.mxu1  ;;  %v2483_v8 = vadd.f32 %v2482_v2, %v2290_v41  ;;  %v2292_v60 = vadd.f32 %v2291_v30, %v8819_v27  ;;  %v3411_v49 = vmax.f32 %v2481_v46, 0.0  ;;  %v11743_v2 = vld [vmem:[#allocation8_spill] sm:$0xff] }
 0x19a   : > { %v2293_v61 = vpop.f32.mrf.mxu0 }
 0x19b   : > { %v2486_v32 = vpop.f32.mrf.mxu1  ;;  %v2485_v33 = vadd.f32 %v2484_v31, %v2292_v60  ;;  %v2294_v56 = vadd.f32 %v2293_v61, %v11738_v37  ;;  %v3412_v27 = vmax.f32 %v2483_v8, 0.0  ;;  %v11745_v37 = vld [vmem:[#allocation67_spill] sm:$0xff] }
 0x19c   : > { %v2297_v6 = vpop.f32.mrf.mxu0  ;;  %2762 = vmatmul.mubr.bf16.gmra.mxu0 %v11739_v43 }
 0x19d   : > { %v2490_v62 = vpop.f32.mrf.mxu1  ;;  %2955 = vmatmul.mubr.bf16.gmra.mxu1 %v11740_v63  ;;  %v3415_v26 = vmax.f32 %v2485_v33, 0.0  ;;  %v2487_v14 = vadd.f32 %v2486_v32, %v2294_v56  ;;  %v2298_v1 = vadd.f32 %v2297_v6, %v11741_v11  ;;  %2771 = vmatprep.mubr.bf16.mxu0 %v11742_v47  ;;  %v11746_v33 = vld [vmem:[#allocation69_spill] sm:$0xff] }
 0x19e   : > { %2964 = vmatprep.mubr.bf16.mxu1 %v11743_v2  ;;  %v2299_v41 = vpop.f32.mrf.mxu0  ;;  %v11748_v2 = vld [vmem:[#allocation70_spill] sm:$0xff] }
 0x19f   : > { %v2492_v30 = vpop.f32.mrf.mxu1  ;;  %v9251_v31 = vpack.c.bf16 %v3415_v26, %v3411_v49  ;;  %v3416_v60 = vmax.f32 %v2487_v14, 0.0  ;;  %v2491_v61 = vadd.f32 %v2490_v62, %v2298_v1  ;;  %v2300_v43 = vadd.f32 %v2299_v41, %v11745_v37  ;;  %v11749_v49 = vld [vmem:[#allocation9_spill] sm:$0xff]  ;;  %v11750_v26 = vld [vmem:[#allocation10_spill] sm:$0xff]  ;;  %v11751_v41 = vld [vmem:[#allocation71_spill] sm:$0xff] }
 0x1a0   : > { %v2301_v23 = vpop.f32.mrf.mxu0  ;;  %v11752_v37 = vld [vmem:[#allocation11_spill] sm:$0xff] }
 0x1a1   : > { %11744 = vst [vmem:[#allocation63_spill] sm:$0xff] %v9251_v31  ;;  %v2494_v63 = vpop.f32.mrf.mxu1  ;;  %v2493_v46 = vadd.f32 %v2492_v30, %v2300_v43  ;;  %v2302_v32 = vadd.f32 %v2301_v23, %v11746_v33  ;;  %v9255_v56 = vpack.c.bf16 %v3416_v60, %v3412_v27  ;;  %v3419_v62 = vmax.f32 %v2491_v61, 0.0  ;;  %v11753_v23 = vld [vmem:[#allocation12_spill] sm:$0xff]  ;;  %v7318_v61 = vld [vmem:[%s11518_s3 + $0x2e4] ss:$16 sps:$4 sm:$0xff]  }
 0x1a2   : > { %v2303_v6 = vpop.f32.mrf.mxu0  ;;  %4586 = vmatprep.subr.bf16.mxu1 %v7318_v61 }
 0x1a3   : > { %11747 = vst [vmem:[#allocation5_spill] sm:$0xff] %v9255_v56  ;;  %v2496_v47 = vpop.f32.mrf.mxu1  ;;  %v2495_v11 = vadd.f32 %v2494_v63, %v2302_v32  ;;  %v2304_v8 = vadd.f32 %v2303_v6, %v11748_v2  ;;  %v3420_v27 = vmax.f32 %v2493_v46, 0.0  ;;  %v11755_v6 = vld [vmem:[#allocation74_spill] sm:$0xff] }
 0x1a4   : > { %v2307_v3 = vpop.f32.mrf.mxu0  ;;  %2772 = vmatmul.mubr.bf16.gmra.mxu0 %v11749_v49 }
 0x1a5   : > { %v2500_v16 = vpop.f32.mrf.mxu1  ;;  %2965 = vmatmul.mubr.bf16.gmra.mxu1 %v11750_v26  ;;  %v3423_v14 = vmax.f32 %v2495_v11, 0.0  ;;  %v2497_v1 = vadd.f32 %v2496_v47, %v2304_v8  ;;  %v2308_v30 = vadd.f32 %v2307_v3, %v11751_v41  ;;  %2781 = vmatprep.mubr.bf16.mxu0 %v11752_v37  ;;  %v11756_v8 = vld [vmem:[#allocation76_spill] sm:$0xff]  ;;  %v11759_v37 = vld [vmem:[#allocation13_spill] sm:$0xff] }
 0x1a6   : > { %2974 = vmatprep.mubr.bf16.mxu1 %v11753_v23  ;;  %v2309_v60 = vpop.f32.mrf.mxu0  ;;  %v11760_v23 = vld [vmem:[#allocation14_spill] sm:$0xff] }
 0x1a7   : > { %v2502_v43 = vpop.f32.mrf.mxu1  ;;  %v9263_v63 = vpack.c.bf16 %v3423_v14, %v3419_v62  ;;  %v3424_v33 = vmax.f32 %v2497_v1, 0.0  ;;  %v2501_v32 = vadd.f32 %v2500_v16, %v2308_v30  ;;  %v2310_v2 = vadd.f32 %v2309_v60, %v11755_v6  ;;  %v11758_v14 = vld [vmem:[#allocation77_spill] sm:$0xff] }
 0x1a8   : > { %v2311_v47 = vpop.f32.mrf.mxu0 }
 0x1a9   : > { %11754 = vst [vmem:[#allocation6_spill] sm:$0xff] %v9263_v63  ;;  %v2504_v11 = vpop.f32.mrf.mxu1  ;;  %v2503_v3 = vadd.f32 %v2502_v43, %v2310_v2  ;;  %v2312_v49 = vadd.f32 %v2311_v47, %v11756_v8  ;;  %v9270_v26 = vpack.c.bf16 %v3424_v33, %v3420_v27  ;;  %v3427_v60 = vmax.f32 %v2501_v32, 0.0  ;;  %v11761_v43 = vld [vmem:[#allocation78_spill] sm:$0xff]  ;;  %v11762_v47 = vld [vmem:[#allocation15_spill] sm:$0xff]  ;;  %v11763_v27 = vld [vmem:[#allocation16_spill] sm:$0xff] }
 0x1aa   : > { %v2313_v46 = vpop.f32.mrf.mxu0 }
 0x1ab   : > { %11757 = vst [vmem:[#allocation64_spill] sm:$0xff] %v9270_v26  ;;  %v2506_v41 = vpop.f32.mrf.mxu1  ;;  %v2505_v62 = vadd.f32 %v2504_v11, %v2312_v49  ;;  %v2314_v1 = vadd.f32 %v2313_v46, %v11758_v14  ;;  %v3428_v33 = vmax.f32 %v2503_v3, 0.0  ;;  %v11765_v14 = vld [vmem:[#allocation81_spill] sm:$0xff] }
 0x1ac   : > { %v2317_v16 = vpop.f32.mrf.mxu0  ;;  %2782 = vmatmul.mubr.bf16.gmra.mxu0 %v11759_v37 }
 0x1ad   : > { %v2510_v30 = vpop.f32.mrf.mxu1  ;;  %2975 = vmatmul.mubr.bf16.gmra.mxu1 %v11760_v23  ;;  %v3431_v6 = vmax.f32 %v2505_v62, 0.0  ;;  %v2507_v63 = vadd.f32 %v2506_v41, %v2314_v1  ;;  %v2318_v2 = vadd.f32 %v2317_v16, %v11761_v43  ;;  %2791 = vmatprep.mubr.bf16.mxu0 %v11762_v47  ;;  %v11766_v62 = vld [vmem:[#allocation83_spill] sm:$0xff] }
 0x1ae   : > { %2984 = vmatprep.mubr.bf16.mxu1 %v11763_v27  ;;  %v2319_v61 = vpop.f32.mrf.mxu0  ;;  %v11768_v27 = vld [vmem:[#allocation84_spill] sm:$0xff] }
 0x1af   : > { %v2512_v11 = vpop.f32.mrf.mxu1  ;;  %v9278_v8 = vpack.c.bf16 %v3431_v6, %v3427_v60  ;;  %v3432_v49 = vmax.f32 %v2507_v63, 0.0  ;;  %v2511_v46 = vadd.f32 %v2510_v30, %v2318_v2  ;;  %v2320_v37 = vadd.f32 %v2319_v61, %v11765_v14  ;;  %v11769_v60 = vld [vmem:[#allocation17_spill] sm:$0xff]  ;;  %v11770_v63 = vld [vmem:[#allocation18_spill] sm:$0xff]  ;;  %v11772_v14 = vld [vmem:[#allocation19_spill] sm:$0xff] }
 0x1b0   : > { %v2321_v26 = vpop.f32.mrf.mxu0  ;;  %v11771_v61 = vld [vmem:[#allocation85_spill] sm:$0xff] }
 0x1b1   : > { %11764 = vst [vmem:[#allocation7_spill] sm:$0xff] %v9278_v8  ;;  %v2514_v23 = vpop.f32.mrf.mxu1  ;;  %v2513_v32 = vadd.f32 %v2512_v11, %v2320_v37  ;;  %v2322_v41 = vadd.f32 %v2321_v26, %v11766_v62  ;;  %v9282_v1 = vpack.c.bf16 %v3432_v49, %v3428_v33  ;;  %v3435_v30 = vmax.f32 %v2511_v46, 0.0  ;;  %v11773_v26 = vld [vmem:[#allocation20_spill] sm:$0xff] }
 0x1b2   : > { %v2323_v16 = vpop.f32.mrf.mxu0 }
 0x1b3   : > { %11767 = vst [vmem:[#allocation8_spill] sm:$0xff] %v9282_v1  ;;  %v2516_v43 = vpop.f32.mrf.mxu1  ;;  %v2515_v47 = vadd.f32 %v2514_v23, %v2322_v41  ;;  %v2324_v3 = vadd.f32 %v2323_v16, %v11768_v27  ;;  %v3436_v33 = vmax.f32 %v2513_v32, 0.0  ;;  %v11775_v16 = vld [vmem:[#allocation88_spill] sm:$0xff] }
 0x1b4   : > { %v2327_v31 = vpop.f32.mrf.mxu0  ;;  %2792 = vmatmul.mubr.bf16.gmra.mxu0 %v11769_v60 }
 0x1b5   : > { %v2520_v56 = vpop.f32.mrf.mxu1  ;;  %2985 = vmatmul.mubr.bf16.gmra.mxu1 %v11770_v63  ;;  %v3439_v6 = vmax.f32 %v2515_v47, 0.0  ;;  %v2517_v2 = vadd.f32 %v2516_v43, %v2324_v3  ;;  %v2328_v11 = vadd.f32 %v2327_v31, %v11771_v61  ;;  %2801 = vmatprep.mubr.bf16.mxu0 %v11772_v14  ;;  %v11776_v47 = vld [vmem:[#allocation90_spill] sm:$0xff] }
 0x1b6   : > { %2994 = vmatprep.mubr.bf16.mxu1 %v11773_v26  ;;  %v2329_v49 = vpop.f32.mrf.mxu0  ;;  %v11778_v26 = vld [vmem:[#allocation91_spill] sm:$0xff] }
 0x1b7   : > { %v2522_v37 = vpop.f32.mrf.mxu1  ;;  %v9290_v23 = vpack.c.bf16 %v3439_v6, %v3435_v30  ;;  %v3440_v62 = vmax.f32 %v2517_v2, 0.0  ;;  %v2521_v41 = vadd.f32 %v2520_v56, %v2328_v11  ;;  %v2330_v27 = vadd.f32 %v2329_v49, %v11775_v16  ;;  %v11779_v30 = vld [vmem:[#allocation21_spill] sm:$0xff]  ;;  %v11780_v6 = vld [vmem:[#allocation22_spill] sm:$0xff]  ;;  %v11781_v49 = vld [vmem:[#allocation92_spill] sm:$0xff] }
 0x1b8   : > { %v2331_v60 = vpop.f32.mrf.mxu0  ;;  %v11782_v16 = vld [vmem:[#allocation23_spill] sm:$0xff] }
 0x1b9   : > { %11774 = vst [vmem:[#allocation67_spill] sm:$0xff] %v9290_v23  ;;  %v2524_v63 = vpop.f32.mrf.mxu1  ;;  %v2523_v46 = vadd.f32 %v2522_v37, %v2330_v27  ;;  %v2332_v43 = vadd.f32 %v2331_v60, %v11776_v47  ;;  %v9294_v3 = vpack.c.bf16 %v3440_v62, %v3436_v33  ;;  %v3443_v56 = vmax.f32 %v2521_v41, 0.0  ;;  %v11783_v33 = vld [vmem:[#allocation24_spill] sm:$0xff] }
 0x1ba   : > { %v2333_v31 = vpop.f32.mrf.mxu0 }
 0x1bb   : > { %11777 = vst [vmem:[#allocation69_spill] sm:$0xff] %v9294_v3  ;;  %v2526_v61 = vpop.f32.mrf.mxu1  ;;  %v2525_v14 = vadd.f32 %v2524_v63, %v2332_v43  ;;  %v2334_v32 = vadd.f32 %v2333_v31, %v11778_v26  ;;  %v3444_v62 = vmax.f32 %v2523_v46, 0.0 }
 0x1bc   : > { %v2337_v8 = vpop.f32.mrf.mxu0  ;;  %2802 = vmatmul.mubr.bf16.gmra.mxu0 %v11779_v30 }
 0x1bd   : > { %v2530_v1 = vpop.f32.mrf.mxu1  ;;  %2995 = vmatmul.mubr.bf16.gmra.mxu1 %v11780_v6  ;;  %v3447_v2 = vmax.f32 %v2525_v14, 0.0  ;;  %v2527_v11 = vadd.f32 %v2526_v61, %v2334_v32  ;;  %v2338_v37 = vadd.f32 %v2337_v8, %v11781_v49  ;;  %2811 = vmatprep.mubr.bf16.mxu0 %v11782_v16  ;;  %v11785_v14 = vld [vmem:[#allocation96_spill] sm:$0xff]  ;;  %v11787_v16 = vld [vmem:[#allocation97_spill] sm:$0xff] }
 0x1be   : > { %3004 = vmatprep.mubr.bf16.mxu1 %v11783_v33  ;;  %v2339_v27 = vpop.f32.mrf.mxu0 }
 0x1bf   : > { %v2532_v60 = vpop.f32.mrf.mxu1  ;;  %v9302_v63 = vpack.c.bf16 %v3447_v2, %v3443_v56  ;;  %v3448_v47 = vmax.f32 %v2527_v11, 0.0  ;;  %v2531_v43 = vadd.f32 %v2530_v1, %v2338_v37  ;;  %v2340_v31 = vadd.f32 %v2339_v27, %v8959_v15  ;;  %v11788_v56 = vld [vmem:[#allocation25_spill] sm:$0xff]  ;;  %v11789_v2 = vld [vmem:[#allocation26_spill] sm:$0xff]  ;;  %v11790_v27 = vld [vmem:[#allocation27_spill] sm:$0xff] }
 0x1c0   : > { %v2341_v26 = vpop.f32.mrf.mxu0 }
 0x1c1   : > { %11784 = vst [vmem:[#allocation70_spill] sm:$0xff] %v9302_v63  ;;  %v2534_v30 = vpop.f32.mrf.mxu1  ;;  %v2533_v41 = vadd.f32 %v2532_v60, %v2340_v31  ;;  %v2342_v61 = vadd.f32 %v2341_v26, %v11785_v14  ;;  %v9306_v32 = vpack.c.bf16 %v3448_v47, %v3444_v62  ;;  %v3451_v1 = vmax.f32 %v2531_v43, 0.0  ;;  %v11791_v62 = vld [vmem:[#allocation28_spill] sm:$0xff] }
 0x1c2   : > { %v2343_v8 = vpop.f32.mrf.mxu0 }
 0x1c3   : > { %11786 = vst [vmem:[#allocation9_spill] sm:$0xff] %v9306_v32  ;;  %v2536_v6 = vpop.f32.mrf.mxu1  ;;  %v2535_v49 = vadd.f32 %v2534_v30, %v2342_v61  ;;  %v2344_v46 = vadd.f32 %v2343_v8, %v11787_v16  ;;  %v3452_v60 = vmax.f32 %v2533_v41, 0.0 }
 0x1c4   : > { %v2347_v33 = vpop.f32.mrf.mxu0  ;;  %2812 = vmatmul.mubr.bf16.gmra.mxu0 %v11788_v56 }
 0x1c5   : > { %v2540_v23 = vpop.f32.mrf.mxu1  ;;  %3005 = vmatmul.mubr.bf16.gmra.mxu1 %v11789_v2  ;;  %v3455_v15 = vmax.f32 %v2535_v49, 0.0  ;;  %v2537_v11 = vadd.f32 %v2536_v6, %v2344_v46  ;;  %v2348_v37 = vadd.f32 %v2347_v33, %v8979_v55  ;;  %2821 = vmatprep.mubr.bf16.mxu0 %v11790_v27  ;;  %v11796_v27 = vld [vmem:[#allocation31_spill] sm:$0xff] }
 0x1c6   : > { %3014 = vmatprep.mubr.bf16.mxu1 %v11791_v62  ;;  %v2349_v47 = vpop.f32.mrf.mxu0 }
 0x1c7   : > { %v2542_v31 = vpop.f32.mrf.mxu1  ;;  %v9314_v26 = vpack.c.bf16 %v3455_v15, %v3451_v1  ;;  %v3456_v30 = vmax.f32 %v2537_v11, 0.0  ;;  %v2541_v14 = vadd.f32 %v2540_v23, %v2348_v37  ;;  %v2350_v61 = vadd.f32 %v2349_v47, %v8986_v58  ;;  %v11794_v1 = vld [vmem:[#allocation29_spill] sm:$0xff]  ;;  %v11795_v15 = vld [vmem:[#allocation30_spill] sm:$0xff] }
 0x1c8   : > { %v2351_v8 = vpop.f32.mrf.mxu0 }
 0x1c9   : > { %11792 = vst [vmem:[#allocation10_spill] sm:$0xff] %v9314_v26  ;;  %v2544_v16 = vpop.f32.mrf.mxu1  ;;  %v2543_v43 = vadd.f32 %v2542_v31, %v2350_v61  ;;  %v2352_v6 = vadd.f32 %v2351_v8, %v8989_v59  ;;  %v9318_v49 = vpack.c.bf16 %v3456_v30, %v3452_v60  ;;  %v3459_v23 = vmax.f32 %v2541_v14, 0.0 }
 0x1ca   : > { %v2353_v55 = vpop.f32.mrf.mxu0  ;;  %v11797_v59 = vmov 0  }
 0x1cb   : > { %11793 = vst [vmem:[#allocation71_spill] sm:$0xff] %v9318_v49  ;;  %v2546_v46 = vpop.f32.mrf.mxu1  ;;  %v2545_v33 = vadd.f32 %v2544_v16, %v2352_v6  ;;  %v2354_v41 = vadd.f32 %v2353_v55, %v8995_v48  ;;  %v3460_v62 = vmax.f32 %v2543_v43, 0.0  ;;  %v7301_v43 = vld [vmem:[%s11518_s3 + $0xe0] ss:$16 sps:$4 sm:$0xff]  }
 0x1cc   : > { %v2357_v56 = vpop.f32.mrf.mxu0  ;;  %2822 = vmatmul.mubr.bf16.gmra.mxu0 %v11794_v1 }
 0x1cd   : > { %v2550_v2 = vpop.f32.mrf.mxu1  ;;  %3015 = vmatmul.mubr.bf16.gmra.mxu1 %v11795_v15  ;;  %v3463_v58 = vmax.f32 %v2545_v33, 0.0  ;;  %v2547_v11 = vadd.f32 %v2546_v46, %v2354_v41  ;;  %v2358_v37 = vadd.f32 %v2357_v56, %v9000_v28  ;;  %3057 = vmatprep.mubr.bf16.mxu0 %v11796_v27  ;;  %v7316_v33 = vld [vmem:[%s11518_s3 + $0x2e0] ss:$16 sps:$4 sm:$0xff]   ;;  %v7306_v56 = vld [vmem:[%s11518_s3 + $0xc4] ss:$16 sps:$4 sm:$0xff]   ;;  %v11800_v15 = vld [vmem:[#allocation32_spill] sm:$0xff] }
 0x1ce   : > { %3250 = vmatprep.mubr.bf16.mxu1 %v11797_v59  ;;  %v2359_v60 = vpop.f32.mrf.mxu0  ;;  %v11802_v27 = vld [vmem:[#allocation34_spill] sm:$0xff] }
 0x1cf   : > { %v2552_v47 = vpop.f32.mrf.mxu1  ;;  %v9326_v31 = vpack.c.bf16 %v3463_v58, %v3459_v23  ;;  %v3464_v48 = vmax.f32 %v2547_v11, 0.0  ;;  %v2551_v30 = vadd.f32 %v2550_v2, %v2358_v37  ;;  %v2360_v61 = vadd.f32 %v2359_v60, %v9003_v38  ;;  %v11801_v23 = vld [vmem:[#allocation33_spill] sm:$0xff] }
 0x1d0   : > { %v2361_v8 = vpop.f32.mrf.mxu0 }
 0x1d1   : > { %11798 = vst [vmem:[#allocation11_spill] sm:$0xff] %v9326_v31  ;;  %v2554_v16 = vpop.f32.mrf.mxu1  ;;  %v2553_v14 = vadd.f32 %v2552_v47, %v2360_v61  ;;  %v2362_v6 = vadd.f32 %v2361_v8, %v9012_v19  ;;  %v9330_v55 = vpack.c.bf16 %v3464_v48, %v3460_v62  ;;  %v7327_v19 = vld [vmem:[%s11518_s3 + $0x2c4] ss:$16 sps:$4 sm:$0xff]   ;;  %v3467_v58 = vmax.f32 %v2551_v30, 0.0  ;;  %v7304_v48 = vld [vmem:[%s11518_s3 + $0xc0] ss:$16 sps:$4 sm:$0xff]  }
 0x1d2   : > { %v2363_v28 = vpop.f32.mrf.mxu0  ;;  %v7325_v30 = vld [vmem:[%s11518_s3 + $0x2c0] ss:$16 sps:$4 sm:$0xff]  }
 0x1d3   : > { %11799 = vst [vmem:[#allocation12_spill] sm:$0xff] %v9330_v55  ;;  %v2556_v46 = vpop.f32.mrf.mxu1  ;;  %v2555_v41 = vadd.f32 %v2554_v16, %v2362_v6  ;;  %v2364_v38 = vadd.f32 %v2363_v28, %v9020_v39  ;;  %v3468_v62 = vmax.f32 %v2553_v14, 0.0  ;;  %v7309_v14 = vld [vmem:[%s11518_s3 + $0xa4] ss:$16 sps:$4 sm:$0xff]  }
 0x1d4   : > { %v2367_v2 = vpop.f32.mrf.mxu0  ;;  %3058 = vmatmul.mubr.bf16.vlgmr.msra.gmra.mxu0 %v11800_v15  ;;  %v7336_v6 = vld [vmem:[%s11518_s3 + $0x2a4] ss:$16 sps:$4 sm:$0xff]  }
 0x1d5   : > { %v2560_v1 = vpop.f32.mrf.mxu1  ;;  %6557 = vmatmul.mubr.msk.bf16.vlgmr.msra.gmra.mxu1 %vm1818_vm0, %v11801_v23  ;;  %v3471_v11 = vmax.f32 %v2555_v41, 0.0  ;;  %v2557_v37 = vadd.f32 %v2556_v46, %v2364_v38  ;;  %v2368_v39 = vadd.f32 %v2367_v2, %v9031_v17  ;;  %3067 = vmatprep.mubr.bf16.mxu0 %v11802_v27  ;;  %v7345_v15 = vld [vmem:[%s11518_s3 + $0x284] ss:$16 sps:$4 sm:$0xff]  }
 0x1d6   : > { %3260 = vmatprep.mubr.bf16.mxu1 %v11797_v59  ;;  %v2369_v60 = vpop.f32.mrf.mxu0  ;;  %4394 = vmatpush1.bf16.msra.mxu0 %v7301_v43 }
 0x1d7   : > { %v2562_v47 = vpop.f32.mrf.mxu1  ;;  %4587 = vmatpush1.bf16.msra.mxu1 %v7316_v33  ;;  %v9357_v61 = vpack.c.bf16 %v3471_v11, %v3467_v58  ;;  %v3472_v17 = vmax.f32 %v2557_v37, 0.0  ;;  %v2561_v8 = vadd.f32 %v2560_v1, %v2368_v39  ;;  %v2370_v16 = vadd.f32 %v2369_v60, %v9034_v13  ;;  %4395 = vmatprep.subr.bf16.mxu0 %v7306_v56  ;;  %v7307_v13 = vld [vmem:[%s11518_s3 + $0xa0] ss:$16 sps:$4 sm:$0xff]   ;;  %v11806_v37 = vld [vmem:[#allocation36_spill] sm:$0xff] }
 0x1d8   : > { %4588 = vmatprep.subr.bf16.mxu1 %v7327_v19  ;;  %v2371_v28 = vpop.f32.mrf.mxu0  ;;  %v7334_v56 = vld [vmem:[%s11518_s3 + $0x2a0] ss:$16 sps:$4 sm:$0xff]  }
 0x1d9   : > { %11803 = vst [vmem:[#allocation74_spill] sm:$0xff] %v9357_v61  ;;  %v2564_v46 = vpop.f32.mrf.mxu1  ;;  %v2563_v43 = vadd.f32 %v2562_v47, %v2370_v16  ;;  %v2372_v33 = vadd.f32 %v2371_v28, %v9040_v57  ;;  %v9367_v41 = vpack.c.bf16 %v3472_v17, %v3468_v62  ;;  %v7312_v57 = vld [vmem:[%s11518_s3 + $0x84] ss:$16 sps:$4 sm:$0xff]   ;;  %v3475_v39 = vmax.f32 %v2561_v8, 0.0  ;;  %v7310_v17 = vld [vmem:[%s11518_s3 + $0x80] ss:$16 sps:$4 sm:$0xff]  }
 0x1da   : > { %v2373_v38 = vpop.f32.mrf.mxu0  ;;  %4396 = vmatpush1.bf16.msra.mxu0 %v7304_v48  ;;  %v11805_v11 = vld [vmem:[#allocation35_spill] sm:$0xff]  ;;  %v11807_v60 = vld [vmem:[#allocation37_spill] sm:$0xff] }
 0x1db   : > { %11804 = vst [vmem:[#allocation76_spill] sm:$0xff] %v9367_v41  ;;  %v2566_v2 = vpop.f32.mrf.mxu1  ;;  %4589 = vmatpush1.bf16.msra.mxu1 %v7325_v30  ;;  %v2565_v19 = vadd.f32 %v2564_v46, %v2372_v33  ;;  %v2374_v1 = vadd.f32 %v2373_v38, %v9048_v29  ;;  %4397 = vmatprep.subr.bf16.mxu0 %v7309_v14  ;;  %v3476_v47 = vmax.f32 %v2563_v43, 0.0  ;;  %v7343_v8 = vld [vmem:[%s11518_s3 + $0x280] ss:$16 sps:$4 sm:$0xff]   ;;  %v7315_v28 = vld [vmem:[%s11518_s3 + $0x64] ss:$16 sps:$4 sm:$0xff]  }
 0x1dc   : > { %4590 = vmatprep.subr.bf16.mxu1 %v7336_v6  ;;  %v2377_v23 = vpop.f32.mrf.mxu0  ;;  %3068 = vmatmul.mubr.bf16.gmra.mxu0 %v11805_v11  ;;  %v7354_v46 = vld [vmem:[%s11518_s3 + $0x264] ss:$16 sps:$4 sm:$0xff]  }
 0x1dd   : > { %v2570_v58 = vpop.f32.mrf.mxu1  ;;  %6558 = vmatmul.mubr.msk.bf16.gmra.mxu1 %vm1818_vm0, %v11806_v37  ;;  %v3479_v27 = vmax.f32 %v2565_v19, 0.0  ;;  %v2567_v29 = vadd.f32 %v2566_v2, %v2374_v1  ;;  %v2378_v62 = vadd.f32 %v2377_v23, %v9056_v53  ;;  %3077 = vmatprep.mubr.bf16.mxu0 %v11807_v60  ;;  %v7352_v1 = vld [vmem:[%s11518_s3 + $0x260] ss:$16 sps:$4 sm:$0xff]   ;;  %v7363_v23 = vld [vmem:[%s11518_s3 + $0x244] ss:$16 sps:$4 sm:$0xff]   ;;  %v11810_v37 = vld [vmem:[#allocation38_spill] sm:$0xff] }
 0x1de   : > { %3270 = vmatprep.mubr.bf16.mxu1 %v11797_v59  ;;  %v2379_v48 = vpop.f32.mrf.mxu0  ;;  %4398 = vmatpush1.bf16.msra.mxu0 %v7307_v13  ;;  %v11812_v60 = vld [vmem:[#allocation40_spill] sm:$0xff] }
 0x1df   : > { %v2572_v30 = vpop.f32.mrf.mxu1  ;;  %4591 = vmatpush1.bf16.msra.mxu1 %v7334_v56  ;;  %v9394_v16 = vpack.c.bf16 %v3479_v27, %v3475_v39  ;;  %v3480_v53 = vmax.f32 %v2567_v29, 0.0  ;;  %v2571_v14 = vadd.f32 %v2570_v58, %v2378_v62  ;;  %v2380_v6 = vadd.f32 %v2379_v48, %v9062_v0  ;;  %4399 = vmatprep.subr.bf16.mxu0 %v7312_v57  ;;  %v7313_v0 = vld [vmem:[%s11518_s3 + $0x60] ss:$16 sps:$4 sm:$0xff]  }
 0x1e0   : > { %4592 = vmatprep.subr.bf16.mxu1 %v7345_v15  ;;  %v2381_v43 = vpop.f32.mrf.mxu0  ;;  %v11811_v39 = vld [vmem:[#allocation39_spill] sm:$0xff] }
 0x1e1   : > { %11808 = vst [vmem:[#allocation77_spill] sm:$0xff] %v9394_v16  ;;  %v2574_v33 = vpop.f32.mrf.mxu1  ;;  %v2573_v38 = vadd.f32 %v2572_v30, %v2380_v6  ;;  %v2382_v2 = vadd.f32 %v2381_v43, %v9068_v18  ;;  %v9404_v13 = vpack.c.bf16 %v3480_v53, %v3476_v47  ;;  %v7321_v18 = vld [vmem:[%s11518_s3 + $0x44] ss:$16 sps:$4 sm:$0xff]   ;;  %v3483_v27 = vmax.f32 %v2571_v14, 0.0 }
 0x1e2   : > { %v2383_v56 = vpop.f32.mrf.mxu0  ;;  %4400 = vmatpush1.bf16.msra.mxu0 %v7310_v17  ;;  %v7319_v17 = vld [vmem:[%s11518_s3 + $0x40] ss:$16 sps:$4 sm:$0xff]  }
 0x1e3   : > { %11809 = vst [vmem:[#allocation13_spill] sm:$0xff] %v9404_v13  ;;  %v2576_v19 = vpop.f32.mrf.mxu1  ;;  %4593 = vmatpush1.bf16.msra.mxu1 %v7343_v8  ;;  %v2575_v57 = vadd.f32 %v2574_v33, %v2382_v2  ;;  %v2384_v15 = vadd.f32 %v2383_v56, %v9076_v54  ;;  %4401 = vmatprep.subr.bf16.mxu0 %v7315_v28  ;;  %v3484_v47 = vmax.f32 %v2573_v38, 0.0  ;;  %v7361_v8 = vld [vmem:[%s11518_s3 + $0x240] ss:$16 sps:$4 sm:$0xff]   ;;  %v7324_v28 = vld [vmem:[%s11518_s3 + $0x24] ss:$16 sps:$4 sm:$0xff]  }
 0x1e4   : > { %4594 = vmatprep.subr.bf16.mxu1 %v7354_v46  ;;  %v2387_v58 = vpop.f32.mrf.mxu0  ;;  %3078 = vmatmul.mubr.bf16.gmra.mxu0 %v11810_v37  ;;  %v7369_v46 = vld [vmem:[%s11518_s3 + $0x224] ss:$16 sps:$4 sm:$0xff]   ;;  %v11815_v37 = vld [vmem:[#allocation42_spill] sm:$0xff] }
 0x1e5   : > { %v2580_v11 = vpop.f32.mrf.mxu1  ;;  %6559 = vmatmul.mubr.msk.bf16.gmra.mxu1 %vm1818_vm0, %v11811_v39  ;;  %v3487_v29 = vmax.f32 %v2575_v57, 0.0  ;;  %v2577_v54 = vadd.f32 %v2576_v19, %v2384_v15  ;;  %v2388_v62 = vadd.f32 %v2387_v58, %v9084_v35  ;;  %3087 = vmatprep.mubr.bf16.mxu0 %v11812_v60 }
 0x1e6   : > { %3280 = vmatprep.mubr.bf16.mxu1 %v11797_v59  ;;  %v2389_v48 = vpop.f32.mrf.mxu0  ;;  %4402 = vmatpush1.bf16.msra.mxu0 %v7313_v0 }
 0x1e7   : > { %v2582_v30 = vpop.f32.mrf.mxu1  ;;  %4595 = vmatpush1.bf16.msra.mxu1 %v7352_v1  ;;  %v9431_v53 = vpack.c.bf16 %v3487_v29, %v3483_v27  ;;  %v3488_v35 = vmax.f32 %v2577_v54, 0.0  ;;  %v2581_v14 = vadd.f32 %v2580_v11, %v2388_v62  ;;  %v2390_v6 = vadd.f32 %v2389_v48, %v9090_v20  ;;  %4403 = vmatprep.subr.bf16.mxu0 %v7321_v18  ;;  %v7322_v20 = vld [vmem:[%s11518_s3 + $0x20] ss:$16 sps:$4 sm:$0xff]   ;;  %v7372_v18 = vld [vmem:[%s11518_s3 + $0x204] ss:$16 sps:$4 sm:$0xff]  }
 0x1e8   : > { %4596 = vmatprep.subr.bf16.mxu1 %v7363_v23  ;;  %v2391_v43 = vpop.f32.mrf.mxu0  ;;  %v7367_v1 = vld [vmem:[%s11518_s3 + $0x220] ss:$16 sps:$4 sm:$0xff]  }
 0x1e9   : > { %v2584_v33 = vpop.f32.mrf.mxu1  ;;  %v2583_v38 = vadd.f32 %v2582_v30, %v2390_v6  ;;  %v2392_v2 = vadd.f32 %v2391_v43, %v9096_v22  ;;  %v9441_v56 = vpack.c.bf16 %v3488_v35, %v3484_v47  ;;  %v7330_v22 = vld [vmem:[%s11518_s3 + $0x4] ss:$16 sps:$4 sm:$0xff]   ;;  %v3491_v39 = vmax.f32 %v2581_v14, 0.0  ;;  %v7328_v48 = vld [vmem:[%s11518_s3] ss:$16 sps:$4 sm:$0xff]  }
 0x1ea   : > { %v2393_v19 = vpop.f32.mrf.mxu0  ;;  %4404 = vmatpush1.bf16.msra.mxu0 %v7319_v17  ;;  %v11814_v11 = vld [vmem:[#allocation41_spill] sm:$0xff]  ;;  %v11816_v54 = vld [vmem:[#allocation43_spill] sm:$0xff] }
 0x1eb   : > { %11813 = vst [vmem:[#allocation14_spill] sm:$0xff] %v9441_v56  ;;  %v2586_v0 = vpop.f32.mrf.mxu1  ;;  %4597 = vmatpush1.bf16.msra.mxu1 %v7361_v8  ;;  %v2585_v57 = vadd.f32 %v2584_v33, %v2392_v2  ;;  %v2394_v15 = vadd.f32 %v2393_v19, %v9104_v34  ;;  %4405 = vmatprep.subr.bf16.mxu0 %v7324_v28  ;;  %v3492_v62 = vmax.f32 %v2583_v38, 0.0  ;;  %v7370_v30 = vld [vmem:[%s11518_s3 + $0x200] ss:$16 sps:$4 sm:$0xff]   ;;  %v7333_v14 = vld [vmem:[%s11518_s3 + $0x1e4] ss:$16 sps:$4 sm:$0xff]  }
 0x1ec   : > { %4598 = vmatprep.subr.bf16.mxu1 %v7369_v46  ;;  %v2397_v23 = vpop.f32.mrf.mxu0  ;;  %3088 = vmatmul.mubr.bf16.gmra.mxu0 %v11814_v11  ;;  %v7375_v6 = vld [vmem:[%s11518_s3 + $0x3e4] ss:$16 sps:$4 sm:$0xff]  }
 0x1ed   : > { %v2590_v58 = vpop.f32.mrf.mxu1  ;;  %6560 = vmatmul.mubr.msk.bf16.gmra.mxu1 %vm1818_vm0, %v11815_v37  ;;  %v3495_v27 = vmax.f32 %v2585_v57, 0.0  ;;  %v2587_v34 = vadd.f32 %v2586_v0, %v2394_v15  ;;  %v2398_v29 = vadd.f32 %v2397_v23, %v9112_v51  ;;  %3097 = vmatprep.mubr.bf16.mxu0 %v11816_v54  ;;  %v7373_v0 = vld [vmem:[%s11518_s3 + $0x3e0] ss:$16 sps:$4 sm:$0xff]   ;;  %v7378_v57 = vld [vmem:[%s11518_s3 + $0x3c4] ss:$16 sps:$4 sm:$0xff]  }
 0x1ee   : > { %3290 = vmatprep.mubr.bf16.mxu1 %v11797_v59  ;;  %v2399_v60 = vpop.f32.mrf.mxu0  ;;  %4406 = vmatpush1.bf16.msra.mxu0 %v7322_v20  ;;  %v11818_v23 = vld [vmem:[#allocation45_spill] sm:$0xff] }
 0x1ef   : > { %v2592_v47 = vpop.f32.mrf.mxu1  ;;  %4599 = vmatpush1.bf16.msra.mxu1 %v7367_v1  ;;  %v9468_v17 = vpack.c.bf16 %v3495_v27, %v3491_v39  ;;  %v3496_v51 = vmax.f32 %v2587_v34, 0.0  ;;  %v2591_v8 = vadd.f32 %v2590_v58, %v2398_v29  ;;  %v2400_v35 = vadd.f32 %v2399_v60, %v9118_v21  ;;  %4407 = vmatprep.subr.bf16.mxu0 %v7330_v22  ;;  %v7331_v21 = vld [vmem:[%s11518_s3 + $0x1e0] ss:$16 sps:$4 sm:$0xff]   ;;  %v11819_v39 = vld [vmem:[#allocation46_spill] sm:$0xff] }
 0x1f0   : > { %4600 = vmatprep.subr.bf16.mxu1 %v7372_v18  ;;  %v2401_v28 = vpop.f32.mrf.mxu0  ;;  %v11817_v18 = vld [vmem:[#allocation44_spill] sm:$0xff]  ;;  %v7337_v54 = vld [vmem:[%s11518_s3 + $0x1c0] ss:$16 sps:$4 sm:$0xff]  }
 0x1f1   : > { %v2594_v46 = vpop.f32.mrf.mxu1  ;;  %v2593_v43 = vadd.f32 %v2592_v47, %v2400_v35  ;;  %v2402_v33 = vadd.f32 %v2401_v28, %v9124_v9  ;;  %v9478_v38 = vpack.c.bf16 %v3496_v51, %v3492_v62  ;;  %v7339_v9 = vld [vmem:[%s11518_s3 + $0x1c4] ss:$16 sps:$4 sm:$0xff]   ;;  %v3499_v58 = vmax.f32 %v2591_v8, 0.0  ;;  %v7376_v62 = vld [vmem:[%s11518_s3 + $0x3c0] ss:$16 sps:$4 sm:$0xff]  }
 0x1f2   : > { %v2403_v2 = vpop.f32.mrf.mxu0  ;;  %4408 = vmatpush1.bf16.msra.mxu0 %v7328_v48  ;;  %v7381_v51 = vld [vmem:[%s11518_s3 + $0x3a4] ss:$16 sps:$4 sm:$0xff]  }
 0x1f3   : > { %v2596_v19 = vpop.f32.mrf.mxu1  ;;  %4601 = vmatpush1.bf16.msra.mxu1 %v7370_v30  ;;  %v2595_v20 = vadd.f32 %v2594_v46, %v2402_v33  ;;  %v2404_v1 = vadd.f32 %v2403_v2, %v9132_v50  ;;  %4409 = vmatprep.subr.bf16.mxu0 %v7333_v14  ;;  %v3500_v27 = vmax.f32 %v2593_v43, 0.0  ;;  %v7342_v30 = vld [vmem:[%s11518_s3 + $0x1a4] ss:$16 sps:$4 sm:$0xff]   ;;  %v7379_v33 = vld [vmem:[%s11518_s3 + $0x3a0] ss:$16 sps:$4 sm:$0xff]  }
 0x1f4   : > { %4602 = vmatprep.subr.bf16.mxu1 %v7375_v6  ;;  %v2407_v15 = vpop.f32.mrf.mxu0  ;;  %3098 = vmatmul.mubr.bf16.gmra.mxu0 %v11817_v18  ;;  %v11822_v18 = vld [vmem:[#allocation49_spill] sm:$0xff] }
 0x1f5   : > { %v2600_v22 = vpop.f32.mrf.mxu1  ;;  %6561 = vmatmul.mubr.msk.bf16.gmra.mxu1 %vm1818_vm0, %v11818_v23  ;;  %v3503_v11 = vmax.f32 %v2595_v20, 0.0  ;;  %v2597_v50 = vadd.f32 %v2596_v19, %v2404_v1  ;;  %v2408_v37 = vadd.f32 %v2407_v15, %v9140_v5  ;;  %3107 = vmatprep.mubr.bf16.mxu0 %v11819_v39  ;;  %v11820_v20 = vld [vmem:[#allocation47_spill] sm:$0xff]  ;;  %v11821_v1 = vld [vmem:[#allocation48_spill] sm:$0xff] }
 0x1f6   : > { %3300 = vmatprep.mubr.bf16.mxu1 %v11797_v59  ;;  %v2409_v34 = vpop.f32.mrf.mxu0  ;;  %4410 = vmatpush2.bf16.msra.mxu0 %v7331_v21 }
 0x1f7   : > { %v2602_v29 = vpop.f32.mrf.mxu1  ;;  %4603 = vmatpush2.bf16.msra.mxu1 %v7373_v0  ;;  %v9505_v60 = vpack.c.bf16 %v3503_v11, %v3499_v58  ;;  %v3504_v5 = vmax.f32 %v2597_v50, 0.0  ;;  %v2601_v47 = vadd.f32 %v2600_v22, %v2408_v37  ;;  %v2410_v48 = vadd.f32 %v2409_v34, %v9146_v40  ;;  %4411 = vmatprep.subr.bf16.mxu0 %v7339_v9  ;;  %v7340_v40 = vld [vmem:[%s11518_s3 + $0x1a0] ss:$16 sps:$4 sm:$0xff]   ;;  %v7351_v50 = vld [vmem:[%s11518_s3 + $0x164] ss:$16 sps:$4 sm:$0xff]  }
 0x1f8   : > { %4604 = vmatprep.subr.bf16.mxu1 %v7378_v57  ;;  %v2411_v8 = vpop.f32.mrf.mxu0  ;;  %v7346_v11 = vld [vmem:[%s11518_s3 + $0x180] ss:$16 sps:$4 sm:$0xff]  }
 0x1f9   : > { %v2604_v35 = vpop.f32.mrf.mxu1  ;;  %v2603_v14 = vadd.f32 %v2602_v29, %v2410_v48  ;;  %v2412_v6 = vadd.f32 %v2411_v8, %v9152_v42  ;;  %v9515_v28 = vpack.c.bf16 %v3504_v5, %v3500_v27  ;;  %v7348_v42 = vld [vmem:[%s11518_s3 + $0x184] ss:$16 sps:$4 sm:$0xff]   ;;  %v3507_v9 = vmax.f32 %v2601_v47, 0.0  ;;  %v7382_v34 = vld [vmem:[%s11518_s3 + $0x380] ss:$16 sps:$4 sm:$0xff]  }
 0x1fa   : > { %v2413_v46 = vpop.f32.mrf.mxu0  ;;  %4412 = vmatpush2.bf16.msra.mxu0 %v7337_v54  ;;  %v7384_v29 = vld [vmem:[%s11518_s3 + $0x384] ss:$16 sps:$4 sm:$0xff]  }
 0x1fb   : > { %v2606_v43 = vpop.f32.mrf.mxu1  ;;  %4605 = vmatpush2.bf16.msra.mxu1 %v7376_v62  ;;  %v2605_v2 = vadd.f32 %v2604_v35, %v2412_v6  ;;  %v2414_v19 = vadd.f32 %v2413_v46, %v9160_v4  ;;  %4413 = vmatprep.subr.bf16.mxu0 %v7342_v30  ;;  %v3508_v4 = vmax.f32 %v2603_v14, 0.0  ;;  %v7357_v14 = vld [vmem:[%s11518_s3 + $0x144] ss:$16 sps:$4 sm:$0xff]  }
 0x1fc   : > { %4606 = vmatprep.subr.bf16.mxu1 %v7381_v51  ;;  %v2417_v21 = vpop.f32.mrf.mxu0  ;;  %3108 = vmatmul.mubr.bf16.gmra.mxu0 %v11820_v20  ;;  %v11823_v46 = vld [vmem:[#allocation51_spill] sm:$0xff] }
 0x1fd   : > { %v2610_v0 = vpop.f32.mrf.mxu1  ;;  %6562 = vmatmul.mubr.msk.bf16.gmra.mxu1 %vm1818_vm0, %v11821_v1  ;;  %v3511_v57 = vmax.f32 %v2605_v2, 0.0  ;;  %v2607_v15 = vadd.f32 %v2606_v43, %v2414_v19  ;;  %v2418_v22 = vadd.f32 %v2417_v21, %v9168_v25  ;;  %3117 = vmatprep.mubr.bf16.mxu0 %v11822_v18  ;;  %v11824_v43 = vld [vmem:[#allocation52_spill] sm:$0xff]  ;;  %v7355_v20 = vld [vmem:[%s11518_s3 + $0x140] ss:$16 sps:$4 sm:$0xff]   ;;  %v7360_v1 = vld [vmem:[%s11518_s3 + $0x124] ss:$16 sps:$4 sm:$0xff]  }
 0x1fe   : > { %3310 = vmatprep.mubr.bf16.mxu1 %v11797_v59  ;;  %v2419_v23 = vpop.f32.mrf.mxu0  ;;  %4414 = vmatpush2.bf16.msra.mxu0 %v7340_v40  ;;  %v7387_v18 = vld [vmem:[%s11518_s3 + $0x364] ss:$16 sps:$4 sm:$0xff]  }
 0x1ff   : > { %v2612_v58 = vpop.f32.mrf.mxu1  ;;  %4607 = vmatpush2.bf16.msra.mxu1 %v7379_v33  ;;  %v9539_v37 = vpack.c.bf16 %v3511_v57, %v3507_v9  ;;  %v3512_v25 = vmax.f32 %v2607_v15, 0.0  ;;  %v2611_v39 = vadd.f32 %v2610_v0, %v2418_v22  ;;  %v2420_v27 = vadd.f32 %v2419_v23, %v9174_v10  ;;  %4415 = vmatprep.subr.bf16.mxu0 %v7348_v42  ;;  %v7349_v10 = vld [vmem:[%s11518_s3 + $0x160] ss:$16 sps:$4 sm:$0xff]  }
 0x200   : > { %v2421_v54 = vpop.f32.mrf.mxu0  ;;  %4608 = vmatprep.subr.bf16.mxu1 %v7384_v29  ;;  %v11825_v42 = vld [vmem:[#allocation53_spill] sm:$0xff] }
 0x201   : > { %v2614_v62 = vpop.f32.mrf.mxu1  ;;  %v2613_v5 = vadd.f32 %v2612_v58, %v2420_v27  ;;  %v2422_v47 = vadd.f32 %v2421_v54, %v9180_v36  ;;  %v9549_v48 = vpack.c.bf16 %v3512_v25, %v3508_v4  ;;  %v3515_v40 = vmax.f32 %v2611_v39, 0.0  ;;  %v7385_v22 = vld [vmem:[%s11518_s3 + $0x360] ss:$16 sps:$4 sm:$0xff]   ;;  %v7366_v29 = vld [vmem:[%s11518_s3 + $0x104] ss:$16 sps:$4 sm:$0xff]  }
 0x202   : > { %v2423_v30 = vpop.f32.mrf.mxu0  ;;  %4416 = vmatpush2.bf16.msra.mxu0 %v7346_v11 }
 0x203   : > { %v2616_v51 = vpop.f32.mrf.mxu1  ;;  %4609 = vmatpush2.bf16.msra.mxu1 %v7382_v34  ;;  %v2615_v8 = vadd.f32 %v2614_v62, %v2422_v47  ;;  %v2424_v35 = vadd.f32 %v2423_v30, %v9188_v24  ;;  %4417 = vmatprep.subr.bf16.mxu0 %v7351_v50  ;;  %v3516_v24 = vmax.f32 %v2613_v5, 0.0  ;;  %v11826_v62 = vld [vmem:[#allocation54_spill] sm:$0xff]  ;;  %v11827_v5 = vld [vmem:[#allocation55_spill] sm:$0xff] }
 0x204   : > { %v2427_v36 = vpop.f32.mrf.mxu0  ;;  %3118 = vmatmul.mubr.bf16.gmra.mxu0 %v11823_v46  ;;  %4610 = vmatprep.subr.bf16.mxu1 %v7387_v18  ;;  %v11828_v47 = vld [vmem:[#allocation50_spill] sm:$0xff] }
 0x205   : > { %v2620_v6 = vpop.f32.mrf.mxu1  ;;  %6563 = vmatmul.mubr.msk.bf16.gmra.mxu1 %vm1818_vm0, %v11824_v43  ;;  %v3519_v33 = vmax.f32 %v2615_v8, 0.0  ;;  %v2617_v2 = vadd.f32 %v2616_v51, %v2424_v35  ;;  %v2428_v19 = vadd.f32 %v2427_v36, %v9196_v45  ;;  %3127 = vmatprep.mubr.bf16.mxu0 %v11825_v42  ;;  %v11609_v30 = vsub.s32 2, %v11828_v47  ;;  %v7364_v43 = vld [vmem:[%s11518_s3 + $0x100] ss:$16 sps:$4 sm:$0xff]  }
 0x206   : > { %3320 = vmatprep.mubr.bf16.mxu1 %v11797_v59  ;;  %v2429_v21 = vpop.f32.mrf.mxu0  ;;  %4418 = vmatpush2.bf16.msra.mxu0 %v7349_v10  ;;  %v11610_v46 = vsub.s32 3, %v11828_v47  ;;  %v7388_v42 = vld [vmem:[%s11518_s3 + $0x340] ss:$16 sps:$4 sm:$0xff]  }
 0x207   : > { %v2622_v0 = vpop.f32.mrf.mxu1  ;;  %v9570_v9 = vpack.c.bf16 %v3519_v33, %v3515_v40  ;;  %v3520_v57 = vmax.f32 %v2617_v2, 0.0  ;;  %v2621_v45 = vadd.f32 %v2620_v6, %v2428_v19  ;;  %v2430_v15 = vadd.f32 %v2429_v21, %v9202_v12  ;;  %4419 = vmatprep.subr.bf16.mxu0 %v7357_v14  ;;  %v7358_v12 = vld [vmem:[%s11518_s3 + $0x120] ss:$16 sps:$4 sm:$0xff]   ;;  %4611 = vmatpush2.bf16.msra.mxu1 %v7385_v22  ;;  %v11831_v19 = vld [vmem:[#allocation100_spill] sm:$0xff] }
 0x208   : > { %v2431_v4 = vpop.f32.mrf.mxu0 }
 0x209   : > { %v2624_v23 = vpop.f32.mrf.mxu1  ;;  %v2623_v58 = vadd.f32 %v2622_v0, %v2430_v15  ;;  %v2432_v11 = vadd.f32 %v2431_v4, %v9208_v52  ;;  %v9580_v50 = vpack.c.bf16 %v3520_v57, %v3516_v24  ;;  %v3523_v51 = vmax.f32 %v2621_v45, 0.0  ;;  %v7390_v24 = vld [vmem:[%s11518_s3 + $0x344] ss:$16 sps:$4 sm:$0xff]   ;;  %v7653_v45 = vld [vmem:[%s11517_s2] sm:$0xf] }
 0x20a   : > { %v2433_v25 = vpop.f32.mrf.mxu0  ;;  %4420 = vmatpush2.bf16.msra.mxu0 %v7355_v20  ;;  %v9615_v15 = vrot.slane %v7653_v45, %v11609_v30  ;;  %4612 = vmatprep.subr.bf16.mxu1 %v7390_v24 }
 0x20b   : > { %v2626_v39 = vpop.f32.mrf.mxu1  ;;  %v2625_v27 = vadd.f32 %v2624_v23, %v2432_v11  ;;  %v2434_v34 = vadd.f32 %v2433_v25, %v9216_v44  ;;  %4421 = vmatprep.subr.bf16.mxu0 %v7360_v1  ;;  %v11829_v44 = vld [vmem:[#allocation56_spill] sm:$0xff]  ;;  %v3524_v14 = vmax.f32 %v2623_v58, 0.0  ;;  %v11832_v1 = vld [vmem:[#allocation101_spill] sm:$0xff]  ;;  %4613 = vmatpush2.bf16.msra.mxu1 %v7388_v42  ;;  %v11833_v11 = vld [vmem:[#allocation102_spill] sm:$0xff] }
 0x20c   : > { %v2437_v52 = vpop.f32.mrf.mxu0  ;;  %3128 = vmatmul.mubr.bf16.gmra.mxu0 %v11826_v62  ;;  %v7396_v23 = vld [vmem:[%s11518_s3 + $0xec] ss:$16 sps:$4 sm:$0xff]  }
 0x20d   : > { %v2630_v54 = vpop.f32.mrf.mxu1  ;;  %6564 = vmatmul.mubr.msk.bf16.gmra.mxu1 %vm1818_vm0, %v11827_v5  ;;  %v3527_v10 = vmax.f32 %v2625_v27, 0.0  ;;  %v2627_v8 = vadd.f32 %v2626_v39, %v2434_v34  ;;  %v2438_v35 = vadd.f32 %v2437_v52, %v9224_v7  ;;  %3137 = vmatprep.mubr.bf16.mxu0 %v11829_v44  ;;  %v9625_v39 = vrot.slane %v7653_v45, %v11610_v46  ;;  %v11834_v34 = vld [vmem:[#allocation57_spill] sm:$0xff] }
 0x20e   : > { %3330 = vmatprep.mubr.bf16.mxu1 %v11797_v59  ;;  %v2439_v36 = vpop.f32.mrf.mxu0  ;;  %4422 = vmatpush2.bf16.msra.mxu0 %v7358_v12 }
 0x20f   : > { %v2632_v6 = vpop.f32.mrf.mxu1  ;;  %v9600_v40 = vpack.c.bf16 %v3527_v10, %v3523_v51  ;;  %v3528_v33 = vmax.f32 %v2627_v8, 0.0  ;;  %v2631_v2 = vadd.f32 %v2630_v54, %v2438_v35  ;;  %v2440_v7 = vadd.f32 %v2439_v36, %v11831_v19  ;;  %4423 = vmatprep.subr.bf16.mxu0 %v7366_v29  ;;  %v11835_v29 = vld [vmem:[#allocation58_spill] sm:$0xff]  ;;  %v11836_v51 = vld [vmem:[#allocation59_spill] sm:$0xff] }
 0x210   : > { %v2441_v21 = vpop.f32.mrf.mxu0 }
 0x211   : > { %11830 = vst [vmem:[#allocation78_spill] sm:$0xff] %v9600_v40  ;;  %v2634_v0 = vpop.f32.mrf.mxu1  ;;  %v2633_v20 = vadd.f32 %v2632_v6, %v2440_v7  ;;  %v2442_v57 = vadd.f32 %v2441_v21, %v11832_v1  ;;  %v9617_v22 = vpack.c.bf16 %v3528_v33, %v3524_v14  ;;  %v3531_v52 = vmax.f32 %v2631_v2, 0.0  ;;  %v7393_v7 = vld [vmem:[%s11518_s3 + $0x324] ss:$16 sps:$4 sm:$0xff]  }
 0x212   : > { %v2443_v18 = vpop.f32.mrf.mxu0  ;;  %4424 = vmatpush2.bf16.msra.mxu0 %v7364_v43  ;;  %4614 = vmatprep.subr.bf16.mxu1 %v7393_v7 }
 0x213   : > { %v2636_v4 = vpop.f32.mrf.mxu1  ;;  %v2635_v58 = vadd.f32 %v2634_v0, %v2442_v57  ;;  %v2444_v25 = vadd.f32 %v2443_v18, %v11833_v11  ;;  %v3532_v10 = vmax.f32 %v2633_v20, 0.0  ;;  %4779 = vmatprep.subr.bf16.mxu0 %v7396_v23  ;;  %v7391_v0 = vld [vmem:[%s11518_s3 + $0x320] ss:$16 sps:$4 sm:$0xff]   ;;  %v11839_v18 = vld [vmem:[#allocation60_spill] sm:$0xff]  ;;  %v11841_v11 = vld [vmem:[#allocation62_spill] sm:$0xff] }
 0x214   : > { %v2673_v12 = vpop.f32.mrf.mxu0  ;;  %3138 = vmatmul.mubr.bf16.gmra.mxu0 %v11834_v34  ;;  %4615 = vmatpush2.bf16.msra.mxu1 %v7391_v0 }
 0x215   : > { %v2866_v27 = vpop.f32.mrf.mxu1  ;;  %6565 = vmatmul.mubr.msk.bf16.gmra.mxu1 %vm1818_vm0, %v11835_v29  ;;  %v3535_v54 = vmax.f32 %v2635_v58, 0.0  ;;  %v2637_v62 = vadd.f32 %v2636_v4, %v2444_v25  ;;  %v2674_v5 = vadd.f32 %v2673_v12, %v9615_v15  ;;  %3147 = vmatprep.mubr.bf16.mxu0 %v11836_v51  ;;  %v11840_v4 = vld [vmem:[#allocation61_spill] sm:$0xff] }
 0x216   : > { %3340 = vmatprep.mubr.bf16.mxu1 %v11797_v59  ;;  %v2675_v8 = vpop.f32.mrf.mxu0 }
 0x217   : > { %v2868_v35 = vpop.f32.mrf.mxu1  ;;  %v9633_v44 = vpack.c.bf16 %v3535_v54, %v3531_v52  ;;  %v3536_v14 = vmax.f32 %v2637_v62, 0.0  ;;  %v9635_v36 = vadd.f32 %v2866_v27, %v2674_v5  ;;  %v2676_v6 = vadd.f32 %v2675_v8, %v9625_v39  ;;  %v7402_v27 = vld [vmem:[%s11518_s3 + $0x304] ss:$16 sps:$4 sm:$0xff]   ;;  %v7400_v52 = vld [vmem:[%s11518_s3 + $0x300] ss:$16 sps:$4 sm:$0xff]  }
 0x218   : > { %v2677_v43 = vpop.f32.mrf.mxu0  ;;  %4616 = vmatprep.subr.bf16.mxu1 %v7402_v27 }
 0x219   : > { %11837 = vst [vmem:[#allocation15_spill] sm:$0xff] %v9633_v44  ;;  %v2870_v33 = vpop.f32.mrf.mxu1  ;;  %v9638_v2 = vadd.f32 %v2868_v35, %v2676_v6  ;;  %v2678_v19 = vadd.f32 %v2677_v43, %v9615_v15  ;;  %v9644_v42 = vpack.c.bf16 %v3536_v14, %v3532_v10  ;;  %4617 = vmatpush2.bf16.msra.mxu1 %v7400_v52  ;;  %v11856_v44 = vld [vmem:[#allocation93_spill] sm:$0xff] }
 0x21a   : > { %v2679_v24 = vpop.f32.mrf.mxu0 }
 0x21b   : > { %11838 = vst [vmem:[#allocation16_spill] sm:$0xff] %v9644_v42  ;;  %v2872_v21 = vpop.f32.mrf.mxu1  ;;  %v9649_v20 = vadd.f32 %v2870_v33, %v2678_v19  ;;  %v2680_v1 = vadd.f32 %v2679_v24, %v9625_v39  ;;  %v11842_v33 = vld [vmem:[#allocation65_spill] sm:$0xff]  ;;  %v11843_v19 = vld [vmem:[#allocation66_spill] sm:$0xff] }
 0x21c   : > { %v2683_v57 = vpop.f32.mrf.mxu0  ;;  %3148 = vmatmul.mubr.bf16.gmra.mxu0 %v11839_v18 }
 0x21d   : > { %v2876_v45 = vpop.f32.mrf.mxu1  ;;  %6566 = vmatmul.mubr.msk.bf16.gmra.mxu1 %vm1818_vm0, %v11840_v4  ;;  %v9655_v23 = vadd.f32 %v2872_v21, %v2680_v1  ;;  %v2684_v58 = vadd.f32 %v2683_v57, %v9615_v15  ;;  %3157 = vmatprep.mubr.bf16.mxu0 %v11841_v11  ;;  %v11844_v21 = vld [vmem:[#allocation68_spill] sm:$0xff] }
 0x21e   : > { %3350 = vmatprep.mubr.bf16.mxu1 %v11797_v59  ;;  %v2685_v25 = vpop.f32.mrf.mxu0 }
 0x21f   : > { %v2878_v12 = vpop.f32.mrf.mxu1  ;;  %v9663_v34 = vadd.f32 %v2876_v45, %v2684_v58  ;;  %v2686_v29 = vadd.f32 %v2685_v25, %v9625_v39  ;;  %v7414_v25 = vld [vmem:[%s11518_s3 + $0x2ec] ss:$16 sps:$4 sm:$0xff]  }
 0x220   : > { %v2687_v54 = vpop.f32.mrf.mxu0  ;;  %4972 = vmatprep.subr.bf16.mxu1 %v7414_v25 }
 0x221   : > { %v2880_v62 = vpop.f32.mrf.mxu1  ;;  %v9669_v5 = vadd.f32 %v2878_v12, %v2686_v29  ;;  %v2688_v51 = vadd.f32 %v2687_v54, %v9615_v15 }
 0x222   : > { %v2689_v10 = vpop.f32.mrf.mxu0 }
 0x223   : > { %v2882_v8 = vpop.f32.mrf.mxu1  ;;  %v9672_v35 = vadd.f32 %v2880_v62, %v2688_v51  ;;  %v2690_v14 = vadd.f32 %v2689_v10, %v9625_v39  ;;  %v11845_v51 = vld [vmem:[#allocation72_spill] sm:$0xff]  ;;  %v11846_v10 = vld [vmem:[#allocation73_spill] sm:$0xff] }
 0x224   : > { %v2693_v6 = vpop.f32.mrf.mxu0  ;;  %3158 = vmatmul.mubr.bf16.gmra.mxu0 %v11842_v33 }
 0x225   : > { %v2886_v43 = vpop.f32.mrf.mxu1  ;;  %6567 = vmatmul.mubr.msk.bf16.gmra.mxu1 %vm1818_vm0, %v11843_v19  ;;  %v9678_v7 = vadd.f32 %v2882_v8, %v2690_v14  ;;  %v2694_v24 = vadd.f32 %v2693_v6, %v9615_v15  ;;  %3167 = vmatprep.mubr.bf16.mxu0 %v11844_v21  ;;  %v11847_v6 = vld [vmem:[#allocation75_spill] sm:$0xff] }
 0x226   : > { %3360 = vmatprep.mubr.bf16.mxu1 %v11797_v59  ;;  %v2695_v0 = vpop.f32.mrf.mxu0 }
 0x227   : > { %v2888_v1 = vpop.f32.mrf.mxu1  ;;  %v9683_v57 = vadd.f32 %v2886_v43, %v2694_v24  ;;  %v2696_v45 = vadd.f32 %v2695_v0, %v9625_v39 }
 0x228   : > { %v2697_v18 = vpop.f32.mrf.mxu0 }
 0x229   : > { %v2890_v4 = vpop.f32.mrf.mxu1  ;;  %v9686_v58 = vadd.f32 %v2888_v1, %v2696_v45  ;;  %v2698_v11 = vadd.f32 %v2697_v18, %v9615_v15 }
 0x22a   : > { %v2699_v12 = vpop.f32.mrf.mxu0 }
 0x22b   : > { %v2892_v27 = vpop.f32.mrf.mxu1  ;;  %v9692_v29 = vadd.f32 %v2890_v4, %v2698_v11  ;;  %v2700_v52 = vadd.f32 %v2699_v12, %v9625_v39 }
 0x22c   : > { %v2703_v54 = vpop.f32.mrf.mxu0  ;;  %3168 = vmatmul.mubr.bf16.gmra.mxu0 %v11845_v51 }
 0x22d   : > { %v2896_v62 = vpop.f32.mrf.mxu1  ;;  %6568 = vmatmul.mubr.msk.bf16.gmra.mxu1 %vm1818_vm0, %v11846_v10  ;;  %v9698_v8 = vadd.f32 %v2892_v27, %v2700_v52  ;;  %v2704_v14 = vadd.f32 %v2703_v54, %v9615_v15  ;;  %3177 = vmatprep.mubr.bf16.mxu0 %v11847_v6  ;;  %v11848_v52 = vld [vmem:[#allocation79_spill] sm:$0xff]  ;;  %v11849_v54 = vld [vmem:[#allocation80_spill] sm:$0xff]  ;;  %v11850_v10 = vld [vmem:[#allocation82_spill] sm:$0xff] }
 0x22e   : > { %3370 = vmatprep.mubr.bf16.mxu1 %v11797_v59  ;;  %v2705_v43 = vpop.f32.mrf.mxu0 }
 0x22f   : > { %v2898_v33 = vpop.f32.mrf.mxu1  ;;  %v9703_v19 = vadd.f32 %v2896_v62, %v2704_v14  ;;  %v2706_v24 = vadd.f32 %v2705_v43, %v9625_v39 }
 0x230   : > { %v2707_v21 = vpop.f32.mrf.mxu0 }
 0x231   : > { %v2900_v0 = vpop.f32.mrf.mxu1  ;;  %v9706_v1 = vadd.f32 %v2898_v33, %v2706_v24  ;;  %v2708_v45 = vadd.f32 %v2707_v21, %v9615_v15 }
 0x232   : > { %v2709_v18 = vpop.f32.mrf.mxu0 }
 0x233   : > { %v2902_v4 = vpop.f32.mrf.mxu1  ;;  %v9709_v11 = vadd.f32 %v2900_v0, %v2708_v45  ;;  %v2710_v25 = vadd.f32 %v2709_v18, %v9625_v39 }
 0x234   : > { %v2713_v12 = vpop.f32.mrf.mxu0  ;;  %3178 = vmatmul.mubr.bf16.gmra.mxu0 %v11848_v52 }
 0x235   : > { %v2906_v27 = vpop.f32.mrf.mxu1  ;;  %6569 = vmatmul.mubr.msk.bf16.gmra.mxu1 %vm1818_vm0, %v11849_v54  ;;  %v9715_v62 = vadd.f32 %v2902_v4, %v2710_v25  ;;  %v2714_v51 = vadd.f32 %v2713_v12, %v9615_v15  ;;  %3187 = vmatprep.mubr.bf16.mxu0 %v11850_v10  ;;  %v11851_v54 = vld [vmem:[#allocation86_spill] sm:$0xff]  ;;  %v11853_v10 = vld [vmem:[#allocation89_spill] sm:$0xff] }
 0x236   : > { %3380 = vmatprep.mubr.bf16.mxu1 %v11797_v59  ;;  %v2715_v14 = vpop.f32.mrf.mxu0 }
 0x237   : > { %v2908_v6 = vpop.f32.mrf.mxu1  ;;  %v9720_v43 = vadd.f32 %v2906_v27, %v2714_v51  ;;  %v2716_v33 = vadd.f32 %v2715_v14, %v9625_v39  ;;  %v11852_v27 = vld [vmem:[#allocation87_spill] sm:$0xff] }
 0x238   : > { %v2717_v24 = vpop.f32.mrf.mxu0 }
 0x239   : > { %v2910_v21 = vpop.f32.mrf.mxu1  ;;  %v9723_v0 = vadd.f32 %v2908_v6, %v2716_v33  ;;  %v2718_v45 = vadd.f32 %v2717_v24, %v9615_v15 }
 0x23a   : > { %v9726_v18 = vpop.f32.mrf.mxu0 }
 0x23b   : > { %v9728_v4 = vpop.f32.mrf.mxu1  ;;  %v9730_v25 = vadd.f32 %v2910_v21, %v2718_v45 }
 0x23c   : > { %v2723_v12 = vpop.f32.mrf.mxu0  ;;  %3188 = vmatmul.mubr.bf16.gmra.mxu0 %v11851_v54 }
 0x23d   : > { %v2916_v52 = vpop.f32.mrf.mxu1  ;;  %6570 = vmatmul.mubr.msk.bf16.gmra.mxu1 %vm1818_vm0, %v11852_v27  ;;  %v2724_v51 = vadd.f32 %v2723_v12, %v9615_v15  ;;  %3197 = vmatprep.mubr.bf16.mxu0 %v11853_v10 }
 0x23e   : > { %3390 = vmatprep.mubr.bf16.mxu1 %v11797_v59  ;;  %v2725_v14 = vpop.f32.mrf.mxu0 }
 0x23f   : > { %v2918_v6 = vpop.f32.mrf.mxu1  ;;  %v9738_v33 = vadd.f32 %v2916_v52, %v2724_v51  ;;  %v2726_v24 = vadd.f32 %v2725_v14, %v9625_v39  ;;  %v11857_v52 = vld [vmem:[#allocation94_spill] sm:$0xff]  ;;  %v11858_v14 = vld [vmem:[#allocation95_spill] sm:$0xff] }
 0x240   : > { %v2727_v21 = vpop.f32.mrf.mxu0 }
 0x241   : > { %v2920_v45 = vpop.f32.mrf.mxu1  ;;  %v9741_v30 = vadd.f32 %v2918_v6, %v2726_v24  ;;  %v2728_v54 = vadd.f32 %v2727_v21, %v9615_v15 }
 0x242   : > { %v9744_v46 = vpop.f32.mrf.mxu0 }
 0x243   : > { %v9746_v27 = vpop.f32.mrf.mxu1  ;;  %v9748_v12 = vadd.f32 %v2920_v45, %v2728_v54 }
 0x244   : > { %11854 = vst [vmem:[#allocation81_spill] sm:$0xff] %v9746_v27  ;;  %v2733_v10 = vpop.f32.mrf.mxu0  ;;  %3198 = vmatmul.mubr.bf16.gmra.mxu0 %v11856_v44  ;;  %v11863_v27 = vld [vmem:[#allocation98_spill] sm:$0xff] }
 0x245   : > { %11855 = vst [vmem:[#allocation83_spill] sm:$0xff] %v9748_v12  ;;  %v2926_v47 = vpop.f32.mrf.mxu1  ;;  %6571 = vmatmul.mubr.msk.bf16.gmra.mxu1 %vm1818_vm0, %v11857_v52  ;;  %v2734_v51 = vadd.f32 %v2733_v10, %v9615_v15  ;;  %3207 = vmatprep.mubr.bf16.mxu0 %v11858_v14 }
 0x246   : > { %3400 = vmatprep.mubr.bf16.mxu1 %v11797_v59  ;;  %v2735_v6 = vpop.f32.mrf.mxu0 }
 0x247   : > { %v2928_v24 = vpop.f32.mrf.mxu1  ;;  %v9756_v21 = vadd.f32 %v2926_v47, %v2734_v51  ;;  %v2736_v45 = vadd.f32 %v2735_v6, %v9625_v39  ;;  %v11864_v47 = vld [vmem:[#allocation99_spill] sm:$0xff]  ;;  %v11865_v6 = vld [vmem:[#allocation5_spill] sm:$0xff] }
 0x248   : > { %v2737_v54 = vpop.f32.mrf.mxu0 }
 0x249   : > { %11859 = vst [vmem:[#allocation84_spill] sm:$0xff] %v9756_v21  ;;  %v2930_v42 = vpop.f32.mrf.mxu1  ;;  %v9759_v40 = vadd.f32 %v2928_v24, %v2736_v45  ;;  %v2738_v44 = vadd.f32 %v2737_v54, %v9615_v15 }
 0x24a   : > { %v9762_v12 = vpop.f32.mrf.mxu0 }
 0x24b   : > { %11860 = vst [vmem:[#allocation17_spill] sm:$0xff] %v9759_v40  ;;  %v9764_v52 = vpop.f32.mrf.mxu1  ;;  %v9766_v10 = vadd.f32 %v2930_v42, %v2738_v44 }
 0x24c   : > { %11861 = vst [vmem:[#allocation18_spill] sm:$0xff] %v9764_v52  ;;  %v2743_v14 = vpop.f32.mrf.mxu0  ;;  %3208 = vmatmul.mubr.bf16.gmra.mxu0 %v11863_v27  ;;  %v7394_v27 = vld [vmem:[%s11518_s3 + $0xe8] ss:$16 sps:$4 sm:$0xff]  }
 0x24d   : > { %11862 = vst [vmem:[#allocation85_spill] sm:$0xff] %v9766_v10  ;;  %v2936_v59 = vpop.f32.mrf.mxu1  ;;  %6572 = vmatmul.mubr.msk.bf16.gmra.mxu1 %vm1818_vm0, %v11864_v47  ;;  %v2744_v51 = vadd.f32 %v2743_v14, %v9615_v15  ;;  %4425 = vmatprep.mubr.bf16.mxu0 %v11865_v6 }
 0x24e   : > { %v2745_v24 = vpop.f32.mrf.mxu0 }
 0x24f   : > { %v2938_v45 = vpop.f32.mrf.mxu1  ;;  %v9773_v54 = vadd.f32 %v2936_v59, %v2744_v51  ;;  %v2746_v40 = vadd.f32 %v2745_v24, %v9625_v39  ;;  %v7399_v59 = vld [vmem:[%s11518_s3 + $0xcc] ss:$16 sps:$4 sm:$0xff]  }
 0x250   : > { %v2747_v52 = vpop.f32.mrf.mxu0 }
 0x251   : > { %11866 = vst [vmem:[#allocation19_spill] sm:$0xff] %v9773_v54  ;;  %v2940_v42 = vpop.f32.mrf.mxu1  ;;  %v9776_v44 = vadd.f32 %v2938_v45, %v2746_v40  ;;  %v2748_v10 = vadd.f32 %v2747_v52, %v9615_v15  ;;  %v11871_v40 = vld [vmem:[#allocation63_spill] sm:$0xff]  ;;  %v11872_v45 = vld [vmem:[#allocation64_spill] sm:$0xff] }
 0x252   : > { %v9782_v47 = vpop.f32.mrf.mxu0 }
 0x253   : > { %11867 = vst [vmem:[#allocation20_spill] sm:$0xff] %v9776_v44  ;;  %11868 = vst [vmem:[#allocation88_spill] sm:$0xff] %v9782_v47  ;;  %v9784_v14 = vpop.f32.mrf.mxu1  ;;  %v9789_v51 = vadd.f32 %v2940_v42, %v2748_v10  ;;  %v7397_v44 = vld [vmem:[%s11518_s3 + $0xc8] ss:$16 sps:$4 sm:$0xff]   ;;  %v7405_v10 = vld [vmem:[%s11518_s3 + $0xac] ss:$16 sps:$4 sm:$0xff]  }
 0x254   : > { %11869 = vst [vmem:[#allocation90_spill] sm:$0xff] %v9784_v14  ;;  %v2753_v24 = vpop.f32.mrf.mxu0  ;;  %4426 = vmatmul.mubr.bf16.vlgmr.msra.gmra.mxu0 %v11871_v40 }
 0x255   : > { %11870 = vst [vmem:[#allocation91_spill] sm:$0xff] %v9789_v51  ;;  %v2946_v6 = vpop.f32.mrf.mxu1  ;;  %v2754_v52 = vadd.f32 %v2753_v24, %v9615_v15  ;;  %4435 = vmatprep.mubr.bf16.mxu0 %v11872_v45  ;;  %4780 = vmatpush1.bf16.msra.mxu0 %v7394_v27  ;;  %v7403_v45 = vld [vmem:[%s11518_s3 + $0xa8] ss:$16 sps:$4 sm:$0xff]  }
 0x256   : > { %v2755_v14 = vpop.f32.mrf.mxu0  ;;  %4781 = vmatprep.subr.bf16.mxu0 %v7399_v59 }
 0x257   : > { %v2948_v54 = vpop.f32.mrf.mxu1  ;;  %v9800_v42 = vadd.f32 %v2946_v6, %v2754_v52  ;;  %v2756_v40 = vadd.f32 %v2755_v14, %v9625_v39  ;;  %v7408_v6 = vld [vmem:[%s11518_s3 + $0x8c] ss:$16 sps:$4 sm:$0xff]  }
 0x258   : > { %v2757_v51 = vpop.f32.mrf.mxu0  ;;  %v11878_v52 = vld [vmem:[#allocation6_spill] sm:$0xff] }
 0x259   : > { %11873 = vst [vmem:[#allocation21_spill] sm:$0xff] %v9800_v42  ;;  %v2950_v24 = vpop.f32.mrf.mxu1  ;;  %v9803_v47 = vadd.f32 %v2948_v54, %v2756_v40  ;;  %v2758_v27 = vadd.f32 %v2757_v51, %v9615_v15  ;;  %4782 = vmatpush1.bf16.msra.mxu0 %v7397_v44  ;;  %v11879_v51 = vld [vmem:[#allocation8_spill] sm:$0xff] }
 0x25a   : > { %v9809_v59 = vpop.f32.mrf.mxu0  ;;  %4783 = vmatprep.subr.bf16.mxu0 %v7405_v10 }
 0x25b   : > { %11874 = vst [vmem:[#allocation22_spill] sm:$0xff] %v9803_v47  ;;  %11875 = vst [vmem:[#allocation92_spill] sm:$0xff] %v9809_v59  ;;  %v9811_v21 = vpop.f32.mrf.mxu1  ;;  %v9816_v14 = vadd.f32 %v2950_v24, %v2758_v27  ;;  %v7411_v24 = vld [vmem:[%s11518_s3 + $0x6c] ss:$16 sps:$4 sm:$0xff]  }
 0x25c   : > { %11876 = vst [vmem:[#allocation23_spill] sm:$0xff] %v9811_v21  ;;  %v2763_v54 = vpop.f32.mrf.mxu0  ;;  %4436 = vmatmul.mubr.bf16.gmra.mxu0 %v11878_v52  ;;  %v7406_v21 = vld [vmem:[%s11518_s3 + $0x88] ss:$16 sps:$4 sm:$0xff]  }
 0x25d   : > { %11877 = vst [vmem:[#allocation24_spill] sm:$0xff] %v9816_v14  ;;  %v2956_v40 = vpop.f32.mrf.mxu1  ;;  %v2764_v44 = vadd.f32 %v2763_v54, %v9615_v15  ;;  %4445 = vmatprep.mubr.bf16.mxu0 %v11879_v51  ;;  %4784 = vmatpush1.bf16.msra.mxu0 %v7403_v45  ;;  %v7409_v51 = vld [vmem:[%s11518_s3 + $0x68] ss:$16 sps:$4 sm:$0xff]  }
 0x25e   : > { %v2765_v10 = vpop.f32.mrf.mxu0  ;;  %4785 = vmatprep.subr.bf16.mxu0 %v7408_v6 }
 0x25f   : > { %v2958_v47 = vpop.f32.mrf.mxu1  ;;  %v9827_v27 = vadd.f32 %v2956_v40, %v2764_v44  ;;  %v2766_v52 = vadd.f32 %v2765_v10, %v9625_v39  ;;  %v7417_v40 = vld [vmem:[%s11518_s3 + $0x4c] ss:$16 sps:$4 sm:$0xff]   ;;  %v11884_v10 = vld [vmem:[#allocation7_spill] sm:$0xff] }
 0x260   : > { %v2767_v14 = vpop.f32.mrf.mxu0 }
 0x261   : > { %11880 = vst [vmem:[#allocation96_spill] sm:$0xff] %v9827_v27  ;;  %v2960_v54 = vpop.f32.mrf.mxu1  ;;  %v9830_v42 = vadd.f32 %v2958_v47, %v2766_v52  ;;  %v2768_v45 = vadd.f32 %v2767_v14, %v9615_v15  ;;  %4786 = vmatpush1.bf16.msra.mxu0 %v7406_v21  ;;  %v7415_v14 = vld [vmem:[%s11518_s3 + $0x48] ss:$16 sps:$4 sm:$0xff]  }
 0x262   : > { %v9836_v6 = vpop.f32.mrf.mxu0  ;;  %4787 = vmatprep.subr.bf16.mxu0 %v7411_v24 }
 0x263   : > { %11881 = vst [vmem:[#allocation97_spill] sm:$0xff] %v9830_v42  ;;  %v9838_v59 = vpop.f32.mrf.mxu1  ;;  %v9843_v44 = vadd.f32 %v2960_v54, %v2768_v45  ;;  %v7420_v54 = vld [vmem:[%s11518_s3 + $0x2c] ss:$16 sps:$4 sm:$0xff]  }
 0x264   : > { %11882 = vst [vmem:[#allocation25_spill] sm:$0xff] %v9838_v59  ;;  %v2773_v47 = vpop.f32.mrf.mxu0  ;;  %4446 = vmatmul.mubr.bf16.gmra.mxu0 %v11884_v10 }
 0x265   : > { %11883 = vst [vmem:[#allocation26_spill] sm:$0xff] %v9843_v44  ;;  %v2966_v52 = vpop.f32.mrf.mxu1  ;;  %v2774_v21 = vadd.f32 %v2773_v47, %v9615_v15  ;;  %4455 = vmatprep.mubr.bf16.mxu0 %v9294_v3  ;;  %4788 = vmatpush1.bf16.msra.mxu0 %v7409_v51  ;;  %v7418_v3 = vld [vmem:[%s11518_s3 + $0x28] ss:$16 sps:$4 sm:$0xff]  }
 0x266   : > { %v2775_v24 = vpop.f32.mrf.mxu0  ;;  %4789 = vmatprep.subr.bf16.mxu0 %v7417_v40 }
 0x267   : > { %v2968_v59 = vpop.f32.mrf.mxu1  ;;  %v9854_v45 = vadd.f32 %v2966_v52, %v2774_v21  ;;  %v2776_v10 = vadd.f32 %v2775_v24, %v9625_v39  ;;  %v7426_v52 = vld [vmem:[%s11518_s3 + $0xc] ss:$16 sps:$4 sm:$0xff]   ;;  %v11889_v24 = vld [vmem:[#allocation67_spill] sm:$0xff] }
 0x268   : > { %v2777_v44 = vpop.f32.mrf.mxu0 }
 0x269   : > { %11885 = vst [vmem:[#allocation27_spill] sm:$0xff] %v9854_v45  ;;  %v2970_v47 = vpop.f32.mrf.mxu1  ;;  %v9857_v42 = vadd.f32 %v2968_v59, %v2776_v10  ;;  %v2778_v51 = vadd.f32 %v2777_v44, %v9615_v15  ;;  %4790 = vmatpush1.bf16.msra.mxu0 %v7415_v14  ;;  %v7424_v14 = vld [vmem:[%s11518_s3 + $0x8] ss:$16 sps:$4 sm:$0xff]  }
 0x26a   : > { %v9863_v40 = vpop.f32.mrf.mxu0  ;;  %4791 = vmatprep.subr.bf16.mxu0 %v7420_v54 }
 0x26b   : > { %11886 = vst [vmem:[#allocation28_spill] sm:$0xff] %v9857_v42  ;;  %v9865_v27 = vpop.f32.mrf.mxu1  ;;  %v9870_v21 = vadd.f32 %v2970_v47, %v2778_v51  ;;  %v7429_v47 = vld [vmem:[%s11518_s3 + $0x1ec] ss:$16 sps:$4 sm:$0xff]  }
 0x26c   : > { %11887 = vst [vmem:[#allocation29_spill] sm:$0xff] %v9865_v27  ;;  %v2783_v59 = vpop.f32.mrf.mxu0  ;;  %4456 = vmatmul.mubr.bf16.gmra.mxu0 %v11889_v24 }
 0x26d   : > { %11888 = vst [vmem:[#allocation30_spill] sm:$0xff] %v9870_v21  ;;  %v2976_v10 = vpop.f32.mrf.mxu1  ;;  %v2784_v44 = vadd.f32 %v2783_v59, %v9615_v15  ;;  %4465 = vmatprep.mubr.bf16.mxu0 %v9306_v32  ;;  %4792 = vmatpush1.bf16.msra.mxu0 %v7418_v3  ;;  %v7427_v32 = vld [vmem:[%s11518_s3 + $0x1e8] ss:$16 sps:$4 sm:$0xff]  }
 0x26e   : > { %v2785_v54 = vpop.f32.mrf.mxu0  ;;  %4793 = vmatprep.subr.bf16.mxu0 %v7426_v52 }
 0x26f   : > { %v2978_v27 = vpop.f32.mrf.mxu1  ;;  %v9881_v51 = vadd.f32 %v2976_v10, %v2784_v44  ;;  %v2786_v24 = vadd.f32 %v2785_v54, %v9625_v39  ;;  %v7435_v10 = vld [vmem:[%s11518_s3 + $0x1cc] ss:$16 sps:$4 sm:$0xff]  }
 0x270   : > { %v2787_v21 = vpop.f32.mrf.mxu0 }
 0x271   : > { %v2980_v59 = vpop.f32.mrf.mxu1  ;;  %v9884_v42 = vadd.f32 %v2978_v27, %v2786_v24  ;;  %v2788_v3 = vadd.f32 %v2787_v21, %v9615_v15  ;;  %4794 = vmatpush1.bf16.msra.mxu0 %v7424_v14  ;;  %v7433_v14 = vld [vmem:[%s11518_s3 + $0x1c8] ss:$16 sps:$4 sm:$0xff]  }
 0x272   : > { %v9890_v52 = vpop.f32.mrf.mxu0  ;;  %4795 = vmatprep.subr.bf16.mxu0 %v7429_v47 }
 0x273   : > { %11890 = vst [vmem:[#allocation31_spill] sm:$0xff] %v9884_v42  ;;  %v9892_v45 = vpop.f32.mrf.mxu1  ;;  %v9897_v44 = vadd.f32 %v2980_v59, %v2788_v3  ;;  %v7438_v59 = vld [vmem:[%s11518_s3 + $0x1ac] ss:$16 sps:$4 sm:$0xff]  }
 0x274   : > { %11891 = vst [vmem:[#allocation32_spill] sm:$0xff] %v9892_v45  ;;  %v2793_v27 = vpop.f32.mrf.mxu0  ;;  %4466 = vmatmul.mubr.bf16.gmra.mxu0 %v9302_v63 }
 0x275   : > { %11892 = vst [vmem:[#allocation33_spill] sm:$0xff] %v9897_v44  ;;  %v2986_v24 = vpop.f32.mrf.mxu1  ;;  %v2794_v21 = vadd.f32 %v2793_v27, %v9615_v15  ;;  %4475 = vmatprep.mubr.bf16.mxu0 %v9318_v49  ;;  %4796 = vmatpush2.bf16.msra.mxu0 %v7427_v32  ;;  %v7436_v49 = vld [vmem:[%s11518_s3 + $0x1a8] ss:$16 sps:$4 sm:$0xff]  }
 0x276   : > { %v2795_v54 = vpop.f32.mrf.mxu0  ;;  %4797 = vmatprep.subr.bf16.mxu0 %v7435_v10 }
 0x277   : > { %v2988_v47 = vpop.f32.mrf.mxu1  ;;  %v9908_v3 = vadd.f32 %v2986_v24, %v2794_v21  ;;  %v2796_v63 = vadd.f32 %v2795_v54, %v9625_v39  ;;  %v7444_v24 = vld [vmem:[%s11518_s3 + $0x18c] ss:$16 sps:$4 sm:$0xff]  }
 0x278   : > { %v2797_v44 = vpop.f32.mrf.mxu0 }
 0x279   : > { %v2990_v27 = vpop.f32.mrf.mxu1  ;;  %v9911_v45 = vadd.f32 %v2988_v47, %v2796_v63  ;;  %v2798_v32 = vadd.f32 %v2797_v44, %v9615_v15  ;;  %4798 = vmatpush2.bf16.msra.mxu0 %v7433_v14  ;;  %v7442_v14 = vld [vmem:[%s11518_s3 + $0x188] ss:$16 sps:$4 sm:$0xff]  }
 0x27a   : > { %v9917_v10 = vpop.f32.mrf.mxu0  ;;  %4799 = vmatprep.subr.bf16.mxu0 %v7438_v59 }
 0x27b   : > { %11893 = vst [vmem:[#allocation34_spill] sm:$0xff] %v9911_v45  ;;  %v9919_v42 = vpop.f32.mrf.mxu1  ;;  %v9924_v21 = vadd.f32 %v2990_v27, %v2798_v32  ;;  %v7447_v27 = vld [vmem:[%s11518_s3 + $0x16c] ss:$16 sps:$4 sm:$0xff]  }
 0x27c   : > { %11894 = vst [vmem:[#allocation35_spill] sm:$0xff] %v9919_v42  ;;  %v2803_v63 = vpop.f32.mrf.mxu0  ;;  %4476 = vmatmul.mubr.bf16.gmra.mxu0 %v9314_v26 }
 0x27d   : > { %11895 = vst [vmem:[#allocation36_spill] sm:$0xff] %v9924_v21  ;;  %v2996_v54 = vpop.f32.mrf.mxu1  ;;  %v2804_v44 = vadd.f32 %v2803_v63, %v9615_v15  ;;  %4485 = vmatprep.mubr.bf16.mxu0 %v9330_v55  ;;  %4800 = vmatpush2.bf16.msra.mxu0 %v7436_v49  ;;  %v7445_v55 = vld [vmem:[%s11518_s3 + $0x168] ss:$16 sps:$4 sm:$0xff]  }
 0x27e   : > { %v2805_v47 = vpop.f32.mrf.mxu0  ;;  %4801 = vmatprep.subr.bf16.mxu0 %v7444_v24 }
 0x27f   : > { %v2998_v59 = vpop.f32.mrf.mxu1  ;;  %v9935_v32 = vadd.f32 %v2996_v54, %v2804_v44  ;;  %v2806_v26 = vadd.f32 %v2805_v47, %v9625_v39  ;;  %v7453_v54 = vld [vmem:[%s11518_s3 + $0x14c] ss:$16 sps:$4 sm:$0xff]  }
 0x280   : > { %v2807_v21 = vpop.f32.mrf.mxu0 }
 0x281   : > { %v3000_v63 = vpop.f32.mrf.mxu1  ;;  %v9938_v42 = vadd.f32 %v2998_v59, %v2806_v26  ;;  %v2808_v49 = vadd.f32 %v2807_v21, %v9615_v15  ;;  %4802 = vmatpush2.bf16.msra.mxu0 %v7442_v14  ;;  %v7451_v14 = vld [vmem:[%s11518_s3 + $0x148] ss:$16 sps:$4 sm:$0xff]  }
 0x282   : > { %v9944_v24 = vpop.f32.mrf.mxu0  ;;  %4803 = vmatprep.subr.bf16.mxu0 %v7447_v27 }
 0x283   : > { %11896 = vst [vmem:[#allocation37_spill] sm:$0xff] %v9938_v42  ;;  %v9946_v45 = vpop.f32.mrf.mxu1  ;;  %v9951_v44 = vadd.f32 %v3000_v63, %v2808_v49  ;;  %v7456_v63 = vld [vmem:[%s11518_s3 + $0x12c] ss:$16 sps:$4 sm:$0xff]  }
 0x284   : > { %11897 = vst [vmem:[#allocation38_spill] sm:$0xff] %v9946_v45  ;;  %v2813_v26 = vpop.f32.mrf.mxu0  ;;  %4486 = vmatmul.mubr.bf16.gmra.mxu0 %v9326_v31 }
 0x285   : > { %11898 = vst [vmem:[#allocation39_spill] sm:$0xff] %v9951_v44  ;;  %v3006_v47 = vpop.f32.mrf.mxu1  ;;  %v2814_v21 = vadd.f32 %v2813_v26, %v9615_v15  ;;  %4495 = vmatprep.mubr.bf16.mxu0 %v9367_v41  ;;  %4804 = vmatpush2.bf16.msra.mxu0 %v7445_v55  ;;  %v7454_v41 = vld [vmem:[%s11518_s3 + $0x128] ss:$16 sps:$4 sm:$0xff]  }
 0x286   : > { %v2815_v59 = vpop.f32.mrf.mxu0  ;;  %4805 = vmatprep.subr.bf16.mxu0 %v7453_v54 }
 0x287   : > { %v3008_v27 = vpop.f32.mrf.mxu1  ;;  %v9962_v49 = vadd.f32 %v3006_v47, %v2814_v21  ;;  %v2816_v31 = vadd.f32 %v2815_v59, %v9625_v39  ;;  %v7462_v47 = vld [vmem:[%s11518_s3 + $0x10c] ss:$16 sps:$4 sm:$0xff]  }
 0x288   : > { %v2817_v44 = vpop.f32.mrf.mxu0 }
 0x289   : > { %11899 = vst [vmem:[#allocation40_spill] sm:$0xff] %v9962_v49  ;;  %v3010_v26 = vpop.f32.mrf.mxu1  ;;  %v9965_v45 = vadd.f32 %v3008_v27, %v2816_v31  ;;  %v2818_v55 = vadd.f32 %v2817_v44, %v9615_v15  ;;  %4806 = vmatpush2.bf16.msra.mxu0 %v7451_v14  ;;  %v7460_v14 = vld [vmem:[%s11518_s3 + $0x108] ss:$16 sps:$4 sm:$0xff]  }
 0x28a   : > { %v9971_v54 = vpop.f32.mrf.mxu0  ;;  %4807 = vmatprep.subr.bf16.mxu0 %v7456_v63 }
 0x28b   : > { %11900 = vst [vmem:[#allocation41_spill] sm:$0xff] %v9965_v45  ;;  %11901 = vst [vmem:[#allocation42_spill] sm:$0xff] %v9971_v54  ;;  %v9973_v42 = vpop.f32.mrf.mxu1  ;;  %v9978_v21 = vadd.f32 %v3010_v26, %v2818_v55 }
 0x28c   : > { %11902 = vst [vmem:[#allocation43_spill] sm:$0xff] %v9973_v42  ;;  %v2823_v31 = vpop.f32.mrf.mxu0  ;;  %4496 = vmatmul.mubr.bf16.gmra.mxu0 %v9357_v61 }
 0x28d   : > { %11903 = vst [vmem:[#allocation44_spill] sm:$0xff] %v9978_v21  ;;  %v3016_v59 = vpop.f32.mrf.mxu1  ;;  %v2824_v44 = vadd.f32 %v2823_v31, %v9615_v15  ;;  %4505 = vmatprep.mubr.bf16.mxu0 %v9404_v13  ;;  %4808 = vmatpush2.bf16.msra.mxu0 %v7454_v41 }
 0x28e   : > { %v2825_v27 = vpop.f32.mrf.mxu0  ;;  %4809 = vmatprep.subr.bf16.mxu0 %v7462_v47 }
 0x28f   : > { %v3018_v63 = vpop.f32.mrf.mxu1  ;;  %v9986_v42 = vadd.f32 %v3016_v59, %v2824_v44  ;;  %v2826_v26 = vadd.f32 %v2825_v27, %v9625_v39 }
 0x290   : > { %v2827_v55 = vpop.f32.mrf.mxu0 }
 0x291   : > { %v3020_v21 = vpop.f32.mrf.mxu1  ;;  %v9989_v45 = vadd.f32 %v3018_v63, %v2826_v26  ;;  %v2828_v31 = vadd.f32 %v2827_v55, %v9615_v15  ;;  %4810 = vmatpush2.bf16.msra.mxu0 %v7460_v14 }
 0x292   : > { %v9992_v13 = vpop.f32.mrf.mxu0 }
 0x293   : > { %11904 = vst [vmem:[#allocation45_spill] sm:$0xff] %v9989_v45  ;;  %v9994_v41 = vpop.f32.mrf.mxu1  ;;  %v9996_v61 = vadd.f32 %v3020_v21, %v2828_v31 }
 0x294   : > { %11905 = vst [vmem:[#allocation46_spill] sm:$0xff] %v9994_v41  ;;  %v3059_v49 = vpop.f32.mrf.mxu0  ;;  %4506 = vmatmul.mubr.bf16.gmra.mxu0 %v9394_v16 }
 0x295   : > { %11906 = vst [vmem:[#allocation47_spill] sm:$0xff] %v9996_v61  ;;  %v3252_v54 = vpop.f32.mrf.mxu1  ;;  %v3060_v47 = vadd.f32 %v3059_v49, %v9635_v36  ;;  %4515 = vmatprep.mubr.bf16.mxu0 %v9441_v56 }
 0x296   : > { %v3061_v59 = vpop.f32.mrf.mxu0 }
 0x297   : > { %v3254_v44 = vpop.f32.mrf.mxu1  ;;  %v3062_v27 = vadd.f32 %v3061_v59, %v9638_v2  ;;  %v3253_v63 = vadd.f32 %v3252_v54, %v3060_v47 }
 0x298   : > { %v3063_v15 = vpop.f32.mrf.mxu0 }
 0x299   : > { %v3256_v14 = vpop.f32.mrf.mxu1  ;;  %v3064_v26 = vadd.f32 %v3063_v15, %v9649_v20  ;;  %v3255_v31 = vadd.f32 %v3254_v44, %v3062_v27  ;;  %v3413_v36 = vmax.f32 %v3253_v63, 0.0 }
 0x29a   : > { %v3065_v55 = vpop.f32.mrf.mxu0 }
 0x29b   : > { %v3258_v21 = vpop.f32.mrf.mxu1  ;;  %v3257_v61 = vadd.f32 %v3256_v14, %v3064_v26  ;;  %v3066_v41 = vadd.f32 %v3065_v55, %v9655_v23  ;;  %v3414_v20 = vmax.f32 %v3255_v31, 0.0 }
 0x29c   : > { %v3069_v16 = vpop.f32.mrf.mxu0  ;;  %4516 = vmatmul.mubr.bf16.gmra.mxu0 %v9431_v53 }
 0x29d   : > { %v3262_v45 = vpop.f32.mrf.mxu1  ;;  %v3417_v49 = vmax.f32 %v3257_v61, 0.0  ;;  %v3259_v56 = vadd.f32 %v3258_v21, %v3066_v41  ;;  %v3070_v2 = vadd.f32 %v3069_v16, %v9663_v34  ;;  %4525 = vmatprep.mubr.bf16.mxu0 %v9478_v38  ;;  %v7412_v61 = vld [vmem:[%s11518_s3 + $0x2e8] ss:$16 sps:$4 sm:$0xff]   ;;  %v7423_v41 = vld [vmem:[%s11518_s3 + $0x2cc] ss:$16 sps:$4 sm:$0xff]  }
 0x29e   : > { %v3071_v54 = vpop.f32.mrf.mxu0 }
 0x29f   : > { %v3264_v47 = vpop.f32.mrf.mxu1  ;;  %v10007_v59 = vpack.c.bf16 %v3417_v49, %v3413_v36  ;;  %v3418_v44 = vmax.f32 %v3259_v56, 0.0  ;;  %v3072_v27 = vadd.f32 %v3071_v54, %v9669_v5  ;;  %v3263_v14 = vadd.f32 %v3262_v45, %v3070_v2 }
 0x2a0   : > { %v3073_v23 = vpop.f32.mrf.mxu0 }
 0x2a1   : > { %v3266_v15 = vpop.f32.mrf.mxu1  ;;  %v3074_v26 = vadd.f32 %v3073_v23, %v9672_v35  ;;  %v10011_v63 = vpack.c.bf16 %v3418_v44, %v3414_v20  ;;  %v3265_v56 = vadd.f32 %v3264_v47, %v3072_v27  ;;  %v3421_v21 = vmax.f32 %v3263_v14, 0.0  ;;  %v7432_v47 = vld [vmem:[%s11518_s3 + $0x2ac] ss:$16 sps:$4 sm:$0xff]  }
 0x2a2   : > { %v3075_v16 = vpop.f32.mrf.mxu0 }
 0x2a3   : > { %v3268_v34 = vpop.f32.mrf.mxu1  ;;  %v3267_v55 = vadd.f32 %v3266_v15, %v3074_v26  ;;  %v3076_v5 = vadd.f32 %v3075_v16, %v9678_v7  ;;  %4618 = vmatprep.mubr.bf16.mxu1 %v10011_v63  ;;  %v7421_v7 = vld [vmem:[%s11518_s3 + $0x2c8] ss:$16 sps:$4 sm:$0xff]   ;;  %v3422_v20 = vmax.f32 %v3265_v56, 0.0  ;;  %v7441_v56 = vld [vmem:[%s11518_s3 + $0x28c] ss:$16 sps:$4 sm:$0xff]  }
 0x2a4   : > { %v3079_v45 = vpop.f32.mrf.mxu0  ;;  %4526 = vmatmul.mubr.bf16.gmra.mxu0 %v9468_v17  ;;  %4619 = vmatmul.mubr.bf16.vlgmr.msra.gmra.mxu1 %v10007_v59  ;;  %v7430_v16 = vld [vmem:[%s11518_s3 + $0x2a8] ss:$16 sps:$4 sm:$0xff]  }
 0x2a5   : > { %v3272_v35 = vpop.f32.mrf.mxu1  ;;  %v3425_v31 = vmax.f32 %v3267_v55, 0.0  ;;  %v3269_v36 = vadd.f32 %v3268_v34, %v3076_v5  ;;  %v3080_v49 = vadd.f32 %v3079_v45, %v9683_v57  ;;  %4535 = vmatprep.mubr.bf16.mxu0 %v9515_v28  ;;  %4973 = vmatpush1.bf16.msra.mxu1 %v7412_v61 }
 0x2a6   : > { %v3081_v2 = vpop.f32.mrf.mxu0  ;;  %4974 = vmatprep.subr.bf16.mxu1 %v7423_v41 }
 0x2a7   : > { %v3274_v54 = vpop.f32.mrf.mxu1  ;;  %v10031_v44 = vpack.c.bf16 %v3425_v31, %v3421_v21  ;;  %v3426_v27 = vmax.f32 %v3269_v36, 0.0  ;;  %v3082_v57 = vadd.f32 %v3081_v2, %v9686_v58  ;;  %v3273_v14 = vadd.f32 %v3272_v35, %v3080_v49  ;;  %v7450_v2 = vld [vmem:[%s11518_s3 + $0x26c] ss:$16 sps:$4 sm:$0xff]  }
 0x2a8   : > { %v3083_v23 = vpop.f32.mrf.mxu0 }
 0x2a9   : > { %v3276_v15 = vpop.f32.mrf.mxu1  ;;  %v3084_v26 = vadd.f32 %v3083_v23, %v9692_v29  ;;  %v10035_v61 = vpack.c.bf16 %v3426_v27, %v3422_v20  ;;  %4975 = vmatpush1.bf16.msra.mxu1 %v7421_v7  ;;  %v3275_v58 = vadd.f32 %v3274_v54, %v3082_v57  ;;  %v3429_v35 = vmax.f32 %v3273_v14, 0.0 }
 0x2aa   : > { %v3085_v34 = vpop.f32.mrf.mxu0  ;;  %4976 = vmatprep.subr.bf16.mxu1 %v7432_v47 }
 0x2ab   : > { %v3278_v41 = vpop.f32.mrf.mxu1  ;;  %v3277_v55 = vadd.f32 %v3276_v15, %v3084_v26  ;;  %v3086_v5 = vadd.f32 %v3085_v34, %v9698_v8  ;;  %4628 = vmatprep.mubr.bf16.mxu1 %v10035_v61  ;;  %v7439_v8 = vld [vmem:[%s11518_s3 + $0x288] ss:$16 sps:$4 sm:$0xff]   ;;  %v3430_v54 = vmax.f32 %v3275_v58, 0.0 }
 0x2ac   : > { %v3089_v29 = vpop.f32.mrf.mxu0  ;;  %4536 = vmatmul.mubr.bf16.gmra.mxu0 %v9505_v60  ;;  %4629 = vmatmul.mubr.bf16.gmra.mxu1 %v10031_v44  ;;  %v7448_v26 = vld [vmem:[%s11518_s3 + $0x268] ss:$16 sps:$4 sm:$0xff]  }
 0x2ad   : > { %v3282_v45 = vpop.f32.mrf.mxu1  ;;  %v3433_v21 = vmax.f32 %v3277_v55, 0.0  ;;  %v3279_v31 = vadd.f32 %v3278_v41, %v3086_v5  ;;  %v3090_v36 = vadd.f32 %v3089_v29, %v9703_v19  ;;  %4545 = vmatprep.mubr.bf16.mxu0 %v9549_v48  ;;  %4977 = vmatpush1.bf16.msra.mxu1 %v7430_v16  ;;  %v7459_v41 = vld [vmem:[%s11518_s3 + $0x24c] ss:$16 sps:$4 sm:$0xff]  }
 0x2ae   : > { %v3091_v49 = vpop.f32.mrf.mxu0  ;;  %4978 = vmatprep.subr.bf16.mxu1 %v7441_v56 }
 0x2af   : > { %v3284_v7 = vpop.f32.mrf.mxu1  ;;  %v10055_v47 = vpack.c.bf16 %v3433_v21, %v3429_v35  ;;  %v3434_v20 = vmax.f32 %v3279_v31, 0.0  ;;  %v3092_v19 = vadd.f32 %v3091_v49, %v9706_v1  ;;  %v3283_v23 = vadd.f32 %v3282_v45, %v3090_v36  ;;  %v7465_v36 = vld [vmem:[%s11518_s3 + $0x22c] ss:$16 sps:$4 sm:$0xff]  }
 0x2b0   : > { %v3093_v27 = vpop.f32.mrf.mxu0 }
 0x2b1   : > { %v3286_v57 = vpop.f32.mrf.mxu1  ;;  %v3094_v15 = vadd.f32 %v3093_v27, %v9709_v11  ;;  %v10059_v14 = vpack.c.bf16 %v3434_v20, %v3430_v54  ;;  %4979 = vmatpush1.bf16.msra.mxu1 %v7439_v8  ;;  %v3285_v1 = vadd.f32 %v3284_v7, %v3092_v19  ;;  %v2720_v11 = vadd.f32 %v9726_v18, %v9625_v39 }
 0x2b2   : > { %v3095_v16 = vpop.f32.mrf.mxu0  ;;  %4980 = vmatprep.subr.bf16.mxu1 %v7450_v2  ;;  %v3437_v29 = vmax.f32 %v3283_v23, 0.0  ;;  %v7463_v23 = vld [vmem:[%s11518_s3 + $0x228] ss:$16 sps:$4 sm:$0xff]  }
 0x2b3   : > { %v3288_v34 = vpop.f32.mrf.mxu1  ;;  %v3287_v56 = vadd.f32 %v3286_v57, %v3094_v15  ;;  %v3096_v58 = vadd.f32 %v3095_v16, %v9715_v62  ;;  %4638 = vmatprep.mubr.bf16.mxu1 %v10059_v14  ;;  %v7457_v62 = vld [vmem:[%s11518_s3 + $0x248] ss:$16 sps:$4 sm:$0xff]   ;;  %v3438_v8 = vmax.f32 %v3285_v1, 0.0  ;;  %v2913_v20 = vadd.f32 %v9728_v4, %v2720_v11 }
 0x2b4   : > { %v3099_v55 = vpop.f32.mrf.mxu0  ;;  %4546 = vmatmul.mubr.bf16.gmra.mxu0 %v9539_v37  ;;  %4639 = vmatmul.mubr.bf16.gmra.mxu1 %v10055_v47 }
 0x2b5   : > { %v3292_v5 = vpop.f32.mrf.mxu1  ;;  %v3441_v45 = vmax.f32 %v3287_v56, 0.0  ;;  %v3289_v35 = vadd.f32 %v3288_v34, %v3096_v58  ;;  %v3100_v21 = vadd.f32 %v3099_v55, %v9720_v43  ;;  %4555 = vmatprep.mubr.bf16.mxu0 %v9580_v50  ;;  %4981 = vmatpush1.bf16.msra.mxu1 %v7448_v26 }
 0x2b6   : > { %v3101_v31 = vpop.f32.mrf.mxu0  ;;  %4982 = vmatprep.subr.bf16.mxu1 %v7459_v41 }
 0x2b7   : > { %v3294_v18 = vpop.f32.mrf.mxu1  ;;  %v10081_v49 = vpack.c.bf16 %v3441_v45, %v3437_v29  ;;  %v3442_v7 = vmax.f32 %v3289_v35, 0.0  ;;  %v3102_v43 = vadd.f32 %v3101_v31, %v9723_v0  ;;  %v3293_v19 = vadd.f32 %v3292_v5, %v3100_v21  ;;  %v7468_v0 = vld [vmem:[%s11518_s3 + $0x20c] ss:$16 sps:$4 sm:$0xff]   ;;  %v7466_v5 = vld [vmem:[%s11518_s3 + $0x208] ss:$16 sps:$4 sm:$0xff]  }
 0x2b8   : > { %v3103_v2 = vpop.f32.mrf.mxu0  ;;  %v7471_v45 = vld [vmem:[%s11518_s3 + $0x3ec] ss:$16 sps:$4 sm:$0xff]  }
 0x2b9   : > { %v3296_v54 = vpop.f32.mrf.mxu1  ;;  %v3104_v27 = vadd.f32 %v3103_v2, %v9730_v25  ;;  %v10086_v57 = vpack.c.bf16 %v3442_v7, %v3438_v8  ;;  %4983 = vmatpush1.bf16.msra.mxu1 %v7457_v62  ;;  %v3295_v16 = vadd.f32 %v3294_v18, %v3102_v43  ;;  %v2730_v25 = vadd.f32 %v9744_v46, %v9625_v39  ;;  %v11908_v43 = vld [vmem:[#allocation83_spill] sm:$0xff] }
 0x2ba   : > { %v3105_v15 = vpop.f32.mrf.mxu0  ;;  %4984 = vmatprep.subr.bf16.mxu1 %v7465_v36  ;;  %v3445_v56 = vmax.f32 %v3293_v19, 0.0  ;;  %v11907_v36 = vld [vmem:[#allocation81_spill] sm:$0xff] }
 0x2bb   : > { %v3298_v26 = vpop.f32.mrf.mxu1  ;;  %v3297_v34 = vadd.f32 %v3296_v54, %v3104_v27  ;;  %v3106_v4 = vadd.f32 %v3105_v15, %v2913_v20  ;;  %4648 = vmatprep.mubr.bf16.mxu1 %v10086_v57  ;;  %v3446_v35 = vmax.f32 %v3295_v16, 0.0  ;;  %v2923_v8 = vadd.f32 %v11907_v36, %v2730_v25  ;;  %v7469_v20 = vld [vmem:[%s11518_s3 + $0x3e8] ss:$16 sps:$4 sm:$0xff]  }
 0x2bc   : > { %v3109_v41 = vpop.f32.mrf.mxu0  ;;  %4556 = vmatmul.mubr.bf16.gmra.mxu0 %v9570_v9  ;;  %4649 = vmatmul.mubr.bf16.gmra.mxu1 %v10081_v49  ;;  %v11913_v36 = vld [vmem:[#allocation18_spill] sm:$0xff] }
 0x2bd   : > { %v3302_v1 = vpop.f32.mrf.mxu1  ;;  %v3449_v58 = vmax.f32 %v3297_v34, 0.0  ;;  %v3299_v11 = vadd.f32 %v3298_v26, %v3106_v4  ;;  %v3110_v55 = vadd.f32 %v3109_v41, %v9738_v33  ;;  %4565 = vmatprep.mubr.bf16.mxu0 %v9617_v22  ;;  %4985 = vmatpush1.bf16.msra.mxu1 %v7463_v23  ;;  %v11909_v4 = vld [vmem:[#allocation78_spill] sm:$0xff] }
 0x2be   : > { %v3111_v29 = vpop.f32.mrf.mxu0  ;;  %4986 = vmatprep.subr.bf16.mxu1 %v7468_v0  ;;  %v2740_v0 = vadd.f32 %v9762_v12, %v9625_v39 }
 0x2bf   : > { %v3304_v46 = vpop.f32.mrf.mxu1  ;;  %v10107_v21 = vpack.c.bf16 %v3449_v58, %v3445_v56  ;;  %v3450_v62 = vmax.f32 %v3299_v11, 0.0  ;;  %v3112_v33 = vadd.f32 %v3111_v29, %v9741_v30  ;;  %v3303_v7 = vadd.f32 %v3302_v1, %v3110_v55  ;;  %v7474_v30 = vld [vmem:[%s11518_s3 + $0x3cc] ss:$16 sps:$4 sm:$0xff]   ;;  %v7472_v55 = vld [vmem:[%s11518_s3 + $0x3c8] ss:$16 sps:$4 sm:$0xff]  }
 0x2c0   : > { %v3113_v31 = vpop.f32.mrf.mxu0  ;;  %v11910_v56 = vld [vmem:[#allocation84_spill] sm:$0xff] }
 0x2c1   : > { %v3306_v18 = vpop.f32.mrf.mxu1  ;;  %v3114_v2 = vadd.f32 %v3113_v31, %v11908_v43  ;;  %v10112_v54 = vpack.c.bf16 %v3450_v62, %v3446_v35  ;;  %4987 = vmatpush1.bf16.msra.mxu1 %v7466_v5  ;;  %v3305_v23 = vadd.f32 %v3304_v46, %v3112_v33  ;;  %v3453_v25 = vmax.f32 %v3303_v7, 0.0  ;;  %v11911_v11 = vld [vmem:[#allocation16_spill] sm:$0xff]  ;;  %v11912_v62 = vld [vmem:[#allocation17_spill] sm:$0xff] }
 0x2c2   : > { %v3115_v19 = vpop.f32.mrf.mxu0  ;;  %4988 = vmatprep.subr.bf16.mxu1 %v7471_v45  ;;  %v7477_v29 = vld [vmem:[%s11518_s3 + $0x3ac] ss:$16 sps:$4 sm:$0xff]   ;;  %v11914_v43 = vld [vmem:[#allocation85_spill] sm:$0xff] }
 0x2c3   : > { %v3308_v27 = vpop.f32.mrf.mxu1  ;;  %v3307_v15 = vadd.f32 %v3306_v18, %v3114_v2  ;;  %v3116_v26 = vadd.f32 %v3115_v19, %v2923_v8  ;;  %4658 = vmatprep.mubr.bf16.mxu1 %v10112_v54  ;;  %v3454_v46 = vmax.f32 %v3305_v23, 0.0  ;;  %v2933_v8 = vadd.f32 %v11913_v36, %v2740_v0  ;;  %v7475_v19 = vld [vmem:[%s11518_s3 + $0x3a8] ss:$16 sps:$4 sm:$0xff]   ;;  %v7480_v23 = vld [vmem:[%s11518_s3 + $0x38c] ss:$16 sps:$4 sm:$0xff]  }
 0x2c4   : > { %v3119_v16 = vpop.f32.mrf.mxu0  ;;  %4566 = vmatmul.mubr.bf16.gmra.mxu0 %v11909_v4  ;;  %4659 = vmatmul.mubr.bf16.gmra.mxu1 %v10107_v21 }
 0x2c5   : > { %v3312_v34 = vpop.f32.mrf.mxu1  ;;  %v3457_v41 = vmax.f32 %v3307_v15, 0.0  ;;  %v3309_v1 = vadd.f32 %v3308_v27, %v3116_v26  ;;  %v3120_v58 = vadd.f32 %v3119_v16, %v11910_v56  ;;  %4575 = vmatprep.mubr.bf16.mxu0 %v11911_v11  ;;  %4989 = vmatpush2.bf16.msra.mxu1 %v7469_v20  ;;  %v11915_v16 = vld [vmem:[#allocation88_spill] sm:$0xff] }
 0x2c6   : > { %v3121_v5 = vpop.f32.mrf.mxu0  ;;  %4990 = vmatprep.subr.bf16.mxu1 %v7474_v30 }
 0x2c7   : > { %v3314_v12 = vpop.f32.mrf.mxu1  ;;  %v10133_v45 = vpack.c.bf16 %v3457_v41, %v3453_v25  ;;  %v3458_v35 = vmax.f32 %v3309_v1, 0.0  ;;  %v3122_v33 = vadd.f32 %v3121_v5, %v11912_v62  ;;  %v3313_v7 = vadd.f32 %v3312_v34, %v3120_v58  ;;  %v11916_v1 = vld [vmem:[#allocation15_spill] sm:$0xff] }
 0x2c8   : > { %v3123_v31 = vpop.f32.mrf.mxu0  ;;  %v2750_v34 = vadd.f32 %v11915_v16, %v9625_v39  ;;  %v11917_v5 = vld [vmem:[#allocation19_spill] sm:$0xff] }
 0x2c9   : > { %v3316_v18 = vpop.f32.mrf.mxu1  ;;  %v3124_v2 = vadd.f32 %v3123_v31, %v11914_v43  ;;  %v10138_v20 = vpack.c.bf16 %v3458_v35, %v3454_v46  ;;  %4991 = vmatpush2.bf16.msra.mxu1 %v7472_v55  ;;  %v3315_v15 = vadd.f32 %v3314_v12, %v3122_v33  ;;  %v3461_v56 = vmax.f32 %v3313_v7, 0.0  ;;  %v11918_v46 = vld [vmem:[#allocation5_spill] sm:$0xff]  ;;  %v7478_v12 = vld [vmem:[%s11518_s3 + $0x388] ss:$16 sps:$4 sm:$0xff]   ;;  %v7483_v33 = vld [vmem:[%s11518_s3 + $0x36c] ss:$16 sps:$4 sm:$0xff]  }
 0x2ca   : > { %v3125_v27 = vpop.f32.mrf.mxu0  ;;  %4992 = vmatprep.subr.bf16.mxu1 %v7477_v29 }
 0x2cb   : > { %v3318_v30 = vpop.f32.mrf.mxu1  ;;  %v3317_v26 = vadd.f32 %v3316_v18, %v3124_v2  ;;  %v3126_v0 = vadd.f32 %v3125_v27, %v2933_v8  ;;  %4668 = vmatprep.mubr.bf16.mxu1 %v10138_v20  ;;  %v3462_v31 = vmax.f32 %v3315_v15, 0.0  ;;  %v11920_v8 = vld [vmem:[#allocation20_spill] sm:$0xff]  ;;  %v11921_v27 = vld [vmem:[#allocation90_spill] sm:$0xff] }
 0x2cc   : > { %v3129_v25 = vpop.f32.mrf.mxu0  ;;  %4576 = vmatmul.mubr.bf16.gmra.mxu0 %v11916_v1  ;;  %4669 = vmatmul.mubr.bf16.gmra.mxu1 %v10133_v45  ;;  %v7481_v15 = vld [vmem:[%s11518_s3 + $0x368] ss:$16 sps:$4 sm:$0xff]  }
 0x2cd   : > { %v3322_v41 = vpop.f32.mrf.mxu1  ;;  %v3465_v58 = vmax.f32 %v3317_v26, 0.0  ;;  %v3319_v55 = vadd.f32 %v3318_v30, %v3126_v0  ;;  %v3130_v29 = vadd.f32 %v3129_v25, %v11917_v5  ;;  %4811 = vmatprep.mubr.bf16.mxu0 %v11918_v46  ;;  %4993 = vmatpush2.bf16.msra.mxu1 %v7475_v19  ;;  %v7493_v19 = vld [vmem:[%s11520_s5 + $0x78] sm:$0xff]   ;;  %v2943_v30 = vadd.f32 %v11921_v27, %v2750_v34 }
 0x2ce   : > { %v3131_v35 = vpop.f32.mrf.mxu0  ;;  %4994 = vmatprep.subr.bf16.mxu1 %v7480_v23  ;;  %v11922_v23 = vld [vmem:[#allocation91_spill] sm:$0xff]  ;;  %6740 = vmatprep.subr.bf16.mxu0 %v7493_v19  ;;  %v7494_v34 = vld [vmem:[%s11520_s5 + $0x38] sm:$0xff]  }
 0x2cf   : > { %v3324_v62 = vpop.f32.mrf.mxu1  ;;  %v10159_v18 = vpack.c.bf16 %v3465_v58, %v3461_v56  ;;  %v3466_v36 = vmax.f32 %v3319_v55, 0.0  ;;  %v3132_v7 = vadd.f32 %v3131_v35, %v11920_v8  ;;  %v3323_v26 = vadd.f32 %v3322_v41, %v3130_v29  ;;  %v7486_v58 = vld [vmem:[%s11518_s3 + $0x34c] ss:$16 sps:$4 sm:$0xff]   ;;  %v7484_v19 = vld [vmem:[%s11518_s3 + $0x348] ss:$16 sps:$4 sm:$0xff]  }
 0x2d0   : > { %v3133_v43 = vpop.f32.mrf.mxu0  ;;  %v11923_v29 = vld [vmem:[#allocation92_spill] sm:$0xff] }
 0x2d1   : > { %11919 = vst [vmem:[#allocation48_spill] sm:$0xff] %v10159_v18  ;;  %v3326_v2 = vpop.f32.mrf.mxu1  ;;  %v3134_v0 = vadd.f32 %v3133_v43, %v11922_v23  ;;  %v10167_v16 = vpack.c.bf16 %v3466_v36, %v3462_v31  ;;  %4995 = vmatpush2.bf16.msra.mxu1 %v7478_v12  ;;  %v3325_v41 = vadd.f32 %v3324_v62, %v3132_v7  ;;  %v7495_v31 = vld [vmem:[%s11520_s5 + $0x70] sm:$0xff]   ;;  %v3469_v36 = vmax.f32 %v3323_v26, 0.0  ;;  %v11925_v7 = vld [vmem:[#allocation21_spill] sm:$0xff]  ;;  %v7489_v23 = vld [vmem:[%s11518_s3 + $0x32c] ss:$16 sps:$4 sm:$0xff]  }
 0x2d2   : > { %v3135_v25 = vpop.f32.mrf.mxu0  ;;  %4996 = vmatprep.subr.bf16.mxu1 %v7483_v33  ;;  %v2760_v46 = vadd.f32 %v11923_v29, %v9625_v39  ;;  %v11924_v33 = vld [vmem:[#allocation63_spill] sm:$0xff] }
 0x2d3   : > { %v3328_v56 = vpop.f32.mrf.mxu1  ;;  %v3327_v55 = vadd.f32 %v3326_v2, %v3134_v0  ;;  %v3136_v5 = vadd.f32 %v3135_v25, %v2943_v30  ;;  %4678 = vmatprep.mubr.bf16.mxu1 %v10167_v16  ;;  %v11926_v2 = vld [vmem:[#allocation64_spill] sm:$0xff]  ;;  %v7496_v26 = vld [vmem:[%s11520_s5 + $0x30] sm:$0xff]   ;;  %v3470_v0 = vmax.f32 %v3325_v41, 0.0 }
 0x2d4   : > { %v3139_v12 = vpop.f32.mrf.mxu0  ;;  %4679 = vmatmul.mubr.bf16.gmra.mxu1 %v10159_v18  ;;  %4812 = vmatmul.mubr.bf16.vlgmr.msra.gmra.mxu0 %v11924_v33  ;;  %v7487_v41 = vld [vmem:[%s11518_s3 + $0x328] ss:$16 sps:$4 sm:$0xff]  }
 0x2d5   : > { %v3332_v35 = vpop.f32.mrf.mxu1  ;;  %v3473_v8 = vmax.f32 %v3327_v55, 0.0  ;;  %v3329_v62 = vadd.f32 %v3328_v56, %v3136_v5  ;;  %v3140_v43 = vadd.f32 %v3139_v12, %v11925_v7  ;;  %4821 = vmatprep.mubr.bf16.mxu0 %v11926_v2  ;;  %4997 = vmatpush2.bf16.msra.mxu1 %v7481_v15  ;;  %v11927_v56 = vld [vmem:[#allocation22_spill] sm:$0xff]  ;;  %v11928_v12 = vld [vmem:[#allocation23_spill] sm:$0xff]  ;;  %v11929_v7 = vld [vmem:[#allocation24_spill] sm:$0xff] }
 0x2d6   : > { %v3141_v27 = vpop.f32.mrf.mxu0  ;;  %4998 = vmatprep.subr.bf16.mxu1 %v7486_v58  ;;  %6741 = vmatpush3.bf16.msra.mxu0 %v7494_v34  ;;  %v7497_v58 = vld [vmem:[%s11520_s5 + $0x68] sm:$0xff]   ;;  %v2953_v33 = vadd.f32 %v11928_v12, %v2760_v46 }
 0x2d7   : > { %v3334_v30 = vpop.f32.mrf.mxu1  ;;  %v10197_v25 = vpack.c.bf16 %v3473_v8, %v3469_v36  ;;  %v3474_v15 = vmax.f32 %v3329_v62, 0.0  ;;  %v3142_v55 = vadd.f32 %v3141_v27, %v11927_v56  ;;  %6742 = vmatprep.subr.bf16.mxu0 %v7495_v31  ;;  %v3333_v34 = vadd.f32 %v3332_v35, %v3140_v43  ;;  %v7492_v8 = vld [vmem:[%s11518_s3 + $0x30c] ss:$16 sps:$4 sm:$0xff]  }
 0x2d8   : > { %v3143_v5 = vpop.f32.mrf.mxu0  ;;  %v7498_v46 = vld [vmem:[%s11520_s5 + $0x28] sm:$0xff]  }
 0x2d9   : > { %v3336_v29 = vpop.f32.mrf.mxu1  ;;  %v3144_v2 = vadd.f32 %v3143_v5, %v11929_v7  ;;  %v10205_v18 = vpack.c.bf16 %v3474_v15, %v3470_v0  ;;  %4999 = vmatpush2.bf16.msra.mxu1 %v7484_v19  ;;  %v3335_v35 = vadd.f32 %v3334_v30, %v3142_v55  ;;  %v2770_v19 = vadd.f32 %v9836_v6, %v9625_v39  ;;  %v11930_v0 = vld [vmem:[#allocation6_spill] sm:$0xff]  ;;  %v11931_v55 = vld [vmem:[#allocation96_spill] sm:$0xff] }
 0x2da   : > { %v3145_v36 = vpop.f32.mrf.mxu0  ;;  %5000 = vmatprep.subr.bf16.mxu1 %v7489_v23  ;;  %6743 = vmatpush3.bf16.msra.mxu0 %v7496_v26  ;;  %v7499_v26 = vld [vmem:[%s11520_s5 + $0x60] sm:$0xff]   ;;  %v3477_v15 = vmax.f32 %v3333_v34, 0.0  ;;  %v7490_v6 = vld [vmem:[%s11518_s3 + $0x308] ss:$16 sps:$4 sm:$0xff]  }
 0x2db   : > { %v3338_v31 = vpop.f32.mrf.mxu1  ;;  %v3337_v62 = vadd.f32 %v3336_v29, %v3144_v2  ;;  %v3146_v43 = vadd.f32 %v3145_v36, %v2953_v33  ;;  %4688 = vmatprep.mubr.bf16.mxu1 %v10205_v18  ;;  %6744 = vmatprep.subr.bf16.mxu0 %v7497_v58  ;;  %v11932_v29 = vld [vmem:[#allocation8_spill] sm:$0xff]  ;;  %v7500_v33 = vld [vmem:[%s11520_s5 + $0x20] sm:$0xff]   ;;  %v3478_v34 = vmax.f32 %v3335_v35, 0.0 }
 0x2dc   : > { %v3149_v27 = vpop.f32.mrf.mxu0  ;;  %4689 = vmatmul.mubr.bf16.gmra.mxu1 %v10197_v25  ;;  %4822 = vmatmul.mubr.bf16.gmra.mxu0 %v11930_v0  ;;  %v11933_v36 = vld [vmem:[#allocation97_spill] sm:$0xff]  ;;  %v11935_v0 = vld [vmem:[#allocation26_spill] sm:$0xff] }
 0x2dd   : > { %v3342_v23 = vpop.f32.mrf.mxu1  ;;  %v3481_v30 = vmax.f32 %v3337_v62, 0.0  ;;  %v3339_v56 = vadd.f32 %v3338_v31, %v3146_v43  ;;  %v3150_v5 = vadd.f32 %v3149_v27, %v11931_v55  ;;  %4831 = vmatprep.mubr.bf16.mxu0 %v11932_v29  ;;  %5001 = vmatpush2.bf16.msra.mxu1 %v7487_v41  ;;  %v7501_v43 = vld [vmem:[%s11520_s5 + $0x58] sm:$0xff]   ;;  %v11934_v27 = vld [vmem:[#allocation25_spill] sm:$0xff] }
 0x2de   : > { %v3151_v58 = vpop.f32.mrf.mxu0  ;;  %5002 = vmatprep.subr.bf16.mxu1 %v7492_v8  ;;  %6745 = vmatpush3.bf16.msra.mxu0 %v7498_v46  ;;  %v2963_v8 = vadd.f32 %v11934_v27, %v2770_v19  ;;  %v2780_v19 = vadd.f32 %v9863_v40, %v9625_v39  ;;  %v7504_v40 = vld [vmem:[%s11520_s5 + $0x10] sm:$0xff]  }
 0x2df   : > { %v3344_v12 = vpop.f32.mrf.mxu1  ;;  %v10232_v7 = vpack.c.bf16 %v3481_v30, %v3477_v15  ;;  %v3482_v2 = vmax.f32 %v3339_v56, 0.0  ;;  %v3152_v31 = vadd.f32 %v3151_v58, %v11933_v36  ;;  %6746 = vmatprep.subr.bf16.mxu0 %v7499_v26  ;;  %v3343_v46 = vadd.f32 %v3342_v23, %v3150_v5  ;;  %v7502_v26 = vld [vmem:[%s11520_s5 + $0x18] sm:$0xff]   ;;  %v11937_v36 = vld [vmem:[#allocation27_spill] sm:$0xff] }
 0x2e0   : > { %v3153_v41 = vpop.f32.mrf.mxu0 }
 0x2e1   : > { %v3346_v62 = vpop.f32.mrf.mxu1  ;;  %v3154_v55 = vadd.f32 %v3153_v41, %v11935_v0  ;;  %v10240_v29 = vpack.c.bf16 %v3482_v2, %v3478_v34  ;;  %5003 = vmatpush2.bf16.msra.mxu1 %v7490_v6  ;;  %v3345_v30 = vadd.f32 %v3344_v12, %v3152_v31  ;;  %v11936_v6 = vld [vmem:[#allocation7_spill] sm:$0xff]  ;;  %v3485_v34 = vmax.f32 %v3343_v46, 0.0  ;;  %v11938_v41 = vld [vmem:[#allocation69_spill] sm:$0xff] }
 0x2e2   : > { %v3155_v35 = vpop.f32.mrf.mxu0  ;;  %6747 = vmatpush3.bf16.msra.mxu0 %v7500_v33  ;;  %v7503_v33 = vld [vmem:[%s11520_s5 + $0x50] sm:$0xff]  }
 0x2e3   : > { %v3348_v15 = vpop.f32.mrf.mxu1  ;;  %v3347_v56 = vadd.f32 %v3346_v62, %v3154_v55  ;;  %v3156_v58 = vadd.f32 %v3155_v35, %v2963_v8  ;;  %4698 = vmatprep.mubr.bf16.mxu1 %v10240_v29  ;;  %6748 = vmatprep.subr.bf16.mxu0 %v7501_v43  ;;  %v3486_v27 = vmax.f32 %v3345_v30, 0.0  ;;  %v11940_v55 = vld [vmem:[#allocation28_spill] sm:$0xff] }
 0x2e4   : > { %v3159_v23 = vpop.f32.mrf.mxu0  ;;  %4699 = vmatmul.mubr.bf16.gmra.mxu1 %v10232_v7  ;;  %4832 = vmatmul.mubr.bf16.gmra.mxu0 %v11936_v6  ;;  %v11942_v6 = vld [vmem:[#allocation30_spill] sm:$0xff] }
 0x2e5   : > { %v3352_v5 = vpop.f32.mrf.mxu1  ;;  %v3489_v12 = vmax.f32 %v3347_v56, 0.0  ;;  %v3349_v2 = vadd.f32 %v3348_v15, %v3156_v58  ;;  %v3160_v31 = vadd.f32 %v3159_v23, %v11937_v36  ;;  %4841 = vmatprep.mubr.bf16.mxu0 %v11938_v41  ;;  %v7505_v56 = vld [vmem:[%s11520_s5 + $0x48] sm:$0xff]   ;;  %v11941_v58 = vld [vmem:[#allocation29_spill] sm:$0xff] }
 0x2e6   : > { %v3161_v62 = vpop.f32.mrf.mxu0  ;;  %6749 = vmatpush3.bf16.msra.mxu0 %v7502_v26  ;;  %v2973_v23 = vadd.f32 %v11941_v58, %v2780_v19  ;;  %v2790_v19 = vadd.f32 %v9890_v52, %v9625_v39  ;;  %v7508_v52 = vld [vmem:[%s11520_s5] sm:$0xff]  }
 0x2e7   : > { %v3354_v43 = vpop.f32.mrf.mxu1  ;;  %v10258_v8 = vpack.c.bf16 %v3489_v12, %v3485_v34  ;;  %v3490_v0 = vmax.f32 %v3349_v2, 0.0  ;;  %v3162_v35 = vadd.f32 %v3161_v62, %v11940_v55  ;;  %6750 = vmatprep.subr.bf16.mxu0 %v7503_v33  ;;  %v3353_v26 = vadd.f32 %v3352_v5, %v3160_v31  ;;  %v7506_v33 = vld [vmem:[%s11520_s5 + $0x8] sm:$0xff]  }
 0x2e8   : > { %v3163_v46 = vpop.f32.mrf.mxu0 }
 0x2e9   : > { %11939 = vst [vmem:[#allocation49_spill] sm:$0xff] %v10258_v8  ;;  %v3356_v15 = vpop.f32.mrf.mxu1  ;;  %v3164_v36 = vadd.f32 %v3163_v46, %v11942_v6  ;;  %v10266_v41 = vpack.c.bf16 %v3490_v0, %v3486_v27  ;;  %v3355_v12 = vadd.f32 %v3354_v43, %v3162_v35  ;;  %v11944_v27 = vld [vmem:[#allocation67_spill] sm:$0xff]  ;;  %v3493_v0 = vmax.f32 %v3353_v26, 0.0  ;;  %v11945_v46 = vld [vmem:[#allocation9_spill] sm:$0xff] }
 0x2ea   : > { %v3165_v30 = vpop.f32.mrf.mxu0  ;;  %6751 = vmatpush3.bf16.msra.mxu0 %v7504_v40  ;;  %v7507_v40 = vld [vmem:[%s11520_s5 + $0x40] sm:$0xff]  }
 0x2eb   : > { %11943 = vst [vmem:[#allocation51_spill] sm:$0xff] %v10266_v41  ;;  %v3358_v34 = vpop.f32.mrf.mxu1  ;;  %v3357_v2 = vadd.f32 %v3356_v15, %v3164_v36  ;;  %v3166_v62 = vadd.f32 %v3165_v30, %v2973_v23  ;;  %4708 = vmatprep.mubr.bf16.mxu1 %v10266_v41  ;;  %6752 = vmatprep.subr.bf16.mxu0 %v7505_v56  ;;  %v3494_v58 = vmax.f32 %v3355_v12, 0.0  ;;  %v11946_v36 = vld [vmem:[#allocation31_spill] sm:$0xff] }
 0x2ec   : > { %v3169_v5 = vpop.f32.mrf.mxu0  ;;  %4709 = vmatmul.mubr.bf16.gmra.mxu1 %v10258_v8  ;;  %4842 = vmatmul.mubr.bf16.gmra.mxu0 %v11944_v27 }
 0x2ed   : > { %v3362_v31 = vpop.f32.mrf.mxu1  ;;  %v3497_v43 = vmax.f32 %v3357_v2, 0.0  ;;  %v3359_v55 = vadd.f32 %v3358_v34, %v3166_v62  ;;  %v3170_v35 = vadd.f32 %v3169_v5, %v9881_v51  ;;  %4851 = vmatprep.mubr.bf16.mxu0 %v11945_v46  ;;  %v11947_v2 = vld [vmem:[#allocation32_spill] sm:$0xff]  ;;  %v11948_v5 = vld [vmem:[#allocation33_spill] sm:$0xff] }
 0x2ee   : > { %v3171_v15 = vpop.f32.mrf.mxu0  ;;  %6753 = vmatpush3.bf16.msra.mxu0 %v7506_v33  ;;  %v2983_v51 = vadd.f32 %v11947_v2, %v2790_v19  ;;  %v11949_v19 = vld [vmem:[#allocation70_spill] sm:$0xff] }
 0x2ef   : > { %v3364_v56 = vpop.f32.mrf.mxu1  ;;  %v10284_v23 = vpack.c.bf16 %v3497_v43, %v3493_v0  ;;  %v3498_v6 = vmax.f32 %v3359_v55, 0.0  ;;  %v3172_v30 = vadd.f32 %v3171_v15, %v11946_v36  ;;  %6754 = vmatprep.subr.bf16.mxu0 %v7507_v40  ;;  %v3363_v62 = vadd.f32 %v3362_v31, %v3170_v35 }
 0x2f0   : > { %v3173_v26 = vpop.f32.mrf.mxu0  ;;  %v2800_v40 = vadd.f32 %v9917_v10, %v9625_v39 }
 0x2f1   : > { %v3366_v34 = vpop.f32.mrf.mxu1  ;;  %v3174_v27 = vadd.f32 %v3173_v26, %v11948_v5  ;;  %v10289_v46 = vpack.c.bf16 %v3498_v6, %v3494_v58  ;;  %v3365_v41 = vadd.f32 %v3364_v56, %v3172_v30  ;;  %v3501_v31 = vmax.f32 %v3363_v62, 0.0  ;;  %v7509_v56 = vld [vmem:[%s11520_s5 + $0xf8] sm:$0xff]  }
 0x2f2   : > { %v3175_v33 = vpop.f32.mrf.mxu0  ;;  %6755 = vmatpush3.bf16.msra.mxu0 %v7508_v52  ;;  %v11950_v52 = vld [vmem:[#allocation71_spill] sm:$0xff]  ;;  %6852 = vmatprep.subr.bf16.mxu1 %v7509_v56 }
 0x2f3   : > { %v3368_v8 = vpop.f32.mrf.mxu1  ;;  %v3367_v12 = vadd.f32 %v3366_v34, %v3174_v27  ;;  %v3176_v0 = vadd.f32 %v3175_v33, %v2983_v51  ;;  %4718 = vmatprep.mubr.bf16.mxu1 %v10289_v46  ;;  %v3502_v10 = vmax.f32 %v3365_v41, 0.0  ;;  %v11951_v34 = vld [vmem:[#allocation34_spill] sm:$0xff]  ;;  %v11953_v27 = vld [vmem:[#allocation36_spill] sm:$0xff] }
 0x2f4   : > { %v3179_v43 = vpop.f32.mrf.mxu0  ;;  %4719 = vmatmul.mubr.bf16.gmra.mxu1 %v10284_v23  ;;  %4852 = vmatmul.mubr.bf16.gmra.mxu0 %v11949_v19 }
 0x2f5   : > { %v3372_v55 = vpop.f32.mrf.mxu1  ;;  %v3505_v35 = vmax.f32 %v3367_v12, 0.0  ;;  %v3369_v15 = vadd.f32 %v3368_v8, %v3176_v0  ;;  %v3180_v58 = vadd.f32 %v3179_v43, %v9908_v3  ;;  %4861 = vmatprep.mubr.bf16.mxu0 %v11950_v52  ;;  %v11952_v8 = vld [vmem:[#allocation35_spill] sm:$0xff] }
 0x2f6   : > { %v3181_v6 = vpop.f32.mrf.mxu0  ;;  %v2993_v5 = vadd.f32 %v11952_v8, %v2800_v40  ;;  %v11954_v40 = vld [vmem:[#allocation10_spill] sm:$0xff] }
 0x2f7   : > { %v3374_v36 = vpop.f32.mrf.mxu1  ;;  %v10301_v30 = vpack.c.bf16 %v3505_v35, %v3501_v31  ;;  %v3506_v26 = vmax.f32 %v3369_v15, 0.0  ;;  %v3182_v2 = vadd.f32 %v3181_v6, %v11951_v34  ;;  %v3373_v3 = vadd.f32 %v3372_v55, %v3180_v58 }
 0x2f8   : > { %v3183_v51 = vpop.f32.mrf.mxu0  ;;  %v2810_v31 = vadd.f32 %v9944_v24, %v9625_v39  ;;  %v11957_v24 = vld [vmem:[#allocation37_spill] sm:$0xff] }
 0x2f9   : > { %v3376_v62 = vpop.f32.mrf.mxu1  ;;  %v3184_v33 = vadd.f32 %v3183_v51, %v11953_v27  ;;  %v10306_v12 = vpack.c.bf16 %v3506_v26, %v3502_v10  ;;  %v3375_v19 = vadd.f32 %v3374_v36, %v3182_v2  ;;  %v3509_v55 = vmax.f32 %v3373_v3, 0.0  ;;  %v11955_v10 = vld [vmem:[#allocation12_spill] sm:$0xff]  ;;  %v11958_v27 = vld [vmem:[#allocation38_spill] sm:$0xff]  ;;  %v11959_v3 = vld [vmem:[#allocation39_spill] sm:$0xff] }
 0x2fa   : > { %v3185_v0 = vpop.f32.mrf.mxu0 }
 0x2fb   : > { %v3378_v43 = vpop.f32.mrf.mxu1  ;;  %v3377_v52 = vadd.f32 %v3376_v62, %v3184_v33  ;;  %v3186_v41 = vadd.f32 %v3185_v0, %v2993_v5  ;;  %4728 = vmatprep.mubr.bf16.mxu1 %v10306_v12  ;;  %v3510_v34 = vmax.f32 %v3375_v19, 0.0  ;;  %v3003_v33 = vadd.f32 %v11958_v27, %v2810_v31  ;;  %v11961_v19 = vld [vmem:[#allocation42_spill] sm:$0xff]  ;;  %v11962_v31 = vld [vmem:[#allocation11_spill] sm:$0xff] }
 0x2fc   : > { %v3189_v35 = vpop.f32.mrf.mxu0  ;;  %4729 = vmatmul.mubr.bf16.gmra.mxu1 %v10301_v30  ;;  %4862 = vmatmul.mubr.bf16.gmra.mxu0 %v11954_v40 }
 0x2fd   : > { %v3382_v15 = vpop.f32.mrf.mxu1  ;;  %v3513_v58 = vmax.f32 %v3377_v52, 0.0  ;;  %v3379_v56 = vadd.f32 %v3378_v43, %v3186_v41  ;;  %v3190_v6 = vadd.f32 %v3189_v35, %v9935_v32  ;;  %4871 = vmatprep.mubr.bf16.mxu0 %v11955_v10 }
 0x2fe   : > { %v3191_v36 = vpop.f32.mrf.mxu0 }
 0x2ff   : > { %v3384_v26 = vpop.f32.mrf.mxu1  ;;  %v10315_v2 = vpack.c.bf16 %v3513_v58, %v3509_v55  ;;  %v3514_v51 = vmax.f32 %v3379_v56, 0.0  ;;  %v3192_v62 = vadd.f32 %v3191_v36, %v11957_v24  ;;  %v3383_v0 = vadd.f32 %v3382_v15, %v3190_v6  ;;  %v11964_v24 = vld [vmem:[#allocation76_spill] sm:$0xff] }
 0x300   : > { %v3193_v8 = vpop.f32.mrf.mxu0  ;;  %v2820_v55 = vadd.f32 %v11961_v19, %v9625_v39  ;;  %v11966_v19 = vld [vmem:[#allocation43_spill] sm:$0xff] }
 0x301   : > { %11956 = vst [vmem:[#allocation52_spill] sm:$0xff] %v10315_v2  ;;  %v3386_v5 = vpop.f32.mrf.mxu1  ;;  %v3194_v52 = vadd.f32 %v3193_v8, %v11959_v3  ;;  %v10320_v43 = vpack.c.bf16 %v3514_v51, %v3510_v34  ;;  %v3385_v35 = vadd.f32 %v3384_v26, %v3192_v62  ;;  %v3517_v15 = vmax.f32 %v3383_v0, 0.0  ;;  %v11963_v34 = vld [vmem:[#allocation40_spill] sm:$0xff] }
 0x302   : > { %v3195_v32 = vpop.f32.mrf.mxu0  ;;  %v11967_v0 = vld [vmem:[#allocation44_spill] sm:$0xff] }
 0x303   : > { %11960 = vst [vmem:[#allocation53_spill] sm:$0xff] %v10320_v43  ;;  %v3388_v41 = vpop.f32.mrf.mxu1  ;;  %v3387_v40 = vadd.f32 %v3386_v5, %v3194_v52  ;;  %v3196_v10 = vadd.f32 %v3195_v32, %v3003_v33  ;;  %4738 = vmatprep.mubr.bf16.mxu1 %v10320_v43  ;;  %v3518_v8 = vmax.f32 %v3385_v35, 0.0  ;;  %v11965_v33 = vld [vmem:[#allocation41_spill] sm:$0xff]  ;;  %v2830_v35 = vadd.f32 %v9992_v13, %v9625_v39 }
 0x304   : > { %v3199_v58 = vpop.f32.mrf.mxu0  ;;  %4739 = vmatmul.mubr.bf16.gmra.mxu1 %v10315_v2  ;;  %4872 = vmatmul.mubr.bf16.gmra.mxu0 %v11962_v31  ;;  %v3013_v2 = vadd.f32 %v11966_v19, %v2820_v55  ;;  %v11968_v55 = vld [vmem:[#allocation74_spill] sm:$0xff]  ;;  %v11970_v13 = vld [vmem:[#allocation45_spill] sm:$0xff] }
 0x305   : > { %v3392_v56 = vpop.f32.mrf.mxu1  ;;  %v3521_v6 = vmax.f32 %v3387_v40, 0.0  ;;  %v3389_v36 = vadd.f32 %v3388_v41, %v3196_v10  ;;  %v3200_v51 = vadd.f32 %v3199_v58, %v11963_v34  ;;  %4881 = vmatprep.mubr.bf16.mxu0 %v11964_v24  ;;  %v11971_v19 = vld [vmem:[#allocation46_spill] sm:$0xff] }
 0x306   : > { %v3201_v26 = vpop.f32.mrf.mxu0 }
 0x307   : > { %v3394_v62 = vpop.f32.mrf.mxu1  ;;  %v10329_v5 = vpack.c.bf16 %v3521_v6, %v3517_v15  ;;  %v3522_v27 = vmax.f32 %v3389_v36, 0.0  ;;  %v3202_v3 = vadd.f32 %v3201_v26, %v11965_v33  ;;  %v3393_v31 = vadd.f32 %v3392_v56, %v3200_v51 }
 0x308   : > { %v3203_v52 = vpop.f32.mrf.mxu0 }
 0x309   : > { %v3396_v32 = vpop.f32.mrf.mxu1  ;;  %v3204_v40 = vadd.f32 %v3203_v52, %v11967_v0  ;;  %v10334_v41 = vpack.c.bf16 %v3522_v27, %v3518_v8  ;;  %v3395_v34 = vadd.f32 %v3394_v62, %v3202_v3  ;;  %v3525_v56 = vmax.f32 %v3393_v31, 0.0  ;;  %v11969_v8 = vld [vmem:[#allocation13_spill] sm:$0xff]  ;;  %v11972_v31 = vld [vmem:[#allocation47_spill] sm:$0xff] }
 0x30a   : > { %v3205_v10 = vpop.f32.mrf.mxu0  ;;  %v3023_v0 = vadd.f32 %v11971_v19, %v2830_v35 }
 0x30b   : > { %v3398_v58 = vpop.f32.mrf.mxu1  ;;  %v3397_v24 = vadd.f32 %v3396_v32, %v3204_v40  ;;  %v3206_v43 = vadd.f32 %v3205_v10, %v3013_v2  ;;  %4748 = vmatprep.mubr.bf16.mxu1 %v10334_v41  ;;  %v3526_v27 = vmax.f32 %v3395_v34, 0.0 }
 0x30c   : > { %v3209_v15 = vpop.f32.mrf.mxu0  ;;  %4749 = vmatmul.mubr.bf16.gmra.mxu1 %v10329_v5  ;;  %4882 = vmatmul.mubr.bf16.gmra.mxu0 %v11968_v55 }
 0x30d   : > { %v3402_v6 = vpop.f32.mrf.mxu1  ;;  %v3529_v36 = vmax.f32 %v3397_v24, 0.0  ;;  %v3399_v51 = vadd.f32 %v3398_v58, %v3206_v43  ;;  %v3210_v26 = vadd.f32 %v3209_v15, %v9986_v42  ;;  %4891 = vmatprep.mubr.bf16.mxu0 %v11969_v8 }
 0x30e   : > { %v3211_v62 = vpop.f32.mrf.mxu0 }
 0x30f   : > { %v3404_v2 = vpop.f32.mrf.mxu1  ;;  %v10343_v33 = vpack.c.bf16 %v3529_v36, %v3525_v56  ;;  %v3530_v3 = vmax.f32 %v3399_v51, 0.0  ;;  %v3212_v39 = vadd.f32 %v3211_v62, %v11970_v13  ;;  %v3403_v40 = vadd.f32 %v3402_v6, %v3210_v26  ;;  %v11973_v56 = vld [vmem:[#allocation77_spill] sm:$0xff]  ;;  %v11974_v51 = vld [vmem:[#allocation14_spill] sm:$0xff] }
 0x310   : > { %v3213_v52 = vpop.f32.mrf.mxu0 }
 0x311   : > { %v3406_v32 = vpop.f32.mrf.mxu1  ;;  %v3214_v10 = vadd.f32 %v3213_v52, %v11972_v31  ;;  %v10348_v43 = vpack.c.bf16 %v3530_v3, %v3526_v27  ;;  %v3405_v58 = vadd.f32 %v3404_v2, %v3212_v39  ;;  %v3533_v36 = vmax.f32 %v3403_v40, 0.0  ;;  %v7511_v40 = vld [vmem:[%s11520_s5 + $0xf0] sm:$0xff]  }
 0x312   : > { %v3215_v42 = vpop.f32.mrf.mxu0 }
 0x313   : > { %v3407_v24 = vadd.f32 %v3406_v32, %v3214_v10  ;;  %v3216_v15 = vadd.f32 %v3215_v42, %v3023_v0  ;;  %4758 = vmatprep.mubr.bf16.mxu1 %v10348_v43  ;;  %v3408_v34 = vpop.f32.mrf.mxu1  ;;  %v3534_v8 = vmax.f32 %v3405_v58, 0.0  ;;  %v7510_v0 = vld [vmem:[%s11520_s5 + $0xb8] sm:$0xff]   ;;  %v7516_v58 = vld [vmem:[%s11520_s5 + $0xa0] sm:$0xff]  }
 0x314   : > { %v10351_v55 = vpop.f32.mrf.mxu0  ;;  %4759 = vmatmul.mubr.bf16.gmra.mxu1 %v10343_v33  ;;  %4892 = vmatmul.mubr.bf16.gmra.mxu0 %v11973_v56 }
 0x315   : > { %v3537_v35 = vmax.f32 %v3407_v24, 0.0  ;;  %v3409_v6 = vadd.f32 %v3408_v34, %v3216_v15  ;;  %4901 = vmatprep.mubr.bf16.mxu0 %v11974_v51  ;;  %v11976_v51 = vld [vmem:[#allocation48_spill] sm:$0xff] }
 0x316   : > { %v10356_v26 = vpop.f32.mrf.mxu0 }
 0x317   : > { %v10358_v62 = vpack.c.bf16 %v3537_v35, %v3533_v36  ;;  %v3538_v2 = vmax.f32 %v3409_v6, 0.0 }
 0x318   : > { %v10360_v27 = vpop.f32.mrf.mxu0 }
 0x319   : > { %v10362_v3 = vpack.c.bf16 %v3538_v2, %v3534_v8 }
 0x31a   : > { %v10364_v13 = vpop.f32.mrf.mxu0 }
 0x31b   : > { %4768 = vmatprep.mubr.bf16.mxu1 %v10362_v3 }
 0x31c   : > { %v10367_v39 = vpop.f32.mrf.mxu0  ;;  %4769 = vmatmul.mubr.bf16.gmra.mxu1 %v10358_v62  ;;  %4902 = vmatmul.mubr.bf16.gmra.mxu0 %v9431_v53 }
 0x31d   : > { %4911 = vmatprep.mubr.bf16.mxu0 %v9478_v38  ;;  %5004 = vmatprep.mubr.bf16.mxu1 %v10011_v63  ;;  %v7512_v38 = vld [vmem:[%s11520_s5 + $0xb0] sm:$0xff]   ;;  %v7513_v63 = vld [vmem:[%s11520_s5 + $0xe8] sm:$0xff]  }
 0x31e   : > { %v10373_v52 = vpop.f32.mrf.mxu0 }
 0x320   : > { %v10375_v32 = vpop.f32.mrf.mxu0 }
 0x322   : > { %v10377_v19 = vpop.f32.mrf.mxu0 }
 0x324   : > { %v10385_v31 = vpop.f32.mrf.mxu0  ;;  %4912 = vmatmul.mubr.bf16.gmra.mxu0 %v9468_v17  ;;  %5005 = vmatmul.mubr.bf16.vlgmr.msra.gmra.mxu1 %v10007_v59  ;;  %v7515_v59 = vld [vmem:[%s11520_s5 + $0xe0] sm:$0xff]  }
 0x325   : > { %4921 = vmatprep.mubr.bf16.mxu0 %v9515_v28  ;;  %5014 = vmatprep.mubr.bf16.mxu1 %v10035_v61  ;;  %v7514_v28 = vld [vmem:[%s11520_s5 + $0xa8] sm:$0xff]  }
 0x326   : > { %v10391_v53 = vpop.f32.mrf.mxu0  ;;  %6853 = vmatpush3.bf16.msra.mxu1 %v7510_v0 }
 0x327   : > { %6854 = vmatprep.subr.bf16.mxu1 %v7511_v40 }
 0x328   : > { %v10399_v10 = vpop.f32.mrf.mxu0 }
 0x32a   : > { %v10401_v17 = vpop.f32.mrf.mxu0  ;;  %6855 = vmatpush3.bf16.msra.mxu1 %v7512_v38  ;;  %v10510_v38 = vld [vmem:[%s11519_s4] sm:$0xf] }
 0x32b   : > { %6856 = vmatprep.subr.bf16.mxu1 %v7513_v63  ;;  %11981 = vst [vmem:[#allocation102_spill] sm:$0xff] %v10510_v38 }
 0x32c   : > { %v10409_v61 = vpop.f32.mrf.mxu0  ;;  %4922 = vmatmul.mubr.bf16.gmra.mxu0 %v9505_v60  ;;  %5015 = vmatmul.mubr.bf16.gmra.mxu1 %v10031_v44  ;;  %v7518_v44 = vld [vmem:[%s11520_s5 + $0x98] sm:$0xff]  }
 0x32d   : > { %4931 = vmatprep.mubr.bf16.mxu0 %v9549_v48  ;;  %5024 = vmatprep.mubr.bf16.mxu1 %v10059_v14  ;;  %v7517_v48 = vld [vmem:[%s11520_s5 + $0xd8] sm:$0xff]  }
 0x32e   : > { %v10415_v42 = vpop.f32.mrf.mxu0  ;;  %6857 = vmatpush3.bf16.msra.mxu1 %v7514_v28  ;;  %v11983_v28 = vld [vmem:[#allocation50_spill] sm:$0xff] }
 0x32f   : > { %6858 = vmatprep.subr.bf16.mxu1 %v7515_v59  ;;  %v11984_v59 = vsub.s32 1, %v11983_v28 }
 0x330   : > { %v10420_v24 = vpop.f32.mrf.mxu0 }
 0x332   : > { %v10422_v15 = vpop.f32.mrf.mxu0  ;;  %6859 = vmatpush3.bf16.msra.mxu1 %v7516_v58  ;;  %v10517_v58 = vrot.slane %v10510_v38, %v11984_v59 }
 0x333   : > { %6860 = vmatprep.subr.bf16.mxu1 %v7517_v48 }
 0x334   : > { %v10424_v60 = vpop.f32.mrf.mxu0  ;;  %4932 = vmatmul.mubr.bf16.gmra.mxu0 %v9539_v37  ;;  %5025 = vmatmul.mubr.bf16.gmra.mxu1 %v10055_v47  ;;  %v4430_v59 = vadd.f32 %v10356_v26, %v10517_v58 }
 0x335   : > { %4941 = vmatprep.mubr.bf16.mxu0 %v9580_v50  ;;  %5034 = vmatprep.mubr.bf16.mxu1 %v10086_v57 }
 0x336   : > { %v10436_v14 = vpop.f32.mrf.mxu0  ;;  %6861 = vmatpush3.bf16.msra.mxu1 %v7518_v44 }
 0x338   : > { %v10438_v34 = vpop.f32.mrf.mxu0 }
 0x33a   : > { %v10440_v37 = vpop.f32.mrf.mxu0 }
 0x33c   : > { %v10442_v47 = vpop.f32.mrf.mxu0  ;;  %4942 = vmatmul.mubr.bf16.gmra.mxu0 %v9570_v9  ;;  %5035 = vmatmul.mubr.bf16.gmra.mxu1 %v10081_v49  ;;  %v7519_v9 = vld [vmem:[%s11520_s5 + $0xd0] sm:$0xff]  }
 0x33d   : > { %4951 = vmatprep.mubr.bf16.mxu0 %v9617_v22  ;;  %5044 = vmatprep.mubr.bf16.mxu1 %v10112_v54  ;;  %v7520_v22 = vld [vmem:[%s11520_s5 + $0x90] sm:$0xff]  }
 0x33e   : > { %v10448_v50 = vpop.f32.mrf.mxu0  ;;  %6862 = vmatprep.subr.bf16.mxu1 %v7519_v9  ;;  %v11987_v9 = vld [vmem:[#allocation51_spill] sm:$0xff] }
 0x33f   : > { %6863 = vmatpush3.bf16.msra.mxu1 %v7520_v22  ;;  %v7523_v22 = vld [vmem:[%s11520_s5 + $0xc0] sm:$0xff]  }
 0x340   : > { %v10450_v57 = vpop.f32.mrf.mxu0 }
 0x342   : > { %v10452_v56 = vpop.f32.mrf.mxu0 }
 0x344   : > { %v10454_v36 = vpop.f32.mrf.mxu0  ;;  %4952 = vmatmul.mubr.bf16.gmra.mxu0 %v11909_v4  ;;  %5045 = vmatmul.mubr.bf16.gmra.mxu1 %v10107_v21 }
 0x345   : > { %4961 = vmatprep.mubr.bf16.mxu0 %v11911_v11  ;;  %5054 = vmatprep.mubr.bf16.mxu1 %v10138_v20 }
 0x346   : > { %v10466_v49 = vpop.f32.mrf.mxu0 }
 0x348   : > { %v10468_v54 = vpop.f32.mrf.mxu0 }
 0x34a   : > { %v10470_v4 = vpop.f32.mrf.mxu0 }
 0x34c   : > { %v10472_v21 = vpop.f32.mrf.mxu0  ;;  %4962 = vmatmul.mubr.bf16.gmra.mxu0 %v11916_v1  ;;  %5055 = vmatmul.mubr.bf16.gmra.mxu1 %v10133_v45  ;;  %v7521_v1 = vld [vmem:[%s11520_s5 + $0xc8] sm:$0xff]  }
 0x34d   : > { %5064 = vmatprep.mubr.bf16.mxu1 %v10167_v16  ;;  %v7522_v45 = vld [vmem:[%s11520_s5 + $0x88] sm:$0xff]   ;;  %6864 = vmatprep.subr.bf16.mxu1 %v7521_v1 }
 0x34e   : > { %v10477_v11 = vpop.f32.mrf.mxu0  ;;  %6865 = vmatpush3.bf16.msra.mxu1 %v7522_v45 }
 0x34f   : > { %6866 = vmatprep.subr.bf16.mxu1 %v7523_v22 }
 0x350   : > { %v10479_v20 = vpop.f32.mrf.mxu0 }
 0x352   : > { %v10481_v35 = vpop.f32.mrf.mxu0 }
 0x354   : > { %v10483_v6 = vpop.f32.mrf.mxu0  ;;  %5065 = vmatmul.mubr.bf16.gmra.mxu1 %v11976_v51  ;;  %v7524_v51 = vld [vmem:[%s11520_s5 + $0x80] sm:$0xff]  }
 0x355   : > { %11975 = vst [vmem:[#allocation54_spill] sm:$0xff] %v10483_v6  ;;  %5074 = vmatprep.mubr.bf16.mxu1 %v10205_v18  ;;  %6867 = vmatpush3.bf16.msra.mxu1 %v7524_v51 }
 0x356   : > { %v10493_v16 = vpop.f32.mrf.mxu0 }
 0x358   : > { %v10495_v8 = vpop.f32.mrf.mxu0 }
 0x35a   : > { %v10497_v2 = vpop.f32.mrf.mxu0 }
 0x35b   : > { %11977 = vst [vmem:[#allocation55_spill] sm:$0xff] %v10497_v2  ;;  %v11990_v2 = vld [vmem:[#allocation49_spill] sm:$0xff] }
 0x35c   : > { %v10499_v0 = vpop.f32.mrf.mxu0  ;;  %5075 = vmatmul.mubr.bf16.gmra.mxu1 %v10197_v25  ;;  %v11985_v25 = vsub.s32 0, %v11983_v28  ;;  %v4434_v28 = vadd.f32 %v10364_v13, %v10517_v58 }
 0x35d   : > { %11978 = vst [vmem:[#allocation56_spill] sm:$0xff] %v10499_v0  ;;  %5084 = vmatprep.mubr.bf16.mxu1 %v10240_v29 }
 0x35e   : > { %v10503_v18 = vpop.f32.mrf.mxu0  ;;  %v10522_v29 = vrot.slane %v10510_v38, %v11985_v25 }
 0x35f   : > { %11979 = vst [vmem:[#allocation100_spill] sm:$0xff] %v10503_v18 }
 0x360   : > { %v10505_v40 = vpop.f32.mrf.mxu0  ;;  %v4432_v25 = vadd.f32 %v10360_v27, %v10522_v29 }
 0x361   : > { %11980 = vst [vmem:[#allocation101_spill] sm:$0xff] %v10505_v40 }
 0x362   : > { %v10512_v63 = vpop.f32.mrf.mxu0 }
 0x363   : > { %11982 = vst [vmem:[#allocation57_spill] sm:$0xff] %v10512_v63 }
 0x364   : > { %v10524_v48 = vpop.f32.mrf.mxu0  ;;  %v4620_v44 = vpop.f32.mrf.mxu1  ;;  %5085 = vmatmul.mubr.bf16.gmra.mxu1 %v10232_v7  ;;  %v4428_v7 = vadd.f32 %v10351_v55, %v10522_v29 }
 0x365   : > { %11986 = vst [vmem:[#allocation58_spill] sm:$0xff] %v10524_v48  ;;  %5094 = vmatprep.mubr.bf16.mxu1 %v11987_v9 }
 0x366   : > { %v10534_v1 = vpop.f32.mrf.mxu0  ;;  %v4622_v45 = vpop.f32.mrf.mxu1  ;;  %v4621_v63 = vadd.f32 %v4620_v44, %v4428_v7 }
 0x367   : > { %11988 = vst [vmem:[#allocation59_spill] sm:$0xff] %v10534_v1  ;;  %v4623_v48 = vadd.f32 %v4622_v45, %v4430_v59 }
 0x368   : > { %v10542_v9 = vpop.f32.mrf.mxu0  ;;  %v4624_v38 = vpop.f32.mrf.mxu1  ;;  %v5165_v51 = vmax.f32 %v4621_v63, 0.0 }
 0x369   : > { %11989 = vst [vmem:[#allocation60_spill] sm:$0xff] %v10542_v9  ;;  %v4625_v1 = vadd.f32 %v4624_v38, %v4432_v25  ;;  %v5166_v55 = vmax.f32 %v4623_v48, 0.0  ;;  %v4440_v38 = vadd.f32 %v10373_v52, %v10517_v58 }
 0x36a   : > { %v10546_v0 = vpop.f32.mrf.mxu0  ;;  %v4626_v26 = vpop.f32.mrf.mxu1 }
 0x36b   : > { %v4627_v40 = vadd.f32 %v4626_v26, %v4434_v28  ;;  %v5169_v18 = vmax.f32 %v4625_v1, 0.0  ;;  %v4442_v28 = vadd.f32 %v10375_v32, %v10522_v29  ;;  %v4438_v1 = vadd.f32 %v10367_v39, %v10522_v29 }
 0x36c   : > { %v10548_v27 = vpop.f32.mrf.mxu0  ;;  %v4630_v22 = vpop.f32.mrf.mxu1  ;;  %5095 = vmatmul.mubr.bf16.gmra.mxu1 %v11990_v2 }
 0x36d   : > { %v5170_v9 = vmax.f32 %v4627_v40, 0.0  ;;  %5104 = vmatprep.mubr.bf16.mxu1 %v10289_v46  ;;  %v5293_v45 = vpack.c.bf16 %v5169_v18, %v5165_v51  ;;  %v4444_v46 = vadd.f32 %v10377_v19, %v10517_v58  ;;  %v4631_v59 = vadd.f32 %v4630_v22, %v4438_v1 }
 0x36e   : > { %v10552_v6 = vpop.f32.mrf.mxu0  ;;  %v4632_v13 = vpop.f32.mrf.mxu1  ;;  %v4450_v22 = vadd.f32 %v10391_v53, %v10517_v58 }
 0x36f   : > { %v5294_v44 = vpack.c.bf16 %v5170_v9, %v5166_v55  ;;  %v4633_v63 = vadd.f32 %v4632_v13, %v4440_v38  ;;  %v5173_v19 = vmax.f32 %v4631_v59, 0.0  ;;  %v4452_v13 = vadd.f32 %v10399_v10, %v10522_v29 }
 0x370   : > { %v10560_v2 = vpop.f32.mrf.mxu0  ;;  %v4634_v40 = vpop.f32.mrf.mxu1 }
 0x371   : > { %v4635_v48 = vadd.f32 %v4634_v40, %v4442_v28  ;;  %5652 = vmatprep.mubr.bf16.mxu0 %v5294_v44  ;;  %v5174_v18 = vmax.f32 %v4633_v63, 0.0  ;;  %v4448_v28 = vadd.f32 %v10385_v31, %v10522_v29 }
 0x372   : > { %v10564_v25 = vpop.f32.mrf.mxu0  ;;  %v4636_v52 = vpop.f32.mrf.mxu1  ;;  %5653 = vmatmul.mubr.bf16.vlgmr.msra.gmra.mxu0 %v5293_v45 }
 0x373   : > { %v4637_v32 = vadd.f32 %v4636_v52, %v4444_v46  ;;  %v5177_v7 = vmax.f32 %v4635_v48, 0.0 }
 0x374   : > { %v10566_v9 = vpop.f32.mrf.mxu0  ;;  %v4640_v39 = vpop.f32.mrf.mxu1  ;;  %5105 = vmatmul.mubr.bf16.gmra.mxu1 %v10284_v23 }
 0x375   : > { %v5178_v26 = vmax.f32 %v4637_v32, 0.0  ;;  %5114 = vmatprep.mubr.bf16.mxu1 %v10306_v12  ;;  %v5297_v44 = vpack.c.bf16 %v5177_v7, %v5173_v19  ;;  %v4454_v12 = vadd.f32 %v10401_v17, %v10517_v58  ;;  %v4641_v46 = vadd.f32 %v4640_v39, %v4448_v28  ;;  %v11991_v7 = vld [vmem:[#allocation53_spill] sm:$0xff] }
 0x376   : > { %v10570_v55 = vpop.f32.mrf.mxu0  ;;  %v4642_v51 = vpop.f32.mrf.mxu1  ;;  %v4460_v39 = vadd.f32 %v10415_v42, %v10517_v58  ;;  %v4462_v19 = vadd.f32 %v10420_v24, %v10522_v29  ;;  %v4464_v28 = vadd.f32 %v10422_v15, %v10517_v58 }
 0x377   : > { %v5298_v38 = vpack.c.bf16 %v5178_v26, %v5174_v18  ;;  %v4643_v45 = vadd.f32 %v4642_v51, %v4450_v22  ;;  %v5181_v17 = vmax.f32 %v4641_v46, 0.0  ;;  %v4458_v22 = vadd.f32 %v10409_v61, %v10522_v29 }
 0x378   : > { %v10578_v23 = vpop.f32.mrf.mxu0  ;;  %v4644_v1 = vpop.f32.mrf.mxu1 }
 0x379   : > { %v4645_v40 = vadd.f32 %v4644_v1, %v4452_v13  ;;  %5660 = vmatprep.mubr.bf16.mxu0 %v5298_v38  ;;  %v5182_v52 = vmax.f32 %v4643_v45, 0.0 }
 0x37a   : > { %v10582_v63 = vpop.f32.mrf.mxu0  ;;  %v4646_v53 = vpop.f32.mrf.mxu1  ;;  %5661 = vmatmul.mubr.bf16.gmra.mxu0 %v5297_v44 }
 0x37b   : > { %v4647_v10 = vadd.f32 %v4646_v53, %v4454_v12  ;;  %v5185_v48 = vmax.f32 %v4645_v40, 0.0  ;;  %v11992_v53 = vld [vmem:[#allocation52_spill] sm:$0xff] }
 0x37c   : > { %v10584_v59 = vpop.f32.mrf.mxu0  ;;  %v4650_v31 = vpop.f32.mrf.mxu1  ;;  %5115 = vmatmul.mubr.bf16.gmra.mxu1 %v10301_v30 }
 0x37d   : > { %v5186_v32 = vmax.f32 %v4647_v10, 0.0  ;;  %5124 = vmatprep.mubr.bf16.mxu1 %v11991_v7  ;;  %v5301_v13 = vpack.c.bf16 %v5185_v48, %v5181_v17  ;;  %v4651_v12 = vadd.f32 %v4650_v31, %v4458_v22  ;;  %v4470_v31 = vadd.f32 %v10436_v14, %v10517_v58 }
 0x37e   : > { %v10588_v18 = vpop.f32.mrf.mxu0  ;;  %v4652_v26 = vpop.f32.mrf.mxu1  ;;  %v4472_v7 = vadd.f32 %v10438_v34, %v10522_v29 }
 0x37f   : > { %v5302_v51 = vpack.c.bf16 %v5186_v32, %v5182_v52  ;;  %v4653_v44 = vadd.f32 %v4652_v26, %v4460_v39  ;;  %v5189_v15 = vmax.f32 %v4651_v12, 0.0  ;;  %v4468_v26 = vadd.f32 %v10424_v60, %v10522_v29 }
 0x380   : > { %v10596_v30 = vpop.f32.mrf.mxu0  ;;  %v4654_v38 = vpop.f32.mrf.mxu1 }
 0x381   : > { %v4655_v1 = vadd.f32 %v4654_v38, %v4462_v19  ;;  %5668 = vmatprep.mubr.bf16.mxu0 %v5302_v51  ;;  %v5190_v10 = vmax.f32 %v4653_v44, 0.0 }
 0x382   : > { %v10600_v45 = vpop.f32.mrf.mxu0  ;;  %v4656_v42 = vpop.f32.mrf.mxu1  ;;  %5669 = vmatmul.mubr.bf16.gmra.mxu0 %v5301_v13 }
 0x383   : > { %v4657_v24 = vadd.f32 %v4656_v42, %v4464_v28  ;;  %v5193_v40 = vmax.f32 %v4655_v1, 0.0 }
 0x384   : > { %v10602_v46 = vpop.f32.mrf.mxu0  ;;  %v4660_v61 = vpop.f32.mrf.mxu1  ;;  %5125 = vmatmul.mubr.bf16.gmra.mxu1 %v11992_v53  ;;  %v4482_v53 = vadd.f32 %v10450_v57, %v10522_v29 }
 0x385   : > { %v5194_v48 = vmax.f32 %v4657_v24, 0.0  ;;  %5134 = vmatprep.mubr.bf16.mxu1 %v10334_v41  ;;  %v5305_v39 = vpack.c.bf16 %v5193_v40, %v5189_v15  ;;  %v4474_v41 = vadd.f32 %v10440_v37, %v10517_v58  ;;  %v4661_v38 = vadd.f32 %v4660_v61, %v4468_v26 }
 0x386   : > { %v10606_v52 = vpop.f32.mrf.mxu0  ;;  %v4662_v32 = vpop.f32.mrf.mxu1  ;;  %v4480_v61 = vadd.f32 %v10448_v50, %v10517_v58 }
 0x387   : > { %v5306_v17 = vpack.c.bf16 %v5194_v48, %v5190_v10  ;;  %v4663_v22 = vadd.f32 %v4662_v32, %v4470_v31  ;;  %v5197_v37 = vmax.f32 %v4661_v38, 0.0  ;;  %v4478_v48 = vadd.f32 %v10442_v47, %v10522_v29 }
 0x388   : > { %v10614_v19 = vpop.f32.mrf.mxu0  ;;  %v4664_v51 = vpop.f32.mrf.mxu1 }
 0x389   : > { %v4665_v13 = vadd.f32 %v4664_v51, %v4472_v7  ;;  %5676 = vmatprep.mubr.bf16.mxu0 %v5306_v17  ;;  %v5198_v12 = vmax.f32 %v4663_v22, 0.0 }
 0x38a   : > { %v10618_v28 = vpop.f32.mrf.mxu0  ;;  %v4666_v14 = vpop.f32.mrf.mxu1  ;;  %5677 = vmatmul.mubr.bf16.gmra.mxu0 %v5305_v39 }
 0x38b   : > { %v4667_v34 = vadd.f32 %v4666_v14, %v4474_v41  ;;  %v5201_v44 = vmax.f32 %v4665_v13, 0.0  ;;  %v4490_v14 = vadd.f32 %v10466_v49, %v10517_v58 }
 0x38c   : > { %v10620_v1 = vpop.f32.mrf.mxu0  ;;  %v4670_v60 = vpop.f32.mrf.mxu1  ;;  %5135 = vmatmul.mubr.bf16.gmra.mxu1 %v10329_v5 }
 0x38d   : > { %v5202_v42 = vmax.f32 %v4667_v34, 0.0  ;;  %5144 = vmatprep.mubr.bf16.mxu1 %v10348_v43  ;;  %v5309_v15 = vpack.c.bf16 %v5201_v44, %v5197_v37  ;;  %v4484_v43 = vadd.f32 %v10452_v56, %v10517_v58  ;;  %v4671_v17 = vadd.f32 %v4670_v60, %v4478_v48 }
 0x38e   : > { %v10624_v24 = vpop.f32.mrf.mxu0  ;;  %v4672_v40 = vpop.f32.mrf.mxu1  ;;  %v4492_v34 = vadd.f32 %v10468_v54, %v10522_v29  ;;  %v4488_v60 = vadd.f32 %v10454_v36, %v10522_v29 }
 0x38f   : > { %v5310_v10 = vpack.c.bf16 %v5202_v42, %v5198_v12  ;;  %v4673_v31 = vadd.f32 %v4672_v40, %v4480_v61  ;;  %v5205_v56 = vmax.f32 %v4671_v17, 0.0  ;;  %v4502_v17 = vadd.f32 %v10479_v20, %v10522_v29 }
 0x390   : > { %v10632_v5 = vpop.f32.mrf.mxu0  ;;  %v4674_v32 = vpop.f32.mrf.mxu1 }
 0x391   : > { %v4675_v7 = vadd.f32 %v4674_v32, %v4482_v53  ;;  %5684 = vmatprep.mubr.bf16.mxu0 %v5310_v10  ;;  %v5206_v47 = vmax.f32 %v4673_v31, 0.0 }
 0x392   : > { %v10636_v26 = vpop.f32.mrf.mxu0  ;;  %v4676_v50 = vpop.f32.mrf.mxu1  ;;  %5685 = vmatmul.mubr.bf16.gmra.mxu0 %v5309_v15 }
 0x393   : > { %v4677_v57 = vadd.f32 %v4676_v50, %v4484_v43  ;;  %v5209_v39 = vmax.f32 %v4675_v7, 0.0  ;;  %v4500_v7 = vadd.f32 %v10477_v11, %v10517_v58 }
 0x394   : > { %v4680_v51 = vpop.f32.mrf.mxu1  ;;  %v10638_v41 = vpop.f32.mrf.mxu0  ;;  %5145 = vmatmul.mubr.bf16.gmra.mxu1 %v10343_v33 }
 0x395   : > { %v5210_v22 = vmax.f32 %v4677_v57, 0.0  ;;  %5154 = vmatprep.mubr.bf16.mxu1 %v10362_v3  ;;  %v5313_v12 = vpack.c.bf16 %v5209_v39, %v5205_v56  ;;  %v4494_v3 = vadd.f32 %v10470_v4, %v10517_v58  ;;  %v4681_v61 = vadd.f32 %v4680_v51, %v4488_v60 }
 0x396   : > { %v4682_v13 = vpop.f32.mrf.mxu1  ;;  %v10642_v38 = vpop.f32.mrf.mxu0  ;;  %v4498_v57 = vadd.f32 %v10472_v21, %v10522_v29 }
 0x397   : > { %v5314_v44 = vpack.c.bf16 %v5210_v22, %v5206_v47  ;;  %v4683_v37 = vadd.f32 %v4682_v13, %v4490_v14  ;;  %v5213_v43 = vmax.f32 %v4681_v61, 0.0 }
 0x398   : > { %v4684_v33 = vpop.f32.mrf.mxu1  ;;  %v10650_v42 = vpop.f32.mrf.mxu0 }
 0x399   : > { %v4685_v40 = vadd.f32 %v4684_v33, %v4492_v34  ;;  %5692 = vmatprep.mubr.bf16.mxu0 %v5314_v44  ;;  %v5214_v36 = vmax.f32 %v4683_v37, 0.0 }
 0x39a   : > { %v4686_v53 = vpop.f32.mrf.mxu1  ;;  %v10654_v49 = vpop.f32.mrf.mxu0  ;;  %5693 = vmatmul.mubr.bf16.gmra.mxu0 %v5313_v12 }
 0x39b   : > { %v4687_v54 = vadd.f32 %v4686_v53, %v4494_v3  ;;  %v5217_v10 = vmax.f32 %v4685_v40, 0.0  ;;  %v4512_v40 = vadd.f32 %v10495_v8, %v10522_v29  ;;  %v11993_v53 = vld [vmem:[#allocation54_spill] sm:$0xff] }
 0x39c   : > { %v4690_v48 = vpop.f32.mrf.mxu1  ;;  %v10656_v15 = vpop.f32.mrf.mxu0  ;;  %5155 = vmatmul.mubr.bf16.gmra.mxu1 %v10358_v62  ;;  %v4504_v62 = vadd.f32 %v10481_v35, %v10517_v58  ;;  %v4510_v35 = vadd.f32 %v10493_v16, %v10517_v58 }
 0x39d   : > { %v5218_v32 = vmax.f32 %v4687_v54, 0.0  ;;  %v5317_v39 = vpack.c.bf16 %v5217_v10, %v5213_v43  ;;  %v4691_v13 = vadd.f32 %v4690_v48, %v4498_v57  ;;  %v4508_v54 = vadd.f32 %v11993_v53, %v10522_v29  ;;  %v11998_v53 = vld [vmem:[#allocation57_spill] sm:$0xff] }
 0x39e   : > { %v4692_v31 = vpop.f32.mrf.mxu1  ;;  %v10659_v4 = vpop.f32.mrf.mxu0 }
 0x39f   : > { %v5318_v50 = vpack.c.bf16 %v5218_v32, %v5214_v36  ;;  %v4693_v22 = vadd.f32 %v4692_v31, %v4500_v7  ;;  %v5221_v33 = vmax.f32 %v4691_v13, 0.0  ;;  %v11994_v32 = vld [vmem:[#allocation55_spill] sm:$0xff] }
 0x3a0   : > { %v4694_v51 = vpop.f32.mrf.mxu1  ;;  %v10667_v47 = vpop.f32.mrf.mxu0  ;;  %v4514_v43 = vadd.f32 %v11994_v32, %v10517_v58 }
 0x3a1   : > { %v4695_v56 = vadd.f32 %v4694_v51, %v4502_v17  ;;  %5700 = vmatprep.mubr.bf16.mxu0 %v5318_v50  ;;  %v5222_v21 = vmax.f32 %v4693_v22, 0.0 }
 0x3a2   : > { %v4696_v14 = vpop.f32.mrf.mxu1  ;;  %v10671_v11 = vpop.f32.mrf.mxu0  ;;  %5701 = vmatmul.mubr.bf16.gmra.mxu0 %v5317_v39 }
 0x3a3   : > { %v4697_v20 = vadd.f32 %v4696_v14, %v4504_v62  ;;  %v5225_v34 = vmax.f32 %v4695_v56, 0.0 }
 0x3a4   : > { %v4700_v44 = vpop.f32.mrf.mxu1  ;;  %v10673_v60 = vpop.f32.mrf.mxu0 }
 0x3a5   : > { %v5226_v12 = vmax.f32 %v4697_v20, 0.0  ;;  %v5321_v10 = vpack.c.bf16 %v5225_v34, %v5221_v33  ;;  %v4701_v17 = vadd.f32 %v4700_v44, %v4508_v54  ;;  %v11995_v20 = vld [vmem:[#allocation100_spill] sm:$0xff]  ;;  %v11996_v44 = vld [vmem:[#allocation101_spill] sm:$0xff]  ;;  %v4524_v54 = vadd.f32 %v11998_v53, %v10517_v58 }
 0x3a6   : > { %v4702_v3 = vpop.f32.mrf.mxu1  ;;  %v10675_v37 = vpop.f32.mrf.mxu0  ;;  %v4520_v34 = vadd.f32 %v11995_v20, %v10517_v58  ;;  %v11997_v33 = vld [vmem:[#allocation56_spill] sm:$0xff]  ;;  %v4534_v53 = vadd.f32 %v10546_v0, %v10517_v58  ;;  %v4540_v0 = vadd.f32 %v10552_v6, %v10517_v58 }
 0x3a7   : > { %v5322_v61 = vpack.c.bf16 %v5226_v12, %v5222_v21  ;;  %v4703_v31 = vadd.f32 %v4702_v3, %v4510_v35  ;;  %v5229_v56 = vmax.f32 %v4701_v17, 0.0  ;;  %v4522_v21 = vadd.f32 %v11996_v44, %v10522_v29 }
 0x3a8   : > { %v4704_v48 = vpop.f32.mrf.mxu1  ;;  %v10683_v36 = vpop.f32.mrf.mxu0  ;;  %v4518_v3 = vadd.f32 %v11997_v33, %v10522_v29 }
 0x3a9   : > { %v4705_v7 = vadd.f32 %v4704_v48, %v4512_v40  ;;  %5708 = vmatprep.mubr.bf16.mxu0 %v5322_v61  ;;  %v5230_v62 = vmax.f32 %v4703_v31, 0.0 }
 0x3aa   : > { %v4706_v50 = vpop.f32.mrf.mxu1  ;;  %v10687_v16 = vpop.f32.mrf.mxu0  ;;  %5709 = vmatmul.mubr.bf16.gmra.mxu0 %v5321_v10 }
 0x3ab   : > { %v4707_v8 = vadd.f32 %v4706_v50, %v4514_v43  ;;  %v5233_v57 = vmax.f32 %v4705_v7, 0.0 }
 0x3ac   : > { %v4710_v39 = vpop.f32.mrf.mxu1  ;;  %v10689_v51 = vpop.f32.mrf.mxu0 }
 0x3ad   : > { %v5234_v22 = vmax.f32 %v4707_v8, 0.0  ;;  %v5325_v35 = vpack.c.bf16 %v5233_v57, %v5229_v56  ;;  %v4711_v32 = vadd.f32 %v4710_v39, %v4518_v3  ;;  %v12001_v39 = vld [vmem:[#allocation60_spill] sm:$0xff] }
 0x3ae   : > { %v4712_v13 = vpop.f32.mrf.mxu1  ;;  %v10691_v14 = vpop.f32.mrf.mxu0  ;;  %v4532_v44 = vadd.f32 %v12001_v39, %v10522_v29 }
 0x3af   : > { %v5326_v12 = vpack.c.bf16 %v5234_v22, %v5230_v62  ;;  %v4713_v10 = vadd.f32 %v4712_v13, %v4520_v34  ;;  %v5237_v22 = vmax.f32 %v4711_v32, 0.0  ;;  %v12000_v13 = vld [vmem:[#allocation59_spill] sm:$0xff] }
 0x3b0   : > { %v4714_v40 = vpop.f32.mrf.mxu1  ;;  %v10699_v61 = vpop.f32.mrf.mxu0  ;;  %v4530_v34 = vadd.f32 %v12000_v13, %v10517_v58 }
 0x3b1   : > { %v4715_v48 = vadd.f32 %v4714_v40, %v4522_v21  ;;  %5716 = vmatprep.mubr.bf16.mxu0 %v5326_v12  ;;  %v5238_v57 = vmax.f32 %v4713_v10, 0.0  ;;  %v12002_v12 = vld [vmem:[#allocation58_spill] sm:$0xff] }
 0x3b2   : > { %v4716_v43 = vpop.f32.mrf.mxu1  ;;  %v10703_v31 = vpop.f32.mrf.mxu0  ;;  %5717 = vmatmul.mubr.bf16.gmra.mxu0 %v5325_v35  ;;  %v4528_v33 = vadd.f32 %v12002_v12, %v10522_v29 }
 0x3b3   : > { %v4717_v7 = vadd.f32 %v4716_v43, %v4524_v54  ;;  %v5241_v17 = vmax.f32 %v4715_v48, 0.0 }
 0x3b4   : > { %v4720_v50 = vpop.f32.mrf.mxu1  ;;  %v10705_v8 = vpop.f32.mrf.mxu0 }
 0x3b5   : > { %11999 = vst [vmem:[#allocation61_spill] sm:$0xff] %v10705_v8  ;;  %v5242_v62 = vmax.f32 %v4717_v7, 0.0  ;;  %v5329_v3 = vpack.c.bf16 %v5241_v17, %v5237_v22  ;;  %v4721_v48 = vadd.f32 %v4720_v50, %v4528_v33  ;;  %v4542_v50 = vadd.f32 %v10560_v2, %v10522_v29 }
 0x3b6   : > { %v4722_v56 = vpop.f32.mrf.mxu1  ;;  %v10707_v20 = vpop.f32.mrf.mxu0 }
 0x3b7   : > { %v5330_v21 = vpack.c.bf16 %v5242_v62, %v5238_v57  ;;  %v4723_v54 = vadd.f32 %v4722_v56, %v4530_v34  ;;  %v5245_v39 = vmax.f32 %v4721_v48, 0.0  ;;  %v4538_v34 = vadd.f32 %v10548_v27, %v10522_v29 }
 0x3b8   : > { %v4724_v35 = vpop.f32.mrf.mxu1  ;;  %v10715_v40 = vpop.f32.mrf.mxu0 }
 0x3b9   : > { %v4725_v10 = vadd.f32 %v4724_v35, %v4532_v44  ;;  %5724 = vmatprep.mubr.bf16.mxu0 %v5330_v21  ;;  %v5246_v17 = vmax.f32 %v4723_v54, 0.0 }
 0x3ba   : > { %v4726_v32 = vpop.f32.mrf.mxu1  ;;  %v10719_v43 = vpop.f32.mrf.mxu0  ;;  %5725 = vmatmul.mubr.bf16.gmra.mxu0 %v5329_v3  ;;  %v4544_v3 = vadd.f32 %v10564_v25, %v10517_v58  ;;  %v4550_v25 = vadd.f32 %v10570_v55, %v10517_v58 }
 0x3bb   : > { %v4727_v7 = vadd.f32 %v4726_v32, %v4534_v53  ;;  %v5249_v57 = vmax.f32 %v4725_v10, 0.0 }
 0x3bc   : > { %v4730_v62 = vpop.f32.mrf.mxu1  ;;  %v10721_v13 = vpop.f32.mrf.mxu0 }
 0x3bd   : > { %v5250_v22 = vmax.f32 %v4727_v7, 0.0  ;;  %v5333_v44 = vpack.c.bf16 %v5249_v57, %v5245_v39  ;;  %v4731_v54 = vadd.f32 %v4730_v62, %v4538_v34  ;;  %v4552_v62 = vadd.f32 %v10578_v23, %v10522_v29 }
 0x3be   : > { %v4732_v12 = vpop.f32.mrf.mxu1  ;;  %v10723_v8 = vpop.f32.mrf.mxu0 }
 0x3bf   : > { %v5334_v56 = vpack.c.bf16 %v5250_v22, %v5246_v17  ;;  %v4733_v35 = vadd.f32 %v4732_v12, %v4540_v0  ;;  %v5253_v17 = vmax.f32 %v4731_v54, 0.0  ;;  %v4548_v0 = vadd.f32 %v10566_v9, %v10522_v29 }
 0x3c0   : > { %v4734_v21 = vpop.f32.mrf.mxu1  ;;  %v10731_v33 = vpop.f32.mrf.mxu0 }
 0x3c1   : > { %v4735_v53 = vadd.f32 %v4734_v21, %v4542_v50  ;;  %5732 = vmatprep.mubr.bf16.mxu0 %v5334_v56  ;;  %v5254_v27 = vmax.f32 %v4733_v35, 0.0 }
 0x3c2   : > { %v4736_v10 = vpop.f32.mrf.mxu1  ;;  %v10735_v6 = vpop.f32.mrf.mxu0  ;;  %5733 = vmatmul.mubr.bf16.gmra.mxu0 %v5333_v44  ;;  %v4554_v44 = vadd.f32 %v10582_v63, %v10517_v58  ;;  %v4560_v63 = vadd.f32 %v10588_v18, %v10517_v58 }
 0x3c3   : > { %v4737_v2 = vadd.f32 %v4736_v10, %v4544_v3  ;;  %v5257_v48 = vmax.f32 %v4735_v53, 0.0 }
 0x3c4   : > { %v4740_v32 = vpop.f32.mrf.mxu1  ;;  %v10737_v7 = vpop.f32.mrf.mxu0 }
 0x3c5   : > { %v5258_v57 = vmax.f32 %v4737_v2, 0.0  ;;  %v5337_v50 = vpack.c.bf16 %v5257_v48, %v5253_v17  ;;  %v4741_v35 = vadd.f32 %v4740_v32, %v4548_v0  ;;  %v4562_v32 = vadd.f32 %v10596_v30, %v10522_v29 }
 0x3c6   : > { %v4742_v22 = vpop.f32.mrf.mxu1  ;;  %v10739_v39 = vpop.f32.mrf.mxu0 }
 0x3c7   : > { %v5338_v12 = vpack.c.bf16 %v5258_v57, %v5254_v27  ;;  %v4743_v21 = vadd.f32 %v4742_v22, %v4550_v25  ;;  %v5261_v27 = vmax.f32 %v4741_v35, 0.0  ;;  %v4558_v25 = vadd.f32 %v10584_v59, %v10522_v29 }
 0x3c8   : > { %v4744_v56 = vpop.f32.mrf.mxu1  ;;  %v10747_v34 = vpop.f32.mrf.mxu0 }
 0x3c9   : > { %v4745_v3 = vadd.f32 %v4744_v56, %v4552_v62  ;;  %5740 = vmatprep.mubr.bf16.mxu0 %v5338_v12  ;;  %v5262_v9 = vmax.f32 %v4743_v21, 0.0 }
 0x3ca   : > { %v4746_v53 = vpop.f32.mrf.mxu1  ;;  %v10751_v55 = vpop.f32.mrf.mxu0  ;;  %5741 = vmatmul.mubr.bf16.gmra.mxu0 %v5337_v50  ;;  %v4564_v50 = vadd.f32 %v10600_v45, %v10517_v58  ;;  %v4570_v45 = vadd.f32 %v10606_v52, %v10517_v58 }
 0x3cb   : > { %v4747_v23 = vadd.f32 %v4746_v53, %v4554_v44  ;;  %v5265_v54 = vmax.f32 %v4745_v3, 0.0 }
 0x3cc   : > { %v4750_v10 = vpop.f32.mrf.mxu1  ;;  %v10753_v2 = vpop.f32.mrf.mxu0 }
 0x3cd   : > { %v5266_v48 = vmax.f32 %v4747_v23, 0.0  ;;  %v5341_v62 = vpack.c.bf16 %v5265_v54, %v5261_v27  ;;  %v4751_v21 = vadd.f32 %v4750_v10, %v4558_v25  ;;  %v4572_v10 = vadd.f32 %v10614_v19, %v10522_v29 }
 0x3ce   : > { %v4752_v57 = vpop.f32.mrf.mxu1  ;;  %v10755_v17 = vpop.f32.mrf.mxu0 }
 0x3cf   : > { %v5342_v22 = vpack.c.bf16 %v5266_v48, %v5262_v9  ;;  %v4753_v56 = vadd.f32 %v4752_v57, %v4560_v63  ;;  %v5269_v9 = vmax.f32 %v4751_v21, 0.0  ;;  %v4568_v63 = vadd.f32 %v10602_v46, %v10522_v29 }
 0x3d0   : > { %v4754_v12 = vpop.f32.mrf.mxu1  ;;  %v10763_v0 = vpop.f32.mrf.mxu0 }
 0x3d1   : > { %v4755_v44 = vadd.f32 %v4754_v12, %v4562_v32  ;;  %5748 = vmatprep.mubr.bf16.mxu0 %v5342_v22  ;;  %v5270_v59 = vmax.f32 %v4753_v56, 0.0 }
 0x3d2   : > { %v4756_v3 = vpop.f32.mrf.mxu1  ;;  %v10767_v18 = vpop.f32.mrf.mxu0  ;;  %5749 = vmatmul.mubr.bf16.gmra.mxu0 %v5341_v62  ;;  %v4574_v62 = vadd.f32 %v10618_v28, %v10517_v58  ;;  %v4580_v28 = vadd.f32 %v10624_v24, %v10517_v58 }
 0x3d3   : > { %v4757_v30 = vadd.f32 %v4756_v3, %v4564_v50  ;;  %v5273_v35 = vmax.f32 %v4755_v44, 0.0 }
 0x3d4   : > { %v4760_v53 = vpop.f32.mrf.mxu1  ;;  %v10769_v23 = vpop.f32.mrf.mxu0 }
 0x3d5   : > { %v5274_v54 = vmax.f32 %v4757_v30, 0.0  ;;  %v5345_v32 = vpack.c.bf16 %v5273_v35, %v5269_v9  ;;  %v4761_v56 = vadd.f32 %v4760_v53, %v4568_v63  ;;  %v4582_v53 = vadd.f32 %v10632_v5, %v10522_v29  ;;  %v12003_v5 = vld [vmem:[#allocation50_spill] sm:$0xff] }
 0x3d6   : > { %v4762_v48 = vpop.f32.mrf.mxu1  ;;  %v10771_v27 = vpop.f32.mrf.mxu0 }
 0x3d7   : > { %v5346_v57 = vpack.c.bf16 %v5274_v54, %v5270_v59  ;;  %v4763_v12 = vadd.f32 %v4762_v48, %v4570_v45  ;;  %v5277_v59 = vmax.f32 %v4761_v56, 0.0  ;;  %v4578_v45 = vadd.f32 %v10620_v1, %v10522_v29 }
 0x3d8   : > { %v4764_v22 = vpop.f32.mrf.mxu1  ;;  %v10779_v25 = vpop.f32.mrf.mxu0  ;;  %v12004_v56 = vsub.s32 3, %v12003_v5  ;;  %v12006_v1 = vsub.s32 2, %v12003_v5 }
 0x3d9   : > { %v4765_v50 = vadd.f32 %v4764_v22, %v4572_v10  ;;  %5756 = vmatprep.mubr.bf16.mxu0 %v5346_v57  ;;  %v5278_v46 = vmax.f32 %v4763_v12, 0.0 }
 0x3da   : > { %v4766_v44 = vpop.f32.mrf.mxu1  ;;  %v10783_v52 = vpop.f32.mrf.mxu0  ;;  %5757 = vmatmul.mubr.bf16.gmra.mxu0 %v5345_v32  ;;  %v4584_v32 = vadd.f32 %v10636_v26, %v10517_v58 }
 0x3db   : > { %v4767_v19 = vadd.f32 %v4766_v44, %v4574_v62  ;;  %v5281_v21 = vmax.f32 %v4765_v50, 0.0  ;;  %v12005_v44 = vld [vmem:[#allocation102_spill] sm:$0xff] }
 0x3dc   : > { %v4770_v3 = vpop.f32.mrf.mxu1  ;;  %v10785_v30 = vpop.f32.mrf.mxu0 }
 0x3dd   : > { %v5282_v35 = vmax.f32 %v4767_v19, 0.0  ;;  %v5349_v10 = vpack.c.bf16 %v5281_v21, %v5277_v59  ;;  %v4771_v12 = vadd.f32 %v4770_v3, %v4578_v45  ;;  %v10804_v19 = vrot.slane %v12005_v44, %v12004_v56 }
 0x3de   : > { %v4772_v54 = vpop.f32.mrf.mxu1  ;;  %v10787_v9 = vpop.f32.mrf.mxu0  ;;  %v10809_v21 = vrot.slane %v12005_v44, %v12006_v1 }
 0x3df   : > { %v5350_v48 = vpack.c.bf16 %v5282_v35, %v5278_v46  ;;  %v4773_v22 = vadd.f32 %v4772_v54, %v4580_v28  ;;  %v5285_v59 = vmax.f32 %v4771_v12, 0.0 }
 0x3e0   : > { %v4774_v57 = vpop.f32.mrf.mxu1  ;;  %v10795_v63 = vpop.f32.mrf.mxu0 }
 0x3e1   : > { %v4775_v62 = vadd.f32 %v4774_v57, %v4582_v53  ;;  %5764 = vmatprep.mubr.bf16.mxu0 %v5350_v48  ;;  %v5286_v3 = vmax.f32 %v4773_v22, 0.0  ;;  %v4816_v53 = vadd.f32 %v10642_v38, %v10804_v19  ;;  %v4818_v48 = vadd.f32 %v10650_v42, %v10809_v21 }
 0x3e2   : > { %v4776_v50 = vpop.f32.mrf.mxu1  ;;  %v10799_v24 = vpop.f32.mrf.mxu0  ;;  %5765 = vmatmul.mubr.bf16.gmra.mxu0 %v5349_v10  ;;  %v4814_v10 = vadd.f32 %v10638_v41, %v10809_v21  ;;  %v4820_v22 = vadd.f32 %v10654_v49, %v10804_v19  ;;  %v4826_v49 = vadd.f32 %v10659_v4, %v10804_v19 }
 0x3e3   : > { %v4777_v29 = vadd.f32 %v4776_v50, %v4584_v32  ;;  %v5289_v58 = vmax.f32 %v4775_v62, 0.0 }
 0x3e4   : > { %v10811_v26 = vpop.f32.mrf.mxu0  ;;  %v5006_v46 = vpop.f32.mrf.mxu1 }
 0x3e5   : > { %v5290_v35 = vmax.f32 %v4777_v29, 0.0  ;;  %v5353_v57 = vpack.c.bf16 %v5289_v58, %v5285_v59  ;;  %v5007_v5 = vadd.f32 %v5006_v46, %v4814_v10  ;;  %v4828_v46 = vadd.f32 %v10667_v47, %v10809_v21 }
 0x3e6   : > { %v10813_v54 = vpop.f32.mrf.mxu0  ;;  %v5008_v28 = vpop.f32.mrf.mxu1 }
 0x3e7   : > { %v5354_v45 = vpack.c.bf16 %v5290_v35, %v5286_v3  ;;  %v5009_v12 = vadd.f32 %v5008_v28, %v4816_v53  ;;  %v5167_v3 = vmax.f32 %v5007_v5, 0.0  ;;  %v4824_v53 = vadd.f32 %v10656_v15, %v10809_v21 }
 0x3e8   : > { %v10821_v32 = vpop.f32.mrf.mxu0  ;;  %v5010_v62 = vpop.f32.mrf.mxu1 }
 0x3e9   : > { %v5011_v50 = vadd.f32 %v5010_v62, %v4818_v48  ;;  %5772 = vmatprep.mubr.bf16.mxu0 %v5354_v45  ;;  %v5168_v1 = vmax.f32 %v5009_v12, 0.0 }
 0x3ea   : > { %v10825_v56 = vpop.f32.mrf.mxu0  ;;  %v5012_v38 = vpop.f32.mrf.mxu1  ;;  %5773 = vmatmul.mubr.bf16.gmra.mxu0 %v5353_v57  ;;  %v4830_v57 = vadd.f32 %v10671_v11, %v10804_v19  ;;  %v4836_v11 = vadd.f32 %v10675_v37, %v10804_v19 }
 0x3eb   : > { %v5013_v42 = vadd.f32 %v5012_v38, %v4820_v22  ;;  %v5171_v44 = vmax.f32 %v5011_v50, 0.0 }
 0x3ec   : > { %v10827_v29 = vpop.f32.mrf.mxu0  ;;  %v5016_v41 = vpop.f32.mrf.mxu1 }
 0x3ed   : > { %v5172_v58 = vmax.f32 %v5013_v42, 0.0  ;;  %v5295_v48 = vpack.c.bf16 %v5171_v44, %v5167_v3  ;;  %v5017_v12 = vadd.f32 %v5016_v41, %v4824_v53  ;;  %v4838_v3 = vadd.f32 %v10683_v36, %v10809_v21 }
 0x3ee   : > { %v10829_v35 = vpop.f32.mrf.mxu0  ;;  %v5018_v59 = vpop.f32.mrf.mxu1  ;;  %v4840_v53 = vadd.f32 %v10687_v16, %v10804_v19  ;;  %v4848_v16 = vadd.f32 %v10699_v61, %v10809_v21 }
 0x3ef   : > { %v5296_v28 = vpack.c.bf16 %v5172_v58, %v5168_v1  ;;  %v5019_v62 = vadd.f32 %v5018_v59, %v4826_v49  ;;  %v5175_v1 = vmax.f32 %v5017_v12, 0.0  ;;  %v4834_v59 = vadd.f32 %v10673_v60, %v10809_v21 }
 0x3f0   : > { %v10837_v45 = vpop.f32.mrf.mxu0  ;;  %v5020_v10 = vpop.f32.mrf.mxu1 }
 0x3f1   : > { %v5021_v22 = vadd.f32 %v5020_v10, %v4828_v46  ;;  %5813 = vmatprep.mubr.bf16.mxu1 %v5296_v28  ;;  %v5176_v42 = vmax.f32 %v5019_v62, 0.0 }
 0x3f2   : > { %v10841_v50 = vpop.f32.mrf.mxu0  ;;  %v5022_v4 = vpop.f32.mrf.mxu1  ;;  %5814 = vmatmul.mubr.bf16.vlgmr.msra.gmra.mxu1 %v5295_v48 }
 0x3f3   : > { %v5023_v47 = vadd.f32 %v5022_v4, %v4830_v57  ;;  %v5179_v5 = vmax.f32 %v5021_v22, 0.0 }
 0x3f4   : > { %v10843_v38 = vpop.f32.mrf.mxu0  ;;  %v5026_v15 = vpop.f32.mrf.mxu1 }
 0x3f5   : > { %v5180_v44 = vmax.f32 %v5023_v47, 0.0  ;;  %v5299_v49 = vpack.c.bf16 %v5179_v5, %v5175_v1  ;;  %v5027_v57 = vadd.f32 %v5026_v15, %v4834_v59  ;;  %v4844_v15 = vadd.f32 %v10689_v51, %v10809_v21 }
 0x3f6   : > { %v5028_v58 = vpop.f32.mrf.mxu1  ;;  %v10851_v46 = vpop.f32.mrf.mxu0 }
 0x3f7   : > { %v5300_v41 = vpack.c.bf16 %v5180_v44, %v5176_v42  ;;  %v5029_v48 = vadd.f32 %v5028_v58, %v4836_v11  ;;  %v5183_v47 = vmax.f32 %v5027_v57, 0.0  ;;  %v4846_v42 = vadd.f32 %v10691_v14, %v10804_v19 }
 0x3f8   : > { %v5030_v28 = vpop.f32.mrf.mxu1  ;;  %v10855_v22 = vpop.f32.mrf.mxu0 }
 0x3f9   : > { %v5031_v10 = vadd.f32 %v5030_v28, %v4838_v3  ;;  %5821 = vmatprep.mubr.bf16.mxu1 %v5300_v41  ;;  %v5184_v4 = vmax.f32 %v5029_v48, 0.0  ;;  %v4850_v3 = vadd.f32 %v10703_v31, %v10804_v19  ;;  %v4858_v31 = vadd.f32 %v10715_v40, %v10809_v21 }
 0x3fa   : > { %v5032_v62 = vpop.f32.mrf.mxu1  ;;  %5822 = vmatmul.mubr.bf16.gmra.mxu1 %v5299_v49  ;;  %v10863_v58 = vpop.f32.mrf.mxu0 }
 0x3fb   : > { %v5033_v37 = vadd.f32 %v5032_v62, %v4840_v53  ;;  %v5187_v36 = vmax.f32 %v5031_v10, 0.0 }
 0x3fc   : > { %v5036_v12 = vpop.f32.mrf.mxu1  ;;  %v10867_v53 = vpop.f32.mrf.mxu0 }
 0x3fd   : > { %v5188_v60 = vmax.f32 %v5033_v37, 0.0  ;;  %v5303_v1 = vpack.c.bf16 %v5187_v36, %v5183_v47  ;;  %v5037_v49 = vadd.f32 %v5036_v12, %v4844_v15  ;;  %v4856_v37 = vadd.f32 %v10707_v20, %v10804_v19  ;;  %v12007_v12 = vld [vmem:[#allocation61_spill] sm:$0xff] }
 0x3fe   : > { %v5038_v5 = vpop.f32.mrf.mxu1 }
 0x3ff   : > { %v5304_v44 = vpack.c.bf16 %v5188_v60, %v5184_v4  ;;  %v5039_v41 = vadd.f32 %v5038_v5, %v4846_v42  ;;  %v5191_v57 = vmax.f32 %v5037_v49, 0.0  ;;  %v4854_v4 = vadd.f32 %v12007_v12, %v10809_v21  ;;  %v10875_v60 = vpop.f32.mrf.mxu0 }
 0x400   : > { %v5040_v11 = vpop.f32.mrf.mxu1  ;;  %v4860_v42 = vadd.f32 %v10719_v43, %v10804_v19  ;;  %v4868_v43 = vadd.f32 %v10731_v33, %v10809_v21 }
 0x401   : > { %v5041_v59 = vadd.f32 %v5040_v11, %v4848_v16  ;;  %5829 = vmatprep.mubr.bf16.mxu1 %v5304_v44  ;;  %v5192_v10 = vmax.f32 %v5039_v41, 0.0  ;;  %v10879_v11 = vpop.f32.mrf.mxu0 }
 0x402   : > { %v5042_v28 = vpop.f32.mrf.mxu1  ;;  %5830 = vmatmul.mubr.bf16.gmra.mxu1 %v5303_v1 }
 0x403   : > { %v5043_v14 = vadd.f32 %v5042_v28, %v4850_v3  ;;  %v5195_v61 = vmax.f32 %v5041_v59, 0.0 }
 0x404   : > { %v5046_v48 = vpop.f32.mrf.mxu1 }
 0x405   : > { %v5196_v51 = vmax.f32 %v5043_v14, 0.0  ;;  %v5307_v47 = vpack.c.bf16 %v5195_v61, %v5191_v57  ;;  %v5047_v15 = vadd.f32 %v5046_v48, %v4854_v4  ;;  %v4866_v14 = vadd.f32 %v10723_v8, %v10804_v19 }
 0x406   : > { %v5048_v62 = vpop.f32.mrf.mxu1  ;;  %v4864_v48 = vadd.f32 %v10721_v13, %v10809_v21 }
 0x407   : > { %v5308_v36 = vpack.c.bf16 %v5196_v51, %v5192_v10  ;;  %v5049_v16 = vadd.f32 %v5048_v62, %v4856_v37  ;;  %v5199_v49 = vmax.f32 %v5047_v15, 0.0  ;;  %v10887_v10 = vpop.f32.mrf.mxu0  ;;  %v4870_v62 = vadd.f32 %v10735_v6, %v10804_v19 }
 0x408   : > { %v5050_v5 = vpop.f32.mrf.mxu1  ;;  %v4878_v6 = vadd.f32 %v10747_v34, %v10809_v21 }
 0x409   : > { %v5051_v44 = vadd.f32 %v5050_v5, %v4858_v31  ;;  %5837 = vmatprep.mubr.bf16.mxu1 %v5308_v36  ;;  %v5200_v41 = vmax.f32 %v5049_v16, 0.0  ;;  %v10891_v4 = vpop.f32.mrf.mxu0 }
 0x40a   : > { %v5052_v1 = vpop.f32.mrf.mxu1  ;;  %5838 = vmatmul.mubr.bf16.gmra.mxu1 %v5307_v47 }
 0x40b   : > { %v5053_v20 = vadd.f32 %v5052_v1, %v4860_v42  ;;  %v5203_v40 = vmax.f32 %v5051_v44, 0.0  ;;  %v4876_v44 = vadd.f32 %v10739_v39, %v10804_v19  ;;  %v4874_v1 = vadd.f32 %v10737_v7, %v10809_v21 }
 0x40c   : > { %v5056_v3 = vpop.f32.mrf.mxu1 }
 0x40d   : > { %v5204_v59 = vmax.f32 %v5053_v20, 0.0  ;;  %v5311_v51 = vpack.c.bf16 %v5203_v40, %v5199_v49  ;;  %v5057_v36 = vadd.f32 %v5056_v3, %v4864_v48  ;;  %v10899_v20 = vpop.f32.mrf.mxu0 }
 0x40e   : > { %v5058_v28 = vpop.f32.mrf.mxu1 }
 0x40f   : > { %v5312_v61 = vpack.c.bf16 %v5204_v59, %v5200_v41  ;;  %v5059_v37 = vadd.f32 %v5058_v28, %v4866_v14  ;;  %v5207_v42 = vmax.f32 %v5057_v36, 0.0  ;;  %v4880_v41 = vadd.f32 %v10751_v55, %v10804_v19 }
 0x410   : > { %v5060_v57 = vpop.f32.mrf.mxu1  ;;  %v4888_v55 = vadd.f32 %v10763_v0, %v10809_v21 }
 0x411   : > { %v5061_v31 = vadd.f32 %v5060_v57, %v4868_v43  ;;  %5845 = vmatprep.mubr.bf16.mxu1 %v5312_v61  ;;  %v5208_v5 = vmax.f32 %v5059_v37, 0.0  ;;  %v10903_v43 = vpop.f32.mrf.mxu0 }
 0x412   : > { %v5062_v12 = vpop.f32.mrf.mxu1  ;;  %5846 = vmatmul.mubr.bf16.gmra.mxu1 %v5311_v51 }
 0x413   : > { %v5063_v8 = vadd.f32 %v5062_v12, %v4870_v62  ;;  %v5211_v33 = vmax.f32 %v5061_v31, 0.0  ;;  %v4886_v62 = vadd.f32 %v10755_v17, %v10804_v19  ;;  %v4884_v31 = vadd.f32 %v10753_v2, %v10809_v21  ;;  %v10911_v36 = vpop.f32.mrf.mxu0 }
 0x414   : > { %v5066_v47 = vpop.f32.mrf.mxu1 }
 0x415   : > { %v5212_v13 = vmax.f32 %v5063_v8, 0.0  ;;  %v5315_v40 = vpack.c.bf16 %v5211_v33, %v5207_v42  ;;  %v5067_v28 = vadd.f32 %v5066_v47, %v4874_v1  ;;  %v4890_v33 = vadd.f32 %v10767_v18, %v10804_v19 }
 0x416   : > { %v5068_v16 = vpop.f32.mrf.mxu1  ;;  %v4898_v18 = vadd.f32 %v10779_v25, %v10809_v21 }
 0x417   : > { %v5316_v15 = vpack.c.bf16 %v5212_v13, %v5208_v5  ;;  %v5069_v59 = vadd.f32 %v5068_v16, %v4876_v44  ;;  %v5215_v51 = vmax.f32 %v5067_v28, 0.0  ;;  %v10915_v16 = vpop.f32.mrf.mxu0 }
 0x418   : > { %v5070_v3 = vpop.f32.mrf.mxu1 }
 0x419   : > { %v5071_v49 = vadd.f32 %v5070_v3, %v4878_v6  ;;  %5853 = vmatprep.mubr.bf16.mxu1 %v5316_v15  ;;  %v5216_v48 = vmax.f32 %v5069_v59, 0.0  ;;  %v10923_v59 = vpop.f32.mrf.mxu0 }
 0x41a   : > { %v5072_v14 = vpop.f32.mrf.mxu1  ;;  %5854 = vmatmul.mubr.bf16.gmra.mxu1 %v5315_v40  ;;  %v4896_v40 = vadd.f32 %v10771_v27, %v10804_v19 }
 0x41b   : > { %v5073_v39 = vadd.f32 %v5072_v14, %v4880_v41  ;;  %v5219_v34 = vmax.f32 %v5071_v49, 0.0  ;;  %v4894_v41 = vadd.f32 %v10769_v23, %v10809_v21  ;;  %v4900_v14 = vadd.f32 %v10783_v52, %v10804_v19 }
 0x41c   : > { %v5076_v61 = vpop.f32.mrf.mxu1  ;;  %v4908_v52 = vadd.f32 %v10795_v63, %v10809_v21 }
 0x41d   : > { %v5220_v7 = vmax.f32 %v5073_v39, 0.0  ;;  %v5319_v12 = vpack.c.bf16 %v5219_v34, %v5215_v51  ;;  %v5077_v13 = vadd.f32 %v5076_v61, %v4884_v31 }
 0x41e   : > { %v5078_v57 = vpop.f32.mrf.mxu1 }
 0x41f   : > { %v5320_v37 = vpack.c.bf16 %v5220_v7, %v5216_v48  ;;  %v5079_v47 = vadd.f32 %v5078_v57, %v4886_v62  ;;  %v5223_v15 = vmax.f32 %v5077_v13, 0.0  ;;  %v10927_v7 = vpop.f32.mrf.mxu0 }
 0x420   : > { %v5080_v8 = vpop.f32.mrf.mxu1 }
 0x421   : > { %v5081_v5 = vadd.f32 %v5080_v8, %v4888_v55  ;;  %5861 = vmatprep.mubr.bf16.mxu1 %v5320_v37  ;;  %v5224_v6 = vmax.f32 %v5079_v47, 0.0  ;;  %v4906_v37 = vadd.f32 %v10787_v9, %v10804_v19  ;;  %v10935_v8 = vpop.f32.mrf.mxu0 }
 0x422   : > { %v5082_v42 = vpop.f32.mrf.mxu1  ;;  %5862 = vmatmul.mubr.bf16.gmra.mxu1 %v5319_v12  ;;  %v4904_v12 = vadd.f32 %v10785_v30, %v10809_v21 }
 0x423   : > { %v5083_v17 = vadd.f32 %v5082_v42, %v4890_v33  ;;  %v5227_v0 = vmax.f32 %v5081_v5, 0.0  ;;  %v4910_v5 = vadd.f32 %v10799_v24, %v10804_v19  ;;  %v4916_v24 = vadd.f32 %v10813_v54, %v10804_v19 }
 0x424   : > { %v5086_v44 = vpop.f32.mrf.mxu1 }
 0x425   : > { %v5228_v2 = vmax.f32 %v5083_v17, 0.0  ;;  %v5323_v49 = vpack.c.bf16 %v5227_v0, %v5223_v15  ;;  %v5087_v61 = vadd.f32 %v5086_v44, %v4894_v41 }
 0x426   : > { %v5088_v1 = vpop.f32.mrf.mxu1 }
 0x427   : > { %v5324_v3 = vpack.c.bf16 %v5228_v2, %v5224_v6  ;;  %v5089_v39 = vadd.f32 %v5088_v1, %v4896_v40  ;;  %v5231_v62 = vmax.f32 %v5087_v61, 0.0 }
 0x428   : > { %v5090_v28 = vpop.f32.mrf.mxu1 }
 0x429   : > { %v5091_v34 = vadd.f32 %v5090_v28, %v4898_v18  ;;  %5869 = vmatprep.mubr.bf16.mxu1 %v5324_v3  ;;  %v5232_v57 = vmax.f32 %v5089_v39, 0.0  ;;  %v4918_v3 = vadd.f32 %v10821_v32, %v10809_v21  ;;  %v4920_v39 = vadd.f32 %v10825_v56, %v10804_v19 }
 0x42a   : > { %v5092_v48 = vpop.f32.mrf.mxu1  ;;  %5870 = vmatmul.mubr.bf16.gmra.mxu1 %v5323_v49  ;;  %v4914_v49 = vadd.f32 %v10811_v26, %v10809_v21  ;;  %v4926_v56 = vadd.f32 %v10829_v35, %v10804_v19 }
 0x42b   : > { %v5093_v27 = vadd.f32 %v5092_v48, %v4900_v14  ;;  %v5235_v25 = vmax.f32 %v5091_v34, 0.0 }
 0x42c   : > { %v5096_v51 = vpop.f32.mrf.mxu1 }
 0x42d   : > { %v5236_v23 = vmax.f32 %v5093_v27, 0.0  ;;  %v5327_v33 = vpack.c.bf16 %v5235_v25, %v5231_v62  ;;  %v5097_v17 = vadd.f32 %v5096_v51, %v4904_v12 }
 0x42e   : > { %v5098_v55 = vpop.f32.mrf.mxu1 }
 0x42f   : > { %v5328_v31 = vpack.c.bf16 %v5236_v23, %v5232_v57  ;;  %v5099_v13 = vadd.f32 %v5098_v55, %v4906_v37  ;;  %v5239_v1 = vmax.f32 %v5097_v17, 0.0  ;;  %v4928_v37 = vadd.f32 %v10837_v45, %v10809_v21 }
 0x430   : > { %v5100_v47 = vpop.f32.mrf.mxu1 }
 0x431   : > { %v5101_v42 = vadd.f32 %v5100_v47, %v4908_v52  ;;  %5877 = vmatprep.mubr.bf16.mxu1 %v5328_v31  ;;  %v5240_v30 = vmax.f32 %v5099_v13, 0.0  ;;  %v4924_v31 = vadd.f32 %v10827_v29, %v10809_v21  ;;  %v4930_v47 = vadd.f32 %v10841_v50, %v10804_v19 }
 0x432   : > { %v5102_v0 = vpop.f32.mrf.mxu1  ;;  %v10939_v9 = vpop.f32.mrf.mxu0  ;;  %5878 = vmatmul.mubr.bf16.gmra.mxu1 %v5327_v33  ;;  %v4936_v50 = vadd.f32 %v10851_v46, %v10804_v19 }
 0x433   : > { %v5103_v63 = vadd.f32 %v5102_v0, %v4910_v5  ;;  %v5243_v44 = vmax.f32 %v5101_v42, 0.0 }
 0x434   : > { %v5106_v6 = vpop.f32.mrf.mxu1  ;;  %v10941_v2 = vpop.f32.mrf.mxu0 }
 0x435   : > { %v5244_v15 = vmax.f32 %v5103_v63, 0.0  ;;  %v5331_v28 = vpack.c.bf16 %v5243_v44, %v5239_v1  ;;  %v5107_v48 = vadd.f32 %v5106_v6, %v4914_v49  ;;  %v4938_v1 = vadd.f32 %v10855_v22, %v10809_v21 }
 0x436   : > { %v5108_v40 = vpop.f32.mrf.mxu1  ;;  %v10943_v18 = vpop.f32.mrf.mxu0  ;;  %v4940_v49 = vadd.f32 %v10863_v58, %v10804_v19  ;;  %v4946_v58 = vadd.f32 %v10875_v60, %v10804_v19 }
 0x437   : > { %v5332_v41 = vpack.c.bf16 %v5244_v15, %v5240_v30  ;;  %v5109_v34 = vadd.f32 %v5108_v40, %v4916_v24  ;;  %v5247_v62 = vmax.f32 %v5107_v48, 0.0  ;;  %v4934_v24 = vadd.f32 %v10843_v38, %v10809_v21 }
 0x438   : > { %v5110_v14 = vpop.f32.mrf.mxu1  ;;  %v10953_v27 = vpop.f32.mrf.mxu0 }
 0x439   : > { %v5111_v61 = vadd.f32 %v5110_v14, %v4918_v3  ;;  %5885 = vmatprep.mubr.bf16.mxu1 %v5332_v41  ;;  %v5248_v57 = vmax.f32 %v5109_v34, 0.0 }
 0x43a   : > { %v5112_v25 = vpop.f32.mrf.mxu1  ;;  %5886 = vmatmul.mubr.bf16.gmra.mxu1 %v5331_v28  ;;  %v10955_v26 = vpop.f32.mrf.mxu0 }
 0x43b   : > { %v5113_v54 = vadd.f32 %v5112_v25, %v4920_v39  ;;  %v5251_v51 = vmax.f32 %v5111_v61, 0.0 }
 0x43c   : > { %v5116_v32 = vpop.f32.mrf.mxu1  ;;  %v10965_v17 = vpop.f32.mrf.mxu0 }
 0x43d   : > { %v5252_v23 = vmax.f32 %v5113_v54, 0.0  ;;  %v5335_v12 = vpack.c.bf16 %v5251_v51, %v5247_v62  ;;  %v5117_v42 = vadd.f32 %v5116_v32, %v4924_v31  ;;  %v4944_v62 = vadd.f32 %v10867_v53, %v10809_v21 }
 0x43e   : > { %v5118_v55 = vpop.f32.mrf.mxu1  ;;  %v10967_v29 = vpop.f32.mrf.mxu0 }
 0x43f   : > { %v5336_v52 = vpack.c.bf16 %v5252_v23, %v5248_v57  ;;  %v5119_v5 = vadd.f32 %v5118_v55, %v4926_v56  ;;  %v5255_v30 = vmax.f32 %v5117_v42, 0.0  ;;  %v4948_v57 = vadd.f32 %v10879_v11, %v10809_v21 }
 0x440   : > { %v5120_v33 = vpop.f32.mrf.mxu1  ;;  %v10977_v39 = vpop.f32.mrf.mxu0 }
 0x441   : > { %v5121_v13 = vadd.f32 %v5120_v33, %v4928_v37  ;;  %5893 = vmatprep.mubr.bf16.mxu1 %v5336_v52  ;;  %v5256_v44 = vmax.f32 %v5119_v5, 0.0  ;;  %v4950_v37 = vadd.f32 %v10887_v10, %v10804_v19  ;;  %v4956_v10 = vadd.f32 %v10899_v20, %v10804_v19 }
 0x442   : > { %v5122_v0 = vpop.f32.mrf.mxu1  ;;  %5894 = vmatmul.mubr.bf16.gmra.mxu1 %v5335_v12  ;;  %v10979_v51 = vpop.f32.mrf.mxu0 }
 0x443   : > { %v5123_v35 = vadd.f32 %v5122_v0, %v4930_v47  ;;  %v5259_v63 = vmax.f32 %v5121_v13, 0.0 }
 0x444   : > { %v5126_v45 = vpop.f32.mrf.mxu1  ;;  %v10989_v12 = vpop.f32.mrf.mxu0 }
 0x445   : > { %v5260_v6 = vmax.f32 %v5123_v35, 0.0  ;;  %v5339_v3 = vpack.c.bf16 %v5259_v63, %v5255_v30  ;;  %v5127_v34 = vadd.f32 %v5126_v45, %v4934_v24  ;;  %v4958_v63 = vadd.f32 %v10903_v43, %v10809_v21 }
 0x446   : > { %v5128_v15 = vpop.f32.mrf.mxu1  ;;  %v10991_v0 = vpop.f32.mrf.mxu0 }
 0x447   : > { %v5340_v40 = vpack.c.bf16 %v5260_v6, %v5256_v44  ;;  %v5129_v28 = vadd.f32 %v5128_v15, %v4936_v50  ;;  %v5263_v38 = vmax.f32 %v5127_v34, 0.0  ;;  %v4954_v44 = vadd.f32 %v10891_v4, %v10809_v21 }
 0x448   : > { %v5130_v41 = vpop.f32.mrf.mxu1  ;;  %v4960_v15 = vadd.f32 %v10911_v36, %v10804_v19  ;;  %v4966_v36 = vadd.f32 %v10923_v59, %v10804_v19 }
 0x449   : > { %v5131_v14 = vadd.f32 %v5130_v41, %v4938_v1  ;;  %5901 = vmatprep.mubr.bf16.mxu1 %v5340_v40  ;;  %v5264_v25 = vmax.f32 %v5129_v28, 0.0  ;;  %v11001_v40 = vpop.f32.mrf.mxu0 }
 0x44a   : > { %v5132_v61 = vpop.f32.mrf.mxu1  ;;  %5902 = vmatmul.mubr.bf16.gmra.mxu1 %v5339_v3 }
 0x44b   : > { %v5133_v46 = vadd.f32 %v5132_v61, %v4940_v49  ;;  %v5267_v48 = vmax.f32 %v5131_v14, 0.0  ;;  %v11003_v14 = vpop.f32.mrf.mxu0  ;;  %v4968_v61 = vadd.f32 %v10927_v7, %v10809_v21 }
 0x44c   : > { %v5136_v22 = vpop.f32.mrf.mxu1 }
 0x44d   : > { %v5268_v54 = vmax.f32 %v5133_v46, 0.0  ;;  %v5343_v55 = vpack.c.bf16 %v5267_v48, %v5263_v38  ;;  %v5137_v33 = vadd.f32 %v5136_v22, %v4944_v62  ;;  %v4964_v48 = vadd.f32 %v10915_v16, %v10809_v21 }
 0x44e   : > { %v5138_v32 = vpop.f32.mrf.mxu1 }
 0x44f   : > { %v5344_v23 = vpack.c.bf16 %v5268_v54, %v5264_v25  ;;  %v5139_v52 = vadd.f32 %v5138_v32, %v4946_v58  ;;  %v5271_v53 = vmax.f32 %v5137_v33, 0.0  ;;  %v4970_v54 = vadd.f32 %v10935_v8, %v10804_v19  ;;  %v11013_v58 = vpop.f32.mrf.mxu0 }
 0x450   : > { %v5140_v56 = vpop.f32.mrf.mxu1 }
 0x451   : > { %v5141_v31 = vadd.f32 %v5140_v56, %v4948_v57  ;;  %5909 = vmatprep.mubr.bf16.mxu1 %v5344_v23  ;;  %v5272_v13 = vmax.f32 %v5139_v52, 0.0  ;;  %v11015_v56 = vpop.f32.mrf.mxu0 }
 0x452   : > { %v5142_v47 = vpop.f32.mrf.mxu1  ;;  %5910 = vmatmul.mubr.bf16.gmra.mxu1 %v5343_v55 }
 0x453   : > { %v5143_v60 = vadd.f32 %v5142_v47, %v4950_v37  ;;  %v5275_v5 = vmax.f32 %v5141_v31, 0.0  ;;  %v11017_v52 = vpop.f32.mrf.mxu0 }
 0x454   : > { %v5146_v11 = vpop.f32.mrf.mxu1 }
 0x455   : > { %v5276_v42 = vmax.f32 %v5143_v60, 0.0  ;;  %v5347_v6 = vpack.c.bf16 %v5275_v5, %v5271_v53  ;;  %v5147_v24 = vadd.f32 %v5146_v11, %v4954_v44  ;;  %v11019_v19 = vpop.f32.mrf.mxu0 }
 0x456   : > { %v5148_v35 = vpop.f32.mrf.mxu1 }
 0x457   : > { %v5348_v45 = vpack.c.bf16 %v5276_v42, %v5272_v13  ;;  %v5149_v50 = vadd.f32 %v5148_v35, %v4956_v10  ;;  %v5279_v4 = vmax.f32 %v5147_v24, 0.0  ;;  %v11021_v8 = vpop.f32.mrf.mxu0 }
 0x458   : > { %v5150_v30 = vpop.f32.mrf.mxu1 }
 0x459   : > { %v5151_v1 = vadd.f32 %v5150_v30, %v4958_v63  ;;  %5917 = vmatprep.mubr.bf16.mxu1 %v5348_v45  ;;  %v5280_v49 = vmax.f32 %v5149_v50, 0.0  ;;  %v11023_v31 = vpop.f32.mrf.mxu0  ;;  %v6758_v30 = vadd.f32 %v10941_v2, %v10939_v9 }
 0x45a   : > { %v5152_v3 = vpop.f32.mrf.mxu1  ;;  %5918 = vmatmul.mubr.bf16.gmra.mxu1 %v5347_v6 }
 0x45b   : > { %v5153_v20 = vadd.f32 %v5152_v3, %v4960_v15  ;;  %v5283_v41 = vmax.f32 %v5151_v1, 0.0  ;;  %v11025_v33 = vpop.f32.mrf.mxu0  ;;  %v11058_v15 = vld [vmem:[%s11521_s6] ss:$0 sm:$0xff] }
 0x45c   : > { %v5156_v43 = vpop.f32.mrf.mxu1  ;;  %v5655_v3 = vadd.f32 %v6758_v30, %v11058_v15  ;;  %v6776_v30 = vadd.f32 %v11013_v58, %v11003_v14 }
 0x45d   : > { %v5284_v28 = vmax.f32 %v5153_v20, 0.0  ;;  %v5351_v22 = vpack.c.bf16 %v5283_v41, %v5279_v4  ;;  %v5157_v57 = vadd.f32 %v5156_v43, %v4964_v48  ;;  %v11027_v47 = vpop.f32.mrf.mxu0  ;;  %v6761_v20 = vadd.f32 %v10953_v27, %v10943_v18 }
 0x45e   : > { %v5158_v34 = vpop.f32.mrf.mxu1  ;;  %v6764_v4 = vadd.f32 %v10965_v17, %v10955_v26  ;;  %v6767_v48 = vadd.f32 %v10977_v39, %v10967_v29 }
 0x45f   : > { %v5352_v46 = vpack.c.bf16 %v5284_v28, %v5280_v49  ;;  %v5159_v38 = vadd.f32 %v5158_v34, %v4966_v36  ;;  %v5287_v21 = vmax.f32 %v5157_v57, 0.0  ;;  %v11029_v60 = vpop.f32.mrf.mxu0  ;;  %v5658_v2 = vadd.f32 %v6761_v20, %v11058_v15 }
 0x460   : > { %v5160_v25 = vpop.f32.mrf.mxu1  ;;  %v5663_v27 = vadd.f32 %v6764_v4, %v11058_v15  ;;  %v5679_v20 = vadd.f32 %v6776_v30, %v11058_v15 }
 0x461   : > { %v5161_v32 = vadd.f32 %v5160_v25, %v4968_v61  ;;  %5925 = vmatprep.mubr.bf16.mxu1 %v5352_v46  ;;  %v5288_v7 = vmax.f32 %v5159_v38, 0.0  ;;  %v11031_v5 = vpop.f32.mrf.mxu0  ;;  %v5666_v38 = vadd.f32 %v6767_v48, %v11058_v15 }
 0x462   : > { %v5162_v23 = vpop.f32.mrf.mxu1  ;;  %5926 = vmatmul.mubr.bf16.gmra.mxu1 %v5351_v22 }
 0x463   : > { %v5163_v59 = vadd.f32 %v5162_v23, %v4970_v54  ;;  %v5291_v62 = vmax.f32 %v5161_v32, 0.0  ;;  %v11033_v11 = vpop.f32.mrf.mxu0  ;;  %v6770_v32 = vadd.f32 %v10989_v12, %v10979_v51 }
 0x465   : > { %v5292_v55 = vmax.f32 %v5163_v59, 0.0  ;;  %v5355_v37 = vpack.c.bf16 %v5291_v62, %v5287_v21  ;;  %v11035_v13 = vpop.f32.mrf.mxu0  ;;  %v5671_v62 = vadd.f32 %v6770_v32, %v11058_v15 }
 0x467   : > { %v5356_v16 = vpack.c.bf16 %v5292_v55, %v5288_v7  ;;  %v11037_v42 = vpop.f32.mrf.mxu0  ;;  %v6773_v7 = vadd.f32 %v11001_v40, %v10991_v0 }
 0x469   : > { %5933 = vmatprep.mubr.bf16.mxu1 %v5356_v16  ;;  %v11039_v53 = vpop.f32.mrf.mxu0 }
 0x46a   : > { %5934 = vmatmul.mubr.bf16.gmra.mxu1 %v5355_v37  ;;  %v5674_v37 = vadd.f32 %v6773_v7, %v11058_v15 }
 0x46b   : > { %v11041_v35 = vpop.f32.mrf.mxu0 }
 0x46d   : > { %v11043_v10 = vpop.f32.mrf.mxu0 }
 0x46f   : > { %v11045_v63 = vpop.f32.mrf.mxu0 }
 0x471   : > { %v11047_v45 = vpop.f32.mrf.mxu0 }
 0x473   : > { %v11049_v44 = vpop.f32.mrf.mxu0 }
 0x475   : > { %v11051_v6 = vpop.f32.mrf.mxu0 }
 0x477   : > { %v11060_v50 = vpop.f32.mrf.mxu0 }
 0x479   : > { %v11065_v43 = vpop.f32.mrf.mxu0 }
 0x47b   : > { %v11073_v36 = vpop.f32.mrf.mxu0 }
 0x47d   : > { %v11081_v25 = vpop.f32.mrf.mxu0 }
 0x47f   : > { %v11089_v23 = vpop.f32.mrf.mxu0 }
 0x481   : > { %v11097_v21 = vpop.f32.mrf.mxu0 }
 0x4b2   : > { %v6868_v1 = vpop.f32.mrf.mxu1 }
 0x4b4   : > { %v6869_v24 = vpop.f32.mrf.mxu1 }
 0x4b5   : > { %v6870_v41 = vadd.f32 %v6869_v24, %v6868_v1  ;;  %v11105_v24 = vpop.f32.mrf.mxu0 }
 0x4b6   : > { %v6871_v49 = vpop.f32.mrf.mxu1 }
 0x4b7   : > { %v11067_v28 = vadd.f32 %v6870_v41, %v5655_v3  ;;  %v6779_v41 = vadd.f32 %v11017_v52, %v11015_v56 }
 0x4b8   : > { %v6872_v9 = vpop.f32.mrf.mxu1 }
 0x4b9   : > { %v6873_v34 = vadd.f32 %v6872_v9, %v6871_v49  ;;  %5942 = vmax.xlane.f32.xlu0 %v11067_v28  ;;  %v11113_v9 = vpop.f32.mrf.mxu0  ;;  %v5682_v4 = vadd.f32 %v6779_v41, %v11058_v15 }
 0x4ba   : > { %v6874_v61 = vpop.f32.mrf.mxu1 }
 0x4bb   : > { %v11075_v46 = vadd.f32 %v6873_v34, %v5658_v2  ;;  %v6782_v34 = vadd.f32 %v11021_v8, %v11019_v19 }
 0x4bc   : > { %v6875_v18 = vpop.f32.mrf.mxu1 }
 0x4bd   : > { %v6876_v22 = vadd.f32 %v6875_v18, %v6874_v61  ;;  %5944 = vmax.xlane.f32.xlu0 %v11075_v46  ;;  %v11121_v18 = vpop.f32.mrf.mxu0  ;;  %v5687_v48 = vadd.f32 %v6782_v34, %v11058_v15 }
 0x4be   : > { %v6877_v26 = vpop.f32.mrf.mxu1 }
 0x4bf   : > { %v11083_v17 = vadd.f32 %v6876_v22, %v5663_v27  ;;  %v6785_v22 = vadd.f32 %v11025_v33, %v11023_v31 }
 0x4c0   : > { %v6878_v54 = vpop.f32.mrf.mxu1 }
 0x4c1   : > { %v6879_v57 = vadd.f32 %v6878_v54, %v6877_v26  ;;  %5946 = vmax.xlane.f32.xlu1 %v11083_v17  ;;  %v11129_v54 = vpop.f32.mrf.mxu0  ;;  %v5690_v32 = vadd.f32 %v6785_v22, %v11058_v15 }
 0x4c2   : > { %v6880_v29 = vpop.f32.mrf.mxu1 }
 0x4c3   : > { %v11091_v39 = vadd.f32 %v6879_v57, %v5666_v38  ;;  %v6788_v57 = vadd.f32 %v11029_v60, %v11027_v47 }
 0x4c4   : > { %v6881_v59 = vpop.f32.mrf.mxu1 }
 0x4c5   : > { %v6882_v55 = vadd.f32 %v6881_v59, %v6880_v29  ;;  %5948 = vmax.xlane.f32.xlu1 %v11091_v39  ;;  %v11137_v59 = vpop.f32.mrf.mxu0  ;;  %v5695_v7 = vadd.f32 %v6788_v57, %v11058_v15 }
 0x4c6   : > { %v6883_v51 = vpop.f32.mrf.mxu1 }
 0x4c7   : > { %v11099_v12 = vadd.f32 %v6882_v55, %v5671_v62  ;;  %v6791_v55 = vadd.f32 %v11033_v11, %v11031_v5 }
 0x4c8   : > { %v6884_v16 = vpop.f32.mrf.mxu1 }
 0x4c9   : > { %v6885_v1 = vadd.f32 %v6884_v16, %v6883_v51  ;;  %5950 = vmax.xlane.f32.xlu0 %v11099_v12  ;;  %v11145_v16 = vpop.f32.mrf.mxu0  ;;  %v5698_v30 = vadd.f32 %v6791_v55, %v11058_v15 }
 0x4ca   : > { %v6886_v0 = vpop.f32.mrf.mxu1 }
 0x4cb   : > { %v11107_v40 = vadd.f32 %v6885_v1, %v5674_v37  ;;  %v6794_v1 = vadd.f32 %v11037_v42, %v11035_v13 }
 0x4cc   : > { %v6887_v3 = vpop.f32.mrf.mxu1 }
 0x4cd   : > { %v6888_v49 = vadd.f32 %v6887_v3, %v6886_v0  ;;  %5952 = vmax.xlane.f32.xlu1 %v11107_v40  ;;  %v11153_v3 = vpop.f32.mrf.mxu0  ;;  %v5703_v41 = vadd.f32 %v6794_v1, %v11058_v15 }
 0x4ce   : > { %v6889_v14 = vpop.f32.mrf.mxu1 }
 0x4cf   : > { %v11115_v58 = vadd.f32 %v6888_v49, %v5679_v20  ;;  %v6797_v49 = vadd.f32 %v11041_v35, %v11039_v53 }
 0x4d0   : > { %v6890_v2 = vpop.f32.mrf.mxu1 }
 0x4d1   : > { %v6891_v61 = vadd.f32 %v6890_v2, %v6889_v14  ;;  %5954 = vmax.xlane.f32.xlu0 %v11115_v58  ;;  %v11161_v2 = vpop.f32.mrf.mxu0  ;;  %v5706_v34 = vadd.f32 %v6797_v49, %v11058_v15 }
 0x4d2   : > { %v6892_v56 = vpop.f32.mrf.mxu1 }
 0x4d3   : > { %v11123_v52 = vadd.f32 %v6891_v61, %v5682_v4  ;;  %v6800_v61 = vadd.f32 %v11045_v63, %v11043_v10 }
 0x4d4   : > { %v6893_v27 = vpop.f32.mrf.mxu1 }
 0x4d5   : > { %v6894_v26 = vadd.f32 %v6893_v27, %v6892_v56  ;;  %5956 = vmax.xlane.f32.xlu1 %v11123_v52  ;;  %v11169_v27 = vpop.f32.mrf.mxu0  ;;  %v5711_v22 = vadd.f32 %v6800_v61, %v11058_v15 }
 0x4d6   : > { %v6895_v19 = vpop.f32.mrf.mxu1 }
 0x4d7   : > { %v11131_v8 = vadd.f32 %v6894_v26, %v5687_v48  ;;  %v6803_v26 = vadd.f32 %v11049_v44, %v11047_v45 }
 0x4d8   : > { %v6896_v38 = vpop.f32.mrf.mxu1 }
 0x4d9   : > { %v6897_v29 = vadd.f32 %v6896_v38, %v6895_v19  ;;  %5958 = vmax.xlane.f32.xlu0 %v11131_v8  ;;  %v11177_v38 = vpop.f32.mrf.mxu0  ;;  %v5714_v57 = vadd.f32 %v6803_v26, %v11058_v15 }
 0x4da   : > { %v6898_v31 = vpop.f32.mrf.mxu1 }
 0x4db   : > { %v11139_v33 = vadd.f32 %v6897_v29, %v5690_v32  ;;  %v6806_v29 = vadd.f32 %v11060_v50, %v11051_v6 }
 0x4dc   : > { %v6899_v62 = vpop.f32.mrf.mxu1 }
 0x4dd   : > { %v6900_v51 = vadd.f32 %v6899_v62, %v6898_v31  ;;  %5960 = vmax.xlane.f32.xlu1 %v11139_v33  ;;  %v6829_v62 = vpop.f32.mrf.mxu0  ;;  %v5719_v55 = vadd.f32 %v6806_v29, %v11058_v15 }
 0x4de   : > { %v6901_v47 = vpop.f32.mrf.mxu1 }
 0x4df   : > { %v11147_v60 = vadd.f32 %v6900_v51, %v5695_v7  ;;  %v6809_v51 = vadd.f32 %v11073_v36, %v11065_v43 }
 0x4e0   : > { %v6902_v37 = vpop.f32.mrf.mxu1 }
 0x4e1   : > { %v6903_v0 = vadd.f32 %v6902_v37, %v6901_v47  ;;  %5962 = vmax.xlane.f32.xlu0 %v11147_v60  ;;  %v6831_v37 = vpop.f32.mrf.mxu0  ;;  %v5722_v50 = vadd.f32 %v6809_v51, %v11058_v15 }
 0x4e2   : > { %v6904_v5 = vpop.f32.mrf.mxu1 }
 0x4e3   : > { %v11155_v11 = vadd.f32 %v6903_v0, %v5698_v30  ;;  %v6812_v0 = vadd.f32 %v11089_v23, %v11081_v25 }
 0x4e4   : > { %v6905_v20 = vpop.f32.mrf.mxu1 }
 0x4e5   : > { %v6906_v14 = vadd.f32 %v6905_v20, %v6904_v5  ;;  %5964 = vmax.xlane.f32.xlu1 %v11155_v11  ;;  %v6832_v20 = vpop.f32.mrf.mxu0  ;;  %v5727_v36 = vadd.f32 %v6812_v0, %v11058_v15 }
 0x4e6   : > { %v6907_v13 = vpop.f32.mrf.mxu1 }
 0x4e7   : > { %v11163_v42 = vadd.f32 %v6906_v14, %v5703_v41  ;;  %v6815_v14 = vadd.f32 %v11105_v24, %v11097_v21 }
 0x4e8   : > { %v6908_v4 = vpop.f32.mrf.mxu1 }
 0x4e9   : > { %v6909_v56 = vadd.f32 %v6908_v4, %v6907_v13  ;;  %5966 = vmax.xlane.f32.xlu0 %v11163_v42  ;;  %v6834_v4 = vpop.f32.mrf.mxu0  ;;  %v5730_v23 = vadd.f32 %v6815_v14, %v11058_v15 }
 0x4ea   : > { %v6910_v53 = vpop.f32.mrf.mxu1 }
 0x4eb   : > { %v11171_v35 = vadd.f32 %v6909_v56, %v5706_v34  ;;  %v6818_v56 = vadd.f32 %v11121_v18, %v11113_v9 }
 0x4ec   : > { %v6911_v48 = vpop.f32.mrf.mxu1 }
 0x4ed   : > { %v6912_v19 = vadd.f32 %v6911_v48, %v6910_v53  ;;  %5968 = vmax.xlane.f32.xlu1 %v11171_v35  ;;  %v6835_v48 = vpop.f32.mrf.mxu0  ;;  %v5735_v24 = vadd.f32 %v6818_v56, %v11058_v15 }
 0x4ee   : > { %v6913_v10 = vpop.f32.mrf.mxu1 }
 0x4ef   : > { %v11179_v63 = vadd.f32 %v6912_v19, %v5711_v22  ;;  %v6821_v19 = vadd.f32 %v11137_v59, %v11129_v54 }
 0x4f0   : > { %v6914_v32 = vpop.f32.mrf.mxu1 }
 0x4f1   : > { %v6915_v31 = vadd.f32 %v6914_v32, %v6913_v10  ;;  %5970 = vmax.xlane.f32.xlu0 %v11179_v63  ;;  %v6837_v32 = vpop.f32.mrf.mxu0  ;;  %v5738_v18 = vadd.f32 %v6821_v19, %v11058_v15 }
 0x4f2   : > { %v6916_v7 = vpop.f32.mrf.mxu1 }
 0x4f3   : > { %v11185_v45 = vadd.f32 %v6915_v31, %v5714_v57  ;;  %v6824_v31 = vadd.f32 %v11153_v3, %v11145_v16 }
 0x4f4   : > { %v6917_v44 = vpop.f32.mrf.mxu1 }
 0x4f5   : > { %v6918_v47 = vadd.f32 %v6917_v44, %v6916_v7  ;;  %5972 = vmax.xlane.f32.xlu1 %v11185_v45  ;;  %v6838_v44 = vpop.f32.mrf.mxu0  ;;  %v5743_v59 = vadd.f32 %v6824_v31, %v11058_v15 }
 0x4f6   : > { %v6919_v30 = vpop.f32.mrf.mxu1 }
 0x4f7   : > { %v11191_v1 = vadd.f32 %v6918_v47, %v5719_v55  ;;  %v6827_v47 = vadd.f32 %v11169_v27, %v11161_v2 }
 0x4f8   : > { %v6920_v6 = vpop.f32.mrf.mxu1 }
 0x4f9   : > { %v6921_v5 = vadd.f32 %v6920_v6, %v6919_v30  ;;  %5974 = vmax.xlane.f32.xlu0 %v11191_v1  ;;  %v6840_v6 = vpop.f32.mrf.mxu0  ;;  %v5746_v3 = vadd.f32 %v6827_v47, %v11058_v15 }
 0x4fa   : > { %v6922_v41 = vpop.f32.mrf.mxu1 }
 0x4fb   : > { %v11197_v49 = vadd.f32 %v6921_v5, %v5722_v50  ;;  %v6830_v5 = vadd.f32 %v6829_v62, %v11177_v38  ;;  %v6836_v62 = vadd.f32 %v6835_v48, %v6834_v4 }
 0x4fc   : > { %v6923_v43 = vpop.f32.mrf.mxu1 }
 0x4fd   : > { %v6924_v13 = vadd.f32 %v6923_v43, %v6922_v41  ;;  %5976 = vmax.xlane.f32.xlu1 %v11197_v49  ;;  %v6841_v43 = vpop.f32.mrf.mxu0  ;;  %v5751_v27 = vadd.f32 %v6830_v5, %v11058_v15 }
 0x4fe   : > { %v6925_v34 = vpop.f32.mrf.mxu1  ;;  %v6842_v48 = vadd.f32 %v6841_v43, %v6840_v6 }
 0x4ff   : > { %v11203_v61 = vadd.f32 %v6924_v13, %v5727_v36  ;;  %v6833_v13 = vadd.f32 %v6832_v20, %v6831_v37  ;;  %v5759_v37 = vadd.f32 %v6836_v62, %v11058_v15  ;;  %v6839_v20 = vadd.f32 %v6838_v44, %v6837_v32 }
 0x500   : > { %v6926_v25 = vpop.f32.mrf.mxu1  ;;  %v5767_v32 = vadd.f32 %v6842_v48, %v11058_v15 }
 0x501   : > { %v6927_v53 = vadd.f32 %v6926_v25, %v6925_v34  ;;  %5978 = vmax.xlane.f32.xlu0 %v11203_v61  ;;  %v6843_v25 = vpop.f32.mrf.mxu0  ;;  %v5754_v38 = vadd.f32 %v6833_v13, %v11058_v15  ;;  %v5762_v4 = vadd.f32 %v6839_v20, %v11058_v15 }
 0x502   : > { %v6928_v22 = vpop.f32.mrf.mxu1 }
 0x503   : > { %v11209_v26 = vadd.f32 %v6927_v53, %v5730_v23 }
 0x504   : > { %v6929_v21 = vpop.f32.mrf.mxu1 }
 0x505   : > { %v6930_v10 = vadd.f32 %v6929_v21, %v6928_v22  ;;  %5980 = vmax.xlane.f32.xlu1 %v11209_v26  ;;  %v6844_v21 = vpop.f32.mrf.mxu0 }
 0x506   : > { %v6931_v57 = vpop.f32.mrf.mxu1  ;;  %v6845_v44 = vadd.f32 %v6844_v21, %v6843_v25 }
 0x507   : > { %v11215_v29 = vadd.f32 %v6930_v10, %v5735_v24 }
 0x508   : > { %v6932_v9 = vpop.f32.mrf.mxu1  ;;  %v5770_v6 = vadd.f32 %v6845_v44, %v11058_v15 }
 0x509   : > { %v6933_v7 = vadd.f32 %v6932_v9, %v6931_v57  ;;  %5982 = vmax.xlane.f32.xlu0 %v11215_v29  ;;  %v6846_v9 = vpop.f32.mrf.mxu0 }
 0x50a   : > { %v6934_v55 = vpop.f32.mrf.mxu1 }
 0x50b   : > { %v11221_v51 = vadd.f32 %v6933_v7, %v5738_v18 }
 0x50c   : > { %v6935_v54 = vpop.f32.mrf.mxu1 }
 0x50d   : > { %v6936_v30 = vadd.f32 %v6935_v54, %v6934_v55  ;;  %5984 = vmax.xlane.f32.xlu1 %v11221_v51  ;;  %v6847_v54 = vpop.f32.mrf.mxu0 }
 0x50e   : > { %v6937_v50 = vpop.f32.mrf.mxu1  ;;  %v6848_v43 = vadd.f32 %v6847_v54, %v6846_v9 }
 0x50f   : > { %v11227_v0 = vadd.f32 %v6936_v30, %v5743_v59 }
 0x510   : > { %v6938_v16 = vpop.f32.mrf.mxu1  ;;  %v5775_v25 = vadd.f32 %v6848_v43, %v11058_v15 }
 0x511   : > { %v6939_v41 = vadd.f32 %v6938_v16, %v6937_v50  ;;  %5986 = vmax.xlane.f32.xlu0 %v11227_v0  ;;  %v6849_v16 = vpop.f32.mrf.mxu0 }
 0x512   : > { %v6940_v36 = vpop.f32.mrf.mxu1 }
 0x513   : > { %v11232_v14 = vadd.f32 %v6939_v41, %v5746_v3 }
 0x514   : > { %v6941_v2 = vpop.f32.mrf.mxu1 }
 0x515   : > { %v6942_v34 = vadd.f32 %v6941_v2, %v6940_v36  ;;  %5988 = vmax.xlane.f32.xlu1 %v11232_v14  ;;  %v6850_v2 = vpop.f32.mrf.mxu0 }
 0x516   : > { %v6943_v23 = vpop.f32.mrf.mxu1 }
 0x517   : > { %v11236_v56 = vadd.f32 %v6942_v34, %v5751_v27 }
 0x518   : > { %v6944_v53 = vpop.f32.mrf.mxu1 }
 0x519   : > { %v6945_v22 = vadd.f32 %v6944_v53, %v6943_v23  ;;  %5990 = vmax.xlane.f32.xlu0 %v11236_v56  ;;  %v6851_v23 = vadd.f32 %v6850_v2, %v6849_v16 }
 0x51a   : > { %v6946_v24 = vpop.f32.mrf.mxu1 }
 0x51b   : > { %v11240_v19 = vadd.f32 %v6945_v22, %v5754_v38  ;;  %v5778_v21 = vadd.f32 %v6851_v23, %v11058_v15 }
 0x51c   : > { %v6947_v10 = vpop.f32.mrf.mxu1 }
 0x51d   : > { %v6948_v57 = vadd.f32 %v6947_v10, %v6946_v24  ;;  %5992 = vmax.xlane.f32.xlu1 %v11240_v19 }
 0x51e   : > { %v6949_v18 = vpop.f32.mrf.mxu1 }
 0x51f   : > { %v11244_v31 = vadd.f32 %v6948_v57, %v5759_v37 }
 0x520   : > { %v6950_v7 = vpop.f32.mrf.mxu1 }
 0x521   : > { %v6951_v55 = vadd.f32 %v6950_v7, %v6949_v18  ;;  %5994 = vmax.xlane.f32.xlu0 %v11244_v31 }
 0x522   : > { %v6952_v59 = vpop.f32.mrf.mxu1 }
 0x523   : > { %v11248_v47 = vadd.f32 %v6951_v55, %v5762_v4 }
 0x524   : > { %v6953_v30 = vpop.f32.mrf.mxu1 }
 0x525   : > { %v6954_v50 = vadd.f32 %v6953_v30, %v6952_v59  ;;  %5996 = vmax.xlane.f32.xlu1 %v11248_v47 }
 0x526   : > { %v6955_v3 = vpop.f32.mrf.mxu1 }
 0x527   : > { %v11252_v5 = vadd.f32 %v6954_v50, %v5767_v32 }
 0x528   : > { %v6956_v41 = vpop.f32.mrf.mxu1 }
 0x529   : > { %v6957_v36 = vadd.f32 %v6956_v41, %v6955_v3  ;;  %5998 = vmax.xlane.f32.xlu0 %v11252_v5 }
 0x52a   : > { %v6958_v27 = vpop.f32.mrf.mxu1 }
 0x52b   : > { %v11256_v13 = vadd.f32 %v6957_v36, %v5770_v6 }
 0x52c   : > { %v6959_v34 = vpop.f32.mrf.mxu1 }
 0x52d   : > { %v6960_v53 = vadd.f32 %v6959_v34, %v6958_v27  ;;  %6000 = vmax.xlane.f32.xlu1 %v11256_v13 }
 0x52e   : > { %v6961_v38 = vpop.f32.mrf.mxu1 }
 0x52f   : > { %v11260_v62 = vadd.f32 %v6960_v53, %v5775_v25 }
 0x530   : > { %v6962_v22 = vpop.f32.mrf.mxu1 }
 0x531   : > { %v6963_v24 = vadd.f32 %v6962_v22, %v6961_v38  ;;  %6002 = vmax.xlane.f32.xlu0 %v11260_v62 }
 0x533   : > { %v11264_v10 = vadd.f32 %v6963_v24, %v5778_v21 }
 0x535   : > { %6004 = vmax.xlane.f32.xlu1 %v11264_v10 }
 0x542   : > { %v5943_v37 = vpop.xlane.xlu0 %5942 }
 0x543   : > { %v6006_v20 = vsub.f32 %v11067_v28, %v5943_v37 }
 0x545   : > { %v6038_v57 = vmul.f32 1.442695, %v6006_v20 }
 0x546   : > { %v5945_v9 = vpop.xlane.xlu0 %5944 }
 0x547   : > { %7525 = vpow2.f32 %v6038_v57  ;;  %v6007_v18 = vsub.f32 %v11075_v46, %v5945_v9 }
 0x549   : > { %v6040_v7 = vmul.f32 1.442695, %v6007_v18 }
 0x54a   : > { %v5947_v4 = vpop.xlane.xlu1 %5946 }
 0x54b   : > { %7527 = vpow2.f32 %v6040_v7  ;;  %v6008_v15 = vsub.f32 %v11083_v17, %v5947_v4 }
 0x54d   : > { %v6042_v48 = vmul.f32 1.442695, %v6008_v15 }
 0x54e   : > { %v5949_v55 = vpop.xlane.xlu1 %5948 }
 0x54f   : > { %7529 = vpow2.f32 %v6042_v48  ;;  %v6009_v54 = vsub.f32 %v11091_v39, %v5949_v55 }
 0x551   : > { %v6044_v59 = vmul.f32 1.442695, %v6009_v54 }
 0x552   : > { %v5951_v30 = vpop.xlane.xlu0 %5950 }
 0x553   : > { %7531 = vpow2.f32 %v6044_v59  ;;  %v6010_v28 = vsub.f32 %v11099_v12, %v5951_v30 }
 0x554   : > { %v11272_v32 = vpop.eup %7525 }
 0x555   : > { %v6046_v44 = vmul.f32 1.442695, %v6010_v28  ;;  %6102 = vadd.xlane.f32.xlu0 %v11272_v32 }
 0x556   : > { %v5953_v46 = vpop.xlane.xlu1 %5952 }
 0x557   : > { %7533 = vpow2.f32 %v6046_v44  ;;  %v6011_v50 = vsub.f32 %v11107_v40, %v5953_v46 }
 0x558   : > { %v11276_v17 = vpop.eup %7527 }
 0x559   : > { %v6048_v16 = vmul.f32 1.442695, %v6011_v50  ;;  %6104 = vadd.xlane.f32.xlu1 %v11276_v17 }
 0x55a   : > { %v5955_v39 = vpop.xlane.xlu0 %5954 }
 0x55b   : > { %7535 = vpow2.f32 %v6048_v16  ;;  %v6012_v3 = vsub.f32 %v11115_v58, %v5955_v39 }
 0x55c   : > { %v11280_v41 = vpop.eup %7529 }
 0x55d   : > { %v6050_v12 = vmul.f32 1.442695, %v6012_v3  ;;  %6106 = vadd.xlane.f32.xlu0 %v11280_v41 }
 0x55e   : > { %v5957_v6 = vpop.xlane.xlu1 %5956 }
 0x55f   : > { %7537 = vpow2.f32 %v6050_v12  ;;  %v6013_v43 = vsub.f32 %v11123_v52, %v5957_v6 }
 0x560   : > { %v11284_v36 = vpop.eup %7531 }
 0x561   : > { %v6052_v40 = vmul.f32 1.442695, %v6013_v43  ;;  %6108 = vadd.xlane.f32.xlu1 %v11284_v36 }
 0x562   : > { %v5959_v2 = vpop.xlane.xlu0 %5958 }
 0x563   : > { %7539 = vpow2.f32 %v6052_v40  ;;  %v6014_v27 = vsub.f32 %v11131_v8, %v5959_v2 }
 0x564   : > { %v11288_v34 = vpop.eup %7533 }
 0x565   : > { %v6054_v58 = vmul.f32 1.442695, %v6014_v27  ;;  %6110 = vadd.xlane.f32.xlu0 %v11288_v34 }
 0x566   : > { %v5961_v25 = vpop.xlane.xlu1 %5960 }
 0x567   : > { %7541 = vpow2.f32 %v6054_v58  ;;  %v6015_v23 = vsub.f32 %v11139_v33, %v5961_v25 }
 0x568   : > { %v11292_v53 = vpop.eup %7535 }
 0x569   : > { %v6056_v52 = vmul.f32 1.442695, %v6015_v23  ;;  %6112 = vadd.xlane.f32.xlu1 %v11292_v53 }
 0x56a   : > { %v5963_v38 = vpop.xlane.xlu0 %5962 }
 0x56b   : > { %7543 = vpow2.f32 %v6056_v52  ;;  %v6016_v22 = vsub.f32 %v11147_v60, %v5963_v38 }
 0x56c   : > { %v11296_v21 = vpop.eup %7537 }
 0x56d   : > { %v6058_v8 = vmul.f32 1.442695, %v6016_v22  ;;  %6114 = vadd.xlane.f32.xlu0 %v11296_v21 }
 0x56e   : > { %v5965_v24 = vpop.xlane.xlu1 %5964 }
 0x56f   : > { %7545 = vpow2.f32 %v6058_v8  ;;  %v6017_v37 = vsub.f32 %v11155_v11, %v5965_v24 }
 0x570   : > { %v11300_v20 = vpop.eup %7539 }
 0x571   : > { %v6060_v33 = vmul.f32 1.442695, %v6017_v37  ;;  %6116 = vadd.xlane.f32.xlu1 %v11300_v20 }
 0x572   : > { %v5967_v57 = vpop.xlane.xlu0 %5966 }
 0x573   : > { %7547 = vpow2.f32 %v6060_v33  ;;  %v6018_v9 = vsub.f32 %v11163_v42, %v5967_v57 }
 0x574   : > { %v11304_v18 = vpop.eup %7541 }
 0x575   : > { %v6062_v60 = vmul.f32 1.442695, %v6018_v9  ;;  %6118 = vadd.xlane.f32.xlu0 %v11304_v18 }
 0x576   : > { %v5969_v7 = vpop.xlane.xlu1 %5968 }
 0x577   : > { %7549 = vpow2.f32 %v6062_v60  ;;  %v6019_v4 = vsub.f32 %v11171_v35, %v5969_v7 }
 0x578   : > { %v11308_v15 = vpop.eup %7543 }
 0x579   : > { %v6064_v11 = vmul.f32 1.442695, %v6019_v4  ;;  %6120 = vadd.xlane.f32.xlu1 %v11308_v15 }
 0x57a   : > { %v5971_v48 = vpop.xlane.xlu0 %5970 }
 0x57b   : > { %7551 = vpow2.f32 %v6064_v11  ;;  %v6020_v55 = vsub.f32 %v11179_v63, %v5971_v48 }
 0x57c   : > { %v11312_v54 = vpop.eup %7545 }
 0x57d   : > { %v6066_v42 = vmul.f32 1.442695, %v6020_v55  ;;  %6122 = vadd.xlane.f32.xlu0 %v11312_v54 }
 0x57e   : > { %v5973_v59 = vpop.xlane.xlu1 %5972 }
 0x57f   : > { %7553 = vpow2.f32 %v6066_v42  ;;  %v6021_v30 = vsub.f32 %v11185_v45, %v5973_v59 }
 0x580   : > { %v11316_v28 = vpop.eup %7547 }
 0x581   : > { %v6068_v35 = vmul.f32 1.442695, %v6021_v30  ;;  %6124 = vadd.xlane.f32.xlu1 %v11316_v28 }
 0x582   : > { %v5975_v44 = vpop.xlane.xlu0 %5974 }
 0x583   : > { %7555 = vpow2.f32 %v6068_v35  ;;  %v6022_v46 = vsub.f32 %v11191_v1, %v5975_v44 }
 0x584   : > { %v11320_v50 = vpop.eup %7549 }
 0x585   : > { %v6070_v63 = vmul.f32 1.442695, %v6022_v46  ;;  %6126 = vadd.xlane.f32.xlu0 %v11320_v50 }
 0x586   : > { %v5977_v16 = vpop.xlane.xlu1 %5976 }
 0x587   : > { %7557 = vpow2.f32 %v6070_v63  ;;  %v6023_v39 = vsub.f32 %v11197_v49, %v5977_v16 }
 0x588   : > { %v11324_v3 = vpop.eup %7551 }
 0x589   : > { %v6072_v45 = vmul.f32 1.442695, %v6023_v39  ;;  %6128 = vadd.xlane.f32.xlu1 %v11324_v3 }
 0x58a   : > { %v5979_v12 = vpop.xlane.xlu0 %5978 }
 0x58b   : > { %7559 = vpow2.f32 %v6072_v45  ;;  %v6024_v6 = vsub.f32 %v11203_v61, %v5979_v12 }
 0x58c   : > { %v11328_v43 = vpop.eup %7553 }
 0x58d   : > { %v6074_v1 = vmul.f32 1.442695, %v6024_v6  ;;  %6130 = vadd.xlane.f32.xlu0 %v11328_v43 }
 0x58e   : > { %v5981_v40 = vpop.xlane.xlu1 %5980 }
 0x58f   : > { %7561 = vpow2.f32 %v6074_v1  ;;  %v6025_v2 = vsub.f32 %v11209_v26, %v5981_v40 }
 0x590   : > { %v11332_v27 = vpop.eup %7555 }
 0x591   : > { %v6076_v49 = vmul.f32 1.442695, %v6025_v2  ;;  %6132 = vadd.xlane.f32.xlu1 %v11332_v27 }
 0x592   : > { %v5983_v58 = vpop.xlane.xlu0 %5982 }
 0x593   : > { %7563 = vpow2.f32 %v6076_v49  ;;  %v6026_v25 = vsub.f32 %v11215_v29, %v5983_v58 }
 0x594   : > { %v11336_v23 = vpop.eup %7557 }
 0x595   : > { %v6078_v61 = vmul.f32 1.442695, %v6026_v25  ;;  %6134 = vadd.xlane.f32.xlu0 %v11336_v23 }
 0x596   : > { %v5985_v52 = vpop.xlane.xlu1 %5984 }
 0x597   : > { %7565 = vpow2.f32 %v6078_v61  ;;  %v6027_v38 = vsub.f32 %v11221_v51, %v5985_v52 }
 0x598   : > { %v11340_v22 = vpop.eup %7559 }
 0x599   : > { %v6080_v26 = vmul.f32 1.442695, %v6027_v38  ;;  %6136 = vadd.xlane.f32.xlu1 %v11340_v22 }
 0x59a   : > { %v5987_v8 = vpop.xlane.xlu0 %5986 }
 0x59b   : > { %7567 = vpow2.f32 %v6080_v26  ;;  %v6028_v24 = vsub.f32 %v11227_v0, %v5987_v8 }
 0x59c   : > { %v11344_v37 = vpop.eup %7561 }
 0x59d   : > { %v6082_v29 = vmul.f32 1.442695, %v6028_v24  ;;  %6138 = vadd.xlane.f32.xlu0 %v11344_v37 }
 0x59e   : > { %v5989_v33 = vpop.xlane.xlu1 %5988 }
 0x59f   : > { %7569 = vpow2.f32 %v6082_v29  ;;  %v6029_v57 = vsub.f32 %v11232_v14, %v5989_v33 }
 0x5a0   : > { %v11348_v9 = vpop.eup %7563 }
 0x5a1   : > { %v6084_v51 = vmul.f32 1.442695, %v6029_v57  ;;  %6140 = vadd.xlane.f32.xlu1 %v11348_v9 }
 0x5a2   : > { %v5991_v60 = vpop.xlane.xlu0 %5990 }
 0x5a3   : > { %7571 = vpow2.f32 %v6084_v51  ;;  %v6030_v7 = vsub.f32 %v11236_v56, %v5991_v60 }
 0x5a4   : > { %v11352_v4 = vpop.eup %7565 }
 0x5a5   : > { %v6086_v0 = vmul.f32 1.442695, %v6030_v7  ;;  %6142 = vadd.xlane.f32.xlu0 %v11352_v4 }
 0x5a6   : > { %v5993_v11 = vpop.xlane.xlu1 %5992 }
 0x5a7   : > { %7573 = vpow2.f32 %v6086_v0  ;;  %v6031_v48 = vsub.f32 %v11240_v19, %v5993_v11 }
 0x5a8   : > { %v11356_v55 = vpop.eup %7567 }
 0x5a9   : > { %v6088_v14 = vmul.f32 1.442695, %v6031_v48  ;;  %6144 = vadd.xlane.f32.xlu1 %v11356_v55 }
 0x5aa   : > { %v5995_v42 = vpop.xlane.xlu0 %5994 }
 0x5ab   : > { %7575 = vpow2.f32 %v6088_v14  ;;  %v6032_v59 = vsub.f32 %v11244_v31, %v5995_v42 }
 0x5ac   : > { %v11360_v30 = vpop.eup %7569 }
 0x5ad   : > { %v6090_v56 = vmul.f32 1.442695, %v6032_v59  ;;  %6146 = vadd.xlane.f32.xlu0 %v11360_v30 }
 0x5ae   : > { %v5997_v35 = vpop.xlane.xlu1 %5996 }
 0x5af   : > { %7577 = vpow2.f32 %v6090_v56  ;;  %v6033_v44 = vsub.f32 %v11248_v47, %v5997_v35 }
 0x5b0   : > { %v11364_v46 = vpop.eup %7571 }
 0x5b1   : > { %v6092_v19 = vmul.f32 1.442695, %v6033_v44  ;;  %6148 = vadd.xlane.f32.xlu1 %v11364_v46 }
 0x5b2   : > { %v5999_v63 = vpop.xlane.xlu0 %5998 }
 0x5b3   : > { %7579 = vpow2.f32 %v6092_v19  ;;  %v6034_v16 = vsub.f32 %v11252_v5, %v5999_v63 }
 0x5b4   : > { %v11368_v39 = vpop.eup %7573 }
 0x5b5   : > { %v6094_v31 = vmul.f32 1.442695, %v6034_v16  ;;  %6150 = vadd.xlane.f32.xlu0 %v11368_v39 }
 0x5b6   : > { %v6001_v45 = vpop.xlane.xlu1 %6000 }
 0x5b7   : > { %7581 = vpow2.f32 %v6094_v31  ;;  %v6035_v12 = vsub.f32 %v11256_v13, %v6001_v45 }
 0x5b8   : > { %v11372_v6 = vpop.eup %7575 }
 0x5b9   : > { %v6096_v47 = vmul.f32 1.442695, %v6035_v12  ;;  %6152 = vadd.xlane.f32.xlu1 %v11372_v6 }
 0x5ba   : > { %v6003_v1 = vpop.xlane.xlu0 %6002 }
 0x5bb   : > { %7583 = vpow2.f32 %v6096_v47  ;;  %v6036_v40 = vsub.f32 %v11260_v62, %v6003_v1 }
 0x5bc   : > { %v11376_v2 = vpop.eup %7577 }
 0x5bd   : > { %v6098_v5 = vmul.f32 1.442695, %v6036_v40  ;;  %6154 = vadd.xlane.f32.xlu0 %v11376_v2 }
 0x5be   : > { %v6005_v49 = vpop.xlane.xlu1 %6004 }
 0x5bf   : > { %7585 = vpow2.f32 %v6098_v5  ;;  %v6037_v58 = vsub.f32 %v11264_v10, %v6005_v49 }
 0x5c0   : > { %v11380_v25 = vpop.eup %7579 }
 0x5c1   : > { %v6100_v13 = vmul.f32 1.442695, %v6037_v58  ;;  %6156 = vadd.xlane.f32.xlu1 %v11380_v25 }
 0x5c3   : > { %7587 = vpow2.f32 %v6100_v13 }
 0x5c4   : > { %v11383_v61 = vpop.eup %7581 }
 0x5c5   : > { %6158 = vadd.xlane.f32.xlu0 %v11383_v61 }
 0x5c8   : > { %v11386_v62 = vpop.eup %7583 }
 0x5c9   : > { %6160 = vadd.xlane.f32.xlu1 %v11386_v62 }
 0x5cc   : > { %v11389_v52 = vpop.eup %7585 }
 0x5cd   : > { %6162 = vadd.xlane.f32.xlu0 %v11389_v52 }
 0x5d0   : > { %v11392_v10 = vpop.eup %7587 }
 0x5d1   : > { %6164 = vadd.xlane.f32.xlu1 %v11392_v10 }
 0x5de   : > { %v6103_v38 = vpop.xlane.xlu0 %6102 }
 0x5df   : > { %7589 = vrcp.f32 %v6103_v38 }
 0x5e2   : > { %v6105_v26 = vpop.xlane.xlu1 %6104 }
 0x5e3   : > { %7591 = vrcp.f32 %v6105_v26 }
 0x5e6   : > { %v6107_v8 = vpop.xlane.xlu0 %6106 }
 0x5e7   : > { %7593 = vrcp.f32 %v6107_v8 }
 0x5ea   : > { %v6109_v24 = vpop.xlane.xlu1 %6108 }
 0x5eb   : > { %7595 = vrcp.f32 %v6109_v24 }
 0x5ec   : > { %v7590_v29 = vpop.eup %7589 }
 0x5ed   : > { %v6198_v33 = vmul.f32 %v7590_v29, %v11272_v32 }
 0x5ee   : > { %v6111_v57 = vpop.xlane.xlu0 %6110 }
 0x5ef   : > { %6230 = vst [vmem:[%s11399_s22] sm:$0xff] %v6198_v33  ;;  %7597 = vrcp.f32 %v6111_v57 }
 0x5f0   : > { %v7592_v51 = vpop.eup %7591 }
 0x5f1   : > { %v6199_v60 = vmul.f32 %v7592_v51, %v11276_v17 }
 0x5f2   : > { %v6113_v7 = vpop.xlane.xlu1 %6112 }
 0x5f3   : > { %6231 = vst [vmem:[%s11399_s22 + $0x8] sm:$0xff] %v6199_v60  ;;  %7599 = vrcp.f32 %v6113_v7 }
 0x5f4   : > { %v7594_v0 = vpop.eup %7593 }
 0x5f5   : > { %v6200_v11 = vmul.f32 %v7594_v0, %v11280_v41 }
 0x5f6   : > { %v6115_v32 = vpop.xlane.xlu0 %6114 }
 0x5f7   : > { %6232 = vst [vmem:[%s11399_s22 + $0x10] sm:$0xff] %v6200_v11  ;;  %7601 = vrcp.f32 %v6115_v32 }
 0x5f8   : > { %v7596_v48 = vpop.eup %7595 }
 0x5f9   : > { %v6201_v14 = vmul.f32 %v7596_v48, %v11284_v36 }
 0x5fa   : > { %v6117_v42 = vpop.xlane.xlu1 %6116 }
 0x5fb   : > { %6233 = vst [vmem:[%s11399_s22 + $0x18] sm:$0xff] %v6201_v14  ;;  %7603 = vrcp.f32 %v6117_v42 }
 0x5fc   : > { %v7598_v59 = vpop.eup %7597 }
 0x5fd   : > { %v6202_v17 = vmul.f32 %v7598_v59, %v11288_v34 }
 0x5fe   : > { %v6119_v56 = vpop.xlane.xlu0 %6118 }
 0x5ff   : > { %6234 = vst [vmem:[%s11399_s22 + $0x20] sm:$0xff] %v6202_v17  ;;  %7605 = vrcp.f32 %v6119_v56 }
 0x600   : > { %v7600_v35 = vpop.eup %7599 }
 0x601   : > { %v6203_v41 = vmul.f32 %v7600_v35, %v11292_v53 }
 0x602   : > { %v6121_v44 = vpop.xlane.xlu1 %6120 }
 0x603   : > { %6235 = vst [vmem:[%s11399_s22 + $0x28] sm:$0xff] %v6203_v41  ;;  %7607 = vrcp.f32 %v6121_v44 }
 0x604   : > { %v7602_v19 = vpop.eup %7601 }
 0x605   : > { %v6204_v36 = vmul.f32 %v7602_v19, %v11296_v21 }
 0x606   : > { %v6123_v63 = vpop.xlane.xlu0 %6122 }
 0x607   : > { %6236 = vst [vmem:[%s11399_s22 + $0x30] sm:$0xff] %v6204_v36  ;;  %7609 = vrcp.f32 %v6123_v63 }
 0x608   : > { %v7604_v16 = vpop.eup %7603 }
 0x609   : > { %v6205_v34 = vmul.f32 %v7604_v16, %v11300_v20 }
 0x60a   : > { %v6125_v31 = vpop.xlane.xlu1 %6124 }
 0x60b   : > { %6237 = vst [vmem:[%s11399_s22 + $0x38] sm:$0xff] %v6205_v34  ;;  %7611 = vrcp.f32 %v6125_v31 }
 0x60c   : > { %v7606_v45 = vpop.eup %7605 }
 0x60d   : > { %v6206_v53 = vmul.f32 %v7606_v45, %v11304_v18 }
 0x60e   : > { %v6127_v12 = vpop.xlane.xlu0 %6126 }
 0x60f   : > { %6238 = vst [vmem:[%s11399_s22 + $0x40] sm:$0xff] %v6206_v53  ;;  %7613 = vrcp.f32 %v6127_v12 }
 0x610   : > { %v7608_v47 = vpop.eup %7607 }
 0x611   : > { %v6207_v21 = vmul.f32 %v7608_v47, %v11308_v15 }
 0x612   : > { %v6129_v1 = vpop.xlane.xlu1 %6128 }
 0x613   : > { %6239 = vst [vmem:[%s11399_s22 + $0x48] sm:$0xff] %v6207_v21  ;;  %7615 = vrcp.f32 %v6129_v1 }
 0x614   : > { %v7610_v40 = vpop.eup %7609 }
 0x615   : > { %v6208_v20 = vmul.f32 %v7610_v40, %v11312_v54 }
 0x616   : > { %v6131_v5 = vpop.xlane.xlu0 %6130 }
 0x617   : > { %6240 = vst [vmem:[%s11399_s22 + $0x50] sm:$0xff] %v6208_v20  ;;  %7617 = vrcp.f32 %v6131_v5 }
 0x618   : > { %v7612_v49 = vpop.eup %7611 }
 0x619   : > { %v6209_v18 = vmul.f32 %v7612_v49, %v11316_v28 }
 0x61a   : > { %v6133_v58 = vpop.xlane.xlu1 %6132 }
 0x61b   : > { %6241 = vst [vmem:[%s11399_s22 + $0x58] sm:$0xff] %v6209_v18  ;;  %7619 = vrcp.f32 %v6133_v58 }
 0x61c   : > { %v7614_v13 = vpop.eup %7613 }
 0x61d   : > { %v6210_v15 = vmul.f32 %v7614_v13, %v11320_v50 }
 0x61e   : > { %v6135_v38 = vpop.xlane.xlu0 %6134 }
 0x61f   : > { %6242 = vst [vmem:[%s11399_s22 + $0x60] sm:$0xff] %v6210_v15  ;;  %7621 = vrcp.f32 %v6135_v38 }
 0x620   : > { %v7616_v26 = vpop.eup %7615 }
 0x621   : > { %v6211_v54 = vmul.f32 %v7616_v26, %v11324_v3 }
 0x622   : > { %v6137_v8 = vpop.xlane.xlu1 %6136 }
 0x623   : > { %6243 = vst [vmem:[%s11399_s22 + $0x68] sm:$0xff] %v6211_v54  ;;  %7623 = vrcp.f32 %v6137_v8 }
 0x624   : > { %v7618_v24 = vpop.eup %7617 }
 0x625   : > { %v6212_v28 = vmul.f32 %v7618_v24, %v11328_v43 }
 0x626   : > { %v6139_v29 = vpop.xlane.xlu0 %6138 }
 0x627   : > { %6244 = vst [vmem:[%s11399_s22 + $0x70] sm:$0xff] %v6212_v28  ;;  %7625 = vrcp.f32 %v6139_v29 }
 0x628   : > { %v7620_v33 = vpop.eup %7619 }
 0x629   : > { %v6213_v50 = vmul.f32 %v7620_v33, %v11332_v27 }
 0x62a   : > { %v6141_v57 = vpop.xlane.xlu1 %6140 }
 0x62b   : > { %6245 = vst [vmem:[%s11399_s22 + $0x78] sm:$0xff] %v6213_v50  ;;  %7627 = vrcp.f32 %v6141_v57 }
 0x62c   : > { %v7622_v51 = vpop.eup %7621 }
 0x62d   : > { %v6214_v3 = vmul.f32 %v7622_v51, %v11336_v23 }
 0x62e   : > { %v6143_v60 = vpop.xlane.xlu0 %6142 }
 0x62f   : > { %6246 = vst [vmem:[%s11399_s22 + $0x80] sm:$0xff] %v6214_v3  ;;  %7629 = vrcp.f32 %v6143_v60 }
 0x630   : > { %v7624_v7 = vpop.eup %7623 }
 0x631   : > { %v6215_v43 = vmul.f32 %v7624_v7, %v11340_v22 }
 0x632   : > { %v6145_v0 = vpop.xlane.xlu1 %6144 }
 0x633   : > { %6247 = vst [vmem:[%s11399_s22 + $0x88] sm:$0xff] %v6215_v43  ;;  %7631 = vrcp.f32 %v6145_v0 }
 0x634   : > { %v7626_v11 = vpop.eup %7625 }
 0x635   : > { %v6216_v27 = vmul.f32 %v7626_v11, %v11344_v37 }
 0x636   : > { %v6147_v32 = vpop.xlane.xlu0 %6146 }
 0x637   : > { %6248 = vst [vmem:[%s11399_s22 + $0x90] sm:$0xff] %v6216_v27  ;;  %7633 = vrcp.f32 %v6147_v32 }
 0x638   : > { %v7628_v48 = vpop.eup %7627 }
 0x639   : > { %v6217_v23 = vmul.f32 %v7628_v48, %v11348_v9 }
 0x63a   : > { %v6149_v14 = vpop.xlane.xlu1 %6148 }
 0x63b   : > { %6249 = vst [vmem:[%s11399_s22 + $0x98] sm:$0xff] %v6217_v23  ;;  %7635 = vrcp.f32 %v6149_v14 }
 0x63c   : > { %v7630_v42 = vpop.eup %7629 }
 0x63d   : > { %v6218_v22 = vmul.f32 %v7630_v42, %v11352_v4 }
 0x63e   : > { %v6151_v59 = vpop.xlane.xlu0 %6150 }
 0x63f   : > { %6250 = vst [vmem:[%s11399_s22 + $0xa0] sm:$0xff] %v6218_v22  ;;  %7637 = vrcp.f32 %v6151_v59 }
 0x640   : > { %v7632_v17 = vpop.eup %7631 }
 0x641   : > { %v6219_v37 = vmul.f32 %v7632_v17, %v11356_v55 }
 0x642   : > { %v6153_v56 = vpop.xlane.xlu1 %6152 }
 0x643   : > { %6251 = vst [vmem:[%s11399_s22 + $0xa8] sm:$0xff] %v6219_v37  ;;  %7639 = vrcp.f32 %v6153_v56 }
 0x644   : > { %v7634_v35 = vpop.eup %7633 }
 0x645   : > { %v6220_v9 = vmul.f32 %v7634_v35, %v11360_v30 }
 0x646   : > { %v6155_v41 = vpop.xlane.xlu0 %6154 }
 0x647   : > { %6252 = vst [vmem:[%s11399_s22 + $0xb0] sm:$0xff] %v6220_v9  ;;  %7641 = vrcp.f32 %v6155_v41 }
 0x648   : > { %v7636_v44 = vpop.eup %7635 }
 0x649   : > { %v6221_v4 = vmul.f32 %v7636_v44, %v11364_v46 }
 0x64a   : > { %v6157_v19 = vpop.xlane.xlu1 %6156 }
 0x64b   : > { %6253 = vst [vmem:[%s11399_s22 + $0xb8] sm:$0xff] %v6221_v4  ;;  %7643 = vrcp.f32 %v6157_v19 }
 0x64c   : > { %v7638_v36 = vpop.eup %7637 }
 0x64d   : > { %v6222_v55 = vmul.f32 %v7638_v36, %v11368_v39 }
 0x64e   : > { %v6159_v63 = vpop.xlane.xlu0 %6158 }
 0x64f   : > { %6254 = vst [vmem:[%s11399_s22 + $0xc0] sm:$0xff] %v6222_v55  ;;  %7645 = vrcp.f32 %v6159_v63 }
 0x650   : > { %v7640_v16 = vpop.eup %7639 }
 0x651   : > { %v6223_v30 = vmul.f32 %v7640_v16, %v11372_v6 }
 0x652   : > { %v6161_v34 = vpop.xlane.xlu1 %6160 }
 0x653   : > { %6255 = vst [vmem:[%s11399_s22 + $0xc8] sm:$0xff] %v6223_v30  ;;  %7647 = vrcp.f32 %v6161_v34 }
 0x654   : > { %v7642_v46 = vpop.eup %7641 }
 0x655   : > { %v6224_v31 = vmul.f32 %v7642_v46, %v11376_v2 }
 0x656   : > { %v6163_v45 = vpop.xlane.xlu0 %6162 }
 0x657   : > { %6256 = vst [vmem:[%s11399_s22 + $0xd0] sm:$0xff] %v6224_v31  ;;  %7649 = vrcp.f32 %v6163_v45 }
 0x658   : > { %v7644_v39 = vpop.eup %7643 }
 0x659   : > { %v6225_v53 = vmul.f32 %v7644_v39, %v11380_v25 }
 0x65a   : > { %v6165_v12 = vpop.xlane.xlu1 %6164 }
 0x65b   : > { %6257 = vst [vmem:[%s11399_s22 + $0xd8] sm:$0xff] %v6225_v53  ;;  %7651 = vrcp.f32 %v6165_v12 }
 0x65c   : > { %v7646_v6 = vpop.eup %7645 }
 0x65d   : > { %v6226_v47 = vmul.f32 %v7646_v6, %v11383_v61 }
 0x65f   : > { %6258 = vst [vmem:[%s11399_s22 + $0xe0] sm:$0xff] %v6226_v47 }
 0x660   : > { %v7648_v21 = vpop.eup %7647 }
 0x661   : > { %v6227_v2 = vmul.f32 %v7648_v21, %v11386_v62 }
 0x663   : > { %6259 = vst [vmem:[%s11399_s22 + $0xe8] sm:$0xff] %v6227_v2 }
 0x664   : > { %v7650_v1 = vpop.eup %7649 }
 0x665   : > { %v6228_v40 = vmul.f32 %v7650_v1, %v11389_v52 }
 0x667   : > { %6260 = vst [vmem:[%s11399_s22 + $0xf0] sm:$0xff] %v6228_v40 }
 0x668   : > { %v7652_v25 = vpop.eup %7651 }
 0x669   : > { %v6229_v61 = vmul.f32 %v7652_v25, %v11392_v10 }
 0x66b   : > { %6261 = vst [vmem:[%s11399_s22 + $0xf8] sm:$0xff] %v6229_v61 }
 0x66c   : > { %7667 = shalt.err (!%p7664_p3)
}
 0x66d   : > { %s7668_s23 = scalar_lea.hbm %s11467_s21, 4096  ;;  %s7672_s17 = scalar_lea.hbm %s11522_s7, 8192 }
 0x66e   : > { %p7669_p4 = scmp.ne.s32.totalorder %s11467_s21, %s7668_s23  ;;  %p7673_p9 = scmp.lt.s32.totalorder %s11467_s21, %s11522_s7 }
 0x66f   : > { %p7674_p10 = scmp.lt.s32.totalorder %s7672_s17, %s7668_s23 }
 0x670   : > { %p7670_p7 = pnand %p7669_p4, %p7798_p5 }
 0x671   : > { %p7675_p11 = por %p7674_p10, %p7673_p9 }
 0x672   : > { %p7671_p8 = pneg %p7670_p7 }
 0x674   : > { %p7676_p12 = pnand %p7675_p11, %p7671_p8 }
 0x676   : > { %7679 = shalt.err (!%p7676_p12)
}
 0x677   : > { %s7718_s19 = smov 128   ;;  %s7719_s20 = smov 8  }
 0x678   : > { %6965 = dma.vmem_to_hbm [thread:$0]  (%p7798_p5), %s11469_s15, 4096, %s11467_s21, %s11475_s29, %s7718_s19, %s7718_s19, %s7719_s20  }
 0x679 PF: > { %p6971_p13 = scmp.ge.s32.totalorder %s7714_s27, 2  ;;  %s6291_s28 = sand.u32 1, %s7702_s24  }
 0x67a   : > { %s6292_s8 = scalar_lea.sflag [#allocation3], %s6291_s28 }
 0x67b   : > { %p6968_p0 = pnand %p6971_p13, %p7802_p6 }
 0x67d   : > { %p6969_p1 = pneg %p6968_p0 }
 0x67f   : > { %7697 = dma.done.wait (%p6969_p1), %s6292_s8, 4096  }
 0x680   : > { %7699 = vsyncadd (%p6969_p1), %s6292_s8, 4294963200  ;;  %p17_p2 = scmp.ge.s32.totalorder %s7785_s30, 4   ;;  %s12008_s24 = smov %s7706_s25 }
 0x681   : > { %s12009_s25 = smov %s7710_s26  ;;  %s12010_s26 = smov %s7796_s10 }
 0x682   : > { %s12011_s27 = smov %s7785_s30  ;;  %19 = sbr.rel (!%p17_p2) target bundleno = 3 (0x3), region = 83 }
 0x687   :  { %6297 = vsyncpa [#allocation3], 1 }
 0x688   :  { %6299 = vsyncpa [#allocation3 + $0x1], 1 }

</bundles_post_ra>
